<compile_context>
chip_gen: v7x
topology: tpu7x:2x2x1
jax: 0.10.0
libtpu: 0.0.40
codegen_flags: <defaults>
</compile_context>

<pallas_src>
import functools

import jax
import jax.numpy as jnp
from jax.experimental import pallas as pl
from jax.experimental.pallas import tpu as pltpu


def mha_kernel(x_ref, wqkv_ref, wp_ref, bp_ref, o_ref, acc_ref,
               *, num_heads, head_size, scale):
    x = x_ref[0]                                    # (T, C)
    T, C = x.shape

    # Fused QKV projection: one lane-dense (T, C) x (C, 3C) MXU matmul.
    # f32 accumulation; operands stay in the input dtype (bf16-friendly).
    qkv = jnp.dot(x, wqkv_ref[...],
                  preferred_element_type=jnp.float32).astype(x.dtype)  # (T, 3C)

    # Additive causal bias (depends only on static T; built once per grid step).
    row = jax.lax.broadcasted_iota(jnp.int32, (T, T), 0)
    col = jax.lax.broadcasted_iota(jnp.int32, (T, T), 1)
    bias = jnp.where(row >= col, jnp.float32(0.0), jnp.float32(-1e30))

    for h in range(num_heads):                      # static loop, H small
        lo = h * head_size
        hi = lo + head_size
        q = qkv[:, lo:hi]                           # (T, hs)
        k = qkv[:, C + lo:C + hi]                   # (T, hs)
        v = qkv[:, 2 * C + lo:2 * C + hi]           # (T, hs)

        # q @ k.T without materializing a transpose: contract dim 1 with dim 1.
        s = jax.lax.dot_general(q, k, (((1,), (1,)), ((), ())),
                                preferred_element_type=jnp.float32)   # (T, T)
        s = s * scale + bias

        # Numerically-stable softmax in f32.
        m = jnp.max(s, axis=-1, keepdims=True)
        p = jnp.exp(s - m)
        l = jnp.sum(p, axis=-1, keepdims=True)
        probs = p * pl.reciprocal(l, approx=False)  # approx=True ok if tol allows
        # TODO(synk): attention-weight dropout omitted (inference / eval mode).

        # Write this head's output directly into its (T, hs) column slab of the
        # f32 scratch accumulator (no concat, bounded live ranges).
        acc_ref[:, lo:hi] = jnp.dot(probs.astype(v.dtype), v,
                                    preferred_element_type=jnp.float32)

    # Output projection from the scratch slab: one lane-dense (T,C)x(C,C)
    # matmul with pre-transposed Wp, then a single bias add.
    y = jnp.dot(acc_ref[...].astype(x.dtype), wp_ref[...],
                preferred_element_type=jnp.float32)
    y = y + bp_ref[...].astype(jnp.float32)
    # TODO(synk): output dropout omitted (inference / eval mode).
    o_ref[0] = y.astype(o_ref.dtype)


def multi_head_attention(x, wq, wk, wv, wp, bp):
    """x: (B, T, C); wq/wk/wv: (H, hs, C) per-head nn.Linear weights;
    wp: (C, C) projection weight; bp: (1, C) projection bias."""
    B, T, C = x.shape
    H, hs, _ = wq.shape
    assert H * hs == C
    scale = float(C) ** (-0.5)        # PyTorch module scales by C**-0.5 (C = n_embd)

    # ---- host-side layout plumbing (free): fuse + pre-transpose weights ----
    # nn.Linear does y = x @ W.T with W:(hs, C).  Stack heads -> (C, C) per
    # projection after transpose, concatenate q/k/v along the output dim.
    wq_t = jnp.transpose(wq.reshape(H * hs, C))          # (C, C)
    wk_t = jnp.transpose(wk.reshape(H * hs, C))          # (C, C)
    wv_t = jnp.transpose(wv.reshape(H * hs, C))          # (C, C)
    wqkv = jnp.concatenate([wq_t, wk_t, wv_t], axis=1)   # (C, 3C)
    wp_t = jnp.transpose(wp)                             # (C, C), y = acc @ wp_t

    kernel = functools.partial(mha_kernel, num_heads=H, head_size=hs, scale=scale)
    return pl.pallas_call(
        kernel,
        out_shape=jax.ShapeDtypeStruct((B, T, C), x.dtype),
        grid=(B,),
        in_specs=[
            pl.BlockSpec((1, T, C), lambda b: (b, 0, 0)),     # x slab (per batch)
            pl.BlockSpec((C, 3 * C), lambda b: (0, 0)),       # fused QKV weight
            pl.BlockSpec((C, C), lambda b: (0, 0)),           # Wproj (pre-transposed)
            pl.BlockSpec((1, C), lambda b: (0, 0)),           # bproj
        ],
        out_specs=pl.BlockSpec((1, T, C), lambda b: (b, 0, 0)),
        scratch_shapes=[pltpu.VMEM((T, C), jnp.float32)],     # head-output slab
        compiler_params=pltpu.CompilerParams(
            dimension_semantics=("parallel",)),
    )(x, wqkv, wp_t, bp)


def reference(x, wq, wk, wv, wp, bp):
    """Pure-JAX reference mirroring the PyTorch forward (dropout = identity)."""
    B, T, C = x.shape
    H, hs, _ = wq.shape
    causal = jnp.tril(jnp.ones((T, T), dtype=bool))
    outs = []
    for h in range(H):
        q = x @ wq[h].T
        k = x @ wk[h].T
        v = x @ wv[h].T
        wei = (q @ jnp.swapaxes(k, -2, -1)) * (C ** -0.5)
        wei = jnp.where(causal, wei, -jnp.inf)
        wei = jax.nn.softmax(wei, axis=-1)
        outs.append(wei @ v)
    cat = jnp.concatenate(outs, axis=-1)
    return cat @ wp.T + bp[0]


if __name__ == "__main__":
    # Module-consistent shapes: block_size=128, n_embd=384.
    B = 2
    T = 128                 # block_size
    n_embd = 384
    num_heads = 6
    head_size = n_embd // num_heads   # 64

    key = jax.random.PRNGKey(0)
    kx, kq, kk, kv, kp, kb = jax.random.split(key, 6)

    # Deterministic synthetic parameters (roughly nn.Linear-scale init).
    s_in = 1.0 / (n_embd ** 0.5)
    x  = jax.random.normal(kx, (B, T, n_embd), dtype=jnp.float32)
    wq = jax.random.uniform(kq, (num_heads, head_size, n_embd),
                            minval=-s_in, maxval=s_in, dtype=jnp.float32)
    wk = jax.random.uniform(kk, (num_heads, head_size, n_embd),
                            minval=-s_in, maxval=s_in, dtype=jnp.float32)
    wv = jax.random.uniform(kv, (num_heads, head_size, n_embd),
                            minval=-s_in, maxval=s_in, dtype=jnp.float32)
    wp = jax.random.uniform(kp, (n_embd, n_embd),
                            minval=-s_in, maxval=s_in, dtype=jnp.float32)
    bp = jax.random.uniform(kb, (1, n_embd),
                            minval=-s_in, maxval=s_in, dtype=jnp.float32)

    out = multi_head_attention(x, wq, wk, wv, wp, bp)
    out = jax.block_until_ready(out)

    ref = reference(x, wq, wk, wv, wp, bp)
    assert out.shape == (B, T, n_embd)
    # Tolerance accounts for TPU default matmul precision (bf16 operand
    # truncation) combined with the different (fused vs per-head) matmul
    # structure of kernel and reference.
    assert jnp.allclose(out, ref, atol=1e-2, rtol=1e-2), "mismatch vs reference"

    print("KERNEL_OK")
</pallas_src>

<mosaic_0001>
module attributes {stable_mosaic.version = 11 : i64} {
  func.func @mha_kernel(%arg0: i32, %arg1: memref<1x128x384xf32, #tpu.memory_space<vmem>>, %arg2: memref<384x1152xf32, #tpu.memory_space<vmem>>, %arg3: memref<384x384xf32, #tpu.memory_space<vmem>>, %arg4: memref<1x384xf32, #tpu.memory_space<vmem>>, %arg5: memref<1x128x384xf32, #tpu.memory_space<vmem>>, %arg6: memref<128x384xf32, #tpu.memory_space<vmem>>) attributes {dimension_semantics = [#tpu.dimension_semantics<parallel>], iteration_bounds = array<i64: 2>, scalar_prefetch = 0 : i64, scratch_operands = 1 : i64, tpu.core_type = #tpu.core_type<tc>, window_params = [{transform_indices = @transform_0, window_bounds = array<i64: 1, 128, 384>}, {pipeline_mode = #tpu.pipeline_mode<synchronous>, transform_indices = @transform_1, window_bounds = array<i64: 384, 1152>}, {pipeline_mode = #tpu.pipeline_mode<synchronous>, transform_indices = @transform_2, window_bounds = array<i64: 384, 384>}, {pipeline_mode = #tpu.pipeline_mode<synchronous>, transform_indices = @transform_3, window_bounds = array<i64: 1, 384>}, {transform_indices = @transform_4, window_bounds = array<i64: 1, 128, 384>}]} {
    %c0 = arith.constant 0 : index
    %c0_0 = arith.constant 0 : index
    %c0_1 = arith.constant 0 : index
    %0 = vector.load %arg1[%c0, %c0_0, %c0_1] : memref<1x128x384xf32, #tpu.memory_space<vmem>>, vector<1x128x384xf32>
    %1 = vector.shape_cast %0 : vector<1x128x384xf32> to vector<128x384xf32>
    %c0_2 = arith.constant 0 : index
    %c0_3 = arith.constant 0 : index
    %2 = vector.load %arg2[%c0_2, %c0_3] : memref<384x1152xf32, #tpu.memory_space<vmem>>, vector<384x1152xf32>
    %cst = arith.constant dense<0.000000e+00> : vector<128x1152xf32>
    %3 = tpu.matmul %1, %2, %cst {dimension_numbers = #tpu.dot_dimension_numbers<[1], [0], [0], [1], [0, 0, 1, 1], [], []>} : vector<128x384xf32>, vector<384x1152xf32>, vector<128x1152xf32> -> vector<128x1152xf32>
    %4 = tpu.iota {dimensions = array<i32: 0>} : vector<128x128xi32>
    %5 = tpu.iota {dimensions = array<i32: 1>} : vector<128x128xi32>
    %6 = arith.cmpi sge, %4, %5 : vector<128x128xi32>
    %cst_4 = arith.constant 0.000000e+00 : f32
    %cst_5 = arith.constant -1.000000e+30 : f32
    %7 = vector.broadcast %cst_4 : f32 to vector<128x128xf32>
    %8 = vector.broadcast %cst_5 : f32 to vector<128x128xf32>
    %9 = arith.select %6, %7, %8 : vector<128x128xi1>, vector<128x128xf32>
    %10 = vector.extract_strided_slice %3 {offsets = [0, 0], sizes = [128, 64], strides = [1, 1]} : vector<128x1152xf32> to vector<128x64xf32>
    %11 = vector.extract_strided_slice %3 {offsets = [0, 384], sizes = [128, 64], strides = [1, 1]} : vector<128x1152xf32> to vector<128x64xf32>
    %12 = vector.extract_strided_slice %3 {offsets = [0, 768], sizes = [128, 64], strides = [1, 1]} : vector<128x1152xf32> to vector<128x64xf32>
    %cst_6 = arith.constant dense<0.000000e+00> : vector<128x128xf32>
    %13 = tpu.matmul %10, %11, %cst_6 {dimension_numbers = #tpu.dot_dimension_numbers<[1], [1], [0], [0], [0, 0, 1, 0], [], []>} : vector<128x64xf32>, vector<128x64xf32>, vector<128x128xf32> -> vector<128x128xf32>
    %cst_7 = arith.constant 0.0510310382 : f32
    %14 = vector.broadcast %cst_7 : f32 to vector<128x128xf32>
    %15 = arith.mulf %13, %14 : vector<128x128xf32>
    %16 = arith.addf %15, %9 : vector<128x128xf32>
    %cst_8 = arith.constant dense<0xFF800000> : vector<128xf32>
    %17 = vector.multi_reduction <maximumf>, %16, %cst_8 [1] : vector<128x128xf32> to vector<128xf32>
    %18 = vector.shape_cast %17 : vector<128xf32> to vector<128x1xf32>
    %19 = vector.broadcast %18 : vector<128x1xf32> to vector<128x128xf32>
    %20 = arith.subf %16, %19 : vector<128x128xf32>
    %21 = math.exp %20 : vector<128x128xf32>
    %cst_9 = arith.constant dense<0.000000e+00> : vector<128xf32>
    %22 = vector.multi_reduction <add>, %21, %cst_9 [1] : vector<128x128xf32> to vector<128xf32>
    %23 = vector.shape_cast %22 : vector<128xf32> to vector<128x1xf32>
    %24 = tpu.reciprocal %23 : vector<128x1xf32> -> vector<128x1xf32>
    %25 = vector.broadcast %24 : vector<128x1xf32> to vector<128x128xf32>
    %26 = arith.mulf %21, %25 : vector<128x128xf32>
    %cst_10 = arith.constant dense<0.000000e+00> : vector<128x64xf32>
    %27 = tpu.matmul %26, %12, %cst_10 {dimension_numbers = #tpu.dot_dimension_numbers<[1], [0], [0], [1], [0, 0, 1, 1], [], []>} : vector<128x128xf32>, vector<128x64xf32>, vector<128x64xf32> -> vector<128x64xf32>
    %c0_11 = arith.constant 0 : index
    %c0_12 = arith.constant 0 : index
    %28 = vector.load %arg6[%c0_11, %c0_12] : memref<128x384xf32, #tpu.memory_space<vmem>>, vector<128x64xf32>
    tpu.vector_store %arg6[%c0_11, %c0_12], %27 {strides = array<i32>} : memref<128x384xf32, #tpu.memory_space<vmem>>, vector<128x64xf32>,
    %29 = vector.extract_strided_slice %3 {offsets = [0, 64], sizes = [128, 64], strides = [1, 1]} : vector<128x1152xf32> to vector<128x64xf32>
    %30 = vector.extract_strided_slice %3 {offsets = [0, 448], sizes = [128, 64], strides = [1, 1]} : vector<128x1152xf32> to vector<128x64xf32>
    %31 = vector.extract_strided_slice %3 {offsets = [0, 832], sizes = [128, 64], strides = [1, 1]} : vector<128x1152xf32> to vector<128x64xf32>
    %cst_13 = arith.constant dense<0.000000e+00> : vector<128x128xf32>
    %32 = tpu.matmul %29, %30, %cst_13 {dimension_numbers = #tpu.dot_dimension_numbers<[1], [1], [0], [0], [0, 0, 1, 0], [], []>} : vector<128x64xf32>, vector<128x64xf32>, vector<128x128xf32> -> vector<128x128xf32>
    %cst_14 = arith.constant 0.0510310382 : f32
    %33 = vector.broadcast %cst_14 : f32 to vector<128x128xf32>
    %34 = arith.mulf %32, %33 : vector<128x128xf32>
    %35 = arith.addf %34, %9 : vector<128x128xf32>
    %cst_15 = arith.constant dense<0xFF800000> : vector<128xf32>
    %36 = vector.multi_reduction <maximumf>, %35, %cst_15 [1] : vector<128x128xf32> to vector<128xf32>
    %37 = vector.shape_cast %36 : vector<128xf32> to vector<128x1xf32>
    %38 = vector.broadcast %37 : vector<128x1xf32> to vector<128x128xf32>
    %39 = arith.subf %35, %38 : vector<128x128xf32>
    %40 = math.exp %39 : vector<128x128xf32>
    %cst_16 = arith.constant dense<0.000000e+00> : vector<128xf32>
    %41 = vector.multi_reduction <add>, %40, %cst_16 [1] : vector<128x128xf32> to vector<128xf32>
    %42 = vector.shape_cast %41 : vector<128xf32> to vector<128x1xf32>
    %43 = tpu.reciprocal %42 : vector<128x1xf32> -> vector<128x1xf32>
    %44 = vector.broadcast %43 : vector<128x1xf32> to vector<128x128xf32>
    %45 = arith.mulf %40, %44 : vector<128x128xf32>
    %cst_17 = arith.constant dense<0.000000e+00> : vector<128x64xf32>
    %46 = tpu.matmul %45, %31, %cst_17 {dimension_numbers = #tpu.dot_dimension_numbers<[1], [0], [0], [1], [0, 0, 1, 1], [], []>} : vector<128x128xf32>, vector<128x64xf32>, vector<128x64xf32> -> vector<128x64xf32>
    %c0_18 = arith.constant 0 : index
    %c64 = arith.constant 64 : index
    %47 = vector.load %arg6[%c0_18, %c64] : memref<128x384xf32, #tpu.memory_space<vmem>>, vector<128x64xf32>
    tpu.vector_store %arg6[%c0_18, %c64], %46 {strides = array<i32>} : memref<128x384xf32, #tpu.memory_space<vmem>>, vector<128x64xf32>,
    %48 = vector.extract_strided_slice %3 {offsets = [0, 128], sizes = [128, 64], strides = [1, 1]} : vector<128x1152xf32> to vector<128x64xf32>
    %49 = vector.extract_strided_slice %3 {offsets = [0, 512], sizes = [128, 64], strides = [1, 1]} : vector<128x1152xf32> to vector<128x64xf32>
    %50 = vector.extract_strided_slice %3 {offsets = [0, 896], sizes = [128, 64], strides = [1, 1]} : vector<128x1152xf32> to vector<128x64xf32>
    %cst_19 = arith.constant dense<0.000000e+00> : vector<128x128xf32>
    %51 = tpu.matmul %48, %49, %cst_19 {dimension_numbers = #tpu.dot_dimension_numbers<[1], [1], [0], [0], [0, 0, 1, 0], [], []>} : vector<128x64xf32>, vector<128x64xf32>, vector<128x128xf32> -> vector<128x128xf32>
    %cst_20 = arith.constant 0.0510310382 : f32
    %52 = vector.broadcast %cst_20 : f32 to vector<128x128xf32>
    %53 = arith.mulf %51, %52 : vector<128x128xf32>
    %54 = arith.addf %53, %9 : vector<128x128xf32>
    %cst_21 = arith.constant dense<0xFF800000> : vector<128xf32>
    %55 = vector.multi_reduction <maximumf>, %54, %cst_21 [1] : vector<128x128xf32> to vector<128xf32>
    %56 = vector.shape_cast %55 : vector<128xf32> to vector<128x1xf32>
    %57 = vector.broadcast %56 : vector<128x1xf32> to vector<128x128xf32>
    %58 = arith.subf %54, %57 : vector<128x128xf32>
    %59 = math.exp %58 : vector<128x128xf32>
    %cst_22 = arith.constant dense<0.000000e+00> : vector<128xf32>
    %60 = vector.multi_reduction <add>, %59, %cst_22 [1] : vector<128x128xf32> to vector<128xf32>
    %61 = vector.shape_cast %60 : vector<128xf32> to vector<128x1xf32>
    %62 = tpu.reciprocal %61 : vector<128x1xf32> -> vector<128x1xf32>
    %63 = vector.broadcast %62 : vector<128x1xf32> to vector<128x128xf32>
    %64 = arith.mulf %59, %63 : vector<128x128xf32>
    %cst_23 = arith.constant dense<0.000000e+00> : vector<128x64xf32>
    %65 = tpu.matmul %64, %50, %cst_23 {dimension_numbers = #tpu.dot_dimension_numbers<[1], [0], [0], [1], [0, 0, 1, 1], [], []>} : vector<128x128xf32>, vector<128x64xf32>, vector<128x64xf32> -> vector<128x64xf32>
    %c0_24 = arith.constant 0 : index
    %c128 = arith.constant 128 : index
    %66 = vector.load %arg6[%c0_24, %c128] : memref<128x384xf32, #tpu.memory_space<vmem>>, vector<128x64xf32>
    tpu.vector_store %arg6[%c0_24, %c128], %65 {strides = array<i32>} : memref<128x384xf32, #tpu.memory_space<vmem>>, vector<128x64xf32>,
    %67 = vector.extract_strided_slice %3 {offsets = [0, 192], sizes = [128, 64], strides = [1, 1]} : vector<128x1152xf32> to vector<128x64xf32>
    %68 = vector.extract_strided_slice %3 {offsets = [0, 576], sizes = [128, 64], strides = [1, 1]} : vector<128x1152xf32> to vector<128x64xf32>
    %69 = vector.extract_strided_slice %3 {offsets = [0, 960], sizes = [128, 64], strides = [1, 1]} : vector<128x1152xf32> to vector<128x64xf32>
    %cst_25 = arith.constant dense<0.000000e+00> : vector<128x128xf32>
    %70 = tpu.matmul %67, %68, %cst_25 {dimension_numbers = #tpu.dot_dimension_numbers<[1], [1], [0], [0], [0, 0, 1, 0], [], []>} : vector<128x64xf32>, vector<128x64xf32>, vector<128x128xf32> -> vector<128x128xf32>
    %cst_26 = arith.constant 0.0510310382 : f32
    %71 = vector.broadcast %cst_26 : f32 to vector<128x128xf32>
    %72 = arith.mulf %70, %71 : vector<128x128xf32>
    %73 = arith.addf %72, %9 : vector<128x128xf32>
    %cst_27 = arith.constant dense<0xFF800000> : vector<128xf32>
    %74 = vector.multi_reduction <maximumf>, %73, %cst_27 [1] : vector<128x128xf32> to vector<128xf32>
    %75 = vector.shape_cast %74 : vector<128xf32> to vector<128x1xf32>
    %76 = vector.broadcast %75 : vector<128x1xf32> to vector<128x128xf32>
    %77 = arith.subf %73, %76 : vector<128x128xf32>
    %78 = math.exp %77 : vector<128x128xf32>
    %cst_28 = arith.constant dense<0.000000e+00> : vector<128xf32>
    %79 = vector.multi_reduction <add>, %78, %cst_28 [1] : vector<128x128xf32> to vector<128xf32>
    %80 = vector.shape_cast %79 : vector<128xf32> to vector<128x1xf32>
    %81 = tpu.reciprocal %80 : vector<128x1xf32> -> vector<128x1xf32>
    %82 = vector.broadcast %81 : vector<128x1xf32> to vector<128x128xf32>
    %83 = arith.mulf %78, %82 : vector<128x128xf32>
    %cst_29 = arith.constant dense<0.000000e+00> : vector<128x64xf32>
    %84 = tpu.matmul %83, %69, %cst_29 {dimension_numbers = #tpu.dot_dimension_numbers<[1], [0], [0], [1], [0, 0, 1, 1], [], []>} : vector<128x128xf32>, vector<128x64xf32>, vector<128x64xf32> -> vector<128x64xf32>
    %c0_30 = arith.constant 0 : index
    %c192 = arith.constant 192 : index
    %85 = vector.load %arg6[%c0_30, %c192] : memref<128x384xf32, #tpu.memory_space<vmem>>, vector<128x64xf32>
    tpu.vector_store %arg6[%c0_30, %c192], %84 {strides = array<i32>} : memref<128x384xf32, #tpu.memory_space<vmem>>, vector<128x64xf32>,
    %86 = vector.extract_strided_slice %3 {offsets = [0, 256], sizes = [128, 64], strides = [1, 1]} : vector<128x1152xf32> to vector<128x64xf32>
    %87 = vector.extract_strided_slice %3 {offsets = [0, 640], sizes = [128, 64], strides = [1, 1]} : vector<128x1152xf32> to vector<128x64xf32>
    %88 = vector.extract_strided_slice %3 {offsets = [0, 1024], sizes = [128, 64], strides = [1, 1]} : vector<128x1152xf32> to vector<128x64xf32>
    %cst_31 = arith.constant dense<0.000000e+00> : vector<128x128xf32>
    %89 = tpu.matmul %86, %87, %cst_31 {dimension_numbers = #tpu.dot_dimension_numbers<[1], [1], [0], [0], [0, 0, 1, 0], [], []>} : vector<128x64xf32>, vector<128x64xf32>, vector<128x128xf32> -> vector<128x128xf32>
    %cst_32 = arith.constant 0.0510310382 : f32
    %90 = vector.broadcast %cst_32 : f32 to vector<128x128xf32>
    %91 = arith.mulf %89, %90 : vector<128x128xf32>
    %92 = arith.addf %91, %9 : vector<128x128xf32>
    %cst_33 = arith.constant dense<0xFF800000> : vector<128xf32>
    %93 = vector.multi_reduction <maximumf>, %92, %cst_33 [1] : vector<128x128xf32> to vector<128xf32>
    %94 = vector.shape_cast %93 : vector<128xf32> to vector<128x1xf32>
    %95 = vector.broadcast %94 : vector<128x1xf32> to vector<128x128xf32>
    %96 = arith.subf %92, %95 : vector<128x128xf32>
    %97 = math.exp %96 : vector<128x128xf32>
    %cst_34 = arith.constant dense<0.000000e+00> : vector<128xf32>
    %98 = vector.multi_reduction <add>, %97, %cst_34 [1] : vector<128x128xf32> to vector<128xf32>
    %99 = vector.shape_cast %98 : vector<128xf32> to vector<128x1xf32>
    %100 = tpu.reciprocal %99 : vector<128x1xf32> -> vector<128x1xf32>
    %101 = vector.broadcast %100 : vector<128x1xf32> to vector<128x128xf32>
    %102 = arith.mulf %97, %101 : vector<128x128xf32>
    %cst_35 = arith.constant dense<0.000000e+00> : vector<128x64xf32>
    %103 = tpu.matmul %102, %88, %cst_35 {dimension_numbers = #tpu.dot_dimension_numbers<[1], [0], [0], [1], [0, 0, 1, 1], [], []>} : vector<128x128xf32>, vector<128x64xf32>, vector<128x64xf32> -> vector<128x64xf32>
    %c0_36 = arith.constant 0 : index
    %c256 = arith.constant 256 : index
    %104 = vector.load %arg6[%c0_36, %c256] : memref<128x384xf32, #tpu.memory_space<vmem>>, vector<128x64xf32>
    tpu.vector_store %arg6[%c0_36, %c256], %103 {strides = array<i32>} : memref<128x384xf32, #tpu.memory_space<vmem>>, vector<128x64xf32>,
    %105 = vector.extract_strided_slice %3 {offsets = [0, 320], sizes = [128, 64], strides = [1, 1]} : vector<128x1152xf32> to vector<128x64xf32>
    %106 = vector.extract_strided_slice %3 {offsets = [0, 704], sizes = [128, 64], strides = [1, 1]} : vector<128x1152xf32> to vector<128x64xf32>
    %107 = vector.extract_strided_slice %3 {offsets = [0, 1088], sizes = [128, 64], strides = [1, 1]} : vector<128x1152xf32> to vector<128x64xf32>
    %cst_37 = arith.constant dense<0.000000e+00> : vector<128x128xf32>
    %108 = tpu.matmul %105, %106, %cst_37 {dimension_numbers = #tpu.dot_dimension_numbers<[1], [1], [0], [0], [0, 0, 1, 0], [], []>} : vector<128x64xf32>, vector<128x64xf32>, vector<128x128xf32> -> vector<128x128xf32>
    %cst_38 = arith.constant 0.0510310382 : f32
    %109 = vector.broadcast %cst_38 : f32 to vector<128x128xf32>
    %110 = arith.mulf %108, %109 : vector<128x128xf32>
    %111 = arith.addf %110, %9 : vector<128x128xf32>
    %cst_39 = arith.constant dense<0xFF800000> : vector<128xf32>
    %112 = vector.multi_reduction <maximumf>, %111, %cst_39 [1] : vector<128x128xf32> to vector<128xf32>
    %113 = vector.shape_cast %112 : vector<128xf32> to vector<128x1xf32>
    %114 = vector.broadcast %113 : vector<128x1xf32> to vector<128x128xf32>
    %115 = arith.subf %111, %114 : vector<128x128xf32>
    %116 = math.exp %115 : vector<128x128xf32>
    %cst_40 = arith.constant dense<0.000000e+00> : vector<128xf32>
    %117 = vector.multi_reduction <add>, %116, %cst_40 [1] : vector<128x128xf32> to vector<128xf32>
    %118 = vector.shape_cast %117 : vector<128xf32> to vector<128x1xf32>
    %119 = tpu.reciprocal %118 : vector<128x1xf32> -> vector<128x1xf32>
    %120 = vector.broadcast %119 : vector<128x1xf32> to vector<128x128xf32>
    %121 = arith.mulf %116, %120 : vector<128x128xf32>
    %cst_41 = arith.constant dense<0.000000e+00> : vector<128x64xf32>
    %122 = tpu.matmul %121, %107, %cst_41 {dimension_numbers = #tpu.dot_dimension_numbers<[1], [0], [0], [1], [0, 0, 1, 1], [], []>} : vector<128x128xf32>, vector<128x64xf32>, vector<128x64xf32> -> vector<128x64xf32>
    %c0_42 = arith.constant 0 : index
    %c320 = arith.constant 320 : index
    %123 = vector.load %arg6[%c0_42, %c320] : memref<128x384xf32, #tpu.memory_space<vmem>>, vector<128x64xf32>
    tpu.vector_store %arg6[%c0_42, %c320], %122 {strides = array<i32>} : memref<128x384xf32, #tpu.memory_space<vmem>>, vector<128x64xf32>,
    %c0_43 = arith.constant 0 : index
    %c0_44 = arith.constant 0 : index
    %124 = vector.load %arg6[%c0_43, %c0_44] : memref<128x384xf32, #tpu.memory_space<vmem>>, vector<128x384xf32>
    %c0_45 = arith.constant 0 : index
    %c0_46 = arith.constant 0 : index
    %125 = vector.load %arg3[%c0_45, %c0_46] : memref<384x384xf32, #tpu.memory_space<vmem>>, vector<384x384xf32>
    %cst_47 = arith.constant dense<0.000000e+00> : vector<128x384xf32>
    %126 = tpu.matmul %124, %125, %cst_47 {dimension_numbers = #tpu.dot_dimension_numbers<[1], [0], [0], [1], [0, 0, 1, 1], [], []>} : vector<128x384xf32>, vector<384x384xf32>, vector<128x384xf32> -> vector<128x384xf32>
    %c0_48 = arith.constant 0 : index
    %c0_49 = arith.constant 0 : index
    %127 = vector.load %arg4[%c0_48, %c0_49] : memref<1x384xf32, #tpu.memory_space<vmem>>, vector<1x384xf32>
    %128 = vector.broadcast %127 : vector<1x384xf32> to vector<128x384xf32>
    %129 = arith.addf %126, %128 : vector<128x384xf32>
    %c0_50 = arith.constant 0 : index
    %c0_51 = arith.constant 0 : index
    %c0_52 = arith.constant 0 : index
    %130 = vector.load %arg5[%c0_50, %c0_51, %c0_52] : memref<1x128x384xf32, #tpu.memory_space<vmem>>, vector<1x128x384xf32>
    %131 = vector.shape_cast %130 : vector<1x128x384xf32> to vector<128x384xf32>
    %132 = vector.shape_cast %129 : vector<128x384xf32> to vector<1x128x384xf32>
    tpu.vector_store %arg5[%c0_50, %c0_51, %c0_52], %132 {strides = array<i32>} : memref<1x128x384xf32, #tpu.memory_space<vmem>>, vector<1x128x384xf32>,
    return
  }
  func.func @transform_0(%arg0: i32) -> (i32, i32, i32) {
    %c0_i32 = arith.constant 0 : i32
    %c0_i32_0 = arith.constant 0 : i32
    %c0_i32_1 = arith.constant 0 : i32
    return %arg0, %c0_i32, %c0_i32_0 : i32, i32, i32
  }
  func.func @transform_1(%arg0: i32) -> (i32, i32) {
    %c0_i32 = arith.constant 0 : i32
    %c0_i32_0 = arith.constant 0 : i32
    %c0_i32_1 = arith.constant 0 : i32
    return %c0_i32, %c0_i32_0 : i32, i32
  }
  func.func @transform_2(%arg0: i32) -> (i32, i32) {
    %c0_i32 = arith.constant 0 : i32
    %c0_i32_0 = arith.constant 0 : i32
    %c0_i32_1 = arith.constant 0 : i32
    return %c0_i32, %c0_i32_0 : i32, i32
  }
  func.func @transform_3(%arg0: i32) -> (i32, i32) {
    %c0_i32 = arith.constant 0 : i32
    %c0_i32_0 = arith.constant 0 : i32
    %c0_i32_1 = arith.constant 0 : i32
    return %c0_i32, %c0_i32_0 : i32, i32
  }
  func.func @transform_4(%arg0: i32) -> (i32, i32, i32) {
    %c0_i32 = arith.constant 0 : i32
    %c0_i32_0 = arith.constant 0 : i32
    %c0_i32_1 = arith.constant 0 : i32
    return %arg0, %c0_i32, %c0_i32_0 : i32, i32, i32
  }
}

</mosaic_0001>

<bundles_post_ra>
// kernel: tpu_custom_call.1
= control target key start
LH: loop header
LB: loop body
LE: loop exit
PB: predicated region body
PF: predicated region fallthrough
CT: control target
= control target key end

     0   :  { %9 = vsyncpa [#allocation4], 0  ;;  %s14809_s0 = inlined_call_operand.hbm [shape: f32[2,128,384], index: 0, kind: input, shape index: {}]   ;;  %s14810_s1 = inlined_call_operand.hbm [shape: f32[384,1152], index: 1, kind: input, shape index: {}]   ;;  %s14811_s2 = inlined_call_operand.hbm [shape: f32[384,384], index: 2, kind: input, shape index: {}]   ;;  %s14812_s3 = inlined_call_operand.hbm [shape: f32[1,384], index: 3, kind: input, shape index: {}]   ;;  %s14813_s4 = inlined_call_operand.hbm [shape: f32[2,128,384], index: 4, kind: output, shape index: {}]  }
   0x1   :  { %11 = vsyncpa [#allocation4 + $0x1], 0 }
   0x2   :  { %12 = vsyncpa [#allocation7], 0 }
   0x3   :  { %13 = vsyncpa [#allocation10], 0 }
   0x4   :  { %14 = vsyncpa [#allocation5], 0 }
   0x5   :  { %16 = vsyncpa [#allocation5 + $0x1], 0  ;;  %s11191_s15 = smov 0   ;;  %s11193_s16 = smov 0  }
   0x6   :  { %s11195_s17 = smov 0   ;;  %s11197_s18 = smov 0  }
   0x7 LB: > { %s11212_s19 = sadd.s32 4294967295, %s11150_s18   ;;  %s7302_s20 = sadd.s32 4294967294, %s11150_s18   ;;  %s11150_s18 = sphi %s11197_s18, %s15462_s18   ;;  %s11146_s17 = sphi %s11195_s17, %s15461_s17   ;;  %s11142_s16 = sphi %s11193_s16, %s15460_s16   ;;  %s11138_s15 = sphi %s11191_s15, %s15459_s15  }
   0x8   : > { %p42_p0 = scmp.ne.s32.totalorder %s11142_s16, %s11138_s15  ;;  %p14814_p1 = scmp.eq.s32.totalorder %s11212_s19, 0 }
   0x9   : > { %p135_p3 = scmp.eq.s32.totalorder %s7302_s20, 1  ;;  %p7303_p5 = scmp.ge.s32.totalorder %s11150_s18, 1 }
   0xa   : > { %p11221_p4 = por %p14814_p1, %p42_p0  ;;  %p142_p7 = scmp.lt.s32.totalorder %s11150_s18, 3 }
   0xb   : > { %p11226_p6 = por %p135_p3, %p42_p0  ;;  %s11152_s24 = smov [#allocation6]  }
   0xc   : > { %s15007_s21 = scalar_select %p11221_p4, 1, 0 }
   0xd   : > { %s15008_s22 = scalar_select %p11226_p6, 1, 0 }
   0xe   : > { %p11231_p8 = pnand %p7303_p5, %p142_p7  ;;  %s154_s25 = sshll.u32 %s11152_s24, 4  ;;  %s11235_s25 = int_to_ptr.vmem [resolvable:$true] %s154_s25 }
   0xf   : > { %s11153_s27 = smov [#allocation8]   ;;  %s10962_s5 = scalar_lea.hbm %s14810_s1, 55296 }
  0x10   : > { %s15009_s23 = scalar_select %p11231_p8, 1, 0 }
  0x11   : > { %p10216_p9 = pneg %p11231_p8  ;;  %s167_s28 = sshll.u32 %s11153_s27, 4  ;;  %s11246_s28 = int_to_ptr.vmem [resolvable:$true] %s167_s28 }
  0x12   : > { %p10963_p12 = scmp.ne.s32.totalorder %s14810_s1, %s10962_s5  ;;  %p10969_p5 = scmp.lt.u32.totalorder %s10962_s5, %s14810_s1 }
  0x13   : > { %p11242_p11 = pnand %p10216_p9, %p14814_p1 }
  0x15   : > { %p11256_p13 = pneg %p11242_p11 }
  0x17   : > { %p10965_p0 = pnand %p11256_p13, %p10963_p12 }
  0x19   : > { %p10966_p3 = pneg %p10965_p0 }
  0x1b   : > { %p10971_p7 = pnand %p10969_p5, %p10966_p3 }
  0x1d   : > { %10974 = shalt.err (!%p10971_p7)
}
  0x1e   : > { %s10975_s11 = scalar_lea.vmem %s11235_s25, 55296  ;;  %p10983_p2 = scmp.lt.s32.totalorder %s11235_s25, %s11235_s25 }
  0x1f   : > { %p10976_p9 = scmp.ne.s32.totalorder %s11235_s25, %s10975_s11  ;;  %p10984_p6 = scmp.lt.s32.totalorder %s10975_s11, %s10975_s11 }
  0x21   : > { %p10978_p10 = pnand %p10976_p9, %p11256_p13  ;;  %p10985_p12 = por %p10984_p6, %p10983_p2 }
  0x23   : > { %p10979_p1 = pneg %p10978_p10 }
  0x25   : > { %p10986_p0 = pnand %p10985_p12, %p10979_p1 }
  0x27   : > { %10989 = shalt.err (!%p10986_p0)
}
  0x28   : > { %s11154_s12 = smov 1152   ;;  %s11155_s13 = smov 72  }
  0x29   : > { %10219 = dma.hbm_to_vmem [thread:$0]  (!%p11242_p11), %s14810_s1, 55296, %s11235_s25, [#allocation7], %s11154_s12, %s11154_s12, %s11155_s13  }
  0x2a   : > { %s10990_s29 = scalar_lea.hbm %s14811_s2, 18432 }
  0x2b   : > { %p10991_p2 = scmp.ne.s32.totalorder %s14811_s2, %s10990_s29  ;;  %p10997_p10 = scmp.lt.u32.totalorder %s10990_s29, %s14811_s2 }
  0x2d   : > { %p10993_p1 = pnand %p10991_p2, %p11256_p13 }
  0x2f   : > { %p10994_p6 = pneg %p10993_p1 }
  0x31   : > { %p10999_p3 = pnand %p10997_p10, %p10994_p6 }
  0x33   : > { %11002 = shalt.err (!%p10999_p3)
}
  0x34   : > { %s11003_s25 = scalar_lea.vmem %s11246_s28, 18432  ;;  %p11011_p12 = scmp.lt.s32.totalorder %s11246_s28, %s11246_s28 }
  0x35   : > { %p11004_p5 = scmp.ne.s32.totalorder %s11246_s28, %s11003_s25  ;;  %p11012_p0 = scmp.lt.s32.totalorder %s11003_s25, %s11003_s25 }
  0x37   : > { %p11006_p7 = pnand %p11004_p5, %p11256_p13  ;;  %p11013_p2 = por %p11012_p0, %p11011_p12 }
  0x39   : > { %p11007_p9 = pneg %p11006_p7 }
  0x3b   : > { %p11014_p1 = pnand %p11013_p2, %p11007_p9 }
  0x3d   : > { %11017 = shalt.err (!%p11014_p1)
}
  0x3e   : > { %s11156_s9 = smov 384   ;;  %s11157_s10 = smov 24  }
  0x3f   : > { %10222 = dma.hbm_to_vmem [thread:$0]  (!%p11242_p11), %s14811_s2, 18432, %s11246_s28, [#allocation7], %s11156_s9, %s11156_s9, %s11157_s10  }
  0x40   : > { %s11158_s13 = smov [#allocation9]   ;;  %s11304_s20 = sadd.s32 1, %s11150_s18  }
  0x41   : > { %s181_s14 = sshll.u32 %s11158_s13, 4  ;;  %s11018_s29 = scalar_lea.hbm %s14812_s3, 48  ;;  %s182_s14 = int_to_ptr.vmem [resolvable:$true] %s181_s14 }
  0x42   : > { %p11019_p6 = scmp.ne.s32.totalorder %s14812_s3, %s11018_s29  ;;  %p11025_p5 = scmp.lt.u32.totalorder %s11018_s29, %s14812_s3 }
  0x44   : > { %p11021_p10 = pnand %p11019_p6, %p11256_p13 }
  0x46   : > { %p11022_p3 = pneg %p11021_p10 }
  0x48   : > { %p11027_p7 = pnand %p11025_p5, %p11022_p3 }
  0x4a   : > { %11030 = shalt.err (!%p11027_p7)
}
  0x4b   : > { %s11031_s28 = scalar_lea.vmem %s182_s14, 48  ;;  %s11038_s25 = scalar_lea.vmem %s182_s14, 64 }
  0x4c   : > { %p11032_p9 = scmp.ne.s32.totalorder %s182_s14, %s11031_s28  ;;  %p11039_p2 = scmp.lt.s32.totalorder %s182_s14, %s182_s14 }
  0x4d   : > { %p11040_p1 = scmp.lt.s32.totalorder %s11038_s25, %s11031_s28 }
  0x4e   : > { %p11034_p12 = pnand %p11032_p9, %p11256_p13 }
  0x4f   : > { %p11041_p4 = por %p11040_p1, %p11039_p2 }
  0x50   : > { %p11035_p0 = pneg %p11034_p12 }
  0x52   : > { %p11042_p8 = pnand %p11041_p4, %p11035_p0 }
  0x54   : > { %11045 = shalt.err (!%p11042_p8)
}
  0x55   : > { %10225 = dma.hbm_to_vmem [thread:$0]  (!%p11242_p11), %s14812_s3, 48, %s182_s14, [#allocation10]  }
  0x56   : > { %s26_s8 = ssub.s32 %s11150_s18, %s11304_s20  ;;  %s29_s13 = sadd.s32 1, %s11146_s17 }
  0x57   : > { %p27_p4 = scmp.eq.s32.totalorder %s26_s8, 0  ;;  %p36_p8 = scmp.ne.s32.totalorder %s11146_s17, %s11142_s16 }
  0x58   : > { %p37_p13 = scmp.eq.s32.totalorder %s11150_s18, 0  ;;  %p10237_p6 = scmp.lt.s32.totalorder %s11150_s18, 2 }
  0x59   : > { %s11332_s26 = scalar_select %p27_p4, %s11146_s17, %s29_s13  }
  0x5a   : > { %p38_p10 = por %p37_p13, %p36_p8  ;;  %p15012_p3 = scmp.eq.s32.totalorder %s11212_s19, 1 }
  0x5b   : > { %s192_s27 = sand.u32 1, %s11146_s17   ;;  %s10197_s29 = smul.u32 6144, %s11150_s18 }
  0x5c   : > { %p11336_p5 = por %p15012_p3, %p36_p8  ;;  %s10196_s30 = smul.u32 384, %s192_s27 }
  0x5d   : > { %p11342_p7 = pnand %p10237_p6, %p38_p10  ;;  %s11349_s7 = scalar_lea.hbm %s14809_s0, %s10197_s29 }
  0x5e   : > { %s196_s28 = scalar_lea.vmem [#allocation3], %s10196_s30  ;;  %s11353_s11 = scalar_lea.sflag [#allocation4], %s192_s27 }
  0x5f   : > { %s203_s25 = sshll.u32 %s196_s28, 4  ;;  %s11046_s12 = scalar_lea.hbm %s11349_s7, 6144  ;;  %s11351_s25 = int_to_ptr.vmem [resolvable:$true] %s203_s25 }
  0x60   : > { %p11047_p11 = scmp.ne.s32.totalorder %s11349_s7, %s11046_s12  ;;  %p11048_p9 = pneg %p11342_p7 }
  0x61   : > { %s11051_s29 = scalar_lea.hbm %s14809_s0, 12288  ;;  %p11052_p2 = scmp.lt.u32.totalorder %s11349_s7, %s14809_s0 }
  0x62   : > { %p11049_p12 = pnand %p11048_p9, %p11047_p11  ;;  %p11053_p1 = scmp.lt.u32.totalorder %s11051_s29, %s11046_s12 }
  0x63   : > { %p11055_p8 = scmp.lt.u32.totalorder %s11046_s12, %s11349_s7 }
  0x64   : > { %p11050_p0 = pneg %p11049_p12  ;;  %p11054_p4 = por %p11053_p1, %p11052_p2 }
  0x66   : > { %p11056_p13 = por %p11055_p8, %p11054_p4 }
  0x68   : > { %p11057_p6 = pnand %p11056_p13, %p11050_p0 }
  0x6a   : > { %11060 = shalt.err (!%p11057_p6)
}
  0x6b   : > { %s11061_s27 = scalar_lea.vmem %s11351_s25, 6144  ;;  %s11159_s30 = smov [#allocation3]  }
  0x6c   : > { %p11062_p10 = scmp.ne.s32.totalorder %s11351_s25, %s11061_s27  ;;  %s11066_s28 = sshll.u32 %s11159_s30, 4  ;;  %s11067_s28 = int_to_ptr.vmem [resolvable:$false] %s11066_s28 }
  0x6d   : > { %s11068_s8 = scalar_lea.vmem %s11067_s28, 12288  ;;  %p11069_p12 = scmp.lt.s32.totalorder %s11351_s25, %s11067_s28 }
  0x6e   : > { %p11064_p3 = pnand %p11062_p10, %p11048_p9  ;;  %p11070_p2 = scmp.lt.s32.totalorder %s11068_s8, %s11061_s27 }
  0x70   : > { %p11065_p11 = pneg %p11064_p3  ;;  %p11071_p1 = por %p11070_p2, %p11069_p12 }
  0x72   : > { %p11072_p4 = pnand %p11071_p1, %p11065_p11 }
  0x74   : > { %11075 = shalt.err (!%p11072_p4)
}
  0x75   : > { %10229 = dma.hbm_to_vmem [thread:$0]  (!%p11342_p7), %s11349_s7, 6144, %s11351_s25, %s11353_s11, %s11156_s9, %s11156_s9, %s11157_s10  }
  0x76   : > { %p15015_p9 = scmp.ne.s32.totalorder %s15009_s23, 0 }
  0x78   : > { %215 = sbr.rel (%p15015_p9) target bundleno = 4895 (0x131f), region = 36 }
  0x7f   : > { %s11387_s12 = sand.u32 1, %s11142_s16   ;;  %p15016_p0 = scmp.ne.s32.totalorder %s15007_s21, 0 }
  0x80   : > { %s10198_s13 = smul.u32 384, %s11387_s12  ;;  %s218_s29 = scalar_lea.sflag [#allocation4], %s11387_s12 }
  0x82   : > { %s11393_s5 = scalar_lea.vmem [#allocation3], %s10198_s13 }
  0x83   : > { %11121 = dma.done.wait (%p15016_p0), %s218_s29, 6144  }
  0x84   : > { %11123 = vsyncadd (%p15016_p0), %s218_s29, 4294961152  ;;  %p15017_p7 = scmp.eq.s32.totalorder %s11212_s19, 0 }
  0x86   : > { %11125 = dma.done.wait (%p15017_p7), [#allocation7], 73728   ;;  %p15018_p8 = pmov %p15017_p7 }
  0x87   : > { %p15019_p13 = pmov %p15017_p7 }
  0x88   : > { %11127 = vsyncadd (%p15018_p8), [#allocation7], 4294893568 }
  0x89   : > { %11129 = dma.done.wait (%p15019_p13), [#allocation10], 48   ;;  %p15020_p6 = pmov %p15017_p7 }
  0x8a   : > { %v14820_v0 = vmov 0.0   ;;  %v307_v1 = vld [vmem:[#allocation6 + $0x8] sm:$0xff]  ;;  %v316_v2 = vld [vmem:[#allocation6 + $0x50] sm:$0xff]  ;;  %v306_v6 = vld [vmem:[#allocation6] sm:$0xff]  ;;  %vm2367_vm0 = vcmask 523264   ;;  %s11161_s21 = smov 64  }
  0x8b   : > { %11131 = vsyncadd (%p15020_p6), [#allocation10], 4294967248  ;;  %963 = vmatprep.mubr.f32.mxu1 %v14820_v0  ;;  %v595_v3 = vld [vmem:[#allocation6 + $0x908] sm:$0xff]  ;;  %v8900_v4 = vpack.c.bf16 %v316_v2, %v307_v1  ;;  %v604_v5 = vld [vmem:[#allocation6 + $0x950] sm:$0xff]  ;;  %s14640_s23 = scalar_lea.vmem [#allocation11], %s10198_s13  ;;  %s10199_s9 = smul.u32 6144, %s11212_s19 }
  0x8c   : > { %v315_v7 = vld [vmem:[#allocation6 + $0x48] sm:$0xff]  ;;  %v8964_v8 = vpack.c.bf16 %v604_v5, %v595_v3  ;;  %v594_v10 = vld [vmem:[#allocation6 + $0x900] sm:$0xff]  ;;  %v325_v12 = vld [vmem:[#allocation6 + $0x98] sm:$0xff]  ;;  %s7200_s10 = sshll.u32 %s14640_s23, 4  ;;  %s7187_s19 = scalar_lea.sflag [#allocation5], %s11387_s12  ;;  %s14763_s10 = int_to_ptr.vmem [resolvable:$true] %s7200_s10 }
  0x8d   : > { %v8902_v9 = vpack.c.bf16 %v315_v7, %v306_v6  ;;  %v603_v11 = vld [vmem:[#allocation6 + $0x948] sm:$0xff]  ;;  %8901 = vmatprep.subr.bf16.mxu0 %v8900_v4  ;;  %v334_v14 = vld [vmem:[#allocation6 + $0xe0] sm:$0xff]  ;;  %v613_v15 = vld [vmem:[#allocation6 + $0x998] sm:$0xff]  ;;  %s14761_s11 = scalar_lea.hbm %s14813_s4, %s10199_s9  ;;  %s11076_s14 = scalar_lea.vmem %s14763_s10, 6144 }
  0x8e   : > { %v8966_v13 = vpack.c.bf16 %v603_v11, %v594_v10  ;;  %v622_v16 = vld [vmem:[#allocation6 + $0x9e0] sm:$0xff]  ;;  %8965 = vmatprep.subr.bf16.mxu1 %v8964_v8  ;;  %v8904_v17 = vpack.c.bf16 %v334_v14, %v325_v12  ;;  %v324_v19 = vld [vmem:[#allocation6 + $0x90] sm:$0xff]  ;;  %v333_v20 = vld [vmem:[#allocation6 + $0xd8] sm:$0xff]  ;;  %p11077_p10 = scmp.ne.s32.totalorder %s14763_s10, %s11076_s14  ;;  %s11163_s6 = smov [#allocation11]  }
  0x8f   : > { %8903 = vmatpush1.bf16.msra.mxu0 %v8902_v9  ;;  %v8968_v18 = vpack.c.bf16 %v622_v16, %v613_v15  ;;  %v612_v21 = vld [vmem:[#allocation6 + $0x990] sm:$0xff]  ;;  %v8906_v22 = vpack.c.bf16 %v333_v20, %v324_v19  ;;  %v621_v23 = vld [vmem:[#allocation6 + $0x9d8] sm:$0xff]  ;;  %v343_v24 = vld [vmem:[#allocation6 + $0x128] sm:$0xff]  ;;  %s11080_s27 = sshll.u32 %s11163_s6, 4  ;;  %s11081_s27 = int_to_ptr.vmem [resolvable:$false] %s11080_s27 }
  0x90   : > { %8967 = vmatpush1.bf16.msra.mxu1 %v8966_v13  ;;  %v352_v25 = vld [vmem:[#allocation6 + $0x170] sm:$0xff]  ;;  %8905 = vmatprep.subr.bf16.mxu0 %v8904_v17  ;;  %v8970_v26 = vpack.c.bf16 %v621_v23, %v612_v21  ;;  %v631_v28 = vld [vmem:[#allocation6 + $0xa28] sm:$0xff]  ;;  %v342_v30 = vld [vmem:[#allocation6 + $0x120] sm:$0xff]  ;;  %p11078_p3 = pnand %p11077_p10, %p11336_p5  ;;  %s11082_s30 = scalar_lea.vmem %s11081_s27, 12288 }
  0x91   : > { %8969 = vmatprep.subr.bf16.mxu1 %v8968_v18  ;;  %v8908_v27 = vpack.c.bf16 %v352_v25, %v343_v24  ;;  %v640_v29 = vld [vmem:[#allocation6 + $0xa70] sm:$0xff]  ;;  %v351_v32 = vld [vmem:[#allocation6 + $0x168] sm:$0xff]  ;;  %v630_v33 = vld [vmem:[#allocation6 + $0xa20] sm:$0xff]  ;;  %p11083_p12 = scmp.lt.s32.totalorder %s14763_s10, %s11081_s27  ;;  %p11084_p2 = scmp.lt.s32.totalorder %s11082_s30, %s11076_s14 }
  0x92   : > { %v8972_v31 = vpack.c.bf16 %v640_v29, %v631_v28  ;;  %v639_v34 = vld [vmem:[#allocation6 + $0xa68] sm:$0xff]  ;;  %v8910_v35 = vpack.c.bf16 %v351_v32, %v342_v30  ;;  %v361_v36 = vld [vmem:[#allocation6 + $0x1b8] sm:$0xff]  ;;  %v370_v37 = vld [vmem:[#allocation6 + $0x200] sm:$0xff]  ;;  %p11079_p11 = pneg %p11078_p3 }
  0x93   : > { %8907 = vmatpush1.bf16.msra.mxu0 %v8906_v22  ;;  %v649_v38 = vld [vmem:[#allocation6 + $0xab8] sm:$0xff]  ;;  %v8974_v39 = vpack.c.bf16 %v639_v34, %v630_v33  ;;  %v8912_v40 = vpack.c.bf16 %v370_v37, %v361_v36  ;;  %v658_v41 = vld [vmem:[#allocation6 + $0xb00] sm:$0xff]  ;;  %v360_v42 = vld [vmem:[#allocation6 + $0x1b0] sm:$0xff]  ;;  %p11085_p1 = por %p11084_p2, %p11083_p12 }
  0x94   : > { %8971 = vmatpush1.bf16.msra.mxu1 %v8970_v26  ;;  %8909 = vmatprep.subr.bf16.mxu0 %v8908_v27  ;;  %v369_v43 = vld [vmem:[#allocation6 + $0x1f8] sm:$0xff]  ;;  %v8976_v44 = vpack.c.bf16 %v658_v41, %v649_v38  ;;  %v648_v45 = vld [vmem:[#allocation6 + $0xab0] sm:$0xff]  ;;  %v379_v47 = vld [vmem:[#allocation6 + $0x248] sm:$0xff] }
  0x95   : > { %8973 = vmatprep.subr.bf16.mxu1 %v8972_v31  ;;  %v657_v46 = vld [vmem:[#allocation6 + $0xaf8] sm:$0xff]  ;;  %v388_v48 = vld [vmem:[#allocation6 + $0x290] sm:$0xff]  ;;  %v667_v49 = vld [vmem:[#allocation6 + $0xb48] sm:$0xff]  ;;  %v8914_v51 = vpack.c.bf16 %v369_v43, %v360_v42  ;;  %p11086_p4 = pnand %p11085_p1, %p11079_p11 }
  0x96   : > { %v676_v50 = vld [vmem:[#allocation6 + $0xb90] sm:$0xff]  ;;  %v8978_v52 = vpack.c.bf16 %v657_v46, %v648_v45  ;;  %v8916_v53 = vpack.c.bf16 %v388_v48, %v379_v47  ;;  %v378_v54 = vld [vmem:[#allocation6 + $0x240] sm:$0xff]  ;;  %v387_v55 = vld [vmem:[#allocation6 + $0x288] sm:$0xff] }
  0x97   : > { %8911 = vmatpush1.bf16.msra.mxu0 %v8910_v35  ;;  %v666_v56 = vld [vmem:[#allocation6 + $0xb40] sm:$0xff]  ;;  %v8980_v57 = vpack.c.bf16 %v676_v50, %v667_v49  ;;  %v675_v58 = vld [vmem:[#allocation6 + $0xb88] sm:$0xff]  ;;  %v397_v59 = vld [vmem:[#allocation6 + $0x2d8] sm:$0xff]  ;;  %v8918_v63 = vpack.c.bf16 %v387_v55, %v378_v54 }
  0x98   : > { %8975 = vmatpush1.bf16.msra.mxu1 %v8974_v39  ;;  %8913 = vmatprep.subr.bf16.mxu0 %v8912_v40  ;;  %v406_v60 = vld [vmem:[#allocation6 + $0x320] sm:$0xff]  ;;  %v685_v61 = vld [vmem:[#allocation6 + $0xbd8] sm:$0xff]  ;;  %v8982_v1 = vpack.c.bf16 %v675_v58, %v666_v56  ;;  %v396_v3 = vld [vmem:[#allocation6 + $0x2d0] sm:$0xff] }
  0x99   : > { %8977 = vmatprep.subr.bf16.mxu1 %v8976_v44  ;;  %v694_v62 = vld [vmem:[#allocation6 + $0xc20] sm:$0xff]  ;;  %v8920_v2 = vpack.c.bf16 %v406_v60, %v397_v59  ;;  %v405_v4 = vld [vmem:[#allocation6 + $0x318] sm:$0xff]  ;;  %v684_v5 = vld [vmem:[#allocation6 + $0xbd0] sm:$0xff] }
  0x9a   : > { %v8984_v6 = vpack.c.bf16 %v694_v62, %v685_v61  ;;  %v693_v7 = vld [vmem:[#allocation6 + $0xc18] sm:$0xff]  ;;  %v415_v8 = vld [vmem:[#allocation6 + $0x368] sm:$0xff]  ;;  %v424_v9 = vld [vmem:[#allocation6 + $0x3b0] sm:$0xff]  ;;  %v8922_v12 = vpack.c.bf16 %v405_v4, %v396_v3 }
  0x9b   : > { %8915 = vmatpush1.bf16.msra.mxu0 %v8914_v51  ;;  %v703_v10 = vld [vmem:[#allocation6 + $0xc68] sm:$0xff]  ;;  %v712_v11 = vld [vmem:[#allocation6 + $0xcb0] sm:$0xff]  ;;  %v8986_v13 = vpack.c.bf16 %v693_v7, %v684_v5  ;;  %v8924_v14 = vpack.c.bf16 %v424_v9, %v415_v8  ;;  %v414_v15 = vld [vmem:[#allocation6 + $0x360] sm:$0xff] }
  0x9c   : > { %8979 = vmatpush1.bf16.msra.mxu1 %v8978_v52  ;;  %8917 = vmatprep.subr.bf16.mxu0 %v8916_v53  ;;  %v423_v16 = vld [vmem:[#allocation6 + $0x3a8] sm:$0xff]  ;;  %v702_v17 = vld [vmem:[#allocation6 + $0xc60] sm:$0xff]  ;;  %v8988_v18 = vpack.c.bf16 %v712_v11, %v703_v10  ;;  %v433_v20 = vld [vmem:[#allocation6 + $0x3f8] sm:$0xff] }
  0x9d   : > { %8981 = vmatprep.subr.bf16.mxu1 %v8980_v57  ;;  %v711_v19 = vld [vmem:[#allocation6 + $0xca8] sm:$0xff]  ;;  %v442_v21 = vld [vmem:[#allocation6 + $0x440] sm:$0xff]  ;;  %v721_v22 = vld [vmem:[#allocation6 + $0xcf8] sm:$0xff]  ;;  %v8926_v24 = vpack.c.bf16 %v423_v16, %v414_v15 }
  0x9e   : > { %v730_v23 = vld [vmem:[#allocation6 + $0xd40] sm:$0xff]  ;;  %v8990_v25 = vpack.c.bf16 %v711_v19, %v702_v17  ;;  %v8928_v26 = vpack.c.bf16 %v442_v21, %v433_v20  ;;  %v432_v27 = vld [vmem:[#allocation6 + $0x3f0] sm:$0xff]  ;;  %v441_v28 = vld [vmem:[#allocation6 + $0x438] sm:$0xff] }
  0x9f   : > { %8919 = vmatpush1.bf16.msra.mxu0 %v8918_v63  ;;  %v720_v29 = vld [vmem:[#allocation6 + $0xcf0] sm:$0xff]  ;;  %v8992_v30 = vpack.c.bf16 %v730_v23, %v721_v22  ;;  %v729_v31 = vld [vmem:[#allocation6 + $0xd38] sm:$0xff]  ;;  %v451_v32 = vld [vmem:[#allocation6 + $0x488] sm:$0xff]  ;;  %v8930_v36 = vpack.c.bf16 %v441_v28, %v432_v27 }
  0xa0   : > { %8983 = vmatpush1.bf16.msra.mxu1 %v8982_v1  ;;  %8921 = vmatprep.subr.bf16.mxu0 %v8920_v2  ;;  %v460_v33 = vld [vmem:[#allocation6 + $0x4d0] sm:$0xff]  ;;  %v309_v34 = vld [vmem:[#allocation6 + $0x18] sm:$0xff]  ;;  %v318_v35 = vld [vmem:[#allocation6 + $0x60] sm:$0xff]  ;;  %v8994_v37 = vpack.c.bf16 %v729_v31, %v720_v29 }
  0xa1   : > { %8985 = vmatprep.subr.bf16.mxu1 %v8984_v6  ;;  %v8932_v38 = vpack.c.bf16 %v460_v33, %v451_v32  ;;  %v450_v39 = vld [vmem:[#allocation6 + $0x480] sm:$0xff]  ;;  %v459_v40 = vld [vmem:[#allocation6 + $0x4c8] sm:$0xff]  ;;  %v8996_v41 = vpack.c.bf16 %v318_v35, %v309_v34  ;;  %v308_v42 = vld [vmem:[#allocation6 + $0x10] sm:$0xff] }
  0xa2   : > { %v317_v43 = vld [vmem:[#allocation6 + $0x58] sm:$0xff]  ;;  %v478_v45 = vld [vmem:[#allocation6 + $0x560] sm:$0xff]  ;;  %v327_v46 = vld [vmem:[#allocation6 + $0xa8] sm:$0xff]  ;;  %v8934_v48 = vpack.c.bf16 %v459_v40, %v450_v39 }
  0xa3   : > { %8923 = vmatpush1.bf16.msra.mxu0 %v8922_v12  ;;  %v469_v44 = vld [vmem:[#allocation6 + $0x518] sm:$0xff]  ;;  %v336_v47 = vld [vmem:[#allocation6 + $0xf0] sm:$0xff]  ;;  %v8998_v50 = vpack.c.bf16 %v317_v43, %v308_v42  ;;  %v326_v55 = vld [vmem:[#allocation6 + $0xa0] sm:$0xff] }
  0xa4   : > { %8987 = vmatpush1.bf16.msra.mxu1 %v8986_v13  ;;  %8925 = vmatprep.subr.bf16.mxu0 %v8924_v14  ;;  %v260_v49 = vld [vmem:[%s11393_s5 + $0x10] sm:$0xff]  ;;  %v477_v52 = vld [vmem:[#allocation6 + $0x558] sm:$0xff]  ;;  %v8936_v53 = vpack.c.bf16 %v478_v45, %v469_v44  ;;  %v9000_v54 = vpack.c.bf16 %v336_v47, %v327_v46  ;;  %v335_v56 = vld [vmem:[#allocation6 + $0xe8] sm:$0xff] }
  0xa5   : > { %8989 = vmatprep.subr.bf16.mxu1 %v8988_v18  ;;  %v468_v51 = vld [vmem:[#allocation6 + $0x510] sm:$0xff]  ;;  %v487_v57 = vld [vmem:[#allocation6 + $0x5a8] sm:$0xff]  ;;  %v345_v59 = vld [vmem:[#allocation6 + $0x138] sm:$0xff]  ;;  %v9002_v63 = vpack.c.bf16 %v335_v56, %v326_v55 }
  0xa6   : > { %v496_v58 = vld [vmem:[#allocation6 + $0x5f0] sm:$0xff]  ;;  %v354_v60 = vld [vmem:[#allocation6 + $0x180] sm:$0xff]  ;;  %v8938_v61 = vpack.c.bf16 %v477_v52, %v468_v51  ;;  %v263_v62 = vld [vmem:[%s11393_s5 + $0x28] sm:$0xff] }
  0xa7   : > { %8927 = vmatpush1.bf16.msra.mxu0 %v8926_v24  ;;  %v486_v1 = vld [vmem:[#allocation6 + $0x5a0] sm:$0xff]  ;;  %v495_v2 = vld [vmem:[#allocation6 + $0x5e8] sm:$0xff]  ;;  %v8940_v3 = vpack.c.bf16 %v496_v58, %v487_v57  ;;  %v9004_v4 = vpack.c.bf16 %v354_v60, %v345_v59  ;;  %v344_v5 = vld [vmem:[#allocation6 + $0x130] sm:$0xff] }
  0xa8   : > { %8991 = vmatpush1.bf16.msra.mxu1 %v8990_v25  ;;  %8929 = vmatprep.subr.bf16.mxu0 %v8928_v26  ;;  %v353_v6 = vld [vmem:[#allocation6 + $0x178] sm:$0xff]  ;;  %v514_v8 = vld [vmem:[#allocation6 + $0x680] sm:$0xff]  ;;  %v363_v9 = vld [vmem:[#allocation6 + $0x1c8] sm:$0xff]  ;;  %v8942_v11 = vpack.c.bf16 %v495_v2, %v486_v1 }
  0xa9   : > { %8993 = vmatprep.subr.bf16.mxu1 %v8992_v30  ;;  %v505_v7 = vld [vmem:[#allocation6 + $0x638] sm:$0xff]  ;;  %v372_v10 = vld [vmem:[#allocation6 + $0x210] sm:$0xff]  ;;  %v266_v12 = vld [vmem:[%s11393_s5 + $0x40] sm:$0xff]  ;;  %v9006_v13 = vpack.c.bf16 %v353_v6, %v344_v5 }
  0xaa   : > { %v504_v14 = vld [vmem:[#allocation6 + $0x630] sm:$0xff]  ;;  %v513_v15 = vld [vmem:[#allocation6 + $0x678] sm:$0xff]  ;;  %v8944_v16 = vpack.c.bf16 %v514_v8, %v505_v7  ;;  %v9008_v17 = vpack.c.bf16 %v372_v10, %v363_v9  ;;  %v362_v18 = vld [vmem:[#allocation6 + $0x1c0] sm:$0xff] }
  0xab   : > { %8931 = vmatpush1.bf16.msra.mxu0 %v8930_v36  ;;  %v371_v19 = vld [vmem:[#allocation6 + $0x208] sm:$0xff]  ;;  %v532_v21 = vld [vmem:[#allocation6 + $0x710] sm:$0xff]  ;;  %v381_v22 = vld [vmem:[#allocation6 + $0x258] sm:$0xff]  ;;  %v8946_v25 = vpack.c.bf16 %v513_v15, %v504_v14 }
  0xac   : > { %8995 = vmatpush1.bf16.msra.mxu1 %v8994_v37  ;;  %8933 = vmatprep.subr.bf16.mxu0 %v8932_v38  ;;  %v523_v20 = vld [vmem:[#allocation6 + $0x6c8] sm:$0xff]  ;;  %v390_v23 = vld [vmem:[#allocation6 + $0x2a0] sm:$0xff]  ;;  %v269_v24 = vld [vmem:[%s11393_s5 + $0x58] sm:$0xff]  ;;  %v9010_v26 = vpack.c.bf16 %v371_v19, %v362_v18 }
  0xad   : > { %8997 = vmatprep.subr.bf16.mxu1 %v8996_v41  ;;  %v522_v27 = vld [vmem:[#allocation6 + $0x6c0] sm:$0xff]  ;;  %v531_v28 = vld [vmem:[#allocation6 + $0x708] sm:$0xff]  ;;  %v8948_v30 = vpack.c.bf16 %v532_v21, %v523_v20  ;;  %v9012_v31 = vpack.c.bf16 %v390_v23, %v381_v22  ;;  %v380_v32 = vld [vmem:[#allocation6 + $0x250] sm:$0xff] }
  0xae   : > { %v11416_v29 = vld [vmem:[%s11393_s5 + $0x8] sm:$0xff]  ;;  %v389_v33 = vld [vmem:[#allocation6 + $0x298] sm:$0xff]  ;;  %v550_v35 = vld [vmem:[#allocation6 + $0x7a0] sm:$0xff]  ;;  %v8950_v38 = vpack.c.bf16 %v531_v28, %v522_v27 }
  0xaf   : > { %964 = vmatmul.mubr.f32.vlgmr.msra.gmra.mrb[0].mxu1 %v260_v49  ;;  %8935 = vmatpush1.bf16.msra.mxu0 %v8934_v48  ;;  %v541_v34 = vld [vmem:[#allocation6 + $0x758] sm:$0xff]  ;;  %v399_v36 = vld [vmem:[#allocation6 + $0x2e8] sm:$0xff]  ;;  %v408_v37 = vld [vmem:[#allocation6 + $0x330] sm:$0xff]  ;;  %v9014_v40 = vpack.c.bf16 %v389_v33, %v380_v32 }
  0xb0   : > { %8999 = vmatpush1.bf16.msra.mxu1 %v8998_v50  ;;  %969 = vmatprep.mubr.f32.mxu1 %v14820_v0  ;;  %v272_v39 = vld [vmem:[%s11393_s5 + $0x70] sm:$0xff]  ;;  %v549_v42 = vld [vmem:[#allocation6 + $0x798] sm:$0xff]  ;;  %v8952_v43 = vpack.c.bf16 %v550_v35, %v541_v34  ;;  %v9016_v44 = vpack.c.bf16 %v408_v37, %v399_v36  ;;  %v398_v45 = vld [vmem:[#allocation6 + $0x2e0] sm:$0xff] }
  0xb1   : > { %8937 = vmatprep.subr.bf16.mxu0 %v8936_v53  ;;  %9001 = vmatprep.subr.bf16.mxu1 %v9000_v54  ;;  %v540_v41 = vld [vmem:[#allocation6 + $0x750] sm:$0xff]  ;;  %v407_v46 = vld [vmem:[#allocation6 + $0x328] sm:$0xff]  ;;  %v417_v49 = vld [vmem:[#allocation6 + $0x378] sm:$0xff] }
  0xb2   : > { %802 = vmatprep.mubr.f32.mxu0 %v11416_v29  ;;  %v559_v47 = vld [vmem:[#allocation6 + $0x7e8] sm:$0xff]  ;;  %v568_v48 = vld [vmem:[#allocation6 + $0x830] sm:$0xff]  ;;  %v426_v50 = vld [vmem:[#allocation6 + $0x3c0] sm:$0xff]  ;;  %v8954_v51 = vpack.c.bf16 %v549_v42, %v540_v41  ;;  %v9018_v53 = vpack.c.bf16 %v407_v46, %v398_v45 }
  0xb3   : > { %970 = vmatmul.mubr.f32.gmra.mrb[2].mxu1 %v263_v62  ;;  %8939 = vmatpush1.bf16.msra.mxu0 %v8938_v61  ;;  %v275_v52 = vld [vmem:[%s11393_s5 + $0x88] sm:$0xff]  ;;  %v558_v54 = vld [vmem:[#allocation6 + $0x7e0] sm:$0xff]  ;;  %v8956_v56 = vpack.c.bf16 %v568_v48, %v559_v47  ;;  %v9020_v57 = vpack.c.bf16 %v426_v50, %v417_v49  ;;  %v416_v58 = vld [vmem:[#allocation6 + $0x370] sm:$0xff] }
  0xb4   : > { %9003 = vmatpush1.bf16.msra.mxu1 %v9002_v63  ;;  %975 = vmatprep.mubr.f32.mxu1 %v14820_v0  ;;  %v567_v55 = vld [vmem:[#allocation6 + $0x828] sm:$0xff]  ;;  %v425_v59 = vld [vmem:[#allocation6 + $0x3b8] sm:$0xff]  ;;  %v586_v61 = vld [vmem:[#allocation6 + $0x8c0] sm:$0xff] }
  0xb5   : > { %8941 = vmatprep.subr.bf16.mxu0 %v8940_v3  ;;  %9005 = vmatprep.subr.bf16.mxu1 %v9004_v4  ;;  %v577_v60 = vld [vmem:[#allocation6 + $0x878] sm:$0xff]  ;;  %v435_v62 = vld [vmem:[#allocation6 + $0x408] sm:$0xff]  ;;  %v444_v63 = vld [vmem:[#allocation6 + $0x450] sm:$0xff]  ;;  %v8958_v1 = vpack.c.bf16 %v567_v55, %v558_v54  ;;  %v9022_v3 = vpack.c.bf16 %v425_v59, %v416_v58 }
  0xb6   : > { %v278_v2 = vld [vmem:[%s11393_s5 + $0xa0] sm:$0xff]  ;;  %v576_v4 = vld [vmem:[#allocation6 + $0x870] sm:$0xff]  ;;  %v585_v5 = vld [vmem:[#allocation6 + $0x8b8] sm:$0xff]  ;;  %v8960_v6 = vpack.c.bf16 %v586_v61, %v577_v60  ;;  %v9024_v7 = vpack.c.bf16 %v444_v63, %v435_v62 }
  0xb7   : > { %976 = vmatmul.mubr.f32.gmra.mrb[4].mxu1 %v266_v12  ;;  %8943 = vmatpush1.bf16.msra.mxu0 %v8942_v11  ;;  %v434_v8 = vld [vmem:[#allocation6 + $0x400] sm:$0xff]  ;;  %v443_v9 = vld [vmem:[#allocation6 + $0x448] sm:$0xff]  ;;  %v453_v10 = vld [vmem:[#allocation6 + $0x498] sm:$0xff]  ;;  %v8962_v14 = vpack.c.bf16 %v585_v5, %v576_v4 }
  0xb8   : > { %9007 = vmatpush1.bf16.msra.mxu1 %v9006_v13  ;;  %981 = vmatprep.mubr.f32.mxu1 %v14820_v0  ;;  %v462_v11 = vld [vmem:[#allocation6 + $0x4e0] sm:$0xff]  ;;  %v311_v12 = vld [vmem:[#allocation6 + $0x28] sm:$0xff]  ;;  %v320_v13 = vld [vmem:[#allocation6 + $0x70] sm:$0xff] }
  0xb9   : > { %8945 = vmatprep.subr.bf16.mxu0 %v8944_v16  ;;  %9009 = vmatprep.subr.bf16.mxu1 %v9008_v17  ;;  %v281_v15 = vld [vmem:[%s11393_s5 + $0xb8] sm:$0xff]  ;;  %v9026_v16 = vpack.c.bf16 %v443_v9, %v434_v8  ;;  %v310_v17 = vld [vmem:[#allocation6 + $0x20] sm:$0xff]  ;;  %v319_v18 = vld [vmem:[#allocation6 + $0x68] sm:$0xff]  ;;  %v9028_v19 = vpack.c.bf16 %v462_v11, %v453_v10  ;;  %v9092_v20 = vpack.c.bf16 %v320_v13, %v311_v12 }
  0xba   : > { %v452_v21 = vld [vmem:[#allocation6 + $0x490] sm:$0xff]  ;;  %v461_v22 = vld [vmem:[#allocation6 + $0x4d8] sm:$0xff]  ;;  %v471_v23 = vld [vmem:[#allocation6 + $0x528] sm:$0xff] }
  0xbb   : > { %982 = vmatmul.mubr.f32.gmra.mrb[6].mxu1 %v269_v24  ;;  %8947 = vmatpush1.bf16.msra.mxu0 %v8946_v25  ;;  %v480_v24 = vld [vmem:[#allocation6 + $0x570] sm:$0xff]  ;;  %v11428_v25 = vld [vmem:[%s11393_s5] sm:$0xff]  ;;  %v329_v27 = vld [vmem:[#allocation6 + $0xb8] sm:$0xff] }
  0xbc   : > { %9011 = vmatpush1.bf16.msra.mxu1 %v9010_v26  ;;  %987 = vmatprep.mubr.f32.mxu1 %v14820_v0  ;;  %v9094_v26 = vpack.c.bf16 %v319_v18, %v310_v17  ;;  %v338_v28 = vld [vmem:[#allocation6 + $0x100] sm:$0xff]  ;;  %v328_v32 = vld [vmem:[#allocation6 + $0xb0] sm:$0xff]  ;;  %v337_v33 = vld [vmem:[#allocation6 + $0xf8] sm:$0xff]  ;;  %v9032_v35 = vpack.c.bf16 %v480_v24, %v471_v23 }
  0xbd   : > { %8949 = vmatprep.subr.bf16.mxu0 %v8948_v30  ;;  %9013 = vmatprep.subr.bf16.mxu1 %v9012_v31  ;;  %v284_v30 = vld [vmem:[%s11393_s5 + $0xd0] sm:$0xff]  ;;  %v9030_v31 = vpack.c.bf16 %v461_v22, %v452_v21  ;;  %v11433_v34 = vld [vmem:[%s11393_s5 + $0x20] sm:$0xff]  ;;  %v479_v37 = vld [vmem:[#allocation6 + $0x568] sm:$0xff]  ;;  %v9098_v42 = vpack.c.bf16 %v337_v33, %v328_v32 }
  0xbe   : > { %v470_v36 = vld [vmem:[#allocation6 + $0x520] sm:$0xff]  ;;  %v11437_v41 = vld [vmem:[%s11393_s5 + $0x18] sm:$0xff]  ;;  %v287_v45 = vld [vmem:[%s11393_s5 + $0xe8] sm:$0xff] }
  0xbf   : > { %988 = vmatmul.mubr.f32.gmra.mrb[8].mxu1 %v272_v39  ;;  %8951 = vmatpush1.bf16.msra.mxu0 %v8950_v38  ;;  %v9096_v38 = vpack.c.bf16 %v338_v28, %v329_v27  ;;  %v489_v39 = vld [vmem:[#allocation6 + $0x5b8] sm:$0xff]  ;;  %v9034_v46 = vpack.c.bf16 %v479_v37, %v470_v36  ;;  %v346_v47 = vld [vmem:[#allocation6 + $0x140] sm:$0xff]  ;;  %v355_v48 = vld [vmem:[#allocation6 + $0x188] sm:$0xff] }
  0xc0   : > { %9015 = vmatpush1.bf16.msra.mxu1 %v9014_v40  ;;  %993 = vmatprep.mubr.f32.mxu1 %v14820_v0  ;;  %v498_v40 = vld [vmem:[#allocation6 + $0x600] sm:$0xff]  ;;  %v11443_v49 = vld [vmem:[%s11393_s5 + $0x38] sm:$0xff]  ;;  %v507_v54 = vld [vmem:[#allocation6 + $0x648] sm:$0xff] }
  0xc1   : > { %8953 = vmatprep.subr.bf16.mxu0 %v8952_v43  ;;  %9017 = vmatprep.subr.bf16.mxu1 %v9016_v44  ;;  %v347_v43 = vld [vmem:[#allocation6 + $0x148] sm:$0xff]  ;;  %v356_v44 = vld [vmem:[#allocation6 + $0x190] sm:$0xff]  ;;  %v9036_v50 = vpack.c.bf16 %v498_v40, %v489_v39  ;;  %v365_v58 = vld [vmem:[#allocation6 + $0x1d8] sm:$0xff] }
  0xc2   : > { %v516_v55 = vld [vmem:[#allocation6 + $0x690] sm:$0xff]  ;;  %v374_v59 = vld [vmem:[#allocation6 + $0x220] sm:$0xff]  ;;  %v373_v63 = vld [vmem:[#allocation6 + $0x218] sm:$0xff] }
  0xc3   : > { %994 = vmatmul.mubr.f32.gmra.mrb[10].mxu1 %v275_v52  ;;  %8955 = vmatpush1.bf16.msra.mxu0 %v8954_v51  ;;  %v488_v51 = vld [vmem:[#allocation6 + $0x5b0] sm:$0xff]  ;;  %v497_v52 = vld [vmem:[#allocation6 + $0x5f8] sm:$0xff]  ;;  %v290_v60 = vld [vmem:[%s11393_s5 + $0x100] sm:$0xff]  ;;  %v9104_v5 = vpack.c.bf16 %v374_v59, %v365_v58 }
  0xc4   : > { %9019 = vmatpush1.bf16.msra.mxu1 %v9018_v53  ;;  %999 = vmatprep.mubr.f32.mxu1 %v14820_v0  ;;  %v9100_v53 = vpack.c.bf16 %v356_v44, %v347_v43  ;;  %v9038_v61 = vpack.c.bf16 %v497_v52, %v488_v51  ;;  %v364_v62 = vld [vmem:[#allocation6 + $0x1d0] sm:$0xff]  ;;  %v515_v4 = vld [vmem:[#allocation6 + $0x688] sm:$0xff]  ;;  %v293_v12 = vld [vmem:[%s11393_s5 + $0x118] sm:$0xff] }
  0xc5   : > { %8957 = vmatprep.subr.bf16.mxu0 %v8956_v56  ;;  %9021 = vmatprep.subr.bf16.mxu1 %v9020_v57  ;;  %v11447_v56 = vld [vmem:[%s11393_s5 + $0x30] sm:$0xff]  ;;  %v9102_v57 = vpack.c.bf16 %v355_v48, %v346_v47  ;;  %v11457_v8 = vld [vmem:[%s11393_s5 + $0x48] sm:$0xff]  ;;  %v9106_v9 = vpack.c.bf16 %v373_v63, %v364_v62  ;;  %v11467_v23 = vld [vmem:[%s11393_s5 + $0x60] sm:$0xff] }
  0xc6   : > { %v383_v10 = vld [vmem:[#allocation6 + $0x268] sm:$0xff]  ;;  %v392_v11 = vld [vmem:[#allocation6 + $0x2b0] sm:$0xff]  ;;  %v410_v27 = vld [vmem:[#allocation6 + $0x340] sm:$0xff] }
  0xc7   : > { %1000 = vmatmul.mubr.f32.gmra.mrb[12].mxu1 %v278_v2  ;;  %8959 = vmatpush1.bf16.msra.mxu0 %v8958_v1  ;;  %v11453_v1 = vld [vmem:[%s11393_s5 + $0x50] sm:$0xff]  ;;  %v9040_v2 = vpack.c.bf16 %v516_v55, %v507_v54  ;;  %v543_v21 = vld [vmem:[#allocation6 + $0x768] sm:$0xff]  ;;  %v409_v32 = vld [vmem:[#allocation6 + $0x338] sm:$0xff] }
  0xc8   : > { %9023 = vmatpush1.bf16.msra.mxu1 %v9022_v3  ;;  %1005 = vmatprep.mubr.f32.mxu1 %v14820_v0  ;;  %v506_v3 = vld [vmem:[#allocation6 + $0x640] sm:$0xff]  ;;  %v524_v18 = vld [vmem:[#allocation6 + $0x6d0] sm:$0xff]  ;;  %v551_v37 = vld [vmem:[#allocation6 + $0x7a8] sm:$0xff] }
  0xc9   : > { %8961 = vmatprep.subr.bf16.mxu0 %v8960_v6  ;;  %9025 = vmatprep.subr.bf16.mxu1 %v9024_v7  ;;  %v525_v6 = vld [vmem:[#allocation6 + $0x6d8] sm:$0xff]  ;;  %v534_v7 = vld [vmem:[#allocation6 + $0x720] sm:$0xff]  ;;  %v9042_v13 = vpack.c.bf16 %v515_v4, %v506_v3  ;;  %v552_v22 = vld [vmem:[#allocation6 + $0x7b0] sm:$0xff] }
  0xca   : > { %v9044_v17 = vpack.c.bf16 %v534_v7, %v525_v6  ;;  %v296_v28 = vld [vmem:[%s11393_s5 + $0x130] sm:$0xff]  ;;  %v11473_v33 = vld [vmem:[%s11393_s5 + $0x80] sm:$0xff]  ;;  %v561_v39 = vld [vmem:[#allocation6 + $0x7f8] sm:$0xff] }
  0xcb   : > { %1006 = vmatmul.mubr.f32.gmra.mrb[14].mxu1 %v281_v15  ;;  %8963 = vmatpush1.bf16.msra.mxu0 %v8962_v14  ;;  %v382_v14 = vld [vmem:[#allocation6 + $0x260] sm:$0xff]  ;;  %v391_v15 = vld [vmem:[#allocation6 + $0x2a8] sm:$0xff]  ;;  %v11483_v51 = vld [vmem:[%s11393_s5 + $0x98] sm:$0xff] }
  0xcc   : > { %9027 = vmatpush1.bf16.msra.mxu1 %v9026_v16  ;;  %1011 = vmatprep.mubr.f32.mxu1 %v14820_v0  ;;  %v11463_v16 = vld [vmem:[%s11393_s5 + $0x68] sm:$0xff]  ;;  %v9110_v24 = vpack.c.bf16 %v391_v15, %v382_v14  ;;  %v542_v36 = vld [vmem:[#allocation6 + $0x760] sm:$0xff]  ;;  %v569_v54 = vld [vmem:[#allocation6 + $0x838] sm:$0xff] }
  0xcd   : > { %9029 = vmatprep.subr.bf16.mxu1 %v9028_v19  ;;  %9093 = vmatprep.subr.bf16.mxu0 %v9092_v20  ;;  %v533_v19 = vld [vmem:[#allocation6 + $0x718] sm:$0xff]  ;;  %v9108_v20 = vpack.c.bf16 %v392_v11, %v383_v10  ;;  %v570_v40 = vld [vmem:[#allocation6 + $0x840] sm:$0xff]  ;;  %v419_v44 = vld [vmem:[#allocation6 + $0x388] sm:$0xff]  ;;  %v9050_v47 = vpack.c.bf16 %v551_v37, %v542_v36 }
  0xce   : > { %803 = vmatmul.mubr.f32.vlgmr.msra.gmra.mrb[0].mxu0 %v11428_v25  ;;  %v418_v48 = vld [vmem:[#allocation6 + $0x380] sm:$0xff]  ;;  %v9052_v52 = vpack.c.bf16 %v570_v40, %v561_v39  ;;  %v588_v58 = vld [vmem:[#allocation6 + $0x8d0] sm:$0xff]  ;;  %v445_v4 = vld [vmem:[#allocation6 + $0x458] sm:$0xff] }
  0xcf   : > { %1012 = vmatmul.mubr.f32.gmra.mrb[16].mxu1 %v284_v30  ;;  %9095 = vmatpush1.bf16.msra.mxu0 %v9094_v26  ;;  %v401_v26 = vld [vmem:[#allocation6 + $0x2f8] sm:$0xff]  ;;  %v9046_v30 = vpack.c.bf16 %v533_v19, %v524_v18  ;;  %v11487_v59 = vld [vmem:[%s11393_s5 + $0x90] sm:$0xff]  ;;  %v446_v62 = vld [vmem:[#allocation6 + $0x460] sm:$0xff] }
  0xd0   : > { %9031 = vmatpush1.bf16.msra.mxu1 %v9030_v31  ;;  %808 = vmatprep.mubr.f32.mxu0 %v11433_v34  ;;  %v400_v31 = vld [vmem:[#allocation6 + $0x2f0] sm:$0xff]  ;;  %v302_v63 = vld [vmem:[%s11393_s5 + $0x160] sm:$0xff]  ;;  %v597_v11 = vld [vmem:[#allocation6 + $0x918] sm:$0xff] }
  0xd1   : > { %1017 = vmatprep.mubr.f32.mxu1 %v14820_v0  ;;  %9033 = vmatprep.subr.bf16.mxu1 %v9032_v35  ;;  %v9048_v35 = vpack.c.bf16 %v552_v22, %v543_v21  ;;  %v9114_v43 = vpack.c.bf16 %v409_v32, %v400_v31  ;;  %v436_v3 = vld [vmem:[#allocation6 + $0x410] sm:$0xff]  ;;  %v578_v7 = vld [vmem:[#allocation6 + $0x880] sm:$0xff]  ;;  %v455_v15 = vld [vmem:[#allocation6 + $0x4a8] sm:$0xff] }
  0xd2   : > { %809 = vmatmul.mubr.f32.gmra.mrb[2].mxu0 %v11437_v41  ;;  %9097 = vmatprep.subr.bf16.mxu0 %v9096_v38  ;;  %v9112_v38 = vpack.c.bf16 %v410_v27, %v401_v26  ;;  %v9122_v14 = vpack.c.bf16 %v445_v4, %v436_v3  ;;  %v305_v18 = vld [vmem:[%s11393_s5 + $0x178] sm:$0xff]  ;;  %v463_v21 = vld [vmem:[#allocation6 + $0x4e8] sm:$0xff]  ;;  %v596_v26 = vld [vmem:[#allocation6 + $0x910] sm:$0xff] }
  0xd3   : > { %1018 = vmatmul.mubr.f32.gmra.mrb[18].mxu1 %v287_v45  ;;  %9099 = vmatpush1.bf16.msra.mxu0 %v9098_v42  ;;  %v11477_v42 = vld [vmem:[%s11393_s5 + $0x78] sm:$0xff]  ;;  %v428_v45 = vld [vmem:[#allocation6 + $0x3d0] sm:$0xff]  ;;  %v11503_v22 = vld [vmem:[%s11393_s5 + $0xc8] sm:$0xff] }
  0xd4   : > { %9035 = vmatpush1.bf16.msra.mxu1 %v9034_v46  ;;  %814 = vmatprep.mubr.f32.mxu0 %v11443_v49  ;;  %v299_v46 = vld [vmem:[%s11393_s5 + $0x148] sm:$0xff]  ;;  %v9116_v55 = vpack.c.bf16 %v428_v45, %v419_v44  ;;  %v605_v27 = vld [vmem:[#allocation6 + $0x958] sm:$0xff]  ;;  %v482_v31 = vld [vmem:[#allocation6 + $0x580] sm:$0xff] }
  0xd5   : > { %1023 = vmatprep.mubr.f32.mxu1 %v14820_v0  ;;  %9037 = vmatprep.subr.bf16.mxu1 %v9036_v50  ;;  %v427_v50 = vld [vmem:[#allocation6 + $0x3c8] sm:$0xff]  ;;  %v11507_v32 = vld [vmem:[%s11393_s5 + $0xc0] sm:$0xff]  ;;  %v624_v37 = vld [vmem:[#allocation6 + $0x9f0] sm:$0xff] }
  0xd6   : > { %815 = vmatmul.mubr.f32.gmra.mrb[4].mxu0 %v11447_v56  ;;  %9101 = vmatprep.subr.bf16.mxu0 %v9100_v53  ;;  %v560_v53 = vld [vmem:[#allocation6 + $0x7f0] sm:$0xff]  ;;  %v615_v36 = vld [vmem:[#allocation6 + $0x9a8] sm:$0xff]  ;;  %v481_v40 = vld [vmem:[#allocation6 + $0x578] sm:$0xff] }
  0xd7   : > { %1024 = vmatmul.mubr.f32.gmra.mrb[20].mxu1 %v290_v60  ;;  %9103 = vmatpush1.bf16.msra.mxu0 %v9102_v57  ;;  %v579_v57 = vld [vmem:[#allocation6 + $0x888] sm:$0xff]  ;;  %v9118_v60 = vpack.c.bf16 %v427_v50, %v418_v48  ;;  %v472_v39 = vld [vmem:[#allocation6 + $0x530] sm:$0xff]  ;;  %v614_v48 = vld [vmem:[#allocation6 + $0x9a0] sm:$0xff] }
  0xd8   : > { %9039 = vmatpush1.bf16.msra.mxu1 %v9038_v61  ;;  %820 = vmatprep.mubr.f32.mxu0 %v11453_v1  ;;  %v437_v61 = vld [vmem:[#allocation6 + $0x418] sm:$0xff]  ;;  %v9056_v6 = vpack.c.bf16 %v588_v58, %v579_v57  ;;  %v491_v45 = vld [vmem:[#allocation6 + $0x5c8] sm:$0xff]  ;;  %v490_v57 = vld [vmem:[#allocation6 + $0x5c0] sm:$0xff] }
  0xd9   : > { %1029 = vmatprep.mubr.f32.mxu1 %v14820_v0  ;;  %9041 = vmatprep.subr.bf16.mxu1 %v9040_v2  ;;  %v9054_v2 = vpack.c.bf16 %v569_v54, %v560_v53  ;;  %v9120_v10 = vpack.c.bf16 %v446_v62, %v437_v61  ;;  %v623_v50 = vld [vmem:[#allocation6 + $0x9e8] sm:$0xff]  ;;  %v9130_v53 = vpack.c.bf16 %v481_v40, %v472_v39  ;;  %v633_v54 = vld [vmem:[#allocation6 + $0xa38] sm:$0xff]  ;;  %v632_v4 = vld [vmem:[#allocation6 + $0xa30] sm:$0xff] }
  0xda   : > { %821 = vmatmul.mubr.f32.gmra.mrb[6].mxu0 %v11457_v8  ;;  %9105 = vmatprep.subr.bf16.mxu0 %v9104_v5  ;;  %v11493_v5 = vld [vmem:[%s11393_s5 + $0xb0] sm:$0xff]  ;;  %v499_v58 = vld [vmem:[#allocation6 + $0x608] sm:$0xff]  ;;  %v9066_v62 = vpack.c.bf16 %v623_v50, %v614_v48  ;;  %v545_v39 = vld [vmem:[#allocation6 + $0x778] sm:$0xff] }
  0xdb   : > { %1030 = vmatmul.mubr.f32.gmra.mrb[22].mxu1 %v293_v12  ;;  %9107 = vmatpush1.bf16.msra.mxu0 %v9106_v9  ;;  %v587_v9 = vld [vmem:[#allocation6 + $0x8c8] sm:$0xff]  ;;  %v606_v12 = vld [vmem:[#allocation6 + $0x960] sm:$0xff]  ;;  %vm12120_vm1 = vmpackc.low %vm2367_vm0, %vm2367_vm0 }
  0xdc   : > { %9043 = vmatpush1.bf16.msra.mxu1 %v9042_v13  ;;  %826 = vmatprep.mubr.f32.mxu0 %v11463_v16  ;;  %v11497_v13 = vld [vmem:[%s11393_s5 + $0xa8] sm:$0xff]  ;;  %v9058_v19 = vpack.c.bf16 %v587_v9, %v578_v7  ;;  %v11527_v7 = vld [vmem:[%s11393_s5 + $0xf0] sm:$0xff]  ;;  %v9134_v9 = vpack.c.bf16 %v499_v58, %v490_v57  ;;  %v11547_v48 = vld [vmem:[%s11393_s5 + $0x120] sm:$0xff] }
  0xdd   : > { %1035 = vmatprep.mubr.f32.mxu1 %v14820_v0  ;;  %9045 = vmatprep.subr.bf16.mxu1 %v9044_v17  ;;  %v464_v17 = vld [vmem:[#allocation6 + $0x4f0] sm:$0xff]  ;;  %v553_v57 = vld [vmem:[#allocation6 + $0x7b8] sm:$0xff]  ;;  %v11552_v58 = vld [vmem:[%s11393_s5 + $0x140] sm:$0xff] }
  0xde   : > { %827 = vmatmul.mubr.f32.gmra.mrb[8].mxu0 %v11467_v23  ;;  %9109 = vmatprep.subr.bf16.mxu0 %v9108_v20  ;;  %v454_v20 = vld [vmem:[#allocation6 + $0x4a0] sm:$0xff] }
  0xdf   : > { %1036 = vmatmul.mubr.f32.gmra.mrb[24].mxu1 %v296_v28  ;;  %9111 = vmatpush1.bf16.msra.mxu0 %v9110_v24  ;;  %v9060_v24 = vpack.c.bf16 %v606_v12, %v597_v11  ;;  %v9124_v28 = vpack.c.bf16 %v464_v17, %v455_v15  ;;  %v660_v11 = vld [vmem:[#allocation6 + $0xb10] sm:$0xff] }
  0xe0   : > { %9047 = vmatpush1.bf16.msra.mxu1 %v9046_v30  ;;  %832 = vmatprep.mubr.f32.mxu0 %v11473_v33  ;;  %v473_v30 = vld [vmem:[#allocation6 + $0x538] sm:$0xff]  ;;  %v508_v12 = vld [vmem:[#allocation6 + $0x650] sm:$0xff] }
  0xe1   : > { %1041 = vmatprep.mubr.f32.mxu1 %v14820_v0  ;;  %9049 = vmatprep.subr.bf16.mxu1 %v9048_v35  ;;  %v9126_v35 = vpack.c.bf16 %v463_v21, %v454_v20  ;;  %v9128_v44 = vpack.c.bf16 %v482_v31, %v473_v30  ;;  %v11532_v15 = vld [vmem:[%s11393_s5 + $0x110] sm:$0xff]  ;;  %v669_v30 = vld [vmem:[#allocation6 + $0xb58] sm:$0xff]  ;;  %v678_v31 = vld [vmem:[#allocation6 + $0xba0] sm:$0xff] }
  0xe2   : > { %833 = vmatmul.mubr.f32.gmra.mrb[10].mxu0 %v11477_v42  ;;  %9113 = vmatprep.subr.bf16.mxu0 %v9112_v38  ;;  %v9062_v38 = vpack.c.bf16 %v605_v27, %v596_v26  ;;  %v536_v20 = vld [vmem:[#allocation6 + $0x730] sm:$0xff]  ;;  %v659_v26 = vld [vmem:[#allocation6 + $0xb08] sm:$0xff] }
  0xe3   : > { %1042 = vmatmul.mubr.f32.gmra.mrb[26].mxu1 %v299_v46  ;;  %9115 = vmatpush1.bf16.msra.mxu0 %v9114_v43  ;;  %v11512_v43 = vld [vmem:[%s11393_s5 + $0xe0] sm:$0xff]  ;;  %v9064_v46 = vpack.c.bf16 %v624_v37, %v615_v36  ;;  %v11537_v27 = vld [vmem:[%s11393_s5 + $0x108] sm:$0xff] }
  0xe4   : > { %9051 = vmatpush1.bf16.msra.mxu1 %v9050_v47  ;;  %838 = vmatprep.mubr.f32.mxu0 %v11483_v51  ;;  %v500_v47 = vld [vmem:[#allocation6 + $0x610] sm:$0xff]  ;;  %v535_v36 = vld [vmem:[#allocation6 + $0x728] sm:$0xff] }
  0xe5   : > { %1047 = vmatprep.mubr.f32.mxu1 %v14820_v0  ;;  %9053 = vmatprep.subr.bf16.mxu1 %v9052_v52  ;;  %v11517_v52 = vld [vmem:[%s11393_s5 + $0xd8] sm:$0xff]  ;;  %v9132_v61 = vpack.c.bf16 %v500_v47, %v491_v45  ;;  %v11542_v37 = vld [vmem:[%s11393_s5 + $0x128] sm:$0xff]  ;;  %v9076_v45 = vpack.c.bf16 %v678_v31, %v669_v30  ;;  %v11567_v31 = vld [vmem:[%s11393_s5 + $0x150] sm:$0xff] }
  0xe6   : > { %839 = vmatmul.mubr.f32.gmra.mrb[12].mxu0 %v11487_v59  ;;  %9117 = vmatprep.subr.bf16.mxu0 %v9116_v55  ;;  %v642_v55 = vld [vmem:[#allocation6 + $0xa80] sm:$0xff]  ;;  %v677_v47 = vld [vmem:[#allocation6 + $0xb98] sm:$0xff] }
  0xe7   : > { %1048 = vmatmul.mubr.f32.gmra.mrb[28].mxu1 %v302_v63  ;;  %9119 = vmatpush1.bf16.msra.mxu0 %v9118_v60  ;;  %v11522_v60 = vld [vmem:[%s11393_s5 + $0xf8] sm:$0xff]  ;;  %v9068_v3 = vpack.c.bf16 %v642_v55, %v633_v54  ;;  %v696_v54 = vld [vmem:[#allocation6 + $0xc30] sm:$0xff] }
  0xe8   : > { %9055 = vmatpush1.bf16.msra.mxu1 %v9054_v2  ;;  %844 = vmatprep.mubr.f32.mxu0 %v11493_v5  ;;  %v509_v63 = vld [vmem:[#allocation6 + $0x658] sm:$0xff]  ;;  %v518_v2 = vld [vmem:[#allocation6 + $0x6a0] sm:$0xff]  ;;  %v544_v55 = vld [vmem:[#allocation6 + $0x770] sm:$0xff] }
  0xe9   : > { %1053 = vmatprep.mubr.f32.mxu1 %v14820_v0  ;;  %9057 = vmatprep.subr.bf16.mxu1 %v9056_v6  ;;  %v641_v6 = vld [vmem:[#allocation6 + $0xa78] sm:$0xff]  ;;  %v9136_v17 = vpack.c.bf16 %v518_v2, %v509_v63  ;;  %v572_v2 = vld [vmem:[#allocation6 + $0x850] sm:$0xff] }
  0xea   : > { %845 = vmatmul.mubr.f32.gmra.mrb[14].mxu0 %v11497_v13  ;;  %9121 = vmatprep.subr.bf16.mxu0 %v9120_v10  ;;  %v651_v10 = vld [vmem:[#allocation6 + $0xac8] sm:$0xff]  ;;  %v713_v30 = vld [vmem:[#allocation6 + $0xcb8] sm:$0xff] }
  0xeb   : > { %1054 = vmatmul.mubr.f32.gmra.mrb[30].mxu1 %v305_v18  ;;  %9123 = vmatpush1.bf16.msra.mxu0 %v9122_v14  ;;  %v517_v14 = vld [vmem:[#allocation6 + $0x698] sm:$0xff]  ;;  %v527_v18 = vld [vmem:[#allocation6 + $0x6e8] sm:$0xff]  ;;  %v9072_v21 = vpack.c.bf16 %v660_v11, %v651_v10  ;;  %v9146_v10 = vpack.c.bf16 %v553_v57, %v544_v55  ;;  %v608_v55 = vld [vmem:[#allocation6 + $0x970] sm:$0xff] }
  0xec   : > { %9059 = vmatpush1.bf16.msra.mxu1 %v9058_v19  ;;  %850 = vmatprep.mubr.f32.mxu0 %v11503_v22  ;;  %v9070_v19 = vpack.c.bf16 %v641_v6, %v632_v4  ;;  %v686_v4 = vld [vmem:[#allocation6 + $0xbe0] sm:$0xff]  ;;  %v695_v6 = vld [vmem:[#allocation6 + $0xc28] sm:$0xff]  ;;  %v705_v11 = vld [vmem:[#allocation6 + $0xc78] sm:$0xff] }
  0xed   : > { %1124 = vmatprep.mubr.f32.mxu1 %v11416_v29  ;;  %9061 = vmatprep.subr.bf16.mxu1 %v9060_v24  ;;  %v650_v24 = vld [vmem:[#allocation6 + $0xac0] sm:$0xff]  ;;  %v11577_v57 = vld [vmem:[%s11393_s5 + $0x168] sm:$0xff] }
  0xee   : > { %851 = vmatmul.mubr.f32.gmra.mrb[16].mxu0 %v11507_v32  ;;  %9125 = vmatprep.subr.bf16.mxu0 %v9124_v28  ;;  %v9138_v28 = vpack.c.bf16 %v517_v14, %v508_v12  ;;  %v9074_v40 = vpack.c.bf16 %v659_v26, %v650_v24  ;;  %v714_v12 = vld [vmem:[#allocation6 + $0xcc0] sm:$0xff] }
  0xef   : > { %1125 = vmatmul.mubr.f32.vlgmr.msra.gmra.mrb[32].mxu1 %v11428_v25  ;;  %9127 = vmatpush1.bf16.msra.mxu0 %v9126_v35  ;;  %v526_v35 = vld [vmem:[#allocation6 + $0x6e0] sm:$0xff]  ;;  %v9084_v26 = vpack.c.bf16 %v714_v12, %v705_v11  ;;  %v617_v11 = vld [vmem:[#allocation6 + $0x9b8] sm:$0xff] }
  0xf0   : > { %9063 = vmatpush1.bf16.msra.mxu1 %v9062_v38  ;;  %856 = vmatprep.mubr.f32.mxu0 %v11512_v43  ;;  %v9140_v38 = vpack.c.bf16 %v536_v20, %v527_v18  ;;  %v9142_v50 = vpack.c.bf16 %v535_v36, %v526_v35  ;;  %v562_v14 = vld [vmem:[#allocation6 + $0x800] sm:$0xff]  ;;  %v11562_v18 = vld [vmem:[%s11393_s5 + $0x158] sm:$0xff]  ;;  %v723_v36 = vld [vmem:[#allocation6 + $0xd08] sm:$0xff] }
  0xf1   : > { %1130 = vmatprep.mubr.f32.mxu1 %v11433_v34  ;;  %9129 = vmatprep.subr.bf16.mxu0 %v9128_v44  ;;  %v554_v44 = vld [vmem:[#allocation6 + $0x7c0] sm:$0xff]  ;;  %v581_v20 = vld [vmem:[#allocation6 + $0x898] sm:$0xff] }
  0xf2   : > { %857 = vmatmul.mubr.f32.gmra.mrb[18].mxu0 %v11517_v52  ;;  %9065 = vmatprep.subr.bf16.mxu1 %v9064_v46  ;;  %v668_v46 = vld [vmem:[#allocation6 + $0xb50] sm:$0xff]  ;;  %v590_v24 = vld [vmem:[#allocation6 + $0x8e0] sm:$0xff] }
  0xf3   : > { %1131 = vmatmul.mubr.f32.gmra.mrb[34].mxu1 %v11437_v41  ;;  %9131 = vmatpush1.bf16.msra.mxu0 %v9130_v53  ;;  %v687_v53 = vld [vmem:[#allocation6 + $0xbe8] sm:$0xff]  ;;  %v9078_v63 = vpack.c.bf16 %v677_v47, %v668_v46  ;;  %v722_v47 = vld [vmem:[#allocation6 + $0xd00] sm:$0xff] }
  0xf4   : > { %862 = vmatprep.mubr.f32.mxu0 %v11522_v60  ;;  %1136 = vmatprep.mubr.f32.mxu1 %v11443_v49  ;;  %v626_v12 = vld [vmem:[#allocation6 + $0xa00] sm:$0xff] }
  0xf5   : > { %9133 = vmatprep.subr.bf16.mxu0 %v9132_v61  ;;  %9067 = vmatpush1.bf16.msra.mxu1 %v9066_v62  ;;  %v9144_v61 = vpack.c.bf16 %v554_v44, %v545_v39  ;;  %v563_v62 = vld [vmem:[#allocation6 + $0x808] sm:$0xff]  ;;  %v580_v39 = vld [vmem:[#allocation6 + $0x890] sm:$0xff] }
  0xf6   : > { %863 = vmatmul.mubr.f32.gmra.mrb[20].mxu0 %v11527_v7  ;;  %9069 = vmatprep.subr.bf16.mxu1 %v9068_v3  ;;  %v9080_v3 = vpack.c.bf16 %v696_v54, %v687_v53  ;;  %v11572_v44 = vld [vmem:[%s11393_s5 + $0x170] sm:$0xff]  ;;  %v731_v53 = vld [vmem:[#allocation6 + $0xd48] sm:$0xff] }
  0xf7   : > { %1137 = vmatmul.mubr.f32.gmra.mrb[36].mxu1 %v11447_v56  ;;  %9135 = vmatpush1.bf16.msra.mxu0 %v9134_v9  ;;  %v11557_v9 = vld [vmem:[%s11393_s5 + $0x138] sm:$0xff]  ;;  %v599_v54 = vld [vmem:[#allocation6 + $0x928] sm:$0xff] }
  0xf8   : > { %868 = vmatprep.mubr.f32.mxu0 %v11532_v15  ;;  %1142 = vmatprep.mubr.f32.mxu1 %v11453_v1 }
  0xf9   : > { %9137 = vmatprep.subr.bf16.mxu0 %v9136_v17  ;;  %9071 = vmatpush1.bf16.msra.mxu1 %v9070_v19  ;;  %v571_v17 = vld [vmem:[#allocation6 + $0x848] sm:$0xff]  ;;  %v9148_v19 = vpack.c.bf16 %v572_v2, %v563_v62  ;;  %v313_v62 = vld [vmem:[#allocation6 + $0x38] sm:$0xff]  ;;  %v9090_v2 = vpack.c.bf16 %v731_v53, %v722_v47  ;;  %v698_v53 = vld [vmem:[#allocation6 + $0xc40] sm:$0xff] }
  0xfa   : > { %869 = vmatmul.mubr.f32.gmra.mrb[22].mxu0 %v11537_v27  ;;  %9073 = vmatprep.subr.bf16.mxu1 %v9072_v21  ;;  %v9082_v21 = vpack.c.bf16 %v695_v6, %v686_v4  ;;  %v9150_v35 = vpack.c.bf16 %v571_v17, %v562_v14  ;;  %v598_v4 = vld [vmem:[#allocation6 + $0x920] sm:$0xff]  ;;  %v607_v6 = vld [vmem:[#allocation6 + $0x968] sm:$0xff]  ;;  %v9160_v17 = vpack.c.bf16 %v626_v12, %v617_v11 }
  0xfb   : > { %1143 = vmatmul.mubr.f32.gmra.mrb[38].mxu1 %v11457_v8  ;;  %9139 = vmatpush1.bf16.msra.mxu0 %v9138_v28  ;;  %v704_v28 = vld [vmem:[#allocation6 + $0xc70] sm:$0xff]  ;;  %v9158_v14 = vpack.c.bf16 %v607_v6, %v598_v4  ;;  %v679_v47 = vld [vmem:[#allocation6 + $0xba8] sm:$0xff]  ;;  %v734_v4 = vld [vmem:[#allocation6 + $0xd60] sm:$0xff] }
  0xfc   : > { %874 = vmatprep.mubr.f32.mxu0 %v11542_v37  ;;  %1148 = vmatprep.mubr.f32.mxu1 %v11463_v16  ;;  %v9086_v46 = vpack.c.bf16 %v713_v30, %v704_v28  ;;  %v634_v28 = vld [vmem:[#allocation6 + $0xa40] sm:$0xff]  ;;  %v643_v30 = vld [vmem:[#allocation6 + $0xa88] sm:$0xff]  ;;  %v724_v6 = vld [vmem:[#allocation6 + $0xd10] sm:$0xff] }
  0xfd   : > { %9141 = vmatprep.subr.bf16.mxu0 %v9140_v38  ;;  %9075 = vmatpush1.bf16.msra.mxu1 %v9074_v40  ;;  %v732_v38 = vld [vmem:[#allocation6 + $0xd50] sm:$0xff]  ;;  %v589_v40 = vld [vmem:[#allocation6 + $0x8d8] sm:$0xff]  ;;  %v458_v11 = vld [vmem:[#allocation6 + $0x4c0] sm:$0xff] }
  0xfe   : > { %875 = vmatmul.mubr.f32.gmra.mrb[24].mxu0 %v11547_v48  ;;  %9077 = vmatprep.subr.bf16.mxu1 %v9076_v45  ;;  %v9152_v45 = vpack.c.bf16 %v590_v24, %v581_v20  ;;  %v625_v20 = vld [vmem:[#allocation6 + $0x9f8] sm:$0xff]  ;;  %v644_v24 = vld [vmem:[#allocation6 + $0xa90] sm:$0xff]  ;;  %v467_v12 = vld [vmem:[#allocation6 + $0x508] sm:$0xff] }
  0xff   : > { %1149 = vmatmul.mubr.f32.gmra.mrb[40].mxu1 %v11467_v23  ;;  %9143 = vmatpush1.bf16.msra.mxu0 %v9142_v50  ;;  %v9088_v50 = vpack.c.bf16 %v732_v38, %v723_v36  ;;  %v662_v36 = vld [vmem:[#allocation6 + $0xb20] sm:$0xff]  ;;  %v652_v38 = vld [vmem:[#allocation6 + $0xad0] sm:$0xff] }
 0x100   : > { %880 = vmatprep.mubr.f32.mxu0 %v11552_v58  ;;  %1154 = vmatprep.mubr.f32.mxu1 %v11473_v33 }
 0x101   : > { %9145 = vmatprep.subr.bf16.mxu0 %v9144_v61  ;;  %9079 = vmatpush1.bf16.msra.mxu1 %v9078_v63  ;;  %v9154_v61 = vpack.c.bf16 %v589_v40, %v580_v39  ;;  %v322_v63 = vld [vmem:[#allocation6 + $0x80] sm:$0xff]  ;;  %v661_v39 = vld [vmem:[#allocation6 + $0xb18] sm:$0xff]  ;;  %v671_v40 = vld [vmem:[#allocation6 + $0xb68] sm:$0xff] }
 0x102   : > { %881 = vmatmul.mubr.f32.gmra.mrb[26].mxu0 %v11557_v9  ;;  %9081 = vmatprep.subr.bf16.mxu1 %v9080_v3  ;;  %v9156_v3 = vpack.c.bf16 %v608_v55, %v599_v54  ;;  %v688_v54 = vld [vmem:[#allocation6 + $0xbf0] sm:$0xff]  ;;  %v697_v55 = vld [vmem:[#allocation6 + $0xc38] sm:$0xff] }
 0x103   : > { %1155 = vmatmul.mubr.f32.gmra.mrb[42].mxu1 %v11477_v42  ;;  %9147 = vmatpush1.bf16.msra.mxu0 %v9146_v10  ;;  %v9188_v10 = vpack.c.bf16 %v322_v63, %v313_v62  ;;  %v716_v62 = vld [vmem:[#allocation6 + $0xcd0] sm:$0xff]  ;;  %v706_v63 = vld [vmem:[#allocation6 + $0xc80] sm:$0xff] }
 0x104   : > { %886 = vmatprep.mubr.f32.mxu0 %v11562_v18  ;;  %1160 = vmatprep.mubr.f32.mxu1 %v11483_v51 }
 0x105   : > { %9149 = vmatprep.subr.bf16.mxu0 %v9148_v19  ;;  %9083 = vmatpush1.bf16.msra.mxu1 %v9082_v21  ;;  %v616_v19 = vld [vmem:[#allocation6 + $0x9b0] sm:$0xff]  ;;  %v635_v21 = vld [vmem:[#allocation6 + $0xa48] sm:$0xff] }
 0x106   : > { %887 = vmatmul.mubr.f32.gmra.mrb[28].mxu0 %v11567_v31  ;;  %9085 = vmatprep.subr.bf16.mxu1 %v9084_v26  ;;  %v9162_v26 = vpack.c.bf16 %v625_v20, %v616_v19  ;;  %v331_v19 = vld [vmem:[#allocation6 + $0xc8] sm:$0xff]  ;;  %v340_v20 = vld [vmem:[#allocation6 + $0x110] sm:$0xff] }
 0x107   : > { %1161 = vmatmul.mubr.f32.gmra.mrb[44].mxu1 %v11487_v59  ;;  %9151 = vmatpush1.bf16.msra.mxu0 %v9150_v35  ;;  %v653_v35 = vld [vmem:[#allocation6 + $0xad8] sm:$0xff] }
 0x108   : > { %892 = vmatprep.mubr.f32.mxu0 %v11572_v44  ;;  %1166 = vmatprep.mubr.f32.mxu1 %v11493_v5 }
 0x109   : > { %9153 = vmatprep.subr.bf16.mxu0 %v9152_v45  ;;  %9087 = vmatpush1.bf16.msra.mxu1 %v9086_v46  ;;  %v680_v45 = vld [vmem:[#allocation6 + $0xbb0] sm:$0xff]  ;;  %v670_v46 = vld [vmem:[#allocation6 + $0xb60] sm:$0xff] }
 0x10a   : > { %893 = vmatmul.mubr.f32.gmra.mrb[30].mxu0 %v11577_v57  ;;  %9089 = vmatprep.subr.bf16.mxu1 %v9088_v50  ;;  %v689_v50 = vld [vmem:[#allocation6 + $0xbf8] sm:$0xff] }
 0x10b   : > { %1167 = vmatmul.mubr.f32.gmra.mrb[46].mxu1 %v11497_v13  ;;  %9155 = vmatpush1.bf16.msra.mxu0 %v9154_v61  ;;  %v707_v61 = vld [vmem:[#allocation6 + $0xc88] sm:$0xff] }
 0x10c   : > { %1172 = vmatprep.mubr.f32.mxu1 %v11503_v22  ;;  %1446 = vmatprep.mubr.f32.mxu0 %v11416_v29  ;;  %v9164_v29 = vpack.c.bf16 %v644_v24, %v635_v21  ;;  %v330_v21 = vld [vmem:[#allocation6 + $0xc0] sm:$0xff]  ;;  %v339_v24 = vld [vmem:[#allocation6 + $0x108] sm:$0xff] }
 0x10d   : > { %9091 = vmatpush1.bf16.msra.mxu1 %v9090_v2  ;;  %9157 = vmatprep.subr.bf16.mxu0 %v9156_v3  ;;  %v715_v2 = vld [vmem:[#allocation6 + $0xcc8] sm:$0xff]  ;;  %v725_v3 = vld [vmem:[#allocation6 + $0xd18] sm:$0xff] }
 0x10e   : > { %1447 = vmatmul.mubr.f32.vlgmr.msra.gmra.mrb[32].mxu0 %v11428_v25  ;;  %9189 = vmatprep.subr.bf16.mxu1 %v9188_v10  ;;  %v9166_v25 = vpack.c.bf16 %v643_v30, %v634_v28  ;;  %v733_v10 = vld [vmem:[#allocation6 + $0xd58] sm:$0xff]  ;;  %v348_v30 = vld [vmem:[#allocation6 + $0x150] sm:$0xff] }
 0x10f   : > { %1173 = vmatmul.mubr.f32.gmra.mrb[48].mxu1 %v11507_v32  ;;  %1452 = vmatprep.mubr.f32.mxu0 %v11433_v34  ;;  %v9168_v34 = vpack.c.bf16 %v662_v36, %v653_v35  ;;  %v357_v35 = vld [vmem:[#allocation6 + $0x198] sm:$0xff]  ;;  %v376_v36 = vld [vmem:[#allocation6 + $0x230] sm:$0xff] }
 0x110   : > { %1178 = vmatprep.mubr.f32.mxu1 %v11512_v43  ;;  %9159 = vmatpush1.bf16.msra.mxu0 %v9158_v14  ;;  %v321_v14 = vld [vmem:[#allocation6 + $0x78] sm:$0xff] }
 0x111   : > { %9161 = vmatprep.subr.bf16.mxu0 %v9160_v17  ;;  %v9284_v17 = vpack.c.bf16 %v467_v12, %v458_v11  ;;  %v465_v11 = vld [vmem:[#allocation6 + $0x4f8] sm:$0xff]  ;;  %v475_v12 = vld [vmem:[#allocation6 + $0x548] sm:$0xff] }
 0x112   : > { %1453 = vmatmul.mubr.f32.gmra.mrb[34].mxu0 %v11437_v41  ;;  %v9170_v41 = vpack.c.bf16 %v661_v39, %v652_v38  ;;  %v366_v38 = vld [vmem:[#allocation6 + $0x1e0] sm:$0xff]  ;;  %v375_v39 = vld [vmem:[#allocation6 + $0x228] sm:$0xff] }
 0x113   : > { %1179 = vmatmul.mubr.f32.gmra.mrb[50].mxu1 %v11517_v52  ;;  %1458 = vmatprep.mubr.f32.mxu0 %v11443_v49  ;;  %v9172_v49 = vpack.c.bf16 %v680_v45, %v671_v40  ;;  %v394_v40 = vld [vmem:[#allocation6 + $0x2c0] sm:$0xff] }
 0x114   : > { %1184 = vmatprep.mubr.f32.mxu1 %v11522_v60  ;;  %9163 = vmatpush1.bf16.msra.mxu0 %v9162_v26  ;;  %v349_v26 = vld [vmem:[#allocation6 + $0x158] sm:$0xff]  ;;  %v11633_v45 = vld [vmem:[%s11393_s5 + $0x40] sm:$0xff] }
 0x115   : > { %9165 = vmatprep.subr.bf16.mxu0 %v9164_v29  ;;  %v358_v29 = vld [vmem:[#allocation6 + $0x1a0] sm:$0xff] }
 0x116   : > { %1459 = vmatmul.mubr.f32.gmra.mrb[36].mxu0 %v11447_v56  ;;  %v9174_v56 = vpack.c.bf16 %v679_v47, %v670_v46  ;;  %v9196_v28 = vpack.c.bf16 %v358_v29, %v349_v26  ;;  %v393_v46 = vld [vmem:[#allocation6 + $0x2b8] sm:$0xff]  ;;  %v412_v47 = vld [vmem:[#allocation6 + $0x350] sm:$0xff] }
 0x117   : > { %1185 = vmatmul.mubr.f32.gmra.mrb[52].mxu1 %v11527_v7  ;;  %1464 = vmatprep.mubr.f32.mxu0 %v11453_v1  ;;  %v9176_v1 = vpack.c.bf16 %v698_v53, %v689_v50  ;;  %v11640_v50 = vld [vmem:[%s11393_s5 + $0x58] sm:$0xff]  ;;  %v332_v29 = vld [vmem:[#allocation6 + $0xd0] sm:$0xff] }
 0x118   : > { %1190 = vmatprep.mubr.f32.mxu1 %v11532_v15  ;;  %9167 = vmatpush1.bf16.msra.mxu0 %v9166_v25  ;;  %v11626_v25 = vld [vmem:[%s11393_s5 + $0x28] sm:$0xff] }
 0x119   : > { %9169 = vmatprep.subr.bf16.mxu0 %v9168_v34 }
 0x11a   : > { %1465 = vmatmul.mubr.f32.gmra.mrb[38].mxu0 %v11457_v8  ;;  %v9178_v8 = vpack.c.bf16 %v697_v55, %v688_v54  ;;  %v430_v54 = vld [vmem:[#allocation6 + $0x3e0] sm:$0xff]  ;;  %v11647_v55 = vld [vmem:[%s11393_s5 + $0x70] sm:$0xff] }
 0x11b   : > { %1191 = vmatmul.mubr.f32.gmra.mrb[54].mxu1 %v11537_v27  ;;  %1470 = vmatprep.mubr.f32.mxu0 %v11463_v16  ;;  %v9180_v16 = vpack.c.bf16 %v716_v62, %v707_v61  ;;  %v420_v62 = vld [vmem:[#allocation6 + $0x390] sm:$0xff] }
 0x11c   : > { %1196 = vmatprep.mubr.f32.mxu1 %v11542_v37  ;;  %9171 = vmatpush1.bf16.msra.mxu0 %v9170_v41 }
 0x11d   : > { %9173 = vmatprep.subr.bf16.mxu0 %v9172_v49  ;;  %v384_v49 = vld [vmem:[#allocation6 + $0x270] sm:$0xff] }
 0x11e   : > { %1471 = vmatmul.mubr.f32.gmra.mrb[40].mxu0 %v11467_v23  ;;  %v9182_v23 = vpack.c.bf16 %v715_v2, %v706_v63  ;;  %v11654_v63 = vld [vmem:[%s11393_s5 + $0x88] sm:$0xff] }
 0x11f   : > { %1197 = vmatmul.mubr.f32.gmra.mrb[56].mxu1 %v11547_v48  ;;  %1476 = vmatprep.mubr.f32.mxu0 %v11473_v33  ;;  %v9184_v33 = vpack.c.bf16 %v734_v4, %v725_v3  ;;  %v438_v3 = vld [vmem:[#allocation6 + $0x420] sm:$0xff]  ;;  %v447_v4 = vld [vmem:[#allocation6 + $0x468] sm:$0xff] }
 0x120   : > { %1202 = vmatprep.mubr.f32.mxu1 %v11552_v58  ;;  %9175 = vmatpush1.bf16.msra.mxu0 %v9174_v56  ;;  %v402_v56 = vld [vmem:[#allocation6 + $0x300] sm:$0xff] }
 0x121   : > { %9177 = vmatprep.subr.bf16.mxu0 %v9176_v1  ;;  %v411_v1 = vld [vmem:[#allocation6 + $0x348] sm:$0xff] }
 0x122   : > { %1477 = vmatmul.mubr.f32.gmra.mrb[42].mxu0 %v11477_v42  ;;  %v9186_v42 = vpack.c.bf16 %v733_v10, %v724_v6  ;;  %v456_v10 = vld [vmem:[#allocation6 + $0x4b0] sm:$0xff] }
 0x123   : > { %1203 = vmatmul.mubr.f32.gmra.mrb[58].mxu1 %v11557_v9  ;;  %1482 = vmatprep.mubr.f32.mxu0 %v11483_v51  ;;  %v312_v51 = vld [vmem:[#allocation6 + $0x30] sm:$0xff] }
 0x124   : > { %1208 = vmatprep.mubr.f32.mxu1 %v11562_v18  ;;  %9179 = vmatpush1.bf16.msra.mxu0 %v9178_v8  ;;  %v429_v8 = vld [vmem:[#allocation6 + $0x3d8] sm:$0xff] }
 0x125   : > { %9181 = vmatprep.subr.bf16.mxu0 %v9180_v16  ;;  %v448_v16 = vld [vmem:[#allocation6 + $0x470] sm:$0xff] }
 0x126   : > { %1483 = vmatmul.mubr.f32.gmra.mrb[44].mxu0 %v11487_v59  ;;  %v9190_v59 = vpack.c.bf16 %v321_v14, %v312_v51  ;;  %v323_v51 = vld [vmem:[#allocation6 + $0x88] sm:$0xff]  ;;  %v11668_v14 = vld [vmem:[%s11393_s5 + $0xb8] sm:$0xff] }
 0x127   : > { %1209 = vmatmul.mubr.f32.gmra.mrb[60].mxu1 %v11567_v31  ;;  %1488 = vmatprep.mubr.f32.mxu0 %v11493_v5  ;;  %v9192_v5 = vpack.c.bf16 %v340_v20, %v331_v19  ;;  %v9222_v19 = vpack.c.bf16 %v465_v11, %v456_v10  ;;  %v386_v10 = vld [vmem:[#allocation6 + $0x280] sm:$0xff]  ;;  %v395_v11 = vld [vmem:[#allocation6 + $0x2c8] sm:$0xff] }
 0x128   : > { %1214 = vmatprep.mubr.f32.mxu1 %v11572_v44  ;;  %9183 = vmatpush1.bf16.msra.mxu0 %v9182_v23  ;;  %v466_v23 = vld [vmem:[#allocation6 + $0x500] sm:$0xff] }
 0x129   : > { %9185 = vmatprep.subr.bf16.mxu0 %v9184_v33  ;;  %v11661_v33 = vld [vmem:[%s11393_s5 + $0xa0] sm:$0xff] }
 0x12a   : > { %1489 = vmatmul.mubr.f32.gmra.mrb[46].mxu0 %v11497_v13  ;;  %v11619_v13 = vld [vmem:[%s11393_s5 + $0x10] sm:$0xff] }
 0x12b   : > { %1215 = vmatmul.mubr.f32.gmra.mrb[62].mxu1 %v11577_v57  ;;  %1494 = vmatprep.mubr.f32.mxu0 %v11503_v22  ;;  %v9194_v22 = vpack.c.bf16 %v339_v24, %v330_v21  ;;  %v502_v24 = vld [vmem:[#allocation6 + $0x620] sm:$0xff] }
 0x12c   : > { %1285 = vmatprep.mubr.f32.mxu1 %v14820_v0  ;;  %9187 = vmatpush1.bf16.msra.mxu0 %v9186_v42  ;;  %v314_v42 = vld [vmem:[#allocation6 + $0x40] sm:$0xff] }
 0x12d   : > { %9285 = vmatprep.subr.bf16.mxu0 %v9284_v17  ;;  %v485_v17 = vld [vmem:[#allocation6 + $0x598] sm:$0xff]  ;;  %v9286_v21 = vpack.c.bf16 %v323_v51, %v314_v42 }
 0x12e   : > { %1495 = vmatmul.mubr.f32.gmra.mrb[48].mxu0 %v11507_v32  ;;  %v367_v32 = vld [vmem:[#allocation6 + $0x1e8] sm:$0xff]  ;;  %v557_v42 = vld [vmem:[#allocation6 + $0x7d8] sm:$0xff] }
 0x12f   : > { %1286 = vmatmul.mubr.f32.vlgmr.msra.gmra.mrb[32].mxu1 %v11619_v13  ;;  %1500 = vmatprep.mubr.f32.mxu0 %v11512_v43  ;;  %v9198_v43 = vpack.c.bf16 %v357_v35, %v348_v30  ;;  %v9200_v34 = vpack.c.bf16 %v376_v36, %v367_v32  ;;  %v494_v30 = vld [vmem:[#allocation6 + $0x5e0] sm:$0xff]  ;;  %v503_v35 = vld [vmem:[#allocation6 + $0x628] sm:$0xff] }
 0x130   : > { %9191 = vmatpush1.bf16.msra.mxu1 %v9190_v59  ;;  %1291 = vmatprep.mubr.f32.mxu1 %v14820_v0  ;;  %v474_v59 = vld [vmem:[#allocation6 + $0x540] sm:$0xff] }
 0x131   : > { %9193 = vmatprep.subr.bf16.mxu1 %v9192_v5  ;;  %v493_v5 = vld [vmem:[#allocation6 + $0x5d8] sm:$0xff] }
 0x132   : > { %1501 = vmatmul.mubr.f32.gmra.mrb[50].mxu0 %v11517_v52  ;;  %v385_v52 = vld [vmem:[#allocation6 + $0x278] sm:$0xff]  ;;  %v9228_v36 = vpack.c.bf16 %v502_v24, %v493_v5 }
 0x133   : > { %1292 = vmatmul.mubr.f32.gmra.mrb[34].mxu1 %v11626_v25  ;;  %1506 = vmatprep.mubr.f32.mxu0 %v11522_v60  ;;  %v9202_v60 = vpack.c.bf16 %v375_v39, %v366_v38  ;;  %v9204_v41 = vpack.c.bf16 %v394_v40, %v385_v52  ;;  %v511_v38 = vld [vmem:[#allocation6 + $0x668] sm:$0xff]  ;;  %v520_v52 = vld [vmem:[#allocation6 + $0x6b0] sm:$0xff]  ;;  %v9292_v40 = vpack.c.bf16 %v503_v35, %v494_v30  ;;  %v413_v24 = vld [vmem:[#allocation6 + $0x358] sm:$0xff] }
 0x134   : > { %9195 = vmatpush1.bf16.msra.mxu1 %v9194_v22  ;;  %1297 = vmatprep.mubr.f32.mxu1 %v14820_v0  ;;  %v341_v22 = vld [vmem:[#allocation6 + $0x118] sm:$0xff] }
 0x135   : > { %9197 = vmatprep.subr.bf16.mxu1 %v9196_v28  ;;  %v11675_v28 = vld [vmem:[%s11393_s5 + $0xd0] sm:$0xff]  ;;  %v9290_v39 = vpack.c.bf16 %v341_v22, %v332_v29  ;;  %v566_v29 = vld [vmem:[#allocation6 + $0x820] sm:$0xff]  ;;  %v575_v22 = vld [vmem:[#allocation6 + $0x868] sm:$0xff] }
 0x136   : > { %1507 = vmatmul.mubr.f32.gmra.mrb[52].mxu0 %v11527_v7  ;;  %v403_v7 = vld [vmem:[#allocation6 + $0x308] sm:$0xff] }
 0x137   : > { %1298 = vmatmul.mubr.f32.gmra.mrb[36].mxu1 %v11633_v45  ;;  %1512 = vmatprep.mubr.f32.mxu0 %v11532_v15  ;;  %v9206_v15 = vpack.c.bf16 %v393_v46, %v384_v49  ;;  %v9208_v53 = vpack.c.bf16 %v412_v47, %v403_v7  ;;  %v11682_v49 = vld [vmem:[%s11393_s5 + $0xe8] sm:$0xff]  ;;  %v512_v46 = vld [vmem:[#allocation6 + $0x670] sm:$0xff]  ;;  %v521_v7 = vld [vmem:[#allocation6 + $0x6b8] sm:$0xff] }
 0x138   : > { %9199 = vmatpush1.bf16.msra.mxu1 %v9198_v43  ;;  %1303 = vmatprep.mubr.f32.mxu1 %v14820_v0  ;;  %v492_v43 = vld [vmem:[#allocation6 + $0x5d0] sm:$0xff] }
 0x139   : > { %9201 = vmatprep.subr.bf16.mxu1 %v9200_v34  ;;  %v501_v34 = vld [vmem:[#allocation6 + $0x618] sm:$0xff] }
 0x13a   : > { %1513 = vmatmul.mubr.f32.gmra.mrb[54].mxu0 %v11537_v27  ;;  %v421_v27 = vld [vmem:[#allocation6 + $0x398] sm:$0xff]  ;;  %v9230_v47 = vpack.c.bf16 %v501_v34, %v492_v43  ;;  %v583_v43 = vld [vmem:[#allocation6 + $0x8a8] sm:$0xff] }
 0x13b   : > { %1304 = vmatmul.mubr.f32.gmra.mrb[38].mxu1 %v11640_v50  ;;  %1518 = vmatprep.mubr.f32.mxu0 %v11542_v37  ;;  %v9210_v37 = vpack.c.bf16 %v411_v1, %v402_v56  ;;  %v9212_v61 = vpack.c.bf16 %v430_v54, %v421_v27  ;;  %v519_v56 = vld [vmem:[#allocation6 + $0x6a8] sm:$0xff]  ;;  %v529_v1 = vld [vmem:[#allocation6 + $0x6f8] sm:$0xff]  ;;  %v538_v54 = vld [vmem:[#allocation6 + $0x740] sm:$0xff] }
 0x13c   : > { %9203 = vmatpush1.bf16.msra.mxu1 %v9202_v60  ;;  %1309 = vmatprep.mubr.f32.mxu1 %v14820_v0  ;;  %v350_v60 = vld [vmem:[#allocation6 + $0x160] sm:$0xff] }
 0x13d   : > { %9205 = vmatprep.subr.bf16.mxu1 %v9204_v41  ;;  %v359_v41 = vld [vmem:[#allocation6 + $0x1a8] sm:$0xff] }
 0x13e   : > { %1519 = vmatmul.mubr.f32.gmra.mrb[56].mxu0 %v11547_v48  ;;  %v439_v48 = vld [vmem:[#allocation6 + $0x428] sm:$0xff]  ;;  %v9294_v27 = vpack.c.bf16 %v359_v41, %v350_v60  ;;  %v584_v41 = vld [vmem:[#allocation6 + $0x8b0] sm:$0xff] }
 0x13f   : > { %1310 = vmatmul.mubr.f32.gmra.mrb[40].mxu1 %v11647_v55  ;;  %1524 = vmatprep.mubr.f32.mxu0 %v11552_v58  ;;  %v9214_v58 = vpack.c.bf16 %v429_v8, %v420_v62  ;;  %v9216_v2 = vpack.c.bf16 %v448_v16, %v439_v48  ;;  %v377_v62 = vld [vmem:[#allocation6 + $0x238] sm:$0xff]  ;;  %v11689_v8 = vld [vmem:[%s11393_s5 + $0x100] sm:$0xff]  ;;  %v539_v16 = vld [vmem:[#allocation6 + $0x748] sm:$0xff] }
 0x140   : > { %9207 = vmatpush1.bf16.msra.mxu1 %v9206_v15  ;;  %1315 = vmatprep.mubr.f32.mxu1 %v14820_v0  ;;  %v9232_v15 = vpack.c.bf16 %v520_v52, %v511_v38  ;;  %v530_v48 = vld [vmem:[#allocation6 + $0x700] sm:$0xff]  ;;  %v592_v38 = vld [vmem:[#allocation6 + $0x8f0] sm:$0xff]  ;;  %v11710_v60 = vld [vmem:[%s11393_s5 + $0x148] sm:$0xff] }
 0x141   : > { %9209 = vmatprep.subr.bf16.mxu1 %v9208_v53  ;;  %v510_v53 = vld [vmem:[#allocation6 + $0x660] sm:$0xff] }
 0x142   : > { %1525 = vmatmul.mubr.f32.gmra.mrb[58].mxu0 %v11557_v9  ;;  %v457_v9 = vld [vmem:[#allocation6 + $0x4b8] sm:$0xff]  ;;  %v422_v52 = vld [vmem:[#allocation6 + $0x3a0] sm:$0xff] }
 0x143   : > { %1316 = vmatmul.mubr.f32.gmra.mrb[42].mxu1 %v11654_v63  ;;  %1530 = vmatprep.mubr.f32.mxu0 %v11562_v18  ;;  %v9218_v18 = vpack.c.bf16 %v447_v4, %v438_v3  ;;  %v9220_v6 = vpack.c.bf16 %v466_v23, %v457_v9  ;;  %v528_v3 = vld [vmem:[#allocation6 + $0x6f0] sm:$0xff]  ;;  %v537_v4 = vld [vmem:[#allocation6 + $0x738] sm:$0xff]  ;;  %v547_v9 = vld [vmem:[#allocation6 + $0x788] sm:$0xff] }
 0x144   : > { %9211 = vmatpush1.bf16.msra.mxu1 %v9210_v37  ;;  %1321 = vmatprep.mubr.f32.mxu1 %v14820_v0  ;;  %v9296_v37 = vpack.c.bf16 %v521_v7, %v512_v46  ;;  %v9238_v51 = vpack.c.bf16 %v537_v4, %v528_v3  ;;  %v593_v46 = vld [vmem:[#allocation6 + $0x8f8] sm:$0xff]  ;;  %v619_v4 = vld [vmem:[#allocation6 + $0x9c8] sm:$0xff] }
 0x145   : > { %9213 = vmatprep.subr.bf16.mxu1 %v9212_v61  ;;  %v368_v61 = vld [vmem:[#allocation6 + $0x1f0] sm:$0xff]  ;;  %v609_v3 = vld [vmem:[#allocation6 + $0x978] sm:$0xff] }
 0x146   : > { %1531 = vmatmul.mubr.f32.gmra.mrb[60].mxu0 %v11567_v31  ;;  %v484_v31 = vld [vmem:[#allocation6 + $0x590] sm:$0xff]  ;;  %v9298_v23 = vpack.c.bf16 %v377_v62, %v368_v61  ;;  %v610_v61 = vld [vmem:[#allocation6 + $0x980] sm:$0xff] }
 0x147   : > { %1322 = vmatmul.mubr.f32.gmra.mrb[44].mxu1 %v11661_v33  ;;  %1536 = vmatprep.mubr.f32.mxu0 %v11572_v44  ;;  %v476_v44 = vld [vmem:[#allocation6 + $0x550] sm:$0xff]  ;;  %v9224_v20 = vpack.c.bf16 %v484_v31, %v475_v12  ;;  %v11696_v12 = vld [vmem:[%s11393_s5 + $0x118] sm:$0xff]  ;;  %v11717_v62 = vld [vmem:[%s11393_s5 + $0x160] sm:$0xff] }
 0x148   : > { %9215 = vmatpush1.bf16.msra.mxu1 %v9214_v58  ;;  %1327 = vmatprep.mubr.f32.mxu1 %v14820_v0  ;;  %v9288_v26 = vpack.c.bf16 %v485_v17, %v476_v44  ;;  %v9234_v58 = vpack.c.bf16 %v519_v56, %v510_v53  ;;  %v548_v31 = vld [vmem:[#allocation6 + $0x790] sm:$0xff]  ;;  %v546_v17 = vld [vmem:[#allocation6 + $0x780] sm:$0xff]  ;;  %v591_v53 = vld [vmem:[#allocation6 + $0x8e8] sm:$0xff] }
 0x149   : > { %9217 = vmatprep.subr.bf16.mxu1 %v9216_v2  ;;  %v9236_v2 = vpack.c.bf16 %v538_v54, %v529_v1  ;;  %v9304_v5 = vpack.c.bf16 %v557_v42, %v548_v31  ;;  %v440_v1 = vld [vmem:[#allocation6 + $0x430] sm:$0xff]  ;;  %v449_v54 = vld [vmem:[#allocation6 + $0x478] sm:$0xff]  ;;  %v627_v31 = vld [vmem:[#allocation6 + $0xa08] sm:$0xff] }
 0x14a   : > { %1537 = vmatmul.mubr.f32.gmra.mrb[62].mxu0 %v11577_v57  ;;  %v483_v57 = vld [vmem:[#allocation6 + $0x588] sm:$0xff]  ;;  %v637_v42 = vld [vmem:[#allocation6 + $0xa58] sm:$0xff] }
 0x14b   : > { %1328 = vmatmul.mubr.f32.gmra.mrb[46].mxu1 %v11668_v14  ;;  %1607 = vmatprep.mubr.f32.mxu0 %v14820_v0  ;;  %v9226_v32 = vpack.c.bf16 %v483_v57, %v474_v59  ;;  %v9302_v59 = vpack.c.bf16 %v395_v11, %v386_v10  ;;  %v574_v57 = vld [vmem:[#allocation6 + $0x860] sm:$0xff] }
 0x14c   : > { %9219 = vmatpush1.bf16.msra.mxu1 %v9218_v18  ;;  %1333 = vmatprep.mubr.f32.mxu1 %v14820_v0  ;;  %v556_v18 = vld [vmem:[#allocation6 + $0x7d0] sm:$0xff]  ;;  %v618_v11 = vld [vmem:[#allocation6 + $0x9c0] sm:$0xff] }
 0x14d   : > { %9221 = vmatprep.subr.bf16.mxu1 %v9220_v6  ;;  %v9300_v6 = vpack.c.bf16 %v539_v16, %v530_v48  ;;  %v9240_v44 = vpack.c.bf16 %v556_v18, %v547_v9  ;;  %v9314_v16 = vpack.c.bf16 %v449_v54, %v440_v1  ;;  %v628_v9 = vld [vmem:[#allocation6 + $0xa10] sm:$0xff]  ;;  %v11729_v18 = vld [vmem:[%s11393_s5 + $0x8] sm:$0xff]  ;;  %v690_v1 = vld [vmem:[#allocation6 + $0xc00] sm:$0xff] }
 0x14e   : > { %1608 = vmatmul.mubr.f32.vlgmr.msra.gmra.mrb[32].mxu0 %v11619_v13  ;;  %v9256_v10 = vpack.c.bf16 %v628_v9, %v619_v4  ;;  %v709_v54 = vld [vmem:[#allocation6 + $0xc98] sm:$0xff]  ;;  %v727_v9 = vld [vmem:[#allocation6 + $0xd28] sm:$0xff] }
 0x14f   : > { %1334 = vmatmul.mubr.f32.gmra.mrb[48].mxu1 %v11675_v28  ;;  %1613 = vmatprep.mubr.f32.mxu0 %v14820_v0 }
 0x150   : > { %9223 = vmatpush1.bf16.msra.mxu1 %v9222_v19  ;;  %1339 = vmatprep.mubr.f32.mxu1 %v14820_v0  ;;  %v555_v19 = vld [vmem:[#allocation6 + $0x7c8] sm:$0xff] }
 0x151   : > { %9225 = vmatprep.subr.bf16.mxu1 %v9224_v20  ;;  %9287 = vmatpush3.bf16.msra.mxu0 %v9286_v21  ;;  %v565_v20 = vld [vmem:[#allocation6 + $0x818] sm:$0xff]  ;;  %v404_v21 = vld [vmem:[#allocation6 + $0x310] sm:$0xff]  ;;  %v9242_v30 = vpack.c.bf16 %v555_v19, %v546_v17  ;;  %v11739_v17 = vld [vmem:[%s11393_s5 + $0x20] sm:$0xff]  ;;  %v9258_v19 = vpack.c.bf16 %v627_v31, %v618_v11 }
 0x152   : > { %1614 = vmatmul.mubr.f32.gmra.mrb[34].mxu0 %v11626_v25  ;;  %9289 = vmatprep.subr.bf16.mxu0 %v9288_v26  ;;  %v11703_v26 = vld [vmem:[%s11393_s5 + $0x130] sm:$0xff]  ;;  %v9244_v35 = vpack.c.bf16 %v574_v57, %v565_v20  ;;  %v9306_v34 = vpack.c.bf16 %v413_v24, %v404_v21  ;;  %v645_v57 = vld [vmem:[#allocation6 + $0xa98] sm:$0xff] }
 0x153   : > { %1340 = vmatmul.mubr.f32.gmra.mrb[50].mxu1 %v11682_v49  ;;  %1619 = vmatprep.mubr.f32.mxu0 %v14820_v0  ;;  %v664_v21 = vld [vmem:[#allocation6 + $0xb30] sm:$0xff]  ;;  %v11744_v24 = vld [vmem:[%s11393_s5 + $0x18] sm:$0xff] }
 0x154   : > { %9227 = vmatpush1.bf16.msra.mxu1 %v9226_v32  ;;  %1345 = vmatprep.mubr.f32.mxu1 %v14820_v0  ;;  %v564_v32 = vld [vmem:[#allocation6 + $0x810] sm:$0xff]  ;;  %v11788_v11 = vld [vmem:[%s11393_s5 + $0x78] sm:$0xff] }
 0x155   : > { %9229 = vmatprep.subr.bf16.mxu1 %v9228_v36  ;;  %9291 = vmatpush3.bf16.msra.mxu0 %v9290_v39  ;;  %v573_v36 = vld [vmem:[#allocation6 + $0x858] sm:$0xff]  ;;  %v9308_v39 = vpack.c.bf16 %v575_v22, %v566_v29 }
 0x156   : > { %1620 = vmatmul.mubr.f32.gmra.mrb[36].mxu0 %v11633_v45  ;;  %9293 = vmatprep.subr.bf16.mxu0 %v9292_v40  ;;  %v431_v40 = vld [vmem:[#allocation6 + $0x3e8] sm:$0xff]  ;;  %v9246_v7 = vpack.c.bf16 %v573_v36, %v564_v32  ;;  %v11749_v29 = vld [vmem:[%s11393_s5 + $0x38] sm:$0xff] }
 0x157   : > { %1346 = vmatmul.mubr.f32.gmra.mrb[52].mxu1 %v11689_v8  ;;  %1625 = vmatprep.mubr.f32.mxu0 %v14820_v0  ;;  %v9310_v56 = vpack.c.bf16 %v431_v40, %v422_v52  ;;  %v663_v32 = vld [vmem:[#allocation6 + $0xb28] sm:$0xff]  ;;  %v673_v36 = vld [vmem:[#allocation6 + $0xb78] sm:$0xff]  ;;  %v672_v40 = vld [vmem:[#allocation6 + $0xb70] sm:$0xff] }
 0x158   : > { %9231 = vmatpush1.bf16.msra.mxu1 %v9230_v47  ;;  %1351 = vmatprep.mubr.f32.mxu1 %v14820_v0  ;;  %v9248_v47 = vpack.c.bf16 %v592_v38, %v583_v43  ;;  %v682_v43 = vld [vmem:[#allocation6 + $0xbc0] sm:$0xff]  ;;  %v11759_v38 = vld [vmem:[%s11393_s5 + $0x50] sm:$0xff]  ;;  %v11793_v31 = vld [vmem:[%s11393_s5 + $0x98] sm:$0xff] }
 0x159   : > { %9233 = vmatprep.subr.bf16.mxu1 %v9232_v15  ;;  %9295 = vmatpush3.bf16.msra.mxu0 %v9294_v27  ;;  %v582_v15 = vld [vmem:[#allocation6 + $0x8a0] sm:$0xff]  ;;  %v9312_v27 = vpack.c.bf16 %v593_v46, %v584_v41  ;;  %v9268_v52 = vpack.c.bf16 %v682_v43, %v673_v36  ;;  %v681_v41 = vld [vmem:[#allocation6 + $0xbb8] sm:$0xff]  ;;  %v691_v46 = vld [vmem:[#allocation6 + $0xc08] sm:$0xff] }
 0x15a   : > { %1626 = vmatmul.mubr.f32.gmra.mrb[38].mxu0 %v11640_v50  ;;  %9297 = vmatprep.subr.bf16.mxu0 %v9296_v37  ;;  %v601_v37 = vld [vmem:[#allocation6 + $0x938] sm:$0xff]  ;;  %v9250_v48 = vpack.c.bf16 %v591_v53, %v582_v15  ;;  %v11769_v15 = vld [vmem:[%s11393_s5 + $0x68] sm:$0xff]  ;;  %v9270_v53 = vpack.c.bf16 %v681_v41, %v672_v40 }
 0x15b   : > { %1352 = vmatmul.mubr.f32.gmra.mrb[54].mxu1 %v11696_v12  ;;  %1631 = vmatprep.mubr.f32.mxu0 %v14820_v0 }
 0x15c   : > { %9235 = vmatpush1.bf16.msra.mxu1 %v9234_v58  ;;  %1357 = vmatprep.mubr.f32.mxu1 %v14820_v0  ;;  %v9252_v58 = vpack.c.bf16 %v610_v61, %v601_v37  ;;  %v718_v37 = vld [vmem:[#allocation6 + $0xce0] sm:$0xff] }
 0x15d   : > { %9237 = vmatprep.subr.bf16.mxu1 %v9236_v2  ;;  %9299 = vmatpush3.bf16.msra.mxu0 %v9298_v23  ;;  %v600_v2 = vld [vmem:[#allocation6 + $0x930] sm:$0xff]  ;;  %v11724_v23 = vld [vmem:[%s11393_s5 + $0x178] sm:$0xff]  ;;  %v11774_v61 = vld [vmem:[%s11393_s5 + $0x60] sm:$0xff] }
 0x15e   : > { %1632 = vmatmul.mubr.f32.gmra.mrb[40].mxu0 %v11647_v55  ;;  %9301 = vmatprep.subr.bf16.mxu0 %v9300_v6  ;;  %v9254_v6 = vpack.c.bf16 %v609_v3, %v600_v2  ;;  %v708_v2 = vld [vmem:[#allocation6 + $0xc90] sm:$0xff]  ;;  %v717_v3 = vld [vmem:[#allocation6 + $0xcd8] sm:$0xff] }
 0x15f   : > { %1358 = vmatmul.mubr.f32.gmra.mrb[56].mxu1 %v11703_v26  ;;  %1637 = vmatprep.mubr.f32.mxu0 %v14820_v0 }
 0x160   : > { %9239 = vmatpush1.bf16.msra.mxu1 %v9238_v51  ;;  %1363 = vmatprep.mubr.f32.mxu1 %v14820_v0  ;;  %v646_v51 = vld [vmem:[#allocation6 + $0xaa0] sm:$0xff] }
 0x161   : > { %9241 = vmatprep.subr.bf16.mxu1 %v9240_v44  ;;  %9303 = vmatpush3.bf16.msra.mxu0 %v9302_v59  ;;  %v11734_v44 = vld [vmem:[%s11393_s5] sm:$0xff]  ;;  %v9260_v20 = vpack.c.bf16 %v646_v51, %v637_v42  ;;  %v636_v59 = vld [vmem:[#allocation6 + $0xa50] sm:$0xff]  ;;  %v9278_v42 = vpack.c.bf16 %v717_v3, %v708_v2 }
 0x162   : > { %1638 = vmatmul.mubr.f32.gmra.mrb[42].mxu0 %v11654_v63  ;;  %9305 = vmatprep.subr.bf16.mxu0 %v9304_v5  ;;  %v655_v5 = vld [vmem:[#allocation6 + $0xae8] sm:$0xff]  ;;  %v9262_v22 = vpack.c.bf16 %v645_v57, %v636_v59  ;;  %v602_v57 = vld [vmem:[#allocation6 + $0x940] sm:$0xff] }
 0x163   : > { %1364 = vmatmul.mubr.f32.gmra.mrb[58].mxu1 %v11710_v60  ;;  %1643 = vmatprep.mubr.f32.mxu0 %v14820_v0 }
 0x164   : > { %9243 = vmatpush1.bf16.msra.mxu1 %v9242_v30  ;;  %1369 = vmatprep.mubr.f32.mxu1 %v14820_v0  ;;  %v9264_v30 = vpack.c.bf16 %v664_v21, %v655_v5  ;;  %v611_v5 = vld [vmem:[#allocation6 + $0x988] sm:$0xff] }
 0x165   : > { %9245 = vmatprep.subr.bf16.mxu1 %v9244_v35  ;;  %9307 = vmatpush3.bf16.msra.mxu0 %v9306_v34  ;;  %v654_v35 = vld [vmem:[#allocation6 + $0xae0] sm:$0xff]  ;;  %v11754_v34 = vld [vmem:[%s11393_s5 + $0x30] sm:$0xff] }
 0x166   : > { %1644 = vmatmul.mubr.f32.gmra.mrb[44].mxu0 %v11661_v33  ;;  %9309 = vmatprep.subr.bf16.mxu0 %v9308_v39  ;;  %v9266_v39 = vpack.c.bf16 %v663_v32, %v654_v35  ;;  %v11810_v32 = vpack.c.bf16 %v611_v5, %v602_v57  ;;  %v11934_v57 = vld [vmem:[%s11393_s5 + $0x170] sm:$0xff] }
 0x167   : > { %1370 = vmatmul.mubr.f32.gmra.mrb[60].mxu1 %v11717_v62  ;;  %1649 = vmatprep.mubr.f32.mxu0 %v14820_v0 }
 0x168   : > { %9247 = vmatpush1.bf16.msra.mxu1 %v9246_v7  ;;  %1375 = vmatprep.mubr.f32.mxu1 %v14820_v0  ;;  %v700_v7 = vld [vmem:[#allocation6 + $0xc50] sm:$0xff] }
 0x169   : > { %9249 = vmatprep.subr.bf16.mxu1 %v9248_v47  ;;  %9311 = vmatpush3.bf16.msra.mxu0 %v9310_v56  ;;  %v11764_v47 = vld [vmem:[%s11393_s5 + $0x48] sm:$0xff]  ;;  %v9272_v56 = vpack.c.bf16 %v700_v7, %v691_v46  ;;  %v11833_v46 = vld [vmem:[%s11393_s5 + $0xc0] sm:$0xff] }
 0x16a   : > { %1650 = vmatmul.mubr.f32.gmra.mrb[46].mxu0 %v11668_v14  ;;  %9313 = vmatprep.subr.bf16.mxu0 %v9312_v27  ;;  %v699_v27 = vld [vmem:[#allocation6 + $0xc48] sm:$0xff] }
 0x16b   : > { %1376 = vmatmul.mubr.f32.gmra.mrb[62].mxu1 %v11724_v23  ;;  %1655 = vmatprep.mubr.f32.mxu0 %v14820_v0 }
 0x16c   : > { %9251 = vmatpush1.bf16.msra.mxu1 %v9250_v48  ;;  %1768 = vmatprep.mubr.f32.mxu1 %v11729_v18  ;;  %v11779_v48 = vld [vmem:[%s11393_s5 + $0x80] sm:$0xff] }
 0x16d   : > { %9315 = vmatpush3.bf16.msra.mxu0 %v9314_v16  ;;  %9253 = vmatprep.subr.bf16.mxu1 %v9252_v58  ;;  %v9274_v16 = vpack.c.bf16 %v699_v27, %v690_v1  ;;  %v9276_v58 = vpack.c.bf16 %v718_v37, %v709_v54  ;;  %v11866_v27 = vld [vmem:[%s11393_s5 + $0x110] sm:$0xff]  ;;  %v11880_v37 = vld [vmem:[%s11393_s5 + $0x128] sm:$0xff] }
 0x16e   : > { %1656 = vmatmul.mubr.f32.gmra.mrb[48].mxu0 %v11675_v28 }
 0x16f   : > { %1769 = vmatmul.mubr.f32.vlgmr.msra.gmra.mrb[64].mxu1 %v11734_v44  ;;  %1661 = vmatprep.mubr.f32.mxu0 %v14820_v0 }
 0x170   : > { %1774 = vmatprep.mubr.f32.mxu1 %v11739_v17  ;;  %9255 = vmatpush1.bf16.msra.mxu1 %v9254_v6  ;;  %v736_v6 = vld [vmem:[#allocation6 + $0xd70] sm:$0xff] }
 0x171   : > { %9257 = vmatprep.subr.bf16.mxu1 %v9256_v10  ;;  %v9280_v51 = vpack.c.bf16 %v736_v6, %v727_v9 }
 0x172   : > { %1662 = vmatmul.mubr.f32.gmra.mrb[50].mxu0 %v11682_v49 }
 0x173   : > { %1775 = vmatmul.mubr.f32.gmra.mrb[66].mxu1 %v11744_v24  ;;  %1667 = vmatprep.mubr.f32.mxu0 %v14820_v0 }
 0x174   : > { %1780 = vmatprep.mubr.f32.mxu1 %v11749_v29  ;;  %9259 = vmatpush1.bf16.msra.mxu1 %v9258_v19  ;;  %v726_v19 = vld [vmem:[#allocation6 + $0xd20] sm:$0xff] }
 0x175   : > { %9261 = vmatprep.subr.bf16.mxu1 %v9260_v20  ;;  %v735_v20 = vld [vmem:[#allocation6 + $0xd68] sm:$0xff] }
 0x176   : > { %1668 = vmatmul.mubr.f32.gmra.mrb[52].mxu0 %v11689_v8  ;;  %v9282_v35 = vpack.c.bf16 %v735_v20, %v726_v19 }
 0x177   : > { %1781 = vmatmul.mubr.f32.gmra.mrb[68].mxu1 %v11754_v34  ;;  %1673 = vmatprep.mubr.f32.mxu0 %v14820_v0 }
 0x178   : > { %1786 = vmatprep.mubr.f32.mxu1 %v11759_v38  ;;  %9263 = vmatpush1.bf16.msra.mxu1 %v9262_v22  ;;  %v11802_v22 = vld [vmem:[%s11393_s5 + $0x90] sm:$0xff] }
 0x179   : > { %9265 = vmatprep.subr.bf16.mxu1 %v9264_v30  ;;  %v11807_v30 = vld [vmem:[%s11393_s5 + $0xb0] sm:$0xff] }
 0x17a   : > { %1674 = vmatmul.mubr.f32.gmra.mrb[54].mxu0 %v11696_v12 }
 0x17b   : > { %1787 = vmatmul.mubr.f32.gmra.mrb[70].mxu1 %v11764_v47  ;;  %1679 = vmatprep.mubr.f32.mxu0 %v14820_v0 }
 0x17c   : > { %1792 = vmatprep.mubr.f32.mxu1 %v11769_v15  ;;  %9267 = vmatpush1.bf16.msra.mxu1 %v9266_v39  ;;  %v11818_v39 = vld [vmem:[%s11393_s5 + $0xa8] sm:$0xff] }
 0x17d   : > { %9269 = vmatprep.subr.bf16.mxu1 %v9268_v52  ;;  %v11823_v52 = vld [vmem:[%s11393_s5 + $0xc8] sm:$0xff] }
 0x17e   : > { %1680 = vmatmul.mubr.f32.gmra.mrb[56].mxu0 %v11703_v26 }
 0x17f   : > { %1793 = vmatmul.mubr.f32.gmra.mrb[72].mxu1 %v11774_v61  ;;  %1685 = vmatprep.mubr.f32.mxu0 %v14820_v0 }
 0x180   : > { %1798 = vmatprep.mubr.f32.mxu1 %v11779_v48  ;;  %9271 = vmatpush1.bf16.msra.mxu1 %v9270_v53 }
 0x181   : > { %9273 = vmatprep.subr.bf16.mxu1 %v9272_v56  ;;  %v11852_v56 = vld [vmem:[%s11393_s5 + $0xf8] sm:$0xff] }
 0x182   : > { %v11782_v4 = vpop.f32.mrb[0].mxu1  ;;  %1686 = vmatmul.mubr.f32.gmra.mrb[58].mxu0 %v11710_v60 }
 0x183   : > { %v11785_v10 = vpop.f32.mrb[1].mxu1  ;;  %1799 = vmatmul.mubr.f32.gmra.mrb[74].mxu1 %v11788_v11  ;;  %1691 = vmatprep.mubr.f32.mxu0 %v14820_v0 }
 0x184   : > { %1804 = vmatprep.mubr.f32.mxu1 %v11793_v31  ;;  %9275 = vmatpush1.bf16.msra.mxu1 %v9274_v16 }
 0x185   : > { %9277 = vmatprep.subr.bf16.mxu1 %v9276_v58  ;;  %v11894_v58 = vld [vmem:[%s11393_s5 + $0x140] sm:$0xff] }
 0x186   : > { %v11796_v59 = vpop.f32.mrb[2].mxu1  ;;  %1692 = vmatmul.mubr.f32.gmra.mrb[60].mxu0 %v11717_v62 }
 0x187   : > { %v11799_v21 = vpop.f32.mrb[3].mxu1  ;;  %1805 = vmatmul.mubr.f32.gmra.mrb[76].mxu1 %v11802_v22  ;;  %1697 = vmatprep.mubr.f32.mxu0 %v14820_v0 }
 0x188   : > { %1810 = vmatprep.mubr.f32.mxu1 %v11807_v30  ;;  %9279 = vmatpush1.bf16.msra.mxu1 %v9278_v42 }
 0x189   : > { %9281 = vmatprep.subr.bf16.mxu1 %v9280_v51 }
 0x18a   : > { %v11812_v36 = vpop.f32.mrb[4].mxu1  ;;  %1698 = vmatmul.mubr.f32.gmra.mrb[62].mxu0 %v11724_v23 }
 0x18b   : > { %v11815_v43 = vpop.f32.mrb[5].mxu1  ;;  %1811 = vmatmul.mubr.f32.gmra.mrb[78].mxu1 %v11818_v39  ;;  %2090 = vmatprep.mubr.f32.mxu0 %v11729_v18  ;;  %v11838_v18 = vld [vmem:[%s11393_s5 + $0xe0] sm:$0xff] }
 0x18c   : > { %1816 = vmatprep.mubr.f32.mxu1 %v11823_v52  ;;  %9283 = vmatpush1.bf16.msra.mxu1 %v9282_v35  ;;  %v620_v35 = vld [vmem:[#allocation6 + $0x9d0] sm:$0xff] }
 0x18d   : > { %9317 = vmatprep.subr.bf16.mxu1 %v11810_v32 }
 0x18e   : > { %v11827_v40 = vpop.f32.mrb[6].mxu1  ;;  %2091 = vmatmul.mubr.f32.vlgmr.msra.gmra.mrb[64].mxu0 %v11734_v44  ;;  %v11847_v44 = vld [vmem:[%s11393_s5 + $0xd8] sm:$0xff] }
 0x18f   : > { %v11830_v41 = vpop.f32.mrb[7].mxu1  ;;  %1817 = vmatmul.mubr.f32.gmra.mrb[80].mxu1 %v11833_v46  ;;  %2095 = vmatprep.mubr.f32.mxu0 %v11739_v17 }
 0x190   : > { %1822 = vmatprep.mubr.f32.mxu1 %v11838_v18 }
 0x192   : > { %v11841_v7 = vpop.f32.mrb[8].mxu1  ;;  %2096 = vmatmul.mubr.f32.gmra.mrb[66].mxu0 %v11744_v24  ;;  %v11861_v24 = vld [vmem:[%s11393_s5 + $0xf0] sm:$0xff] }
 0x193   : > { %v11844_v53 = vpop.f32.mrb[9].mxu1  ;;  %1823 = vmatmul.mubr.f32.gmra.mrb[82].mxu1 %v11847_v44  ;;  %2100 = vmatprep.mubr.f32.mxu0 %v11749_v29 }
 0x194   : > { %1828 = vmatprep.mubr.f32.mxu1 %v11852_v56 }
 0x196   : > { %v11855_v17 = vpop.f32.mrb[10].mxu1  ;;  %2101 = vmatmul.mubr.f32.gmra.mrb[68].mxu0 %v11754_v34  ;;  %v11875_v34 = vld [vmem:[%s11393_s5 + $0x108] sm:$0xff] }
 0x197   : > { %v11858_v1 = vpop.f32.mrb[11].mxu1  ;;  %1829 = vmatmul.mubr.f32.gmra.mrb[84].mxu1 %v11861_v24  ;;  %2105 = vmatprep.mubr.f32.mxu0 %v11759_v38 }
 0x198   : > { %1834 = vmatprep.mubr.f32.mxu1 %v11866_v27 }
 0x19a   : > { %v11869_v29 = vpop.f32.mrb[12].mxu1  ;;  %2106 = vmatmul.mubr.f32.gmra.mrb[70].mxu0 %v11764_v47  ;;  %v11889_v47 = vld [vmem:[%s11393_s5 + $0x120] sm:$0xff] }
 0x19b   : > { %v11872_v54 = vpop.f32.mrb[13].mxu1  ;;  %1835 = vmatmul.mubr.f32.gmra.mrb[86].mxu1 %v11875_v34  ;;  %2110 = vmatprep.mubr.f32.mxu0 %v11769_v15 }
 0x19c   : > { %1840 = vmatprep.mubr.f32.mxu1 %v11880_v37 }
 0x19e   : > { %v11883_v38 = vpop.f32.mrb[14].mxu1  ;;  %2111 = vmatmul.mubr.f32.gmra.mrb[72].mxu0 %v11774_v61 }
 0x19f   : > { %v11886_v16 = vpop.f32.mrb[15].mxu1  ;;  %1841 = vmatmul.mubr.f32.gmra.mrb[88].mxu1 %v11889_v47  ;;  %2115 = vmatprep.mubr.f32.mxu0 %v11779_v48  ;;  %v11909_v48 = vld [vmem:[%s11393_s5 + $0x138] sm:$0xff] }
 0x1a0   : > { %1846 = vmatprep.mubr.f32.mxu1 %v11894_v58 }
 0x1a1   : > { %v804_v15 = vpop.f32.mrb[0].mxu0 }
 0x1a2   : > { %v11898_v2 = vadd.f32 %v11782_v4, %v804_v15  ;;  %v11900_v3 = vpop.f32.mrb[16].mxu1  ;;  %v806_v61 = vpop.f32.mrb[1].mxu0  ;;  %2116 = vmatmul.mubr.f32.gmra.mrb[74].mxu0 %v11788_v11  ;;  %v11914_v4 = vld [vmem:[%s11393_s5 + $0x158] sm:$0xff] }
 0x1a3   : > { %v11904_v9 = vadd.f32 %v11785_v10, %v806_v61  ;;  %v11906_v6 = vpop.f32.mrb[17].mxu1  ;;  %1847 = vmatmul.mubr.f32.gmra.mrb[90].mxu1 %v11909_v48  ;;  %2120 = vmatprep.mubr.f32.mxu0 %v11793_v31  ;;  %v11929_v31 = vld [vmem:[%s11393_s5 + $0x150] sm:$0xff]  ;;  %v629_v15 = vld [vmem:[#allocation6 + $0xa18] sm:$0xff] }
 0x1a4   : > { %1852 = vmatprep.mubr.f32.mxu1 %v11914_v4 }
 0x1a5   : > { %15021 = vst [vmem:[#allocation16_spill] sm:$0xff] %v11904_v9  ;;  %v810_v42 = vpop.f32.mrb[2].mxu0 }
 0x1a6   : > { %v11918_v51 = vadd.f32 %v11796_v59, %v810_v42  ;;  %v11920_v11 = vpop.f32.mrb[18].mxu1  ;;  %v812_v10 = vpop.f32.mrb[3].mxu0  ;;  %2121 = vmatmul.mubr.f32.gmra.mrb[76].mxu0 %v11802_v22 }
 0x1a7   : > { %v11924_v19 = vadd.f32 %v11799_v21, %v812_v10  ;;  %v11926_v20 = vpop.f32.mrb[19].mxu1  ;;  %1853 = vmatmul.mubr.f32.gmra.mrb[92].mxu1 %v11929_v31  ;;  %2125 = vmatprep.mubr.f32.mxu0 %v11807_v30  ;;  %v11949_v30 = vld [vmem:[%s11393_s5 + $0x168] sm:$0xff]  ;;  %v9320_v10 = vpack.c.bf16 %v629_v15, %v620_v35  ;;  %v665_v15 = vld [vmem:[#allocation6 + $0xb38] sm:$0xff] }
 0x1a8   : > { %1858 = vmatprep.mubr.f32.mxu1 %v11934_v57 }
 0x1a9   : > { %15022 = vst [vmem:[#allocation17_spill] sm:$0xff] %v11924_v19  ;;  %v816_v59 = vpop.f32.mrb[4].mxu0 }
 0x1aa   : > { %v11938_v5 = vadd.f32 %v11812_v36, %v816_v59  ;;  %v11940_v22 = vpop.f32.mrb[20].mxu1  ;;  %v818_v21 = vpop.f32.mrb[5].mxu0  ;;  %2126 = vmatmul.mubr.f32.gmra.mrb[78].mxu0 %v11818_v39 }
 0x1ab   : > { %v11944_v61 = vadd.f32 %v11815_v43, %v818_v21  ;;  %v11946_v42 = vpop.f32.mrb[21].mxu1  ;;  %1859 = vmatmul.mubr.f32.gmra.mrb[94].mxu1 %v11949_v30  ;;  %2130 = vmatprep.mubr.f32.mxu0 %v11823_v52  ;;  %v638_v43 = vld [vmem:[#allocation6 + $0xa60] sm:$0xff]  ;;  %v647_v21 = vld [vmem:[#allocation6 + $0xaa8] sm:$0xff] }
 0x1ac   : > { %1929 = vmatprep.mubr.f32.mxu1 %v14820_v0 }
 0x1ad   : > { %15023 = vst [vmem:[#allocation18_spill] sm:$0xff] %v11944_v61  ;;  %v822_v36 = vpop.f32.mrb[6].mxu0 }
 0x1ae   : > { %v11955_v59 = vadd.f32 %v11827_v40, %v822_v36  ;;  %v11957_v39 = vpop.f32.mrb[22].mxu1  ;;  %v824_v19 = vpop.f32.mrb[7].mxu0  ;;  %2131 = vmatmul.mubr.f32.gmra.mrb[80].mxu0 %v11833_v46  ;;  %v9324_v40 = vpack.c.bf16 %v647_v21, %v638_v43  ;;  %v683_v21 = vld [vmem:[#allocation6 + $0xbc8] sm:$0xff] }
 0x1af   : > { %v11961_v61 = vadd.f32 %v11830_v41, %v824_v19  ;;  %v11963_v9 = vpop.f32.mrb[23].mxu1  ;;  %1930 = vmatmul.mubr.f32.vlgmr.msra.gmra.mrb[64].mxu1 %v11619_v13  ;;  %2135 = vmatprep.mubr.f32.mxu0 %v11838_v18  ;;  %v656_v19 = vld [vmem:[#allocation6 + $0xaf0] sm:$0xff] }
 0x1b0   : > { %1935 = vmatprep.mubr.f32.mxu1 %v14820_v0  ;;  %9319 = vmatpush3.bf16.msra.mxu1 %v11810_v32 }
 0x1b1   : > { %15024 = vst [vmem:[#allocation19_spill] sm:$0xff] %v11961_v61  ;;  %v828_v52 = vpop.f32.mrb[8].mxu0  ;;  %9321 = vmatprep.subr.bf16.mxu1 %v9320_v10 }
 0x1b2   : > { %v11970_v46 = vadd.f32 %v11841_v7, %v828_v52  ;;  %v11972_v35 = vpop.f32.mrb[24].mxu1  ;;  %v830_v41 = vpop.f32.mrb[9].mxu0  ;;  %2136 = vmatmul.mubr.f32.gmra.mrb[82].mxu0 %v11847_v44  ;;  %v9328_v7 = vpack.c.bf16 %v665_v15, %v656_v19  ;;  %v701_v19 = vld [vmem:[#allocation6 + $0xc58] sm:$0xff] }
 0x1b3   : > { %v11976_v13 = vadd.f32 %v11844_v53, %v830_v41  ;;  %v11978_v18 = vpop.f32.mrb[25].mxu1  ;;  %1936 = vmatmul.mubr.f32.gmra.mrb[66].mxu1 %v11626_v25  ;;  %2140 = vmatprep.mubr.f32.mxu0 %v11852_v56  ;;  %v674_v53 = vld [vmem:[#allocation6 + $0xb80] sm:$0xff] }
 0x1b4   : > { %1941 = vmatprep.mubr.f32.mxu1 %v14820_v0  ;;  %9323 = vmatpush3.bf16.msra.mxu1 %v9320_v10  ;;  %v9332_v10 = vpack.c.bf16 %v683_v21, %v674_v53  ;;  %v737_v21 = vld [vmem:[#allocation6 + $0xd78] sm:$0xff] }
 0x1b5   : > { %15025 = vst [vmem:[#allocation20_spill] sm:$0xff] %v11976_v13  ;;  %v834_v32 = vpop.f32.mrb[10].mxu0  ;;  %9325 = vmatprep.subr.bf16.mxu1 %v9324_v40 }
 0x1b6   : > { %v11984_v36 = vadd.f32 %v11855_v17, %v834_v32  ;;  %v11986_v44 = vpop.f32.mrb[26].mxu1  ;;  %v836_v43 = vpop.f32.mrb[11].mxu0  ;;  %2141 = vmatmul.mubr.f32.gmra.mrb[84].mxu0 %v11861_v24 }
 0x1b7   : > { %v11990_v25 = vadd.f32 %v11858_v1, %v836_v43  ;;  %v11992_v56 = vpop.f32.mrb[27].mxu1  ;;  %1942 = vmatmul.mubr.f32.gmra.mrb[68].mxu1 %v11633_v45  ;;  %2145 = vmatprep.mubr.f32.mxu0 %v11866_v27  ;;  %v692_v1 = vld [vmem:[#allocation6 + $0xc10] sm:$0xff]  ;;  %v719_v43 = vld [vmem:[#allocation6 + $0xce8] sm:$0xff] }
 0x1b8   : > { %1947 = vmatprep.mubr.f32.mxu1 %v14820_v0  ;;  %9327 = vmatpush3.bf16.msra.mxu1 %v9324_v40  ;;  %v9336_v40 = vpack.c.bf16 %v701_v19, %v692_v1 }
 0x1b9   : > { %15026 = vst [vmem:[#allocation21_spill] sm:$0xff] %v11990_v25  ;;  %v840_v17 = vpop.f32.mrb[12].mxu0  ;;  %9329 = vmatprep.subr.bf16.mxu1 %v9328_v7 }
 0x1ba   : > { %v11998_v52 = vadd.f32 %v11869_v29, %v840_v17  ;;  %v12000_v24 = vpop.f32.mrb[28].mxu1  ;;  %v842_v41 = vpop.f32.mrb[13].mxu0  ;;  %2146 = vmatmul.mubr.f32.gmra.mrb[86].mxu0 %v11875_v34 }
 0x1bb   : > { %v12004_v45 = vadd.f32 %v11872_v54, %v842_v41  ;;  %v12006_v27 = vpop.f32.mrb[29].mxu1  ;;  %1948 = vmatmul.mubr.f32.gmra.mrb[70].mxu1 %v11640_v50  ;;  %2150 = vmatprep.mubr.f32.mxu0 %v11880_v37  ;;  %v710_v54 = vld [vmem:[#allocation6 + $0xca0] sm:$0xff] }
 0x1bc   : > { %1953 = vmatprep.mubr.f32.mxu1 %v14820_v0  ;;  %9331 = vmatpush3.bf16.msra.mxu1 %v9328_v7  ;;  %v9340_v7 = vpack.c.bf16 %v719_v43, %v710_v54 }
 0x1bd   : > { %15027 = vst [vmem:[#allocation22_spill] sm:$0xff] %v12004_v45  ;;  %v846_v29 = vpop.f32.mrb[14].mxu0  ;;  %9333 = vmatprep.subr.bf16.mxu1 %v9332_v10 }
 0x1be   : > { %v12012_v15 = vadd.f32 %v11883_v38, %v846_v29  ;;  %v12014_v34 = vpop.f32.mrb[30].mxu1  ;;  %v848_v32 = vpop.f32.mrb[15].mxu0  ;;  %2151 = vmatmul.mubr.f32.gmra.mrb[88].mxu0 %v11889_v47 }
 0x1bf   : > { %v12018_v50 = vadd.f32 %v11886_v16, %v848_v32  ;;  %v12020_v37 = vpop.f32.mrb[31].mxu1  ;;  %1954 = vmatmul.mubr.f32.gmra.mrb[72].mxu1 %v11647_v55  ;;  %2155 = vmatprep.mubr.f32.mxu0 %v11894_v58  ;;  %v728_v16 = vld [vmem:[#allocation6 + $0xd30] sm:$0xff] }
 0x1c0   : > { %1959 = vmatprep.mubr.f32.mxu1 %v14820_v0  ;;  %9335 = vmatpush3.bf16.msra.mxu1 %v9332_v10  ;;  %v9344_v10 = vpack.c.bf16 %v737_v21, %v728_v16 }
 0x1c1   : > { %15028 = vst [vmem:[#allocation23_spill] sm:$0xff] %v12018_v50  ;;  %v852_v38 = vpop.f32.mrb[16].mxu0  ;;  %9337 = vmatprep.subr.bf16.mxu1 %v9336_v40 }
 0x1c2   : > { %v12026_v53 = vadd.f32 %v11900_v3, %v852_v38  ;;  %v854_v47 = vpop.f32.mrb[17].mxu0  ;;  %2156 = vmatmul.mubr.f32.gmra.mrb[90].mxu0 %v11909_v48 }
 0x1c3   : > { %v12030_v17 = vadd.f32 %v11906_v6, %v854_v47  ;;  %1960 = vmatmul.mubr.f32.gmra.mrb[74].mxu1 %v11654_v63  ;;  %2160 = vmatprep.mubr.f32.mxu0 %v11914_v4 }
 0x1c4   : > { %1965 = vmatprep.mubr.f32.mxu1 %v14820_v0  ;;  %9339 = vmatpush3.bf16.msra.mxu1 %v9336_v40 }
 0x1c5   : > { %15029 = vst [vmem:[#allocation24_spill] sm:$0xff] %v12030_v17  ;;  %v858_v58 = vpop.f32.mrb[18].mxu0  ;;  %9341 = vmatprep.subr.bf16.mxu1 %v9340_v7 }
 0x1c6   : > { %v12036_v3 = vadd.f32 %v11920_v11, %v858_v58  ;;  %v860_v41 = vpop.f32.mrb[19].mxu0  ;;  %2161 = vmatmul.mubr.f32.gmra.mrb[92].mxu0 %v11929_v31 }
 0x1c7   : > { %v12040_v48 = vadd.f32 %v11926_v20, %v860_v41  ;;  %1966 = vmatmul.mubr.f32.gmra.mrb[76].mxu1 %v11661_v33  ;;  %2165 = vmatprep.mubr.f32.mxu0 %v11934_v57 }
 0x1c8   : > { %1971 = vmatprep.mubr.f32.mxu1 %v14820_v0  ;;  %9343 = vmatpush3.bf16.msra.mxu1 %v9340_v7  ;;  %v10961_v7 = vld [vmem:[%s11393_s5 + $0x58] sm:$0xff] }
 0x1c9   : > { %15030 = vst [vmem:[#allocation25_spill] sm:$0xff] %v12040_v48  ;;  %v864_v6 = vpop.f32.mrb[20].mxu0  ;;  %9345 = vmatprep.subr.bf16.mxu1 %v9344_v10 }
 0x1ca   : > { %v12046_v4 = vadd.f32 %v11940_v22, %v864_v6  ;;  %v866_v11 = vpop.f32.mrb[21].mxu0  ;;  %2166 = vmatmul.mubr.f32.gmra.mrb[94].mxu0 %v11949_v30 }
 0x1cb   : > { %v12050_v31 = vadd.f32 %v11946_v42, %v866_v11  ;;  %1972 = vmatmul.mubr.f32.gmra.mrb[78].mxu1 %v11668_v14  ;;  %8204 = vmatprep.mubr.msk.f32.mxu0 %vm2367_vm0, %v11898_v2 }
 0x1cc   : > { %1977 = vmatprep.mubr.f32.mxu1 %v14820_v0  ;;  %9347 = vmatpush3.bf16.msra.mxu1 %v9344_v10 }
 0x1cd   : > { %15031 = vst [vmem:[#allocation26_spill] sm:$0xff] %v12050_v31  ;;  %v870_v20 = vpop.f32.mrb[22].mxu0 }
 0x1ce   : > { %v12057_v57 = vadd.f32 %v11957_v39, %v870_v20  ;;  %v872_v22 = vpop.f32.mrb[23].mxu0 }
 0x1cf   : > { %v12060_v1 = vadd.f32 %v11963_v9, %v872_v22  ;;  %1978 = vmatmul.mubr.f32.gmra.mrb[80].mxu1 %v11675_v28 }
 0x1d0   : > { %1983 = vmatprep.mubr.f32.mxu1 %v14820_v0 }
 0x1d1   : > { %15032 = vst [vmem:[#allocation27_spill] sm:$0xff] %v12060_v1  ;;  %v876_v42 = vpop.f32.mrb[24].mxu0 }
 0x1d2   : > { %v12065_v30 = vadd.f32 %v11972_v35, %v876_v42  ;;  %v878_v19 = vpop.f32.mrb[25].mxu0 }
 0x1d3   : > { %v12068_v29 = vadd.f32 %v11978_v18, %v878_v19  ;;  %1984 = vmatmul.mubr.f32.gmra.mrb[82].mxu1 %v11682_v49 }
 0x1d4   : > { %1989 = vmatprep.mubr.f32.mxu1 %v14820_v0 }
 0x1d5   : > { %15033 = vst [vmem:[#allocation28_spill] sm:$0xff] %v12068_v29  ;;  %v882_v39 = vpop.f32.mrb[26].mxu0 }
 0x1d6   : > { %v12073_v9 = vadd.f32 %v11986_v44, %v882_v39  ;;  %v884_v40 = vpop.f32.mrb[27].mxu0 }
 0x1d7   : > { %v12076_v32 = vadd.f32 %v11992_v56, %v884_v40  ;;  %1990 = vmatmul.mubr.f32.gmra.mrb[84].mxu1 %v11689_v8 }
 0x1d8   : > { %1995 = vmatprep.mubr.f32.mxu1 %v14820_v0 }
 0x1d9   : > { %15034 = vst [vmem:[#allocation29_spill] sm:$0xff] %v12076_v32  ;;  %v888_v35 = vpop.f32.mrb[28].mxu0 }
 0x1da   : > { %v12081_v18 = vadd.f32 %v12000_v24, %v888_v35  ;;  %v890_v54 = vpop.f32.mrb[29].mxu0 }
 0x1db   : > { %v12084_v43 = vadd.f32 %v12006_v27, %v890_v54  ;;  %1996 = vmatmul.mubr.f32.gmra.mrb[86].mxu1 %v11696_v12  ;;  %v10958_v27 = vld [vmem:[%s11393_s5 + $0x10] sm:$0xff] }
 0x1dc   : > { %2001 = vmatprep.mubr.f32.mxu1 %v14820_v0 }
 0x1dd   : > { %15035 = vst [vmem:[#allocation30_spill] sm:$0xff] %v12084_v43  ;;  %v894_v44 = vpop.f32.mrb[30].mxu0 }
 0x1de   : > { %v12089_v56 = vadd.f32 %v12014_v34, %v894_v44  ;;  %v896_v38 = vpop.f32.mrb[31].mxu0  ;;  %v10959_v34 = vld [vmem:[%s11393_s5 + $0x28] sm:$0xff] }
 0x1df   : > { %v12092_v24 = vadd.f32 %v12020_v37, %v896_v38  ;;  %2002 = vmatmul.mubr.f32.gmra.mrb[88].mxu1 %v11703_v26  ;;  %v10960_v37 = vld [vmem:[%s11393_s5 + $0x40] sm:$0xff] }
 0x1e0   : > { %2007 = vmatprep.mubr.f32.mxu1 %v14820_v0 }
 0x1e1   : > { %15036 = vst [vmem:[#allocation31_spill] sm:$0xff] %v12092_v24 }
 0x1e3   : > { %2008 = vmatmul.mubr.f32.gmra.mrb[90].mxu1 %v11710_v60 }
 0x1e4   : > { %2013 = vmatprep.mubr.f32.mxu1 %v14820_v0 }
 0x1e7   : > { %2014 = vmatmul.mubr.f32.gmra.mrb[92].mxu1 %v11717_v62 }
 0x1e8   : > { %2019 = vmatprep.mubr.f32.mxu1 %v14820_v0 }
 0x1eb   : > { %2020 = vmatmul.mubr.f32.gmra.mrb[94].mxu1 %v11724_v23 }
 0x1ec   : > { %8148 = vmatprep.mubr.f32.mxu1 %v10958_v27 }
 0x1ef   : > { %8149 = vmatmul.mubr.f32.vlgmr.msra.gmra.mrb[96].mxu1 %v10959_v34 }
 0x1f0   : > { %8151 = vmatprep.mubr.f32.mxu1 %v10960_v37 }
 0x1f3   : > { %8152 = vmatmul.mubr.f32.gmra.mrb[98].mxu1 %v10961_v7 }
 0x1f4   : > { %8154 = vmatprep.mubr.f32.mxu1 %v11647_v55 }
 0x1f7   : > { %8155 = vmatmul.mubr.f32.gmra.mrb[100].mxu1 %v11654_v63 }
 0x1f8   : > { %8157 = vmatprep.mubr.f32.mxu1 %v11661_v33 }
 0x1fb   : > { %8158 = vmatmul.mubr.f32.gmra.mrb[102].mxu1 %v11668_v14 }
 0x1fc   : > { %8160 = vmatprep.mubr.f32.mxu1 %v11675_v28 }
 0x1ff   : > { %8161 = vmatmul.mubr.f32.gmra.mrb[104].mxu1 %v11682_v49 }
 0x200   : > { %8163 = vmatprep.mubr.f32.mxu1 %v11689_v8 }
 0x202   : > { %v12112_v47 = vpop.f32.mrb[32].mxu1 }
 0x203   : > { %15037 = vst [vmem:[#allocation32_spill] sm:$0xff] %v12112_v47  ;;  %v1289_v16 = vpop.f32.mrb[33].mxu1  ;;  %8164 = vmatmul.mubr.f32.gmra.mrb[106].mxu1 %v11696_v12 }
 0x204   : > { %8166 = vmatprep.mubr.f32.mxu1 %v11703_v26 }
 0x206   : > { %v12116_v55 = vpop.f32.mrb[34].mxu1 }
 0x207   : > { %15038 = vst [vmem:[#allocation33_spill] sm:$0xff] %v12116_v55  ;;  %v1295_v63 = vpop.f32.mrb[35].mxu1  ;;  %8167 = vmatmul.mubr.f32.gmra.mrb[108].mxu1 %v11710_v60 }
 0x208   : > { %v9348_v14 = vpack.c.bf16 %v1295_v63, %v1289_v16  ;;  %v10286_v28 = vpack.i.bf16 %v1295_v63, %v1289_v16  ;;  %8169 = vmatprep.mubr.f32.mxu1 %v11717_v62 }
 0x20a   : > { %10287 = vrot.lane.b32.xlu0 %v10286_v28, %s11161_s21  ;;  %v12127_v49 = vpop.f32.mrb[36].mxu1  ;;  %9350 = vmatprep.subr.msk.bf16.mxu0 %vm12120_vm1, %v9348_v14 }
 0x20b   : > { %15041 = vst [vmem:[#allocation34_spill] sm:$0xff] %v12127_v49  ;;  %v1301_v8 = vpop.f32.mrb[37].mxu1  ;;  %9353 = vmatpush3.bf16.xpose.msk.msra.mxu0 %vm12120_vm1, %v9348_v14  ;;  %8170 = vmatmul.mubr.f32.gmra.mrb[110].mxu1 %v11724_v23 }
 0x20e   : > { %v12134_v12 = vpop.f32.mrb[38].mxu1 }
 0x20f   : > { %15042 = vst [vmem:[#allocation35_spill] sm:$0xff] %v12134_v12  ;;  %v1307_v26 = vpop.f32.mrb[39].mxu1 }
 0x210   : > { %v9354_v60 = vpack.c.bf16 %v1307_v26, %v1301_v8  ;;  %v10291_v21 = vpack.i.bf16 %v1307_v26, %v1301_v8 }
 0x212   : > { %10292 = vrot.lane.b32.xlu1 %v10291_v21, %s11161_s21  ;;  %v12137_v62 = vpop.f32.mrb[40].mxu1  ;;  %9356 = vmatprep.subr.msk.bf16.mxu0 %vm12120_vm1, %v9354_v60 }
 0x213   : > { %15043 = vst [vmem:[#allocation36_spill] sm:$0xff] %v12137_v62  ;;  %v1313_v58 = vpop.f32.mrb[41].mxu1  ;;  %9359 = vmatpush3.bf16.xpose.msk.msra.mxu0 %vm12120_vm1, %v9354_v60 }
 0x216   : > { %v12143_v10 = vpop.f32.mrb[42].mxu1 }
 0x217   : > { %15044 = vst [vmem:[#allocation37_spill] sm:$0xff] %v12143_v10  ;;  %v1319_v41 = vpop.f32.mrb[43].mxu1 }
 0x218   : > { %v10296_v23 = vpack.i.bf16 %v1319_v41, %v1313_v58  ;;  %v9360_v6 = vpack.c.bf16 %v1319_v41, %v1313_v58 }
 0x21a   : > { %10297 = vrot.lane.b32.xlu0 %v10296_v23, %s11161_s21  ;;  %v12146_v11 = vpop.f32.mrb[44].mxu1  ;;  %9362 = vmatprep.subr.msk.bf16.mxu0 %vm12120_vm1, %v9360_v6 }
 0x21b   : > { %15045 = vst [vmem:[#allocation38_spill] sm:$0xff] %v12146_v11  ;;  %v1325_v20 = vpop.f32.mrb[45].mxu1  ;;  %9365 = vmatpush3.bf16.xpose.msk.msra.mxu0 %vm12120_vm1, %v9360_v6 }
 0x21e   : > { %v12152_v22 = vpop.f32.mrb[46].mxu1 }
 0x21f   : > { %15046 = vst [vmem:[#allocation39_spill] sm:$0xff] %v12152_v22  ;;  %v1331_v42 = vpop.f32.mrb[47].mxu1 }
 0x220   : > { %v10301_v19 = vpack.i.bf16 %v1331_v42, %v1325_v20  ;;  %v9366_v39 = vpack.c.bf16 %v1331_v42, %v1325_v20 }
 0x221   : > { %v12154_v40 = vpop.f32.mrb[32].mxu0 }
 0x222   : > { %15047 = vst [vmem:[#allocation40_spill] sm:$0xff] %v12154_v40  ;;  %10302 = vrot.lane.b32.xlu1 %v10301_v19, %s11161_s21  ;;  %v12157_v35 = vpop.f32.mrb[48].mxu1  ;;  %9368 = vmatprep.subr.msk.bf16.mxu0 %vm12120_vm1, %v9366_v39  ;;  %v12161_v54 = vpop.f32.mrb[33].mxu0 }
 0x223   : > { %15048 = vst [vmem:[#allocation41_spill] sm:$0xff] %v12157_v35  ;;  %15049 = vst [vmem:[#allocation42_spill] sm:$0xff] %v12161_v54  ;;  %v12163_v44 = vpop.f32.mrb[49].mxu1  ;;  %9371 = vmatpush3.bf16.xpose.msk.msra.mxu0 %vm12120_vm1, %v9366_v39 }
 0x225   : > { %v12167_v38 = vpop.f32.mrb[34].mxu0 }
 0x226   : > { %15050 = vst [vmem:[#allocation43_spill] sm:$0xff] %v12167_v38  ;;  %v12169_v27 = vpop.f32.mrb[50].mxu1  ;;  %v12175_v37 = vpack.c.bf16 %v12167_v38, %v12154_v40  ;;  %v12177_v7 = vpop.f32.mrb[35].mxu0 }
 0x227   : > { %15051 = vst [vmem:[#allocation44_spill] sm:$0xff] %v12169_v27  ;;  %15053 = vst [vmem:[#allocation46_spill] sm:$0xff] %v12177_v7  ;;  %v12179_v16 = vpop.f32.mrb[51].mxu1  ;;  %v12185_v14 = vpack.c.bf16 %v12177_v7, %v12161_v54 }
 0x228   : > { %15052 = vst [vmem:[#allocation45_spill] sm:$0xff] %v12175_v37  ;;  %v9372_v8 = vpack.c.bf16 %v12179_v16, %v12163_v44 }
 0x229   : > { %15054 = vst [vmem:[#allocation47_spill] sm:$0xff] %v12185_v14  ;;  %v12191_v26 = vpop.f32.mrb[36].mxu0 }
 0x22a   : > { %15055 = vst [vmem:[#allocation48_spill] sm:$0xff] %v12191_v26  ;;  %v12193_v60 = vpop.f32.mrb[52].mxu1  ;;  %9374 = vmatprep.subr.msk.bf16.mxu0 %vm12120_vm1, %v9372_v8  ;;  %v12197_v21 = vpop.f32.mrb[37].mxu0 }
 0x22b   : > { %15056 = vst [vmem:[#allocation49_spill] sm:$0xff] %v12193_v60  ;;  %15057 = vst [vmem:[#allocation50_spill] sm:$0xff] %v12197_v21  ;;  %v12199_v58 = vpop.f32.mrb[53].mxu1  ;;  %9377 = vmatpush3.bf16.xpose.msk.msra.mxu0 %vm12120_vm1, %v9372_v8 }
 0x22d   : > { %v12203_v41 = vpop.f32.mrb[38].mxu0 }
 0x22e   : > { %15058 = vst [vmem:[#allocation51_spill] sm:$0xff] %v12203_v41  ;;  %v12205_v23 = vpop.f32.mrb[54].mxu1  ;;  %v12211_v20 = vpack.c.bf16 %v12203_v41, %v12191_v26  ;;  %v12213_v42 = vpop.f32.mrb[39].mxu0 }
 0x22f   : > { %15059 = vst [vmem:[#allocation52_spill] sm:$0xff] %v12205_v23  ;;  %15061 = vst [vmem:[#allocation54_spill] sm:$0xff] %v12213_v42  ;;  %v12215_v19 = vpop.f32.mrb[55].mxu1  ;;  %v12221_v8 = vpack.c.bf16 %v12213_v42, %v12197_v21 }
 0x230   : > { %15060 = vst [vmem:[#allocation53_spill] sm:$0xff] %v12211_v20  ;;  %v9378_v63 = vpack.c.bf16 %v12215_v19, %v12199_v58 }
 0x231   : > { %15062 = vst [vmem:[#allocation55_spill] sm:$0xff] %v12221_v8  ;;  %v12227_v34 = vpop.f32.mrb[40].mxu0 }
 0x232   : > { %15063 = vst [vmem:[#allocation56_spill] sm:$0xff] %v12227_v34  ;;  %v12229_v6 = vpop.f32.mrb[56].mxu1  ;;  %9380 = vmatprep.subr.msk.bf16.mxu0 %vm12120_vm1, %v9378_v63  ;;  %v12233_v28 = vpop.f32.mrb[41].mxu0 }
 0x233   : > { %15064 = vst [vmem:[#allocation57_spill] sm:$0xff] %v12229_v6  ;;  %15065 = vst [vmem:[#allocation58_spill] sm:$0xff] %v12233_v28  ;;  %v12235_v39 = vpop.f32.mrb[57].mxu1  ;;  %9383 = vmatpush3.bf16.xpose.msk.msra.mxu0 %vm12120_vm1, %v9378_v63 }
 0x235   : > { %v12239_v23 = vpop.f32.mrb[42].mxu0 }
 0x236   : > { %15066 = vst [vmem:[#allocation59_spill] sm:$0xff] %v12239_v23  ;;  %v12241_v0 = vpop.f32.mrb[58].mxu1  ;;  %v12247_v6 = vpack.c.bf16 %v12239_v23, %v12227_v34  ;;  %v12249_v27 = vpop.f32.mrb[43].mxu0 }
 0x237   : > { %15067 = vst [vmem:[#allocation60_spill] sm:$0xff] %v12241_v0  ;;  %15069 = vst [vmem:[#allocation62_spill] sm:$0xff] %v12249_v27  ;;  %v12251_v35 = vpop.f32.mrb[59].mxu1  ;;  %v12257_v63 = vpack.c.bf16 %v12249_v27, %v12233_v28 }
 0x238   : > { %15068 = vst [vmem:[#allocation61_spill] sm:$0xff] %v12247_v6  ;;  %v9384_v60 = vpack.c.bf16 %v12251_v35, %v12235_v39 }
 0x239   : > { %15070 = vst [vmem:[#allocation63_spill] sm:$0xff] %v12257_v63  ;;  %v12263_v11 = vpop.f32.mrb[44].mxu0 }
 0x23a   : > { %15071 = vst [vmem:[#allocation64_spill] sm:$0xff] %v12263_v11  ;;  %v12265_v10 = vpop.f32.mrb[60].mxu1  ;;  %9386 = vmatprep.subr.msk.bf16.mxu0 %vm12120_vm1, %v9384_v60  ;;  %v12269_v62 = vpop.f32.mrb[45].mxu0 }
 0x23b   : > { %15072 = vst [vmem:[#allocation65_spill] sm:$0xff] %v12265_v10  ;;  %15073 = vst [vmem:[#allocation66_spill] sm:$0xff] %v12269_v62  ;;  %v12271_v22 = vpop.f32.mrb[61].mxu1  ;;  %9389 = vmatpush3.bf16.xpose.msk.msra.mxu0 %vm12120_vm1, %v9384_v60 }
 0x23d   : > { %v12275_v12 = vpop.f32.mrb[46].mxu0 }
 0x23e   : > { %15074 = vst [vmem:[#allocation67_spill] sm:$0xff] %v12275_v12  ;;  %v12277_v0 = vpop.f32.mrb[62].mxu1  ;;  %v12283_v10 = vpack.c.bf16 %v12275_v12, %v12263_v11  ;;  %v12285_v55 = vpop.f32.mrb[47].mxu0 }
 0x23f   : > { %15075 = vst [vmem:[#allocation68_spill] sm:$0xff] %v12277_v0  ;;  %15077 = vst [vmem:[#allocation70_spill] sm:$0xff] %v12285_v55  ;;  %v12287_v47 = vpop.f32.mrb[63].mxu1  ;;  %v12293_v60 = vpack.c.bf16 %v12285_v55, %v12269_v62 }
 0x240   : > { %15076 = vst [vmem:[#allocation69_spill] sm:$0xff] %v12283_v10  ;;  %v9390_v49 = vpack.c.bf16 %v12287_v47, %v12271_v22 }
 0x241   : > { %15078 = vst [vmem:[#allocation71_spill] sm:$0xff] %v12293_v60  ;;  %v12299_v8 = vpop.f32.mrb[48].mxu0 }
 0x242   : > { %15079 = vst [vmem:[#allocation72_spill] sm:$0xff] %v12299_v8  ;;  %9392 = vmatprep.subr.msk.bf16.mxu0 %vm12120_vm1, %v9390_v49  ;;  %v12303_v14 = vpop.f32.mrb[49].mxu0 }
 0x243   : > { %15080 = vst [vmem:[#allocation73_spill] sm:$0xff] %v12303_v14  ;;  %9395 = vmatpush3.bf16.xpose.msk.msra.mxu0 %vm12120_vm1, %v9390_v49 }
 0x245   : > { %v12307_v63 = vpop.f32.mrb[50].mxu0 }
 0x246   : > { %15081 = vst [vmem:[#allocation74_spill] sm:$0xff] %v12307_v63  ;;  %v12313_v0 = vpack.c.bf16 %v12307_v63, %v12299_v8  ;;  %v12315_v55 = vpop.f32.mrb[51].mxu0 }
 0x247   : > { %15083 = vst [vmem:[#allocation76_spill] sm:$0xff] %v12315_v55  ;;  %v12321_v28 = vpack.c.bf16 %v12315_v55, %v12303_v14 }
 0x248   : > { %15082 = vst [vmem:[#allocation75_spill] sm:$0xff] %v12313_v0 }
 0x249   : > { %15084 = vst [vmem:[#allocation77_spill] sm:$0xff] %v12321_v28  ;;  %v12323_v27 = vpop.f32.mrb[52].mxu0 }
 0x24a   : > { %15085 = vst [vmem:[#allocation78_spill] sm:$0xff] %v12323_v27  ;;  %8205 = vmatmul.mubr.msk.f32.vlgmr.msra.gmra.mrb[96].mxu0 %vm2367_vm0, %v11918_v51  ;;  %v12327_v49 = vpop.f32.mrb[53].mxu0 }
 0x24b   : > { %15086 = vst [vmem:[#allocation79_spill] sm:$0xff] %v12327_v49  ;;  %8207 = vmatprep.mubr.msk.f32.mxu0 %vm2367_vm0, %v11938_v5 }
 0x24d   : > { %v12331_v62 = vpop.f32.mrb[54].mxu0 }
 0x24e   : > { %15087 = vst [vmem:[#allocation80_spill] sm:$0xff] %v12331_v62  ;;  %8208 = vmatmul.mubr.msk.f32.gmra.mrb[98].mxu0 %vm2367_vm0, %v11955_v59  ;;  %v12339_v14 = vpack.c.bf16 %v12331_v62, %v12323_v27  ;;  %v12341_v55 = vpop.f32.mrb[55].mxu0 }
 0x24f   : > { %15089 = vst [vmem:[#allocation82_spill] sm:$0xff] %v12341_v55  ;;  %8210 = vmatprep.mubr.msk.f32.mxu0 %vm2367_vm0, %v11970_v46  ;;  %v12349_v54 = vpack.c.bf16 %v12341_v55, %v12327_v49 }
 0x250   : > { %15088 = vst [vmem:[#allocation81_spill] sm:$0xff] %v12339_v14 }
 0x251   : > { %15090 = vst [vmem:[#allocation83_spill] sm:$0xff] %v12349_v54  ;;  %v12351_v7 = vpop.f32.mrb[56].mxu0 }
 0x252   : > { %15091 = vst [vmem:[#allocation84_spill] sm:$0xff] %v12351_v7  ;;  %8211 = vmatmul.mubr.msk.f32.gmra.mrb[100].mxu0 %vm2367_vm0, %v11984_v36  ;;  %v12355_v60 = vpop.f32.mrb[57].mxu0 }
 0x253   : > { %15092 = vst [vmem:[#allocation85_spill] sm:$0xff] %v12355_v60  ;;  %8213 = vmatprep.mubr.msk.f32.mxu0 %vm2367_vm0, %v11998_v52 }
 0x255   : > { %v12359_v21 = vpop.f32.mrb[58].mxu0 }
 0x256   : > { %15093 = vst [vmem:[#allocation86_spill] sm:$0xff] %v12359_v21  ;;  %8214 = vmatmul.mubr.msk.f32.gmra.mrb[102].mxu0 %vm2367_vm0, %v12012_v15  ;;  %v12367_v49 = vpack.c.bf16 %v12359_v21, %v12351_v7  ;;  %v12369_v55 = vpop.f32.mrb[59].mxu0 }
 0x257   : > { %15095 = vst [vmem:[#allocation88_spill] sm:$0xff] %v12369_v55  ;;  %8216 = vmatprep.mubr.msk.f32.mxu0 %vm2367_vm0, %v12026_v53  ;;  %v12377_v42 = vpack.c.bf16 %v12369_v55, %v12355_v60 }
 0x258   : > { %15094 = vst [vmem:[#allocation87_spill] sm:$0xff] %v12367_v49 }
 0x259   : > { %15096 = vst [vmem:[#allocation89_spill] sm:$0xff] %v12377_v42  ;;  %v12379_v27 = vpop.f32.mrb[60].mxu0 }
 0x25a   : > { %15097 = vst [vmem:[#allocation90_spill] sm:$0xff] %v12379_v27  ;;  %8217 = vmatmul.mubr.msk.f32.gmra.mrb[104].mxu0 %vm2367_vm0, %v12036_v3  ;;  %v12383_v28 = vpop.f32.mrb[61].mxu0 }
 0x25b   : > { %15098 = vst [vmem:[#allocation91_spill] sm:$0xff] %v12383_v28  ;;  %8219 = vmatprep.mubr.msk.f32.mxu0 %vm2367_vm0, %v12046_v4 }
 0x25d   : > { %v12387_v7 = vpop.f32.mrb[62].mxu0 }
 0x25e   : > { %15099 = vst [vmem:[#allocation92_spill] sm:$0xff] %v12387_v7  ;;  %8220 = vmatmul.mubr.msk.f32.gmra.mrb[106].mxu0 %vm2367_vm0, %v12057_v57  ;;  %v12395_v60 = vpack.c.bf16 %v12387_v7, %v12379_v27  ;;  %v12397_v55 = vpop.f32.mrb[63].mxu0 }
 0x25f   : > { %15101 = vst [vmem:[#allocation94_spill] sm:$0xff] %v12397_v55  ;;  %8222 = vmatprep.mubr.msk.f32.mxu0 %vm2367_vm0, %v12065_v30  ;;  %v12405_v21 = vpack.c.bf16 %v12397_v55, %v12383_v28 }
 0x260   : > { %15100 = vst [vmem:[#allocation93_spill] sm:$0xff] %v12395_v60 }
 0x261   : > { %15102 = vst [vmem:[#allocation95_spill] sm:$0xff] %v12405_v21  ;;  %v7540_v62 = vpop.f32.mrb[64].mxu0 }
 0x262   : > { %8223 = vmatmul.mubr.msk.f32.gmra.mrb[108].mxu0 %vm2367_vm0, %v12073_v9  ;;  %v7541_v54 = vpop.f32.mrb[65].mxu0 }
 0x263   : > { %8225 = vmatprep.mubr.msk.f32.mxu0 %vm2367_vm0, %v12081_v18  ;;  %v12411_v27 = vadd.f32 %v7541_v54, %v7540_v62 }
 0x265   : > { %v7543_v7 = vpop.f32.mrb[66].mxu0 }
 0x266   : > { %8226 = vmatmul.mubr.msk.f32.gmra.mrb[110].mxu0 %vm2367_vm0, %v12089_v56  ;;  %v7544_v8 = vpop.f32.mrb[67].mxu0 }
 0x267   : > { %v12415_v42 = vadd.f32 %v7544_v8, %v7543_v7 }
 0x269   : > { %v7546_v63 = vpop.f32.mrb[68].mxu0 }
 0x26a   : > { %v7547_v28 = vpop.f32.mrb[69].mxu0 }
 0x26b   : > { %v12417_v55 = vadd.f32 %v7547_v28, %v7546_v63 }
 0x26d   : > { %v7549_v21 = vpop.f32.mrb[70].mxu0 }
 0x26e   : > { %v7550_v11 = vpop.f32.mrb[71].mxu0 }
 0x26f   : > { %v12419_v12 = vadd.f32 %v7550_v11, %v7549_v21 }
 0x271   : > { %v7552_v24 = vpop.f32.mrb[72].mxu0 }
 0x272   : > { %v7553_v43 = vpop.f32.mrb[73].mxu0 }
 0x273   : > { %v12421_v32 = vadd.f32 %v7553_v43, %v7552_v24 }
 0x275   : > { %v7555_v62 = vpop.f32.mrb[74].mxu0 }
 0x276   : > { %v7556_v54 = vpop.f32.mrb[75].mxu0 }
 0x277   : > { %v12423_v29 = vadd.f32 %v7556_v54, %v7555_v62 }
 0x279   : > { %v7558_v1 = vpop.f32.mrb[76].mxu0 }
 0x27a   : > { %v7559_v31 = vpop.f32.mrb[77].mxu0 }
 0x27b   : > { %v12425_v7 = vadd.f32 %v7559_v31, %v7558_v1 }
 0x27d   : > { %v7561_v8 = vpop.f32.mrb[78].mxu0 }
 0x27e   : > { %v7562_v48 = vpop.f32.mrb[79].mxu0 }
 0x27f   : > { %v12427_v28 = vadd.f32 %v7562_v48, %v7561_v8 }
 0x281   : > { %v7564_v63 = vpop.f32.mrb[80].mxu0 }
 0x282   : > { %v12429_v17 = vpop.f32.mrb[64].mxu1  ;;  %v7565_v11 = vpop.f32.mrb[81].mxu0 }
 0x283   : > { %v12431_v21 = vpop.f32.mrb[65].mxu1  ;;  %v12433_v43 = vadd.f32 %v7565_v11, %v7564_v63 }
 0x284   : > { %15103 = vst [vmem:[#allocation96_spill] sm:$0xff] %v12431_v21 }
 0x285   : > { %v7567_v24 = vpop.f32.mrb[82].mxu0 }
 0x286   : > { %v12435_v50 = vpop.f32.mrb[66].mxu1  ;;  %v7568_v62 = vpop.f32.mrb[83].mxu0 }
 0x287   : > { %v9396_v1 = vpack.c.bf16 %v12435_v50, %v12429_v17  ;;  %v12441_v48 = vpop.f32.mrb[67].mxu1  ;;  %v12443_v54 = vadd.f32 %v7568_v62, %v7567_v24 }
 0x288   : > { %15104 = vst [vmem:[#allocation97_spill] sm:$0xff] %v12441_v48  ;;  %v12449_v63 = vpack.c.bf16 %v12441_v48, %v12431_v21 }
 0x289   : > { %9397 = vmatprep.subr.bf16.mxu1 %v9396_v1  ;;  %v7570_v11 = vpop.f32.mrb[84].mxu0 }
 0x28a   : > { %15105 = vst [vmem:[#allocation98_spill] sm:$0xff] %v12449_v63  ;;  %v12451_v45 = vpop.f32.mrb[68].mxu1  ;;  %9399 = vmatpush3.bf16.msra.mxu1 %v9396_v1  ;;  %v7571_v31 = vpop.f32.mrb[85].mxu0 }
 0x28b   : > { %v12453_v25 = vpop.f32.mrb[69].mxu1  ;;  %v12455_v13 = vadd.f32 %v7571_v31, %v7570_v11 }
 0x28c   : > { %15106 = vst [vmem:[#allocation99_spill] sm:$0xff] %v12453_v25 }
 0x28d   : > { %v7573_v61 = vpop.f32.mrb[86].mxu0 }
 0x28e   : > { %v12457_v24 = vpop.f32.mrb[70].mxu1  ;;  %v7574_v62 = vpop.f32.mrb[87].mxu0 }
 0x28f   : > { %v9400_v21 = vpack.c.bf16 %v12457_v24, %v12451_v45  ;;  %v12463_v48 = vpop.f32.mrb[71].mxu1  ;;  %v12465_v60 = vadd.f32 %v7574_v62, %v7573_v61 }
 0x290   : > { %15107 = vst [vmem:[#allocation100_spill] sm:$0xff] %v12463_v48  ;;  %v12471_v31 = vpack.c.bf16 %v12463_v48, %v12453_v25 }
 0x291   : > { %9401 = vmatprep.subr.bf16.mxu1 %v9400_v21  ;;  %v7576_v11 = vpop.f32.mrb[88].mxu0 }
 0x292   : > { %15108 = vst [vmem:[#allocation101_spill] sm:$0xff] %v12471_v31  ;;  %v12473_v49 = vpop.f32.mrb[72].mxu1  ;;  %9403 = vmatpush3.bf16.msra.mxu1 %v9400_v21  ;;  %v7577_v8 = vpop.f32.mrb[89].mxu0 }
 0x293   : > { %v12475_v14 = vpop.f32.mrb[73].mxu1  ;;  %v12477_v0 = vadd.f32 %v7577_v8, %v7576_v11 }
 0x294   : > { %15109 = vst [vmem:[#allocation102_spill] sm:$0xff] %v12475_v14 }
 0x295   : > { %v7579_v10 = vpop.f32.mrb[90].mxu0 }
 0x296   : > { %v12479_v61 = vpop.f32.mrb[74].mxu1  ;;  %v7580_v62 = vpop.f32.mrb[91].mxu0 }
 0x297   : > { %v9404_v25 = vpack.c.bf16 %v12479_v61, %v12473_v49  ;;  %v12485_v48 = vpop.f32.mrb[75].mxu1  ;;  %v12487_v6 = vadd.f32 %v7580_v62, %v7579_v10 }
 0x298   : > { %15110 = vst [vmem:[#allocation103_spill] sm:$0xff] %v12485_v48  ;;  %v12493_v8 = vpack.c.bf16 %v12485_v48, %v12475_v14 }
 0x299   : > { %9405 = vmatprep.subr.bf16.mxu1 %v9404_v25  ;;  %v7582_v11 = vpop.f32.mrb[92].mxu0 }
 0x29a   : > { %15111 = vst [vmem:[#allocation104_spill] sm:$0xff] %v12493_v8  ;;  %v12495_v20 = vpop.f32.mrb[76].mxu1  ;;  %9407 = vmatpush3.bf16.msra.mxu1 %v9404_v25  ;;  %v7583_v1 = vpop.f32.mrb[93].mxu0 }
 0x29b   : > { %15112 = vst [vmem:[#allocation105_spill] sm:$0xff] %v12495_v20  ;;  %v12497_v37 = vpop.f32.mrb[77].mxu1  ;;  %v12499_v34 = vadd.f32 %v7583_v1, %v7582_v11 }
 0x29c   : > { %15113 = vst [vmem:[#allocation106_spill] sm:$0xff] %v12497_v37 }
 0x29d   : > { %v7585_v23 = vpop.f32.mrb[94].mxu0 }
 0x29e   : > { %v12501_v10 = vpop.f32.mrb[78].mxu1  ;;  %v7586_v62 = vpop.f32.mrb[95].mxu0 }
 0x29f   : > { %15114 = vst [vmem:[#allocation107_spill] sm:$0xff] %v12501_v10  ;;  %v9408_v14 = vpack.c.bf16 %v12501_v10, %v12495_v20  ;;  %v12507_v48 = vpop.f32.mrb[79].mxu1  ;;  %v12509_v40 = vadd.f32 %v7586_v62, %v7585_v23 }
 0x2a0   : > { %15115 = vst [vmem:[#allocation108_spill] sm:$0xff] %v12507_v48  ;;  %v12515_v1 = vpack.c.bf16 %v12507_v48, %v12497_v37 }
 0x2a1   : > { %9409 = vmatprep.subr.bf16.mxu1 %v9408_v14 }
 0x2a2   : > { %15116 = vst [vmem:[#allocation109_spill] sm:$0xff] %v12515_v1  ;;  %v12517_v11 = vpop.f32.mrb[80].mxu1  ;;  %9411 = vmatpush3.bf16.msra.mxu1 %v9408_v14 }
 0x2a3   : > { %15117 = vst [vmem:[#allocation110_spill] sm:$0xff] %v12517_v11  ;;  %v12519_v38 = vpop.f32.mrb[81].mxu1 }
 0x2a4   : > { %15118 = vst [vmem:[#allocation111_spill] sm:$0xff] %v12519_v38 }
 0x2a6   : > { %v12521_v21 = vpop.f32.mrb[82].mxu1 }
 0x2a7   : > { %15119 = vst [vmem:[#allocation112_spill] sm:$0xff] %v12521_v21  ;;  %v9412_v23 = vpack.c.bf16 %v12521_v21, %v12517_v11  ;;  %v12527_v62 = vpop.f32.mrb[83].mxu1 }
 0x2a8   : > { %15120 = vst [vmem:[#allocation113_spill] sm:$0xff] %v12527_v62  ;;  %v12533_v37 = vpack.c.bf16 %v12527_v62, %v12519_v38 }
 0x2a9   : > { %9413 = vmatprep.subr.bf16.mxu1 %v9412_v23 }
 0x2aa   : > { %15121 = vst [vmem:[#allocation114_spill] sm:$0xff] %v12533_v37  ;;  %v12535_v14 = vpop.f32.mrb[84].mxu1  ;;  %9415 = vmatpush3.bf16.msra.mxu1 %v9412_v23 }
 0x2ab   : > { %15122 = vst [vmem:[#allocation115_spill] sm:$0xff] %v12535_v14  ;;  %v12537_v48 = vpop.f32.mrb[85].mxu1 }
 0x2ac   : > { %15123 = vst [vmem:[#allocation116_spill] sm:$0xff] %v12537_v48 }
 0x2ae   : > { %v12539_v41 = vpop.f32.mrb[86].mxu1 }
 0x2af   : > { %15124 = vst [vmem:[#allocation117_spill] sm:$0xff] %v12539_v41  ;;  %v9416_v11 = vpack.c.bf16 %v12539_v41, %v12535_v14  ;;  %v12545_v21 = vpop.f32.mrb[87].mxu1 }
 0x2b0   : > { %15125 = vst [vmem:[#allocation118_spill] sm:$0xff] %v12545_v21  ;;  %v12551_v38 = vpack.c.bf16 %v12545_v21, %v12537_v48 }
 0x2b1   : > { %9417 = vmatprep.subr.bf16.mxu1 %v9416_v11 }
 0x2b2   : > { %15126 = vst [vmem:[#allocation119_spill] sm:$0xff] %v12551_v38  ;;  %v12553_v23 = vpop.f32.mrb[88].mxu1  ;;  %9419 = vmatpush3.bf16.msra.mxu1 %v9416_v11  ;;  %v10288_v11 = vpop.permute.xlu0 %10287 }
 0x2b3   : > { %15127 = vst [vmem:[#allocation120_spill] sm:$0xff] %v12553_v23  ;;  %v12555_v62 = vpop.f32.mrb[89].mxu1  ;;  %v10290_v26 = vunpack.i.h.bf16 %v10288_v11  ;;  %v10289_v38 = vunpack.i.l.bf16 %v10288_v11 }
 0x2b4   : > { %15128 = vst [vmem:[#allocation121_spill] sm:$0xff] %v12555_v62 }
 0x2b6   : > { %v12557_v20 = vpop.f32.mrb[90].mxu1 }
 0x2b7   : > { %15129 = vst [vmem:[#allocation122_spill] sm:$0xff] %v12557_v20  ;;  %v9420_v14 = vpack.c.bf16 %v12557_v20, %v12553_v23  ;;  %v12563_v41 = vpop.f32.mrb[91].mxu1 }
 0x2b8   : > { %15130 = vst [vmem:[#allocation123_spill] sm:$0xff] %v12563_v41  ;;  %v12569_v48 = vpack.c.bf16 %v12563_v41, %v12555_v62  ;;  %v12589_v41 = vpack.c.bf16 %v10290_v26, %v10289_v38 }
 0x2b9   : > { %9421 = vmatprep.subr.bf16.mxu1 %v9420_v14 }
 0x2ba   : > { %15131 = vst [vmem:[#allocation124_spill] sm:$0xff] %v12569_v48  ;;  %v12571_v21 = vpop.f32.mrb[92].mxu1  ;;  %9423 = vmatpush3.bf16.msra.mxu1 %v9420_v14 }
 0x2bb   : > { %15132 = vst [vmem:[#allocation125_spill] sm:$0xff] %v12571_v21  ;;  %v12573_v10 = vpop.f32.mrb[93].mxu1 }
 0x2bc   : > { %15133 = vst [vmem:[#allocation126_spill] sm:$0xff] %v12573_v10 }
 0x2be   : > { %v12575_v37 = vpop.f32.mrb[94].mxu1 }
 0x2bf   : > { %15134 = vst [vmem:[#allocation127_spill] sm:$0xff] %v12575_v37  ;;  %v9424_v25 = vpack.c.bf16 %v12575_v37, %v12571_v21  ;;  %v12581_v20 = vpop.f32.mrb[95].mxu1 }
 0x2c0   : > { %15135 = vst [vmem:[#allocation128_spill] sm:$0xff] %v12581_v20  ;;  %v12587_v14 = vpack.c.bf16 %v12581_v20, %v12573_v10 }
 0x2c1   : > { %9425 = vmatprep.subr.bf16.mxu1 %v9424_v25 }
 0x2c2   : > { %15136 = vst [vmem:[#allocation129_spill] sm:$0xff] %v12587_v14  ;;  %9427 = vmatpush3.bf16.msra.mxu1 %v9424_v25  ;;  %v8150_v11 = vpop.f32.mrb[96].mxu1 }
 0x2c3   : > { %9430 = vmatprep.subr.msk.bf16.mxu1 %vm12120_vm1, %v12589_v41  ;;  %v12595_v23 = vadd.f32 %v8150_v11, %v12415_v42  ;;  %v2237_v21 = vpop.f32.mrb[97].mxu1 }
 0x2c4   : > { %v12598_v37 = vadd.f32 %v12411_v27, %v2237_v21 }
 0x2c5   : > { %15137 = vst [vmem:[#allocation130_spill] sm:$0xff] %v12595_v23 }
 0x2c6   : > { %15138 = vst [vmem:[#allocation131_spill] sm:$0xff] %v12598_v37  ;;  %v12604_v38 = vpack.c.bf16 %v12595_v23, %v12598_v37  ;;  %v8153_v26 = vpop.f32.mrb[98].mxu1 }
 0x2c7   : > { %v12607_v25 = vadd.f32 %v8153_v26, %v12419_v12  ;;  %v2247_v10 = vpop.f32.mrb[99].mxu1 }
 0x2c8   : > { %15139 = vst [vmem:[#allocation132_spill] sm:$0xff] %v12604_v38  ;;  %v12610_v20 = vadd.f32 %v12417_v55, %v2247_v10 }
 0x2c9   : > { %15140 = vst [vmem:[#allocation133_spill] sm:$0xff] %v12607_v25 }
 0x2ca   : > { %15141 = vst [vmem:[#allocation134_spill] sm:$0xff] %v12610_v20  ;;  %v12616_v27 = vpack.c.bf16 %v12607_v25, %v12610_v20  ;;  %v8156_v21 = vpop.f32.mrb[100].mxu1 }
 0x2cb   : > { %v12619_v11 = vadd.f32 %v8156_v21, %v12423_v29  ;;  %v2257_v62 = vpop.f32.mrb[101].mxu1 }
 0x2cc   : > { %15142 = vst [vmem:[#allocation135_spill] sm:$0xff] %v12616_v27  ;;  %v12622_v37 = vadd.f32 %v12421_v32, %v2257_v62 }
 0x2cd   : > { %15143 = vst [vmem:[#allocation136_spill] sm:$0xff] %v12619_v11 }
 0x2ce   : > { %15144 = vst [vmem:[#allocation137_spill] sm:$0xff] %v12622_v37  ;;  %v12628_v55 = vpack.c.bf16 %v12619_v11, %v12622_v37  ;;  %v8159_v10 = vpop.f32.mrb[102].mxu1 }
 0x2cf   : > { %v12631_v26 = vadd.f32 %v8159_v10, %v12427_v28  ;;  %v2267_v42 = vpop.f32.mrb[103].mxu1 }
 0x2d0   : > { %15145 = vst [vmem:[#allocation138_spill] sm:$0xff] %v12628_v55  ;;  %v12634_v23 = vadd.f32 %v12425_v7, %v2267_v42 }
 0x2d1   : > { %15146 = vst [vmem:[#allocation139_spill] sm:$0xff] %v12631_v26 }
 0x2d2   : > { %15147 = vst [vmem:[#allocation140_spill] sm:$0xff] %v12634_v23  ;;  %v12640_v32 = vpack.c.bf16 %v12631_v26, %v12634_v23  ;;  %v8162_v62 = vpop.f32.mrb[104].mxu1 }
 0x2d3   : > { %v12643_v21 = vadd.f32 %v8162_v62, %v12443_v54  ;;  %v2277_v12 = vpop.f32.mrb[105].mxu1 }
 0x2d4   : > { %15148 = vst [vmem:[#allocation141_spill] sm:$0xff] %v12640_v32  ;;  %v12646_v37 = vadd.f32 %v12433_v43, %v2277_v12 }
 0x2d5   : > { %15149 = vst [vmem:[#allocation142_spill] sm:$0xff] %v12643_v21 }
 0x2d6   : > { %15150 = vst [vmem:[#allocation143_spill] sm:$0xff] %v12646_v37  ;;  %v12652_v7 = vpack.c.bf16 %v12643_v21, %v12646_v37  ;;  %v8165_v42 = vpop.f32.mrb[106].mxu1 }
 0x2d7   : > { %v12655_v10 = vadd.f32 %v8165_v42, %v12465_v60  ;;  %v2287_v29 = vpop.f32.mrb[107].mxu1 }
 0x2d8   : > { %15151 = vst [vmem:[#allocation144_spill] sm:$0xff] %v12652_v7  ;;  %v12658_v11 = vadd.f32 %v12455_v13, %v2287_v29 }
 0x2d9   : > { %15152 = vst [vmem:[#allocation145_spill] sm:$0xff] %v12655_v10 }
 0x2da   : > { %15153 = vst [vmem:[#allocation146_spill] sm:$0xff] %v12658_v11  ;;  %v12664_v43 = vpack.c.bf16 %v12655_v10, %v12658_v11  ;;  %v8168_v12 = vpop.f32.mrb[108].mxu1 }
 0x2db   : > { %v12667_v62 = vadd.f32 %v8168_v12, %v12487_v6  ;;  %v2297_v28 = vpop.f32.mrb[109].mxu1 }
 0x2dc   : > { %15154 = vst [vmem:[#allocation147_spill] sm:$0xff] %v12664_v43  ;;  %v12670_v37 = vadd.f32 %v12477_v0, %v2297_v28  ;;  %v2316_v28 = vlaneseq }
 0x2dd   : > { %15155 = vst [vmem:[#allocation148_spill] sm:$0xff] %v12667_v62 }
 0x2de   : > { %15156 = vst [vmem:[#allocation149_spill] sm:$0xff] %v12670_v37  ;;  %v12676_v13 = vpack.c.bf16 %v12667_v62, %v12670_v37  ;;  %v8171_v29 = vpop.f32.mrb[110].mxu1  ;;  %v12690_v12 = vshrl.u32 %v2316_v28, 7  ;;  %v12693_v37 = vand.u32 127, %v2316_v28 }
 0x2df   : > { %v12679_v42 = vadd.f32 %v8171_v29, %v12509_v40  ;;  %v2307_v54 = vpop.f32.mrb[111].mxu1 }
 0x2e0   : > { %15157 = vst [vmem:[#allocation150_spill] sm:$0xff] %v12676_v13  ;;  %v12682_v21 = vadd.f32 %v12499_v34, %v2307_v54  ;;  %15161 = vst [vmem:[#allocation154_spill] sm:$0xff] %v12690_v12  ;;  %v2318_v60 = vadd.s32 8, %v12690_v12  ;;  %v2320_v40 = vadd.s32 24, %v12690_v12  ;;  %v14943_v54 = vmov -1e+30  }
 0x2e1   : > { %15158 = vst [vmem:[#allocation151_spill] sm:$0xff] %v12679_v42  ;;  %vm2335_vm3 = vcmp.ge.s32.totalorder %v12690_v12, %v12693_v37  ;;  %v2321_v28 = vadd.s32 32, %v12690_v12 }
 0x2e2   : > { %15159 = vst [vmem:[#allocation152_spill] sm:$0xff] %v12682_v21  ;;  %v12688_v0 = vpack.c.bf16 %v12679_v42, %v12682_v21  ;;  %vm2336_vm2 = vcmp.ge.s32.totalorder %v2318_v60, %v12693_v37  ;;  %vm2338_vm4 = vcmp.ge.s32.totalorder %v2320_v40, %v12693_v37  ;;  %v2319_v21 = vadd.s32 16, %v12690_v12 }
 0x2e3   : > { %v12698_v29 = vsel %vm2336_vm2, 0.0, %v14943_v54  ;;  %v12709_v10 = vsel %vm2335_vm3, 0.0, %v14943_v54  ;;  %v2322_v40 = vadd.s32 40, %v12690_v12  ;;  %vm2339_vm6 = vcmp.ge.s32.totalorder %v2321_v28, %v12693_v37 }
 0x2e4   : > { %15160 = vst [vmem:[#allocation153_spill] sm:$0xff] %v12688_v0  ;;  %15162 = vst [vmem:[#allocation155_spill] sm:$0xff] %v12698_v29  ;;  %vm2337_vm5 = vcmp.ge.s32.totalorder %v2319_v21, %v12693_v37 }
 0x2e5   : > { %15163 = vst [vmem:[#allocation156_spill] sm:$0xff] %v12709_v10  ;;  %vm2340_vm7 = vcmp.ge.s32.totalorder %v2322_v40, %v12693_v37 }
 0x31d   : > { %v8206_v34 = vpop.f32.mrb[96].mxu0 }
 0x31e   : > { %v2610_v6 = vmul.f32 0.05103104, %v8206_v34  ;;  %v2530_v62 = vpop.f32.mrb[97].mxu0  ;;  %v12712_v34 = vsel %vm2338_vm4, 0.0, %v14943_v54 }
 0x31f   : > { %v2609_v42 = vmul.f32 0.05103104, %v2530_v62  ;;  %15164 = vst [vmem:[#allocation157_spill] sm:$0xff] %v12712_v34  ;;  %v2323_v62 = vadd.s32 48, %v12690_v12 }
 0x320   : > { %v12706_v60 = vadd.f32 %v2610_v6, %v12698_v29 }
 0x321   : > { %v8209_v11 = vpop.f32.mrb[98].mxu0  ;;  %v12720_v20 = vadd.f32 %v2609_v42, %v12709_v10  ;;  %vm2341_vm8 = vcmp.ge.s32.totalorder %v2323_v62, %v12693_v37 }
 0x322   : > { %v2612_v23 = vmul.f32 0.05103104, %v8209_v11  ;;  %2643 = vmax.xlane.f32.xlu0 %v12706_v60  ;;  %v2540_v26 = vpop.f32.mrb[99].mxu0  ;;  %v15165_v11 = vmov -1e+30  }
 0x323   : > { %v2611_v6 = vmul.f32 0.05103104, %v2540_v26  ;;  %v12726_v0 = vsel %vm2337_vm5, 0.0, %v15165_v11  ;;  %v12731_v28 = vsel %vm2339_vm6, 0.0, %v15165_v11  ;;  %v2324_v26 = vadd.s32 56, %v12690_v12 }
 0x324   : > { %v12723_v25 = vadd.f32 %v2612_v23, %v12712_v34  ;;  %15166 = vst [vmem:[#allocation158_spill] sm:$0xff] %v12726_v0  ;;  %15167 = vst [vmem:[#allocation159_spill] sm:$0xff] %v12731_v28  ;;  %v2325_v23 = vadd.s32 64, %v12690_v12  ;;  %v12744_v55 = vsel %vm2340_vm7, 0.0, %v15165_v11 }
 0x325   : > { %v8212_v54 = vpop.f32.mrb[100].mxu0  ;;  %v12738_v43 = vadd.f32 %v2611_v6, %v12726_v0  ;;  %15168 = vst [vmem:[#allocation160_spill] sm:$0xff] %v12744_v55  ;;  %vm2342_vm9 = vcmp.ge.s32.totalorder %v2324_v26, %v12693_v37  ;;  %v2327_v6 = vadd.s32 80, %v12690_v12 }
 0x326   : > { %2641 = vmax.xlane.f32.xlu0 %v12720_v20  ;;  %2647 = vmax.xlane.f32.xlu1 %v12723_v25  ;;  %v2550_v21 = vpop.f32.mrb[101].mxu0  ;;  %v2614_v13 = vmul.f32 0.05103104, %v8212_v54  ;;  %v2326_v54 = vadd.s32 72, %v12690_v12  ;;  %vm2343_vm10 = vcmp.ge.s32.totalorder %v2325_v23, %v12693_v37  ;;  %v12762_v0 = vsel %vm2342_vm9, 0.0, %v15165_v11 }
 0x327   : > { %v2613_v42 = vmul.f32 0.05103104, %v2550_v21  ;;  %v12748_v21 = vsel %vm2341_vm8, 0.0, %v15165_v11  ;;  %15170 = vst [vmem:[#allocation162_spill] sm:$0xff] %v12762_v0  ;;  %vm2345_vm12 = vcmp.ge.s32.totalorder %v2327_v6, %v12693_v37 }
 0x328   : > { %15169 = vst [vmem:[#allocation161_spill] sm:$0xff] %v12748_v21  ;;  %v12756_v27 = vadd.f32 %v2614_v13, %v12744_v55  ;;  %vm2344_vm11 = vcmp.ge.s32.totalorder %v2326_v54, %v12693_v37  ;;  %v2329_v13 = vadd.s32 96, %v12690_v12 }
 0x329   : > { %v8215_v7 = vpop.f32.mrb[102].mxu0  ;;  %v12741_v32 = vadd.f32 %v2613_v42, %v12731_v28  ;;  %v12780_v10 = vsel %vm2344_vm11, 0.0, %v15165_v11 }
 0x32a   : > { %2645 = vmax.xlane.f32.xlu1 %v12738_v43  ;;  %v2560_v40 = vpop.f32.mrb[103].mxu0  ;;  %v2616_v42 = vmul.f32 0.05103104, %v8215_v7  ;;  %v2328_v7 = vadd.s32 88, %v12690_v12  ;;  %15172 = vst [vmem:[#allocation164_spill] sm:$0xff] %v12780_v10  ;;  %vm2347_vm14 = vcmp.ge.s32.totalorder %v2329_v13, %v12693_v37 }
 0x32b   : > { %v2615_v62 = vmul.f32 0.05103104, %v2560_v40  ;;  %2649 = vmax.xlane.f32.xlu0 %v12741_v32  ;;  %v12766_v40 = vsel %vm2343_vm10, 0.0, %v15165_v11 }
 0x32c   : > { %15171 = vst [vmem:[#allocation163_spill] sm:$0xff] %v12766_v40  ;;  %vm2346_vm13 = vcmp.ge.s32.totalorder %v2328_v7, %v12693_v37 }
 0x32d   : > { %v8218_v38 = vpop.f32.mrb[104].mxu0  ;;  %v12759_v28 = vadd.f32 %v2615_v62, %v12748_v21  ;;  %v12774_v21 = vadd.f32 %v2616_v42, %v12762_v0  ;;  %v2331_v42 = vadd.s32 112, %v12690_v12  ;;  %v12798_v14 = vsel %vm2346_vm13, 0.0, %v15165_v11 }
 0x32e   : > { %2651 = vmax.xlane.f32.xlu1 %v12756_v27  ;;  %v2570_v26 = vpop.f32.mrb[105].mxu0  ;;  %v2618_v62 = vmul.f32 0.05103104, %v8218_v38  ;;  %v2330_v38 = vadd.s32 104, %v12690_v12  ;;  %15174 = vst [vmem:[#allocation166_spill] sm:$0xff] %v12798_v14 }
 0x32f   : > { %v2617_v23 = vmul.f32 0.05103104, %v2570_v26  ;;  %2653 = vmax.xlane.f32.xlu0 %v12759_v28  ;;  %v12784_v26 = vsel %vm2345_vm12, 0.0, %v15165_v11  ;;  %vm2349_vm2 = vcmp.ge.s32.totalorder %v2331_v42, %v12693_v37 }
 0x330   : > { %15173 = vst [vmem:[#allocation165_spill] sm:$0xff] %v12784_v26  ;;  %vm2348_vm15 = vcmp.ge.s32.totalorder %v2330_v38, %v12693_v37 }
 0x331   : > { %v8221_v34 = vpop.f32.mrb[106].mxu0  ;;  %v12777_v55 = vadd.f32 %v2617_v23, %v12766_v40  ;;  %v12792_v40 = vadd.f32 %v2618_v62, %v12780_v10  ;;  %v12815_v48 = vsel %vm2348_vm15, 0.0, %v15165_v11 }
 0x332   : > { %2655 = vmax.xlane.f32.xlu1 %v12774_v21  ;;  %v2580_v54 = vpop.f32.mrb[107].mxu0  ;;  %v2620_v23 = vmul.f32 0.05103104, %v8221_v34  ;;  %v2332_v34 = vadd.s32 120, %v12690_v12  ;;  %15176 = vst [vmem:[#allocation168_spill] sm:$0xff] %v12815_v48 }
 0x333   : > { %v2619_v6 = vmul.f32 0.05103104, %v2580_v54  ;;  %2657 = vmax.xlane.f32.xlu0 %v12777_v55  ;;  %v12802_v54 = vsel %vm2347_vm14, 0.0, %v15165_v11 }
 0x334   : > { %15175 = vst [vmem:[#allocation167_spill] sm:$0xff] %v12802_v54  ;;  %vm2350_vm3 = vcmp.ge.s32.totalorder %v2332_v34, %v12693_v37  ;;  %v15179_v37 = vpack.i.bf16 %v12179_v16, %v12163_v44  ;;  %v12851_v44 = vpop.permute.xlu1 %10292 }
 0x335   : > { %v8224_v0 = vpop.f32.mrb[108].mxu0  ;;  %v12795_v29 = vadd.f32 %v2619_v6, %v12784_v26  ;;  %v12809_v6 = vadd.f32 %v2620_v23, %v12798_v14  ;;  %v12830_v12 = vsel %vm2350_vm3, 0.0, %v15165_v11 }
 0x336   : > { %2659 = vmax.xlane.f32.xlu1 %v12792_v40  ;;  %v2590_v7 = vpop.f32.mrb[109].mxu0  ;;  %v2622_v62 = vmul.f32 0.05103104, %v8224_v0  ;;  %15178 = vst [vmem:[#allocation170_spill] sm:$0xff] %v12830_v12 }
 0x337   : > { %v2621_v13 = vmul.f32 0.05103104, %v2590_v7  ;;  %2661 = vmax.xlane.f32.xlu0 %v12795_v29  ;;  %v12819_v7 = vsel %vm2349_vm2, 0.0, %v15165_v11 }
 0x338   : > { %15177 = vst [vmem:[#allocation169_spill] sm:$0xff] %v12819_v7  ;;  %v12824_v23 = vadd.f32 %v2622_v62, %v12815_v48  ;;  %v12854_v16 = vpop.permute.xlu1 %10302 }
 0x339   : > { %v8227_v26 = vpop.f32.mrb[110].mxu0  ;;  %v12812_v10 = vadd.f32 %v2621_v13, %v12802_v54 }
 0x33a   : > { %2663 = vmax.xlane.f32.xlu1 %v12809_v6  ;;  %v2600_v38 = vpop.f32.mrb[111].mxu0  ;;  %v2624_v0 = vmul.f32 0.05103104, %v8227_v26  ;;  %v12842_v26 = vpop.permute.xlu0 %10297 }
 0x33b   : > { %v2623_v42 = vmul.f32 0.05103104, %v2600_v38  ;;  %2665 = vmax.xlane.f32.xlu0 %v12812_v10 }
 0x33c   : > { %v12835_v54 = vadd.f32 %v2624_v0, %v12830_v12 }
 0x33d   : > { %v12827_v13 = vadd.f32 %v2623_v42, %v12819_v7 }
 0x33e   : > { %2667 = vmax.xlane.f32.xlu1 %v12824_v23 }
 0x33f   : > { %2669 = vmax.xlane.f32.xlu0 %v12827_v13 }
 0x342   : > { %2671 = vmax.xlane.f32.xlu1 %v12835_v54 }
 0x355   : > { %10307 = vrot.lane.b32.xlu0 %v15179_v37, %s11161_s21 }
 0x3af   : > { %v2644_v34 = vpop.xlane.xlu0 %2643 }
 0x3b0   : > { %v2674_v11 = vsub.f32 %v12706_v60, %v2644_v34 }
 0x3b2   : > { %v2691_v62 = vmul.f32 1.442695, %v2674_v11  ;;  %v15181_v11 = vpack.i.bf16 %v12251_v35, %v12235_v39 }
 0x3b3   : > { %v2642_v38 = vpop.xlane.xlu0 %2641  ;;  %v2648_v60 = vpop.xlane.xlu1 %2647 }
 0x3b4   : > { %10526 = vpow2.f32 %v2691_v62  ;;  %v2673_v42 = vsub.f32 %v12720_v20, %v2642_v38  ;;  %v15180_v20 = vpack.i.bf16 %v12215_v19, %v12199_v58  ;;  %v2676_v14 = vsub.f32 %v12723_v25, %v2648_v60 }
 0x3b6   : > { %v2689_v7 = vmul.f32 1.442695, %v2673_v42  ;;  %v2695_v58 = vmul.f32 1.442695, %v2676_v14 }
 0x3b7   : > { %v2646_v37 = vpop.xlane.xlu1 %2645 }
 0x3b8   : > { %10528 = vpow2.f32 %v2689_v7  ;;  %v2650_v34 = vpop.xlane.xlu0 %2649  ;;  %v2675_v42 = vsub.f32 %v12738_v43, %v2646_v37 }
 0x3b9   : > { %v2677_v19 = vsub.f32 %v12741_v32, %v2650_v34 }
 0x3ba   : > { %v2693_v8 = vmul.f32 1.442695, %v2675_v42 }
 0x3bb   : > { %v2652_v7 = vpop.xlane.xlu1 %2651 }
 0x3bc   : > { %v2654_v38 = vpop.xlane.xlu0 %2653  ;;  %v2678_v31 = vsub.f32 %v12756_v27, %v2652_v7  ;;  %10530 = vpow2.f32 %v2693_v8 }
 0x3bd   : > { %10532 = vpow2.f32 %v2695_v58  ;;  %v2679_v43 = vsub.f32 %v12759_v28, %v2654_v38 }
 0x3be   : > { %v12846_v0 = vpop.eup %10526  ;;  %v2699_v63 = vmul.f32 1.442695, %v2678_v31 }
 0x3bf   : > { %2723 = vadd.xlane.f32.xlu1 %v12846_v0  ;;  %v2656_v62 = vpop.xlane.xlu1 %2655  ;;  %v2701_v27 = vmul.f32 1.442695, %v2679_v43 }
 0x3c0   : > { %v2658_v1 = vpop.xlane.xlu0 %2657  ;;  %v2680_v35 = vsub.f32 %v12774_v21, %v2656_v62  ;;  %10534 = vpow2.f32 %v2699_v63 }
 0x3c1   : > { %v2681_v7 = vsub.f32 %v12777_v55, %v2658_v1 }
 0x3c2   : > { %v12849_v12 = vpop.eup %10528  ;;  %v2703_v37 = vmul.f32 1.442695, %v2680_v35 }
 0x3c3   : > { %2721 = vadd.xlane.f32.xlu0 %v12849_v12  ;;  %v2660_v48 = vpop.xlane.xlu1 %2659 }
 0x3c4   : > { %v2662_v39 = vpop.xlane.xlu0 %2661  ;;  %v2682_v14 = vsub.f32 %v12792_v40, %v2660_v48  ;;  %v2705_v40 = vmul.f32 1.442695, %v2681_v7 }
 0x3c5   : > { %v2683_v25 = vsub.f32 %v12795_v29, %v2662_v39 }
 0x3c6   : > { %v12873_v21 = vpop.eup %10530  ;;  %v2707_v28 = vmul.f32 1.442695, %v2682_v14 }
 0x3c7   : > { %v2709_v32 = vmul.f32 1.442695, %v2683_v25  ;;  %v12878_v34 = vpop.eup %10532 }
 0x3c8   : > { %v2666_v8 = vpop.xlane.xlu0 %2665 }
 0x3c9   : > { %v2685_v63 = vsub.f32 %v12812_v10, %v2666_v8 }
 0x3ca   : > { %v12880_v48 = vpop.eup %10534 }
 0x3cb   : > { %v2713_v1 = vmul.f32 1.442695, %v2685_v63 }
 0x3d0   : > { %10312 = vrot.lane.b32.xlu1 %v15180_v20, %s11161_s21  ;;  %v2664_v20 = vpop.xlane.xlu1 %2663 }
 0x3d4   : > { %v2668_v60 = vpop.xlane.xlu1 %2667 }
 0x3d5   : > { %v2686_v31 = vsub.f32 %v12824_v23, %v2668_v60  ;;  %v2684_v23 = vsub.f32 %v12809_v6, %v2664_v20 }
 0x3d7   : > { %v2715_v29 = vmul.f32 1.442695, %v2686_v31  ;;  %v2711_v10 = vmul.f32 1.442695, %v2684_v23 }
 0x3d8   : > { %v2672_v62 = vpop.xlane.xlu1 %2671 }
 0x3d9   : > { %10317 = vrot.lane.b32.xlu0 %v15181_v11, %s11161_s21  ;;  %v2697_v11 = vmul.f32 1.442695, %v2677_v19  ;;  %v2688_v42 = vsub.f32 %v12835_v54, %v2672_v62  ;;  %v2670_v19 = vpop.xlane.xlu0 %2669 }
 0x3da   : > { %v2687_v20 = vsub.f32 %v12827_v13, %v2670_v19 }
 0x3db   : > { %10536 = vpow2.f32 %v2697_v11  ;;  %v2719_v35 = vmul.f32 1.442695, %v2688_v42 }
 0x3dc   : > { %10538 = vpow2.f32 %v2703_v37  ;;  %v2717_v54 = vmul.f32 1.442695, %v2687_v20 }
 0x3dd   : > { %10540 = vpow2.f32 %v2701_v27  ;;  %v15182_v27 = vpack.i.bf16 %v12287_v47, %v12271_v22 }
 0x3de   : > { %10542 = vpow2.f32 %v2709_v32 }
 0x3df   : > { %10544 = vpow2.f32 %v2707_v28 }
 0x3e0   : > { %10546 = vpow2.f32 %v2715_v29 }
 0x3e1   : > { %10548 = vpow2.f32 %v2705_v40 }
 0x3e2   : > { %10550 = vpow2.f32 %v2713_v1 }
 0x3e3   : > { %10552 = vpow2.f32 %v2711_v10 }
 0x3e4   : > { %10554 = vpow2.f32 %v2719_v35 }
 0x3e5   : > { %v12885_v55 = vpop.eup %10536  ;;  %10556 = vpow2.f32 %v2717_v54 }
 0x3e6   : > { %v12887_v38 = vpop.eup %10538 }
 0x3e7   : > { %v12892_v58 = vpop.eup %10540 }
 0x3e8   : > { %v12894_v6 = vpop.eup %10542 }
 0x3e9   : > { %v12899_v39 = vpop.eup %10544 }
 0x3ea   : > { %v12901_v11 = vpop.eup %10546 }
 0x3eb   : > { %v12905_v43 = vpop.eup %10548 }
 0x3ec   : > { %v12907_v37 = vpop.eup %10550 }
 0x3ed   : > { %v12911_v13 = vpop.eup %10552 }
 0x3ee   : > { %v12914_v25 = vpop.eup %10554 }
 0x3ef   : > { %v12917_v60 = vpop.eup %10556 }
 0x3f4   : > { %2725 = vadd.xlane.f32.xlu1 %v12873_v21 }
 0x3f8   : > { %2731 = vadd.xlane.f32.xlu1 %v12880_v48  ;;  %2727 = vadd.xlane.f32.xlu0 %v12878_v34 }
 0x3fc   : > { %2735 = vadd.xlane.f32.xlu1 %v12887_v38  ;;  %2729 = vadd.xlane.f32.xlu0 %v12885_v55 }
 0x400   : > { %2733 = vadd.xlane.f32.xlu1 %v12892_v58  ;;  %2741 = vadd.xlane.f32.xlu0 %v12894_v6 }
 0x404   : > { %2739 = vadd.xlane.f32.xlu1 %v12899_v39  ;;  %2747 = vadd.xlane.f32.xlu0 %v12901_v11 }
 0x408   : > { %2737 = vadd.xlane.f32.xlu1 %v12905_v43  ;;  %2745 = vadd.xlane.f32.xlu0 %v12907_v37 }
 0x40c   : > { %2743 = vadd.xlane.f32.xlu1 %v12911_v13 }
 0x410   : > { %2751 = vadd.xlane.f32.xlu1 %v12914_v25 }
 0x414   : > { %2749 = vadd.xlane.f32.xlu1 %v12917_v60 }
 0x41e   : > { %10322 = vrot.lane.b32.xlu0 %v15182_v27, %s11161_s21 }
 0x422   : > { %2946 = vrot.lane.b32.xlu0 %v11898_v2, %s11161_s21  ;;  %v15183_v2 = vpack.i.bf16 %v12435_v50, %v12429_v17  ;;  %v10295_v50 = vunpack.i.h.bf16 %v12851_v44 }
 0x425   : > { %2948 = vrot.lane.b32.xlu1 %v11918_v51, %s11161_s21  ;;  %v15184_v51 = vpack.i.bf16 %v12457_v24, %v12451_v45 }
 0x426   : > { %2950 = vrot.lane.b32.xlu0 %v11938_v5, %s11161_s21  ;;  %v15185_v5 = vpack.i.bf16 %v12479_v61, %v12473_v49 }
 0x429   : > { %2952 = vrot.lane.b32.xlu1 %v11955_v59, %s11161_s21  ;;  %v10308_v59 = vpop.permute.xlu0 %10307 }
 0x42a   : > { %2954 = vrot.lane.b32.xlu0 %v11970_v46, %s11161_s21  ;;  %v10310_v47 = vunpack.i.h.bf16 %v10308_v59  ;;  %v10309_v22 = vunpack.i.l.bf16 %v10308_v59 }
 0x42d   : > { %2956 = vrot.lane.b32.xlu1 %v11984_v36, %s11161_s21 }
 0x42e   : > { %2958 = vrot.lane.b32.xlu0 %v11998_v52, %s11161_s21 }
 0x431   : > { %2960 = vrot.lane.b32.xlu1 %v12012_v15, %s11161_s21 }
 0x432   : > { %2962 = vrot.lane.b32.xlu0 %v12026_v53, %s11161_s21  ;;  %v10294_v53 = vunpack.i.l.bf16 %v12851_v44 }
 0x435   : > { %2964 = vrot.lane.b32.xlu1 %v12036_v3, %s11161_s21  ;;  %v9434_v3 = vpack.c.bf16 %v10295_v50, %v10294_v53  ;;  %v15186_v53 = vld [vmem:[#allocation98_spill] sm:$0xff] }
 0x436   : > { %2966 = vrot.lane.b32.xlu0 %v12046_v4, %s11161_s21  ;;  %v10300_v4 = vunpack.i.h.bf16 %v12842_v26 }
 0x439   : > { %2968 = vrot.lane.b32.xlu1 %v12057_v57, %s11161_s21  ;;  %v10299_v57 = vunpack.i.l.bf16 %v12842_v26 }
 0x43a   : > { %2970 = vrot.lane.b32.xlu0 %v12065_v30, %s11161_s21 }
 0x43b   : > { %v9440_v30 = vpack.c.bf16 %v10300_v4, %v10299_v57 }
 0x43d   : > { %2972 = vrot.lane.b32.xlu1 %v12073_v9, %s11161_s21  ;;  %v10305_v9 = vunpack.i.h.bf16 %v12854_v16 }
 0x43e   : > { %2974 = vrot.lane.b32.xlu0 %v12081_v18, %s11161_s21  ;;  %v10304_v18 = vunpack.i.l.bf16 %v12854_v16 }
 0x441   : > { %2976 = vrot.lane.b32.xlu1 %v12089_v56, %s11161_s21  ;;  %v9446_v56 = vpack.c.bf16 %v10305_v9, %v10304_v18 }
 0x442   : > { %10327 = vrot.lane.b32.xlu0 %v15183_v2, %s11161_s21 }
 0x445   : > { %10332 = vrot.lane.b32.xlu1 %v15184_v51, %s11161_s21 }
 0x449   : > { %10337 = vrot.lane.b32.xlu1 %v15185_v5, %s11161_s21 }
 0x44c   : > { %v2724_v46 = vpop.xlane.xlu1 %2723 }
 0x44d   : > { %10558 = vrcp.f32 %v2724_v46 }
 0x450   : > { %v2722_v36 = vpop.xlane.xlu0 %2721  ;;  %v10313_v49 = vpop.permute.xlu1 %10312 }
 0x451   : > { %10560 = vrcp.f32 %v2722_v36  ;;  %v10315_v24 = vunpack.i.h.bf16 %v10313_v49  ;;  %v10314_v61 = vunpack.i.l.bf16 %v10313_v49 }
 0x454   : > { %v10318_v26 = vpop.permute.xlu0 %10317 }
 0x455   : > { %v10320_v44 = vunpack.i.h.bf16 %v10318_v26  ;;  %v10319_v16 = vunpack.i.l.bf16 %v10318_v26 }
 0x457   : > { %v10559_v52 = vpop.eup %10558  ;;  %v9464_v31 = vpack.c.bf16 %v10320_v44, %v10319_v16  ;;  %v15187_v44 = vld [vmem:[#allocation101_spill] sm:$0xff]  ;;  %v15188_v16 = vld [vmem:[#allocation104_spill] sm:$0xff] }
 0x458   : > { %v2770_v45 = vmul.f32 %v10559_v52, %v12846_v0 }
 0x45b   : > { %v10561_v15 = vpop.eup %10560 }
 0x45c   : > { %v2769_v17 = vmul.f32 %v10561_v15, %v12849_v12  ;;  %v9458_v12 = vpack.c.bf16 %v10315_v24, %v10314_v61 }
 0x45e   : > { %8260 = vmatprep.mubr.f32.mxu1 %v2769_v17 }
 0x45f   : > { %8261 = vmatmul.mubr.f32.vlgmr.msra.gmra.mrb[112].mxu1 %v2770_v45 }
 0x460   : > { %9433 = vmatpush3.bf16.xpose.msk.msra.mxu1 %vm12120_vm1, %v12589_v41  ;;  %v9452_v41 = vpack.c.bf16 %v10310_v47, %v10309_v22 }
 0x461   : > { %9436 = vmatprep.subr.msk.bf16.mxu1 %vm12120_vm1, %v9434_v3 }
 0x468   : > { %9439 = vmatpush3.bf16.xpose.msk.msra.mxu1 %vm12120_vm1, %v9434_v3 }
 0x469   : > { %9442 = vmatprep.subr.msk.bf16.mxu1 %vm12120_vm1, %v9440_v30 }
 0x470   : > { %9445 = vmatpush3.bf16.xpose.msk.msra.mxu1 %vm12120_vm1, %v9440_v30 }
 0x471   : > { %9448 = vmatprep.subr.msk.bf16.mxu1 %vm12120_vm1, %v9446_v56 }
 0x478   : > { %9451 = vmatpush3.bf16.xpose.msk.msra.mxu1 %vm12120_vm1, %v9446_v56 }
 0x479   : > { %9454 = vmatprep.subr.msk.bf16.mxu1 %vm12120_vm1, %v9452_v41 }
 0x480   : > { %9457 = vmatpush3.bf16.xpose.msk.msra.mxu1 %vm12120_vm1, %v9452_v41 }
 0x481   : > { %9460 = vmatprep.subr.msk.bf16.mxu1 %vm12120_vm1, %v9458_v12  ;;  %v2726_v0 = vpop.xlane.xlu1 %2725 }
 0x482   : > { %10562 = vrcp.f32 %v2726_v0 }
 0x485   : > { %v2732_v14 = vpop.xlane.xlu1 %2731  ;;  %v2728_v32 = vpop.xlane.xlu0 %2727 }
 0x486   : > { %10564 = vrcp.f32 %v2728_v32 }
 0x487   : > { %10566 = vrcp.f32 %v2732_v14 }
 0x488   : > { %9463 = vmatpush3.bf16.xpose.msk.msra.mxu1 %vm12120_vm1, %v9458_v12 }
 0x489   : > { %9466 = vmatprep.subr.msk.bf16.mxu1 %vm12120_vm1, %v9464_v31  ;;  %v2736_v8 = vpop.xlane.xlu1 %2735  ;;  %v2730_v7 = vpop.xlane.xlu0 %2729 }
 0x48a   : > { %10568 = vrcp.f32 %v2730_v7  ;;  %v15189_v7 = vld [vmem:[#allocation109_spill] sm:$0xff] }
 0x48b   : > { %10570 = vrcp.f32 %v2736_v8 }
 0x48c   : > { %v10563_v28 = vpop.eup %10562 }
 0x48d   : > { %v2734_v63 = vpop.xlane.xlu1 %2733  ;;  %v2742_v29 = vpop.xlane.xlu0 %2741  ;;  %v2771_v40 = vmul.f32 %v10563_v28, %v12873_v21 }
 0x48e   : > { %10572 = vrcp.f32 %v2734_v63 }
 0x48f   : > { %8263 = vmatprep.mubr.f32.mxu1 %v2771_v40  ;;  %10574 = vrcp.f32 %v2742_v29  ;;  %v15190_v29 = vld [vmem:[#allocation114_spill] sm:$0xff] }
 0x490   : > { %9469 = vmatpush3.bf16.xpose.msk.msra.mxu1 %vm12120_vm1, %v9464_v31  ;;  %v10565_v23 = vpop.eup %10564 }
 0x491   : > { %v2740_v1 = vpop.xlane.xlu1 %2739  ;;  %v2748_v62 = vpop.xlane.xlu0 %2747  ;;  %v2772_v10 = vmul.f32 %v10565_v23, %v12878_v34 }
 0x492   : > { %v10567_v42 = vpop.eup %10566  ;;  %10576 = vrcp.f32 %v2740_v1 }
 0x493   : > { %8264 = vmatmul.mubr.f32.gmra.mrb[114].mxu1 %v2772_v10  ;;  %v2774_v27 = vmul.f32 %v10567_v42, %v12880_v48 }
 0x494   : > { %v10569_v19 = vpop.eup %10568 }
 0x495   : > { %v2738_v20 = vpop.xlane.xlu1 %2737  ;;  %v2746_v35 = vpop.xlane.xlu0 %2745  ;;  %v2773_v21 = vmul.f32 %v10569_v19, %v12885_v55 }
 0x496   : > { %10578 = vrcp.f32 %v2738_v20  ;;  %v10571_v54 = vpop.eup %10570 }
 0x497   : > { %8266 = vmatprep.mubr.f32.mxu1 %v2773_v21  ;;  %10580 = vrcp.f32 %v2746_v35  ;;  %v2776_v36 = vmul.f32 %v10571_v54, %v12887_v38  ;;  %v15192_v35 = vld [vmem:[#allocation124_spill] sm:$0xff]  ;;  %v15193_v54 = vld [vmem:[#allocation129_spill] sm:$0xff] }
 0x498   : > { %v10573_v2 = vpop.eup %10572  ;;  %8267 = vmatmul.mubr.f32.gmra.mrb[116].mxu1 %v2774_v27 }
 0x499   : > { %v2744_v51 = vpop.xlane.xlu1 %2743  ;;  %v10323_v5 = vpop.permute.xlu0 %10322  ;;  %v2775_v34 = vmul.f32 %v10573_v2, %v12892_v58 }
 0x49a   : > { %10582 = vrcp.f32 %v2744_v51  ;;  %v10325_v59 = vunpack.i.h.bf16 %v10323_v5  ;;  %v10324_v46 = vunpack.i.l.bf16 %v10323_v5  ;;  %v10575_v48 = vpop.eup %10574 }
 0x49b   : > { %8269 = vmatprep.mubr.f32.mxu1 %v2775_v34  ;;  %10584 = vrcp.f32 %v2748_v62  ;;  %v2779_v57 = vmul.f32 %v10575_v48, %v12894_v6  ;;  %v15191_v62 = vld [vmem:[#allocation119_spill] sm:$0xff] }
 0x49c   : > { %v9470_v52 = vpack.c.bf16 %v10325_v59, %v10324_v46  ;;  %8270 = vmatmul.mubr.f32.gmra.mrb[118].mxu1 %v2776_v36  ;;  %v10577_v50 = vpop.eup %10576 }
 0x49d   : > { %v2752_v55 = vpop.xlane.xlu1 %2751  ;;  %v2947_v15 = vpop.permute.xlu0 %2946  ;;  %v2778_v3 = vmul.f32 %v10577_v50, %v12899_v39 }
 0x49e   : > { %9472 = vmatprep.subr.msk.bf16.mxu1 %vm12120_vm1, %v9470_v52  ;;  %10586 = vrcp.f32 %v2752_v55 }
 0x49f   : > { %9475 = vmatpush3.bf16.xpose.msk.msra.mxu1 %vm12120_vm1, %v9470_v52 }
 0x4a0   : > { %v10579_v58 = vpop.eup %10578  ;;  %9557 = vmatprep.subr.bf16.mxu1 %v15186_v53 }
 0x4a1   : > { %v2750_v17 = vpop.xlane.xlu1 %2749  ;;  %v2951_v45 = vpop.permute.xlu0 %2950  ;;  %v2777_v38 = vmul.f32 %v10579_v58, %v12905_v43 }
 0x4a2   : > { %10588 = vrcp.f32 %v2750_v17  ;;  %v10581_v4 = vpop.eup %10580 }
 0x4a3   : > { %8272 = vmatprep.mubr.f32.mxu1 %v2777_v38  ;;  %v2781_v22 = vmul.f32 %v10581_v4, %v12907_v37 }
 0x4a4   : > { %v10583_v30 = vpop.eup %10582  ;;  %8273 = vmatmul.mubr.f32.gmra.mrb[120].mxu1 %v2778_v3 }
 0x4a5   : > { %v2949_v9 = vpop.permute.xlu1 %2948  ;;  %8275 = vmatprep.mubr.f32.mxu1 %v2779_v57  ;;  %v2955_v18 = vpop.permute.xlu0 %2954  ;;  %v2780_v56 = vmul.f32 %v10583_v30, %v12911_v13  ;;  %v15194_v57 = vld [vmem:[#allocation155_spill] sm:$0xff] }
 0x4a6   : > { %v10585_v47 = vpop.eup %10584 }
 0x4a7   : > { %v2782_v39 = vmul.f32 %v10585_v47, %v12901_v11 }
 0x4a8   : > { %8276 = vmatmul.mubr.f32.gmra.mrb[122].mxu1 %v2780_v56  ;;  %v10587_v49 = vpop.eup %10586 }
 0x4a9   : > { %v2953_v41 = vpop.permute.xlu1 %2952  ;;  %8278 = vmatprep.mubr.f32.mxu1 %v2781_v22  ;;  %v2959_v43 = vpop.permute.xlu0 %2958  ;;  %v2784_v26 = vmul.f32 %v10587_v49, %v12914_v25 }
 0x4ac   : > { %v10589_v24 = vpop.eup %10588  ;;  %8279 = vmatmul.mubr.f32.gmra.mrb[124].mxu1 %v2782_v39  ;;  %v15196_v39 = vld [vmem:[#allocation160_spill] sm:$0xff] }
 0x4ad   : > { %v2957_v6 = vpop.permute.xlu1 %2956  ;;  %v2963_v61 = vpop.permute.xlu0 %2962  ;;  %v2783_v12 = vmul.f32 %v10589_v24, %v12917_v60 }
 0x4af   : > { %8281 = vmatprep.mubr.f32.mxu1 %v2783_v12  ;;  %v15197_v12 = vld [vmem:[#allocation162_spill] sm:$0xff] }
 0x4b0   : > { %8282 = vmatmul.mubr.f32.gmra.mrb[126].mxu1 %v2784_v26 }
 0x4b1   : > { %v2961_v13 = vpop.permute.xlu1 %2960  ;;  %8316 = vmatprep.mubr.msk.f32.mxu1 %vm2367_vm0, %v2947_v15  ;;  %v2967_v37 = vpop.permute.xlu0 %2966 }
 0x4b4   : > { %8317 = vmatmul.mubr.msk.f32.vlgmr.msra.gmra.mrb[128].mxu1 %vm2367_vm0, %v2949_v9 }
 0x4b5   : > { %9559 = vmatpush3.bf16.msra.mxu1 %v15186_v53  ;;  %v2965_v11 = vpop.permute.xlu1 %2964  ;;  %v2971_v0 = vpop.permute.xlu0 %2970  ;;  %8319 = vmatprep.mubr.msk.f32.mxu1 %vm2367_vm0, %v2951_v45 }
 0x4b6   : > { %9561 = vmatprep.subr.bf16.mxu1 %v15187_v44 }
 0x4b8   : > { %8320 = vmatmul.mubr.msk.f32.gmra.mrb[130].mxu1 %vm2367_vm0, %v2953_v41 }
 0x4b9   : > { %9563 = vmatpush3.bf16.msra.mxu1 %v15187_v44  ;;  %v2969_v25 = vpop.permute.xlu1 %2968  ;;  %v2975_v60 = vpop.permute.xlu0 %2974  ;;  %8322 = vmatprep.mubr.msk.f32.mxu1 %vm2367_vm0, %v2955_v18  ;;  %v15195_v18 = vld [vmem:[#allocation156_spill] sm:$0xff] }
 0x4ba   : > { %9565 = vmatprep.subr.bf16.mxu1 %v15188_v16 }
 0x4bc   : > { %8323 = vmatmul.mubr.msk.f32.gmra.mrb[132].mxu1 %vm2367_vm0, %v2957_v6 }
 0x4bd   : > { %9567 = vmatpush3.bf16.msra.mxu1 %v15188_v16  ;;  %v2973_v14 = vpop.permute.xlu1 %2972  ;;  %v10328_v32 = vpop.permute.xlu0 %10327  ;;  %8325 = vmatprep.mubr.msk.f32.mxu1 %vm2367_vm0, %v2959_v43 }
 0x4be   : > { %v10330_v31 = vunpack.i.h.bf16 %v10328_v32  ;;  %v10329_v8 = vunpack.i.l.bf16 %v10328_v32  ;;  %9569 = vmatprep.subr.bf16.mxu1 %v15189_v7 }
 0x4c0   : > { %8326 = vmatmul.mubr.msk.f32.gmra.mrb[134].mxu1 %vm2367_vm0, %v2961_v13  ;;  %v9476_v28 = vpack.c.bf16 %v10330_v31, %v10329_v8 }
 0x4c1   : > { %9571 = vmatpush3.bf16.msra.mxu1 %v15189_v7  ;;  %v2977_v63 = vpop.permute.xlu1 %2976  ;;  %8328 = vmatprep.mubr.msk.f32.mxu1 %vm2367_vm0, %v2963_v61 }
 0x4c2   : > { %9573 = vmatprep.subr.bf16.mxu1 %v15190_v29  ;;  %9477 = vmatprep.subr.bf16.mxu0 %v9476_v28 }
 0x4c3   : > { %9479 = vmatpush3.bf16.msra.mxu0 %v9476_v28  ;;  %v15200_v28 = vld [vmem:[#allocation168_spill] sm:$0xff] }
 0x4c4   : > { %8329 = vmatmul.mubr.msk.f32.gmra.mrb[136].mxu1 %vm2367_vm0, %v2965_v11 }
 0x4c5   : > { %9575 = vmatpush3.bf16.msra.mxu1 %v15190_v29  ;;  %v10333_v40 = vpop.permute.xlu1 %10332  ;;  %8331 = vmatprep.mubr.msk.f32.mxu1 %vm2367_vm0, %v2967_v37  ;;  %v15201_v29 = vld [vmem:[#allocation107_spill] sm:$0xff] }
 0x4c6   : > { %v10335_v23 = vunpack.i.h.bf16 %v10333_v40  ;;  %v10334_v1 = vunpack.i.l.bf16 %v10333_v40  ;;  %9577 = vmatprep.subr.bf16.mxu1 %v15191_v62  ;;  %v15202_v40 = vld [vmem:[#allocation105_spill] sm:$0xff] }
 0x4c8   : > { %8332 = vmatmul.mubr.msk.f32.gmra.mrb[138].mxu1 %vm2367_vm0, %v2969_v25  ;;  %v9480_v10 = vpack.c.bf16 %v10335_v23, %v10334_v1  ;;  %v15203_v23 = vpack.i.bf16 %v15201_v29, %v15202_v40 }
 0x4c9   : > { %9579 = vmatpush3.bf16.msra.mxu1 %v15191_v62  ;;  %v10338_v42 = vpop.permute.xlu1 %10337  ;;  %8334 = vmatprep.mubr.msk.f32.mxu1 %vm2367_vm0, %v2971_v0  ;;  %v15198_v0 = vld [vmem:[#allocation164_spill] sm:$0xff] }
 0x4ca   : > { %v10340_v19 = vunpack.i.h.bf16 %v10338_v42  ;;  %v10339_v20 = vunpack.i.l.bf16 %v10338_v42  ;;  %9581 = vmatprep.subr.bf16.mxu1 %v15192_v35  ;;  %9481 = vmatprep.subr.bf16.mxu0 %v9480_v10  ;;  %v15204_v42 = vld [vmem:[#allocation170_spill] sm:$0xff] }
 0x4cb   : > { %9483 = vmatpush3.bf16.msra.mxu0 %v9480_v10 }
 0x4cc   : > { %8335 = vmatmul.mubr.msk.f32.gmra.mrb[140].mxu1 %vm2367_vm0, %v2973_v14  ;;  %v9484_v21 = vpack.c.bf16 %v10340_v19, %v10339_v20  ;;  %v15199_v14 = vld [vmem:[#allocation166_spill] sm:$0xff]  ;;  %v15205_v20 = vld [vmem:[#allocation117_spill] sm:$0xff] }
 0x4cd   : > { %9583 = vmatpush3.bf16.msra.mxu1 %v15192_v35  ;;  %8337 = vmatprep.mubr.msk.f32.mxu1 %vm2367_vm0, %v2975_v60  ;;  %v15206_v35 = vld [vmem:[#allocation115_spill] sm:$0xff] }
 0x4ce   : > { %9585 = vmatprep.subr.bf16.mxu1 %v15193_v54  ;;  %9485 = vmatprep.subr.bf16.mxu0 %v9484_v21 }
 0x4cf   : > { %9487 = vmatpush3.bf16.msra.mxu0 %v9484_v21  ;;  %v15207_v21 = vpack.i.bf16 %v15205_v20, %v15206_v35 }
 0x4d0   : > { %8338 = vmatmul.mubr.msk.f32.gmra.mrb[142].mxu1 %vm2367_vm0, %v2977_v63 }
 0x4d1   : > { %9587 = vmatpush3.bf16.msra.mxu1 %v15193_v54 }
 0x532   : > { %v8262_v27 = vpop.f32.mrb[112].mxu1 }
 0x533   : > { %2931 = vst.msk [vmem:[#allocation2 + $0x18] sm:$0xff] %vm2367_vm0, %v8262_v27  ;;  %v2851_v2 = vpop.f32.mrb[113].mxu1  ;;  %v15208_v27 = vld [vmem:[#allocation122_spill] sm:$0xff] }
 0x534   : > { %2930 = vst.msk [vmem:[#allocation2] sm:$0xff] %vm2367_vm0, %v2851_v2  ;;  %v15209_v2 = vld [vmem:[#allocation120_spill] sm:$0xff] }
 0x566   : > { %v8265_v51 = vpop.f32.mrb[114].mxu1 }
 0x567   : > { %2933 = vst.msk [vmem:[#allocation2 + $0x48] sm:$0xff] %vm2367_vm0, %v8265_v51  ;;  %v2861_v5 = vpop.f32.mrb[115].mxu1  ;;  %v15210_v51 = vpack.i.bf16 %v15208_v27, %v15209_v2 }
 0x568   : > { %2932 = vst.msk [vmem:[#allocation2 + $0x30] sm:$0xff] %vm2367_vm0, %v2861_v5 }
 0x56b   : > { %v8268_v34 = vpop.f32.mrb[116].mxu1 }
 0x56c   : > { %2935 = vst.msk [vmem:[#allocation2 + $0x78] sm:$0xff] %vm2367_vm0, %v8268_v34  ;;  %v2871_v59 = vpop.f32.mrb[117].mxu1  ;;  %v15211_v34 = vld [vmem:[#allocation157_spill] sm:$0xff] }
 0x56d   : > { %2934 = vst.msk [vmem:[#allocation2 + $0x60] sm:$0xff] %vm2367_vm0, %v2871_v59 }
 0x56f   : > { %v8271_v46 = vpop.f32.mrb[118].mxu1 }
 0x570   : > { %2937 = vst.msk [vmem:[#allocation2 + $0xa8] sm:$0xff] %vm2367_vm0, %v8271_v46  ;;  %v2881_v36 = vpop.f32.mrb[119].mxu1 }
 0x571   : > { %2936 = vst.msk [vmem:[#allocation2 + $0x90] sm:$0xff] %vm2367_vm0, %v2881_v36  ;;  %v15212_v36 = vld [vmem:[#allocation158_spill] sm:$0xff] }
 0x577   : > { %v8274_v52 = vpop.f32.mrb[120].mxu1 }
 0x578   : > { %2939 = vst.msk [vmem:[#allocation2 + $0xd8] sm:$0xff] %vm2367_vm0, %v8274_v52  ;;  %v2891_v55 = vpop.f32.mrb[121].mxu1 }
 0x579   : > { %2938 = vst.msk [vmem:[#allocation2 + $0xc0] sm:$0xff] %vm2367_vm0, %v2891_v55 }
 0x57b   : > { %v8277_v15 = vpop.f32.mrb[122].mxu1 }
 0x57c   : > { %2941 = vst.msk [vmem:[#allocation2 + $0x108] sm:$0xff] %vm2367_vm0, %v8277_v15  ;;  %v2901_v48 = vpop.f32.mrb[123].mxu1  ;;  %v15213_v15 = vld [vmem:[#allocation159_spill] sm:$0xff] }
 0x57d   : > { %2940 = vst.msk [vmem:[#allocation2 + $0xf0] sm:$0xff] %vm2367_vm0, %v2901_v48 }
 0x57f   : > { %v8280_v50 = vpop.f32.mrb[124].mxu1 }
 0x580   : > { %2943 = vst.msk [vmem:[#allocation2 + $0x138] sm:$0xff] %vm2367_vm0, %v8280_v50  ;;  %v2911_v58 = vpop.f32.mrb[125].mxu1 }
 0x581   : > { %2942 = vst.msk [vmem:[#allocation2 + $0x120] sm:$0xff] %vm2367_vm0, %v2911_v58  ;;  %v15214_v58 = vld [vmem:[#allocation161_spill] sm:$0xff] }
 0x583   : > { %v8283_v53 = vpop.f32.mrb[126].mxu1 }
 0x584   : > { %2945 = vst.msk [vmem:[#allocation2 + $0x168] sm:$0xff] %vm2367_vm0, %v8283_v53  ;;  %v2921_v17 = vpop.f32.mrb[127].mxu1 }
 0x585   : > { %2944 = vst.msk [vmem:[#allocation2 + $0x150] sm:$0xff] %vm2367_vm0, %v2921_v17 }
 0x587   : > { %v8318_v45 = vpop.f32.mrb[128].mxu1 }
 0x588   : > { %v3220_v38 = vmul.f32 0.05103104, %v8318_v45  ;;  %v3140_v3 = vpop.f32.mrb[129].mxu1  ;;  %v15215_v45 = vld [vmem:[#allocation163_spill] sm:$0xff] }
 0x589   : > { %v3219_v4 = vmul.f32 0.05103104, %v3140_v3 }
 0x58a   : > { %v13070_v30 = vadd.f32 %v3220_v38, %v15194_v57 }
 0x58b   : > { %v8321_v9 = vpop.f32.mrb[130].mxu1  ;;  %v13073_v56 = vadd.f32 %v3219_v4, %v15195_v18  ;;  %v15216_v4 = vld [vmem:[#allocation165_spill] sm:$0xff] }
 0x58c   : > { %3253 = vmax.xlane.f32.xlu1 %v13070_v30  ;;  %v3150_v47 = vpop.f32.mrb[131].mxu1  ;;  %v3222_v54 = vmul.f32 0.05103104, %v8321_v9 }
 0x58d   : > { %3251 = vmax.xlane.f32.xlu0 %v13073_v56  ;;  %v3221_v5 = vmul.f32 0.05103104, %v3150_v47 }
 0x58e   : > { %v3238_v59 = vadd.f32 %v3222_v54, %v15211_v34 }
 0x58f   : > { %v8324_v22 = vpop.f32.mrb[132].mxu1  ;;  %v3237_v52 = vadd.f32 %v3221_v5, %v15212_v36 }
 0x590   : > { %v3224_v41 = vmul.f32 0.05103104, %v8324_v22  ;;  %v3160_v43 = vpop.f32.mrb[133].mxu1  ;;  %v15217_v22 = vld [vmem:[#allocation167_spill] sm:$0xff] }
 0x591   : > { %v3223_v46 = vmul.f32 0.05103104, %v3160_v43  ;;  %v15218_v43 = vld [vmem:[#allocation169_spill] sm:$0xff] }
 0x592   : > { %v13078_v49 = vadd.f32 %v3224_v41, %v15196_v39 }
 0x593   : > { %v8327_v24 = vpop.f32.mrb[134].mxu1  ;;  %v13116_v48 = vadd.f32 %v3223_v46, %v15213_v15 }
 0x594   : > { %v3226_v6 = vmul.f32 0.05103104, %v8327_v24  ;;  %3261 = vmax.xlane.f32.xlu1 %v13078_v49  ;;  %v3170_v61 = vpop.f32.mrb[135].mxu1 }
 0x595   : > { %v3225_v55 = vmul.f32 0.05103104, %v3170_v61 }
 0x596   : > { %v13082_v26 = vadd.f32 %v3226_v6, %v15197_v12 }
 0x597   : > { %v8330_v13 = vpop.f32.mrb[136].mxu1  ;;  %v13120_v53 = vadd.f32 %v3225_v55, %v15214_v58 }
 0x598   : > { %v3228_v37 = vmul.f32 0.05103104, %v8330_v13  ;;  %3265 = vmax.xlane.f32.xlu1 %v13082_v26  ;;  %v3180_v11 = vpop.f32.mrb[137].mxu1 }
 0x599   : > { %v3227_v50 = vmul.f32 0.05103104, %v3180_v11 }
 0x59a   : > { %v13086_v44 = vadd.f32 %v3228_v37, %v15198_v0 }
 0x59b   : > { %v8333_v25 = vpop.f32.mrb[138].mxu1  ;;  %v13124_v38 = vadd.f32 %v3227_v50, %v15215_v45 }
 0x59c   : > { %v3230_v60 = vmul.f32 0.05103104, %v8333_v25  ;;  %3269 = vmax.xlane.f32.xlu1 %v13086_v44  ;;  %v3190_v16 = vpop.f32.mrb[139].mxu1 }
 0x59d   : > { %v3229_v17 = vmul.f32 0.05103104, %v3190_v16 }
 0x59e   : > { %v13090_v32 = vadd.f32 %v3230_v60, %v15199_v14 }
 0x59f   : > { %v8336_v31 = vpop.f32.mrb[140].mxu1  ;;  %v13128_v9 = vadd.f32 %v3229_v17, %v15216_v4 }
 0x5a0   : > { %v3232_v8 = vmul.f32 0.05103104, %v8336_v31  ;;  %3273 = vmax.xlane.f32.xlu1 %v13090_v32  ;;  %v3200_v7 = vpop.f32.mrb[141].mxu1 }
 0x5a1   : > { %v3231_v3 = vmul.f32 0.05103104, %v3200_v7 }
 0x5a2   : > { %v13094_v63 = vadd.f32 %v3232_v8, %v15200_v28 }
 0x5a3   : > { %10342 = vrot.lane.b32.xlu0 %v15203_v23, %s11161_s21  ;;  %v8339_v1 = vpop.f32.mrb[142].mxu1  ;;  %v13132_v41 = vadd.f32 %v3231_v3, %v15217_v22 }
 0x5a4   : > { %v3234_v62 = vmul.f32 0.05103104, %v8339_v1  ;;  %3277 = vmax.xlane.f32.xlu1 %v13094_v63  ;;  %v3210_v10 = vpop.f32.mrb[143].mxu1  ;;  %v15222_v1 = vld [vmem:[#allocation112_spill] sm:$0xff] }
 0x5a5   : > { %v3233_v47 = vmul.f32 0.05103104, %v3210_v10 }
 0x5a6   : > { %v13102_v19 = vadd.f32 %v3234_v62, %v15204_v42  ;;  %v15223_v62 = vld [vmem:[#allocation110_spill] sm:$0xff] }
 0x5a7   : > { %v13136_v24 = vadd.f32 %v3233_v47, %v15218_v43  ;;  %v15224_v10 = vpack.i.bf16 %v15222_v1, %v15223_v62 }
 0x5a8   : > { %3281 = vmax.xlane.f32.xlu1 %v13102_v19 }
 0x5b9   : > { %10352 = vrot.lane.b32.xlu1 %v15207_v21, %s11161_s21 }
 0x5bd   : > { %10357 = vrot.lane.b32.xlu1 %v15210_v51, %s11161_s21 }
 0x5c2   : > { %3257 = vmax.xlane.f32.xlu0 %v3238_v59 }
 0x5c6   : > { %3255 = vmax.xlane.f32.xlu0 %v3237_v52 }
 0x5ca   : > { %3259 = vmax.xlane.f32.xlu0 %v13116_v48 }
 0x5ce   : > { %3263 = vmax.xlane.f32.xlu0 %v13120_v53 }
 0x5d2   : > { %3267 = vmax.xlane.f32.xlu0 %v13124_v38 }
 0x5d6   : > { %3271 = vmax.xlane.f32.xlu0 %v13128_v9 }
 0x5da   : > { %3275 = vmax.xlane.f32.xlu0 %v13132_v41 }
 0x5de   : > { %3279 = vmax.xlane.f32.xlu0 %v13136_v24 }
 0x619   : > { %v3254_v6 = vpop.xlane.xlu1 %3253 }
 0x61a   : > { %v3284_v61 = vsub.f32 %v13070_v30, %v3254_v6  ;;  %v3252_v13 = vpop.xlane.xlu0 %3251  ;;  %v15219_v30 = vld [vmem:[#allocation127_spill] sm:$0xff] }
 0x61b   : > { %v3283_v37 = vsub.f32 %v13073_v56, %v3252_v13  ;;  %v15220_v56 = vld [vmem:[#allocation125_spill] sm:$0xff] }
 0x61c   : > { %v3301_v11 = vmul.f32 1.442695, %v3284_v61  ;;  %v15221_v40 = vpack.i.bf16 %v15219_v30, %v15220_v56 }
 0x61d   : > { %v3299_v25 = vmul.f32 1.442695, %v3283_v37 }
 0x61e   : > { %10590 = vpow2.f32 %v3301_v11  ;;  %v10343_v60 = vpop.permute.xlu0 %10342 }
 0x61f   : > { %10592 = vpow2.f32 %v3299_v25  ;;  %v10345_v16 = vunpack.i.h.bf16 %v10343_v60  ;;  %v10344_v31 = vunpack.i.l.bf16 %v10343_v60 }
 0x621   : > { %v9488_v8 = vpack.c.bf16 %v10345_v16, %v10344_v31  ;;  %v3262_v23 = vpop.xlane.xlu1 %3261 }
 0x622   : > { %v3288_v5 = vsub.f32 %v13078_v49, %v3262_v23 }
 0x623   : > { %9489 = vmatprep.subr.bf16.mxu0 %v9488_v8 }
 0x624   : > { %9491 = vmatpush3.bf16.msra.mxu0 %v9488_v8  ;;  %v3309_v6 = vmul.f32 1.442695, %v3288_v5 }
 0x625   : > { %v3266_v20 = vpop.xlane.xlu1 %3265 }
 0x626   : > { %v3290_v21 = vsub.f32 %v13082_v26, %v3266_v20 }
 0x628   : > { %v13141_v7 = vpop.eup %10590  ;;  %v3313_v46 = vmul.f32 1.442695, %v3290_v21 }
 0x629   : > { %v13143_v29 = vpop.eup %10592  ;;  %3333 = vadd.xlane.f32.xlu0 %v13141_v7  ;;  %v3270_v35 = vpop.xlane.xlu1 %3269 }
 0x62a   : > { %3331 = vadd.xlane.f32.xlu1 %v13143_v29  ;;  %v3292_v50 = vsub.f32 %v13086_v44, %v3270_v35 }
 0x62c   : > { %v3317_v26 = vmul.f32 1.442695, %v3292_v50  ;;  %v15225_v50 = vld [vmem:[#allocation51_spill] sm:$0xff] }
 0x62d   : > { %v3274_v27 = vpop.xlane.xlu1 %3273 }
 0x62e   : > { %v3294_v61 = vsub.f32 %v13090_v32, %v3274_v27 }
 0x630   : > { %v3321_v37 = vmul.f32 1.442695, %v3294_v61 }
 0x631   : > { %v3278_v3 = vpop.xlane.xlu1 %3277 }
 0x632   : > { %v3296_v49 = vsub.f32 %v13094_v63, %v3278_v3 }
 0x634   : > { %v3325_v16 = vmul.f32 1.442695, %v3296_v49 }
 0x635   : > { %v3282_v44 = vpop.xlane.xlu1 %3281 }
 0x636   : > { %v3298_v32 = vsub.f32 %v13102_v19, %v3282_v44 }
 0x638   : > { %v3329_v56 = vmul.f32 1.442695, %v3298_v32 }
 0x63b   : > { %10362 = vrot.lane.b32.xlu1 %v15221_v40, %s11161_s21 }
 0x63f   : > { %10347 = vrot.lane.b32.xlu0 %v15224_v10, %s11161_s21 }
 0x64f   : > { %v3258_v54 = vpop.xlane.xlu0 %3257 }
 0x650   : > { %v3286_v2 = vsub.f32 %v3238_v59, %v3258_v54 }
 0x652   : > { %v3305_v51 = vmul.f32 1.442695, %v3286_v2 }
 0x653   : > { %v3256_v55 = vpop.xlane.xlu0 %3255 }
 0x654   : > { %10594 = vpow2.f32 %v3305_v51  ;;  %v3285_v17 = vsub.f32 %v3237_v52, %v3256_v55 }
 0x655   : > { %10596 = vpow2.f32 %v3313_v46 }
 0x656   : > { %v3303_v47 = vmul.f32 1.442695, %v3285_v17  ;;  %v15226_v17 = vld [vmem:[#allocation48_spill] sm:$0xff] }
 0x657   : > { %v3260_v13 = vpop.xlane.xlu0 %3259  ;;  %v15227_v3 = vpack.i.bf16 %v15225_v50, %v15226_v17  ;;  %v15236_v17 = vld [vmem:[#allocation61_spill] sm:$0xff] }
 0x658   : > { %10598 = vpow2.f32 %v3303_v47  ;;  %v3287_v59 = vsub.f32 %v13116_v48, %v3260_v13  ;;  %v15228_v47 = vld [vmem:[#allocation43_spill] sm:$0xff] }
 0x659   : > { %10600 = vpow2.f32 %v3309_v6  ;;  %v15229_v6 = vld [vmem:[#allocation40_spill] sm:$0xff]  ;;  %v15231_v13 = vld [vmem:[#allocation59_spill] sm:$0xff] }
 0x65a   : > { %10602 = vpow2.f32 %v3317_v26  ;;  %v3307_v25 = vmul.f32 1.442695, %v3287_v59  ;;  %v15230_v61 = vpack.i.bf16 %v15228_v47, %v15229_v6  ;;  %v15232_v26 = vld [vmem:[#allocation56_spill] sm:$0xff]  ;;  %v15238_v47 = vld [vmem:[#allocation75_spill] sm:$0xff] }
 0x65b   : > { %v3264_v11 = vpop.xlane.xlu0 %3263  ;;  %10604 = vpow2.f32 %v3321_v37  ;;  %v15233_v59 = vpack.i.bf16 %v15231_v13, %v15232_v26  ;;  %v10353_v37 = vpop.permute.xlu1 %10352  ;;  %v15239_v26 = vld [vmem:[#allocation81_spill] sm:$0xff] }
 0x65c   : > { %v3289_v52 = vsub.f32 %v13120_v53, %v3264_v11  ;;  %10606 = vpow2.f32 %v3307_v25 }
 0x65d   : > { %10608 = vpow2.f32 %v3325_v16  ;;  %v10354_v16 = vunpack.i.l.bf16 %v10353_v37 }
 0x65e   : > { %v13162_v60 = vpop.eup %10594  ;;  %v3311_v48 = vmul.f32 1.442695, %v3289_v52  ;;  %v10355_v52 = vunpack.i.h.bf16 %v10353_v37 }
 0x65f   : > { %v3268_v31 = vpop.xlane.xlu0 %3267  ;;  %3337 = vadd.xlane.f32.xlu1 %v13162_v60  ;;  %v13167_v63 = vpop.eup %10596 }
 0x660   : > { %v3291_v8 = vsub.f32 %v13124_v38, %v3268_v31  ;;  %10610 = vpow2.f32 %v3311_v48  ;;  %v10358_v49 = vpop.permute.xlu1 %10357 }
 0x661   : > { %10612 = vpow2.f32 %v3329_v56  ;;  %v10359_v56 = vunpack.i.l.bf16 %v10358_v49 }
 0x662   : > { %v13169_v30 = vpop.eup %10598  ;;  %v3315_v19 = vmul.f32 1.442695, %v3291_v8  ;;  %v10360_v8 = vunpack.i.h.bf16 %v10358_v49 }
 0x663   : > { %v3272_v53 = vpop.xlane.xlu0 %3271  ;;  %3345 = vadd.xlane.f32.xlu1 %v13167_v63  ;;  %3335 = vadd.xlane.f32.xlu0 %v13169_v30  ;;  %v13174_v23 = vpop.eup %10600 }
 0x664   : > { %v3293_v40 = vsub.f32 %v13128_v9, %v3272_v53  ;;  %v13176_v1 = vpop.eup %10602  ;;  %10614 = vpow2.f32 %v3315_v19  ;;  %v9496_v53 = vpack.c.bf16 %v10355_v52, %v10354_v16  ;;  %v15240_v16 = vld [vmem:[#allocation87_spill] sm:$0xff] }
 0x665   : > { %v13181_v20 = vpop.eup %10604 }
 0x666   : > { %v3319_v62 = vmul.f32 1.442695, %v3293_v40  ;;  %v13183_v35 = vpop.eup %10606 }
 0x667   : > { %v3276_v38 = vpop.xlane.xlu0 %3275  ;;  %3349 = vadd.xlane.f32.xlu1 %v13176_v1  ;;  %3341 = vadd.xlane.f32.xlu0 %v13174_v23  ;;  %v13188_v27 = vpop.eup %10608 }
 0x668   : > { %v3295_v10 = vsub.f32 %v13132_v41, %v3276_v38  ;;  %10616 = vpow2.f32 %v3319_v62 }
 0x66a   : > { %v3323_v21 = vmul.f32 1.442695, %v3295_v10  ;;  %v13190_v2 = vpop.eup %10610  ;;  %v9500_v10 = vpack.c.bf16 %v10360_v8, %v10359_v56 }
 0x66b   : > { %3353 = vadd.xlane.f32.xlu1 %v13181_v20  ;;  %3339 = vadd.xlane.f32.xlu0 %v13183_v35  ;;  %v3280_v9 = vpop.xlane.xlu0 %3279  ;;  %v13194_v51 = vpop.eup %10612 }
 0x66c   : > { %v3297_v54 = vsub.f32 %v13136_v24, %v3280_v9  ;;  %10618 = vpow2.f32 %v3323_v21 }
 0x66e   : > { %v3327_v41 = vmul.f32 1.442695, %v3297_v54  ;;  %v13196_v5 = vpop.eup %10614 }
 0x66f   : > { %3357 = vadd.xlane.f32.xlu1 %v13188_v27  ;;  %3343 = vadd.xlane.f32.xlu0 %v13190_v2 }
 0x670   : > { %10620 = vpow2.f32 %v3327_v41  ;;  %v15234_v41 = vld [vmem:[#allocation45_spill] sm:$0xff] }
 0x672   : > { %v13200_v24 = vpop.eup %10616 }
 0x673   : > { %3361 = vadd.xlane.f32.xlu1 %v13194_v51  ;;  %3347 = vadd.xlane.f32.xlu0 %v13196_v5 }
 0x676   : > { %v13203_v46 = vpop.eup %10618 }
 0x677   : > { %3351 = vadd.xlane.f32.xlu0 %v13200_v24 }
 0x67a   : > { %v13206_v55 = vpop.eup %10620 }
 0x67b   : > { %3355 = vadd.xlane.f32.xlu0 %v13203_v46 }
 0x67f   : > { %3359 = vadd.xlane.f32.xlu0 %v13206_v55 }
 0x684   : > { %10372 = vrot.lane.b32.xlu1 %v15227_v3, %s11161_s21 }
 0x695   : > { %10367 = vrot.lane.b32.xlu0 %v15230_v61, %s11161_s21 }
 0x699   : > { %10377 = vrot.lane.b32.xlu0 %v15233_v59, %s11161_s21 }
 0x6b6   : > { %v3334_v11 = vpop.xlane.xlu0 %3333 }
 0x6b7   : > { %v3332_v44 = vpop.xlane.xlu1 %3331 }
 0x6b8   : > { %10622 = vrcp.f32 %v3332_v44 }
 0x6b9   : > { %10624 = vrcp.f32 %v3334_v11 }
 0x6ba   : > { %v10348_v25 = vpop.permute.xlu0 %10347 }
 0x6bb   : > { %v10350_v32 = vunpack.i.h.bf16 %v10348_v25  ;;  %v10349_v31 = vunpack.i.l.bf16 %v10348_v25  ;;  %v10363_v19 = vpop.permute.xlu1 %10362 }
 0x6bc   : > { %v10365_v38 = vunpack.i.h.bf16 %v10363_v19  ;;  %v10364_v62 = vunpack.i.l.bf16 %v10363_v19  ;;  %v15241_v19 = vld [vmem:[#allocation93_spill] sm:$0xff] }
 0x6bd   : > { %v9492_v48 = vpack.c.bf16 %v10350_v32, %v10349_v31 }
 0x6be   : > { %v9504_v21 = vpack.c.bf16 %v10365_v38, %v10364_v62 }
 0x6bf   : > { %9493 = vmatprep.subr.bf16.mxu0 %v9492_v48 }
 0x6c0   : > { %9495 = vmatpush3.bf16.msra.mxu0 %v9492_v48 }
 0x6c1   : > { %9497 = vmatprep.subr.bf16.mxu0 %v9496_v53 }
 0x6c2   : > { %v10623_v40 = vpop.eup %10622 }
 0x6c3   : > { %v3379_v9 = vmul.f32 %v10623_v40, %v13143_v29  ;;  %v10625_v54 = vpop.eup %10624  ;;  %v15235_v29 = vld [vmem:[#allocation53_spill] sm:$0xff] }
 0x6c4   : > { %9499 = vmatpush3.bf16.msra.mxu0 %v9496_v53  ;;  %v3380_v50 = vmul.f32 %v10625_v54, %v13141_v7  ;;  %v15237_v7 = vld [vmem:[#allocation69_spill] sm:$0xff] }
 0x6c5   : > { %9501 = vmatprep.subr.bf16.mxu0 %v9500_v10  ;;  %8372 = vmatprep.mubr.f32.mxu0 %v3379_v9 }
 0x6c8   : > { %9503 = vmatpush3.bf16.msra.mxu0 %v9500_v10 }
 0x6c9   : > { %9505 = vmatprep.subr.bf16.mxu0 %v9504_v21 }
 0x6cc   : > { %9507 = vmatpush3.bf16.msra.mxu0 %v9504_v21 }
 0x6cd   : > { %9510 = vmatprep.subr.msk.bf16.mxu0 %vm12120_vm1, %v15234_v41 }
 0x6cf   : > { %8373 = vmatmul.mubr.f32.vlgmr.msra.gmra.mrb[112].mxu0 %v3380_v50 }
 0x6d5   : > { %9513 = vmatpush3.bf16.xpose.msk.msra.mxu0 %vm12120_vm1, %v15234_v41 }
 0x6d6   : > { %9516 = vmatprep.subr.msk.bf16.mxu0 %vm12120_vm1, %v15235_v29 }
 0x6dd   : > { %9519 = vmatpush3.bf16.xpose.msk.msra.mxu0 %vm12120_vm1, %v15235_v29 }
 0x6de   : > { %9522 = vmatprep.subr.msk.bf16.mxu0 %vm12120_vm1, %v15236_v17 }
 0x6e5   : > { %9525 = vmatpush3.bf16.xpose.msk.msra.mxu0 %vm12120_vm1, %v15236_v17 }
 0x6e6   : > { %9528 = vmatprep.subr.msk.bf16.mxu0 %vm12120_vm1, %v15237_v7 }
 0x6ec   : > { %v3338_v3 = vpop.xlane.xlu1 %3337 }
 0x6ed   : > { %9531 = vmatpush3.bf16.xpose.msk.msra.mxu0 %vm12120_vm1, %v15237_v7  ;;  %10626 = vrcp.f32 %v3338_v3 }
 0x6ee   : > { %9534 = vmatprep.subr.msk.bf16.mxu0 %vm12120_vm1, %v15238_v47 }
 0x6f0   : > { %v3336_v6 = vpop.xlane.xlu0 %3335  ;;  %v3346_v61 = vpop.xlane.xlu1 %3345 }
 0x6f1   : > { %10628 = vrcp.f32 %v3336_v6 }
 0x6f4   : > { %v3342_v13 = vpop.xlane.xlu0 %3341  ;;  %v3350_v59 = vpop.xlane.xlu1 %3349 }
 0x6f5   : > { %9537 = vmatpush3.bf16.xpose.msk.msra.mxu0 %vm12120_vm1, %v15238_v47  ;;  %10630 = vrcp.f32 %v3342_v13 }
 0x6f6   : > { %9540 = vmatprep.subr.msk.bf16.mxu0 %vm12120_vm1, %v15239_v26 }
 0x6f7   : > { %v10627_v49 = vpop.eup %10626 }
 0x6f8   : > { %v3340_v37 = vpop.xlane.xlu0 %3339  ;;  %v3354_v25 = vpop.xlane.xlu1 %3353  ;;  %v3382_v32 = vmul.f32 %v10627_v49, %v13162_v60  ;;  %v15244_v49 = vld [vmem:[#allocation18_spill] sm:$0xff] }
 0x6f9   : > { %10632 = vrcp.f32 %v3340_v37  ;;  %v15242_v37 = vld [vmem:[#allocation16_spill] sm:$0xff] }
 0x6fa   : > { %10634 = vrcp.f32 %v3346_v61 }
 0x6fb   : > { %v10629_v11 = vpop.eup %10628 }
 0x6fc   : > { %v3344_v44 = vpop.xlane.xlu0 %3343  ;;  %v3381_v52 = vmul.f32 %v10629_v11, %v13169_v30  ;;  %v3358_v8 = vpop.xlane.xlu1 %3357  ;;  %v15245_v11 = vld [vmem:[#allocation19_spill] sm:$0xff] }
 0x6fd   : > { %9543 = vmatpush3.bf16.xpose.msk.msra.mxu0 %vm12120_vm1, %v15239_v26  ;;  %10636 = vrcp.f32 %v3344_v44  ;;  %v15249_v44 = vld [vmem:[#allocation23_spill] sm:$0xff] }
 0x6fe   : > { %9546 = vmatprep.subr.msk.bf16.mxu0 %vm12120_vm1, %v15240_v16  ;;  %8375 = vmatprep.mubr.f32.mxu0 %v3381_v52  ;;  %10638 = vrcp.f32 %v3350_v59  ;;  %v15251_v52 = vld [vmem:[#allocation25_spill] sm:$0xff] }
 0x6ff   : > { %8376 = vmatmul.mubr.f32.gmra.mrb[114].mxu0 %v3382_v32  ;;  %v10631_v48 = vpop.eup %10630  ;;  %v15253_v32 = vld [vmem:[#allocation27_spill] sm:$0xff] }
 0x700   : > { %v3348_v31 = vpop.xlane.xlu0 %3347  ;;  %v3384_v60 = vmul.f32 %v10631_v48, %v13174_v23  ;;  %v3362_v10 = vpop.xlane.xlu1 %3361  ;;  %v15255_v48 = vld [vmem:[#allocation29_spill] sm:$0xff] }
 0x701   : > { %10640 = vrcp.f32 %v3348_v31  ;;  %v15254_v31 = vld [vmem:[#allocation28_spill] sm:$0xff] }
 0x702   : > { %10642 = vrcp.f32 %v3354_v25  ;;  %v15250_v25 = vld [vmem:[#allocation24_spill] sm:$0xff] }
 0x703   : > { %v10633_v56 = vpop.eup %10632 }
 0x704   : > { %v3352_v53 = vpop.xlane.xlu0 %3351  ;;  %v3383_v30 = vmul.f32 %v10633_v56, %v13183_v35  ;;  %v10635_v40 = vpop.eup %10634  ;;  %v15257_v56 = vld [vmem:[#allocation31_spill] sm:$0xff] }
 0x705   : > { %10644 = vrcp.f32 %v3352_v53  ;;  %9549 = vmatpush3.bf16.xpose.msk.msra.mxu0 %vm12120_vm1, %v15240_v16  ;;  %v3386_v21 = vmul.f32 %v10635_v40, %v13167_v63  ;;  %v15252_v16 = vld [vmem:[#allocation26_spill] sm:$0xff] }
 0x706   : > { %9552 = vmatprep.subr.msk.bf16.mxu0 %vm12120_vm1, %v15241_v19  ;;  %8378 = vmatprep.mubr.f32.mxu0 %v3383_v30  ;;  %10646 = vrcp.f32 %v3358_v8  ;;  %v15256_v8 = vld [vmem:[#allocation30_spill] sm:$0xff] }
 0x707   : > { %v10637_v38 = vpop.eup %10636  ;;  %8379 = vmatmul.mubr.f32.gmra.mrb[116].mxu0 %v3384_v60 }
 0x708   : > { %v3356_v62 = vpop.xlane.xlu0 %3355  ;;  %v3385_v9 = vmul.f32 %v10637_v38, %v13190_v2  ;;  %v10639_v54 = vpop.eup %10638 }
 0x709   : > { %10648 = vrcp.f32 %v3356_v62  ;;  %v3388_v29 = vmul.f32 %v10639_v54, %v13176_v1 }
 0x70a   : > { %8381 = vmatprep.mubr.f32.mxu0 %v3385_v9  ;;  %10650 = vrcp.f32 %v3362_v10 }
 0x70b   : > { %v10641_v35 = vpop.eup %10640  ;;  %8382 = vmatmul.mubr.f32.gmra.mrb[118].mxu0 %v3386_v21 }
 0x70c   : > { %v3360_v41 = vpop.xlane.xlu0 %3359  ;;  %v3387_v23 = vmul.f32 %v10641_v35, %v13196_v5  ;;  %v10643_v50 = vpop.eup %10642 }
 0x70d   : > { %10652 = vrcp.f32 %v3360_v41  ;;  %9555 = vmatpush3.bf16.xpose.msk.msra.mxu0 %vm12120_vm1, %v15241_v19  ;;  %v3390_v6 = vmul.f32 %v10643_v50, %v13181_v20 }
 0x70e   : > { %8384 = vmatprep.mubr.f32.mxu0 %v3387_v23 }
 0x70f   : > { %v10645_v17 = vpop.eup %10644  ;;  %8385 = vmatmul.mubr.f32.gmra.mrb[120].mxu0 %v3388_v29 }
 0x710   : > { %v10368_v63 = vpop.permute.xlu0 %10367  ;;  %v3389_v2 = vmul.f32 %v10645_v17, %v13200_v24  ;;  %v10647_v47 = vpop.eup %10646 }
 0x711   : > { %v10370_v7 = vunpack.i.h.bf16 %v10368_v63  ;;  %v10369_v3 = vunpack.i.l.bf16 %v10368_v63  ;;  %v3392_v24 = vmul.f32 %v10647_v47, %v13188_v27  ;;  %v15246_v27 = vld [vmem:[#allocation20_spill] sm:$0xff] }
 0x712   : > { %8387 = vmatprep.mubr.f32.mxu0 %v3389_v2 }
 0x713   : > { %v10649_v61 = vpop.eup %10648  ;;  %v13281_v13 = vpack.c.bf16 %v10370_v7, %v10369_v3  ;;  %8388 = vmatmul.mubr.f32.gmra.mrb[122].mxu0 %v3390_v6 }
 0x714   : > { %v3391_v5 = vmul.f32 %v10649_v61, %v13203_v46  ;;  %v10651_v1 = vpop.eup %10650  ;;  %v15243_v46 = vld [vmem:[#allocation17_spill] sm:$0xff] }
 0x715   : > { %9590 = vmatprep.subr.msk.bf16.mxu1 %vm12120_vm1, %v13281_v13  ;;  %v3394_v20 = vmul.f32 %v10651_v1, %v13194_v51  ;;  %v15248_v51 = vld [vmem:[#allocation22_spill] sm:$0xff] }
 0x716   : > { %8390 = vmatprep.mubr.f32.mxu0 %v3391_v5 }
 0x717   : > { %v10653_v26 = vpop.eup %10652  ;;  %8391 = vmatmul.mubr.f32.gmra.mrb[124].mxu0 %v3392_v24 }
 0x718   : > { %v3393_v59 = vmul.f32 %v10653_v26, %v13206_v55  ;;  %v15247_v55 = vld [vmem:[#allocation21_spill] sm:$0xff] }
 0x71a   : > { %8393 = vmatprep.mubr.f32.mxu0 %v3393_v59 }
 0x71b   : > { %8394 = vmatmul.mubr.f32.gmra.mrb[126].mxu0 %v3394_v20 }
 0x71c   : > { %8428 = vmatprep.mubr.msk.f32.mxu0 %vm2367_vm0, %v15242_v37 }
 0x71f   : > { %8429 = vmatmul.mubr.msk.f32.vlgmr.msra.gmra.mrb[128].mxu0 %vm2367_vm0, %v15243_v46 }
 0x720   : > { %8431 = vmatprep.mubr.msk.f32.mxu0 %vm2367_vm0, %v15244_v49 }
 0x723   : > { %8432 = vmatmul.mubr.msk.f32.gmra.mrb[130].mxu0 %vm2367_vm0, %v15245_v11 }
 0x724   : > { %8434 = vmatprep.mubr.msk.f32.mxu0 %vm2367_vm0, %v15246_v27 }
 0x727   : > { %8435 = vmatmul.mubr.msk.f32.gmra.mrb[132].mxu0 %vm2367_vm0, %v15247_v55 }
 0x728   : > { %8437 = vmatprep.mubr.msk.f32.mxu0 %vm2367_vm0, %v15248_v51 }
 0x72b   : > { %8438 = vmatmul.mubr.msk.f32.gmra.mrb[134].mxu0 %vm2367_vm0, %v15249_v44 }
 0x72c   : > { %8440 = vmatprep.mubr.msk.f32.mxu0 %vm2367_vm0, %v15250_v25 }
 0x72f   : > { %8441 = vmatmul.mubr.msk.f32.gmra.mrb[136].mxu0 %vm2367_vm0, %v15251_v52 }
 0x730   : > { %8443 = vmatprep.mubr.msk.f32.mxu0 %vm2367_vm0, %v15252_v16 }
 0x733   : > { %8444 = vmatmul.mubr.msk.f32.gmra.mrb[138].mxu0 %vm2367_vm0, %v15253_v32 }
 0x734   : > { %8446 = vmatprep.mubr.msk.f32.mxu0 %vm2367_vm0, %v15254_v31 }
 0x737   : > { %8447 = vmatmul.mubr.msk.f32.gmra.mrb[140].mxu0 %vm2367_vm0, %v15255_v48 }
 0x738   : > { %8449 = vmatprep.mubr.msk.f32.mxu0 %vm2367_vm0, %v15256_v8 }
 0x73b   : > { %8450 = vmatmul.mubr.msk.f32.gmra.mrb[142].mxu0 %vm2367_vm0, %v15257_v56 }
 0x7a2   : > { %v13322_v53 = vpop.f32.mrb[112].mxu0 }
 0x7a3   : > { %15258 = vst [vmem:[#allocation98_spill] sm:$0xff] %v13322_v53  ;;  %v13324_v30 = vpop.f32.mrb[113].mxu0  ;;  %v15281_v53 = vld [vmem:[#allocation78_spill] sm:$0xff] }
 0x7a4   : > { %15259 = vst [vmem:[#allocation101_spill] sm:$0xff] %v13324_v30 }
 0x7d2   : > { %v13326_v19 = vpop.f32.mrb[114].mxu0 }
 0x7d3   : > { %15260 = vst [vmem:[#allocation104_spill] sm:$0xff] %v13326_v19  ;;  %v13328_v60 = vpop.f32.mrb[115].mxu0 }
 0x7d4   : > { %15261 = vst [vmem:[#allocation109_spill] sm:$0xff] %v13328_v60  ;;  %v15280_v60 = vld [vmem:[#allocation80_spill] sm:$0xff] }
 0x7da   : > { %v13330_v40 = vpop.f32.mrb[116].mxu0 }
 0x7db   : > { %15262 = vst [vmem:[#allocation114_spill] sm:$0xff] %v13330_v40  ;;  %v13332_v38 = vpop.f32.mrb[117].mxu0 }
 0x7dc   : > { %15263 = vst [vmem:[#allocation119_spill] sm:$0xff] %v13332_v38 }
 0x7de   : > { %v13334_v62 = vpop.f32.mrb[118].mxu0 }
 0x7df   : > { %15264 = vst [vmem:[#allocation124_spill] sm:$0xff] %v13334_v62  ;;  %v13336_v10 = vpop.f32.mrb[119].mxu0 }
 0x7e0   : > { %15265 = vst [vmem:[#allocation129_spill] sm:$0xff] %v13336_v10  ;;  %v15278_v10 = vld [vmem:[#allocation72_spill] sm:$0xff] }
 0x7e2   : > { %v13338_v9 = vpop.f32.mrb[120].mxu0 }
 0x7e3   : > { %15266 = vst [vmem:[#allocation155_spill] sm:$0xff] %v13338_v9  ;;  %v13340_v21 = vpop.f32.mrb[121].mxu0 }
 0x7e4   : > { %15267 = vst [vmem:[#allocation156_spill] sm:$0xff] %v13340_v21 }
 0x7e6   : > { %v13342_v54 = vpop.f32.mrb[122].mxu0 }
 0x7e7   : > { %15268 = vst [vmem:[#allocation160_spill] sm:$0xff] %v13342_v54  ;;  %v13344_v35 = vpop.f32.mrb[123].mxu0  ;;  %v15275_v54 = vld [vmem:[#allocation64_spill] sm:$0xff] }
 0x7e8   : > { %15269 = vst [vmem:[#allocation162_spill] sm:$0xff] %v13344_v35 }
 0x7ea   : > { %v13346_v41 = vpop.f32.mrb[124].mxu0 }
 0x7eb   : > { %15270 = vst [vmem:[#allocation164_spill] sm:$0xff] %v13346_v41  ;;  %v13348_v23 = vpop.f32.mrb[125].mxu0 }
 0x7ec   : > { %15271 = vst [vmem:[#allocation107_spill] sm:$0xff] %v13348_v23  ;;  %v15274_v23 = vld [vmem:[#allocation67_spill] sm:$0xff] }
 0x7ee   : > { %v13350_v50 = vpop.f32.mrb[126].mxu0 }
 0x7ef   : > { %15272 = vst [vmem:[#allocation105_spill] sm:$0xff] %v13350_v50  ;;  %v13352_v29 = vpop.f32.mrb[127].mxu0 }
 0x7f0   : > { %15273 = vst [vmem:[#allocation117_spill] sm:$0xff] %v13352_v29 }
 0x7f2   : > { %v8430_v17 = vpop.f32.mrb[128].mxu0 }
 0x7f3   : > { %v3927_v63 = vmul.f32 0.05103104, %v8430_v17  ;;  %v3847_v2 = vpop.f32.mrb[129].mxu0 }
 0x7f4   : > { %v3926_v7 = vmul.f32 0.05103104, %v3847_v2 }
 0x7f5   : > { %v13355_v3 = vadd.f32 %v3927_v63, %v15194_v57 }
 0x7f6   : > { %v13358_v47 = vadd.f32 %v3926_v7, %v15195_v18  ;;  %v8433_v6 = vpop.f32.mrb[130].mxu0 }
 0x7f7   : > { %3960 = vmax.xlane.f32.xlu1 %v13355_v3  ;;  %v3857_v61 = vpop.f32.mrb[131].mxu0 }
 0x7f8   : > { %v3928_v5 = vmul.f32 0.05103104, %v3857_v61  ;;  %3958 = vmax.xlane.f32.xlu0 %v13358_v47 }
 0x7fa   : > { %v13363_v1 = vadd.f32 %v3928_v5, %v15212_v36  ;;  %v8436_v24 = vpop.f32.mrb[132].mxu0 }
 0x7fb   : > { %v3867_v26 = vpop.f32.mrb[133].mxu0 }
 0x7fc   : > { %v3930_v59 = vmul.f32 0.05103104, %v3867_v26  ;;  %3962 = vmax.xlane.f32.xlu0 %v13363_v1 }
 0x7fe   : > { %v13367_v20 = vadd.f32 %v3930_v59, %v15213_v15  ;;  %v8439_v17 = vpop.f32.mrb[134].mxu0 }
 0x7ff   : > { %v3877_v63 = vpop.f32.mrb[135].mxu0 }
 0x800   : > { %v3932_v2 = vmul.f32 0.05103104, %v3877_v63  ;;  %3966 = vmax.xlane.f32.xlu0 %v13367_v20  ;;  %v15276_v63 = vpack.i.bf16 %v15274_v23, %v15275_v54  ;;  %v3929_v23 = vmul.f32 0.05103104, %v8433_v6 }
 0x802   : > { %v13371_v7 = vadd.f32 %v3932_v2, %v15214_v58  ;;  %v8442_v61 = vpop.f32.mrb[136].mxu0 }
 0x803   : > { %v3887_v50 = vpop.f32.mrb[137].mxu0 }
 0x804   : > { %v3934_v5 = vmul.f32 0.05103104, %v3887_v50  ;;  %3970 = vmax.xlane.f32.xlu0 %v13371_v7 }
 0x806   : > { %v13375_v26 = vadd.f32 %v3934_v5, %v15215_v45  ;;  %v8445_v29 = vpop.f32.mrb[138].mxu0 }
 0x807   : > { %v3897_v41 = vpop.f32.mrb[139].mxu0  ;;  %v3937_v6 = vmul.f32 0.05103104, %v8445_v29  ;;  %v13417_v29 = vpop.permute.xlu1 %10372 }
 0x808   : > { %v3936_v59 = vmul.f32 0.05103104, %v3897_v41  ;;  %10382 = vrot.lane.b32.xlu1 %v15276_v63, %s11161_s21  ;;  %3974 = vmax.xlane.f32.xlu0 %v13375_v26  ;;  %v3931_v63 = vmul.f32 0.05103104, %v8436_v24 }
 0x809   : > { %v13406_v24 = vadd.f32 %v3937_v6, %v15199_v14 }
 0x80a   : > { %v13383_v2 = vadd.f32 %v3936_v59, %v15216_v4  ;;  %v8448_v35 = vpop.f32.mrb[140].mxu0  ;;  %v3945_v59 = vadd.f32 %v3929_v23, %v15211_v34  ;;  %v13419_v23 = vpop.permute.xlu0 %10377 }
 0x80b   : > { %v3907_v50 = vpop.f32.mrb[141].mxu0 }
 0x80c   : > { %v3938_v9 = vmul.f32 0.05103104, %v3907_v50  ;;  %3978 = vmax.xlane.f32.xlu0 %v13383_v2  ;;  %v15277_v50 = vld [vmem:[#allocation74_spill] sm:$0xff] }
 0x80d   : > { %v15279_v40 = vpack.i.bf16 %v15277_v50, %v15278_v10  ;;  %v3939_v10 = vmul.f32 0.05103104, %v8448_v35 }
 0x80e   : > { %v13387_v5 = vadd.f32 %v3938_v9, %v15217_v22  ;;  %v8451_v21 = vpop.f32.mrb[142].mxu0  ;;  %v3947_v9 = vadd.f32 %v3931_v63, %v15196_v39 }
 0x80f   : > { %v3917_v41 = vpop.f32.mrb[143].mxu0 }
 0x810   : > { %v3940_v62 = vmul.f32 0.05103104, %v3917_v41  ;;  %3982 = vmax.xlane.f32.xlu0 %v13387_v5  ;;  %v3933_v41 = vmul.f32 0.05103104, %v8439_v17  ;;  %v3941_v17 = vmul.f32 0.05103104, %v8451_v21 }
 0x812   : > { %v13391_v54 = vadd.f32 %v3940_v62, %v15218_v43  ;;  %v3949_v38 = vadd.f32 %v3933_v41, %v15197_v12  ;;  %v3935_v62 = vmul.f32 0.05103104, %v8442_v61  ;;  %v13414_v61 = vadd.f32 %v3941_v17, %v15204_v42 }
 0x814   : > { %3986 = vmax.xlane.f32.xlu0 %v13391_v54  ;;  %v13402_v19 = vadd.f32 %v3935_v62, %v15198_v0 }
 0x82a   : > { %10387 = vrot.lane.b32.xlu0 %v15279_v40, %s11161_s21  ;;  %v13410_v40 = vadd.f32 %v3939_v10, %v15200_v28 }
 0x82c   : > { %3964 = vmax.xlane.f32.xlu1 %v3945_v59 }
 0x830   : > { %3968 = vmax.xlane.f32.xlu1 %v3947_v9 }
 0x834   : > { %3972 = vmax.xlane.f32.xlu1 %v3949_v38 }
 0x838   : > { %3976 = vmax.xlane.f32.xlu1 %v13402_v19 }
 0x83c   : > { %3980 = vmax.xlane.f32.xlu1 %v13406_v24 }
 0x840   : > { %3984 = vmax.xlane.f32.xlu1 %v13410_v40 }
 0x844   : > { %3988 = vmax.xlane.f32.xlu1 %v13414_v61 }
 0x884   : > { %v3961_v63 = vpop.xlane.xlu1 %3960 }
 0x885   : > { %v3991_v35 = vsub.f32 %v13355_v3, %v3961_v63  ;;  %v3959_v50 = vpop.xlane.xlu0 %3958  ;;  %v15282_v3 = vpack.i.bf16 %v15280_v60, %v15281_v53 }
 0x886   : > { %v3990_v41 = vsub.f32 %v13358_v47, %v3959_v50  ;;  %v15283_v47 = vld [vmem:[#allocation86_spill] sm:$0xff] }
 0x887   : > { %v4008_v62 = vmul.f32 1.442695, %v3991_v35  ;;  %v15284_v35 = vld [vmem:[#allocation84_spill] sm:$0xff] }
 0x888   : > { %v4006_v6 = vmul.f32 1.442695, %v3990_v41  ;;  %v15285_v50 = vpack.i.bf16 %v15283_v47, %v15284_v35 }
 0x889   : > { %10654 = vpow2.f32 %v4008_v62  ;;  %v3963_v17 = vpop.xlane.xlu0 %3962  ;;  %v13437_v62 = vpop.permute.xlu1 %10382 }
 0x88a   : > { %10656 = vpow2.f32 %v4006_v6  ;;  %v3992_v6 = vsub.f32 %v13363_v1, %v3963_v17 }
 0x88c   : > { %v4010_v43 = vmul.f32 1.442695, %v3992_v6 }
 0x88d   : > { %v3967_v63 = vpop.xlane.xlu0 %3966 }
 0x88e   : > { %v3994_v45 = vsub.f32 %v13367_v20, %v3967_v63  ;;  %10658 = vpow2.f32 %v4010_v43 }
 0x890   : > { %v4014_v15 = vmul.f32 1.442695, %v3994_v45 }
 0x891   : > { %v3971_v41 = vpop.xlane.xlu0 %3970 }
 0x892   : > { %v3996_v36 = vsub.f32 %v13371_v7, %v3971_v41 }
 0x893   : > { %v13423_v21 = vpop.eup %10654 }
 0x894   : > { %v13425_v10 = vpop.eup %10656  ;;  %4040 = vadd.xlane.f32.xlu1 %v13423_v21  ;;  %v4018_v20 = vmul.f32 1.442695, %v3996_v36 }
 0x895   : > { %4038 = vadd.xlane.f32.xlu0 %v13425_v10  ;;  %v3975_v30 = vpop.xlane.xlu0 %3974 }
 0x898   : > { %v13444_v43 = vpop.eup %10658 }
 0x899   : > { %v3979_v58 = vpop.xlane.xlu0 %3978 }
 0x89a   : > { %v4000_v47 = vsub.f32 %v13383_v2, %v3979_v58  ;;  %v3998_v58 = vsub.f32 %v13375_v26, %v3975_v30 }
 0x89c   : > { %v4026_v17 = vmul.f32 1.442695, %v4000_v47 }
 0x8a5   : > { %10392 = vrot.lane.b32.xlu1 %v15282_v3, %s11161_s21 }
 0x8ab   : > { %10397 = vrot.lane.b32.xlu0 %v15285_v50, %s11161_s21 }
 0x8b9   : > { %v3965_v22 = vpop.xlane.xlu1 %3964 }
 0x8ba   : > { %v3993_v4 = vsub.f32 %v3945_v59, %v3965_v22 }
 0x8bc   : > { %v4012_v53 = vmul.f32 1.442695, %v3993_v4 }
 0x8bd   : > { %v3969_v60 = vpop.xlane.xlu1 %3968 }
 0x8be   : > { %10660 = vpow2.f32 %v4012_v53  ;;  %v3995_v3 = vsub.f32 %v3947_v9, %v3969_v60 }
 0x8c0   : > { %v4016_v35 = vmul.f32 1.442695, %v3995_v3 }
 0x8c1   : > { %v3973_v50 = vpop.xlane.xlu1 %3972 }
 0x8c2   : > { %10662 = vpow2.f32 %v4016_v35  ;;  %v3997_v1 = vsub.f32 %v3949_v38, %v3973_v50  ;;  %v3983_v38 = vpop.xlane.xlu0 %3982 }
 0x8c3   : > { %10664 = vpow2.f32 %v4014_v15  ;;  %v4002_v9 = vsub.f32 %v13387_v5, %v3983_v38 }
 0x8c4   : > { %v4020_v22 = vmul.f32 1.442695, %v3997_v1 }
 0x8c5   : > { %v3977_v59 = vpop.xlane.xlu1 %3976  ;;  %v4030_v60 = vmul.f32 1.442695, %v4002_v9 }
 0x8c6   : > { %10666 = vpow2.f32 %v4020_v22  ;;  %v3999_v4 = vsub.f32 %v13402_v19, %v3977_v59  ;;  %v4022_v19 = vmul.f32 1.442695, %v3998_v58  ;;  %v15286_v58 = vld [vmem:[#allocation92_spill] sm:$0xff] }
 0x8c7   : > { %10668 = vpow2.f32 %v4026_v17 }
 0x8c8   : > { %v13446_v45 = vpop.eup %10660  ;;  %10670 = vpow2.f32 %v4018_v20  ;;  %v4024_v15 = vmul.f32 1.442695, %v3999_v4 }
 0x8c9   : > { %v3981_v2 = vpop.xlane.xlu1 %3980  ;;  %4042 = vadd.xlane.f32.xlu1 %v13444_v43 }
 0x8ca   : > { %4044 = vadd.xlane.f32.xlu0 %v13446_v45  ;;  %10672 = vpow2.f32 %v4024_v15  ;;  %v4001_v30 = vsub.f32 %v13406_v24, %v3981_v2  ;;  %v3987_v24 = vpop.xlane.xlu0 %3986  ;;  %v15287_v2 = vld [vmem:[#allocation90_spill] sm:$0xff] }
 0x8cb   : > { %10674 = vpow2.f32 %v4022_v19  ;;  %v4004_v35 = vsub.f32 %v13391_v54, %v3987_v24  ;;  %v15288_v38 = vpack.i.bf16 %v15286_v58, %v15287_v2 }
 0x8cc   : > { %v13451_v7 = vpop.eup %10662  ;;  %v4028_v3 = vmul.f32 1.442695, %v4001_v30  ;;  %v10379_v30 = vunpack.i.l.bf16 %v13419_v23 }
 0x8cd   : > { %v13453_v36 = vpop.eup %10664  ;;  %v3985_v63 = vpop.xlane.xlu1 %3984  ;;  %4048 = vadd.xlane.f32.xlu1 %v13451_v7  ;;  %v4034_v17 = vmul.f32 1.442695, %v4004_v35 }
 0x8ce   : > { %v4003_v26 = vsub.f32 %v13410_v40, %v3985_v63  ;;  %4046 = vadd.xlane.f32.xlu0 %v13453_v36  ;;  %v10380_v63 = vunpack.i.h.bf16 %v13419_v23 }
 0x8d0   : > { %v13460_v41 = vpop.eup %10666  ;;  %v4032_v6 = vmul.f32 1.442695, %v4003_v26  ;;  %v9600_v26 = vpack.c.bf16 %v10380_v63, %v10379_v30 }
 0x8d1   : > { %v13462_v53 = vpop.eup %10668  ;;  %4052 = vadd.xlane.f32.xlu1 %v13460_v41  ;;  %v3989_v5 = vpop.xlane.xlu1 %3988 }
 0x8d2   : > { %10676 = vpow2.f32 %v4032_v6  ;;  %v4005_v47 = vsub.f32 %v13414_v61, %v3989_v5  ;;  %4058 = vadd.xlane.f32.xlu0 %v13462_v53  ;;  %v13467_v40 = vpop.eup %10670 }
 0x8d3   : > { %10678 = vpow2.f32 %v4030_v60 }
 0x8d4   : > { %10680 = vpow2.f32 %v4028_v3  ;;  %v4036_v50 = vmul.f32 1.442695, %v4005_v47  ;;  %v13471_v1 = vpop.eup %10672 }
 0x8d5   : > { %4050 = vadd.xlane.f32.xlu1 %v13467_v40  ;;  %v13474_v22 = vpop.eup %10674 }
 0x8d6   : > { %10682 = vpow2.f32 %v4036_v50 }
 0x8d7   : > { %10684 = vpow2.f32 %v4034_v17 }
 0x8d9   : > { %4056 = vadd.xlane.f32.xlu1 %v13471_v1 }
 0x8dc   : > { %v13476_v61 = vpop.eup %10676 }
 0x8dd   : > { %4054 = vadd.xlane.f32.xlu1 %v13474_v22  ;;  %4064 = vadd.xlane.f32.xlu0 %v13476_v61  ;;  %v13480_v59 = vpop.eup %10678 }
 0x8de   : > { %v13482_v54 = vpop.eup %10680 }
 0x8e0   : > { %v13486_v20 = vpop.eup %10682 }
 0x8e1   : > { %4060 = vadd.xlane.f32.xlu1 %v13482_v54  ;;  %4062 = vadd.xlane.f32.xlu0 %v13480_v59  ;;  %v13489_v4 = vpop.eup %10684 }
 0x8e5   : > { %4068 = vadd.xlane.f32.xlu1 %v13486_v20 }
 0x8e9   : > { %4066 = vadd.xlane.f32.xlu1 %v13489_v4 }
 0x8f7   : > { %10402 = vrot.lane.b32.xlu0 %v15288_v38, %s11161_s21 }
 0x8fa   : > { %4265 = vrot.lane.b32.xlu1 %v15243_v46, %s11161_s21  ;;  %v15290_v46 = vld [vmem:[#allocation99_spill] sm:$0xff] }
 0x8fb   : > { %4263 = vrot.lane.b32.xlu0 %v15242_v37, %s11161_s21  ;;  %v15289_v37 = vld [vmem:[#allocation100_spill] sm:$0xff] }
 0x8fe   : > { %4269 = vrot.lane.b32.xlu1 %v15245_v11, %s11161_s21  ;;  %v15292_v11 = vld [vmem:[#allocation97_spill] sm:$0xff] }
 0x8ff   : > { %4267 = vrot.lane.b32.xlu0 %v15244_v49, %s11161_s21  ;;  %v15291_v49 = vpack.i.bf16 %v15289_v37, %v15290_v46 }
 0x902   : > { %4273 = vrot.lane.b32.xlu1 %v15247_v55, %s11161_s21 }
 0x903   : > { %4271 = vrot.lane.b32.xlu0 %v15246_v27, %s11161_s21  ;;  %v15293_v27 = vld [vmem:[#allocation96_spill] sm:$0xff] }
 0x904   : > { %v15294_v55 = vpack.i.bf16 %v15292_v11, %v15293_v27 }
 0x906   : > { %4277 = vrot.lane.b32.xlu1 %v15249_v44, %s11161_s21  ;;  %v15295_v44 = vld [vmem:[#allocation103_spill] sm:$0xff] }
 0x907   : > { %4275 = vrot.lane.b32.xlu0 %v15248_v51, %s11161_s21  ;;  %v10388_v51 = vpop.permute.xlu0 %10387 }
 0x908   : > { %v10389_v23 = vunpack.i.l.bf16 %v10388_v51 }
 0x90a   : > { %4281 = vrot.lane.b32.xlu1 %v15251_v52, %s11161_s21 }
 0x90b   : > { %4279 = vrot.lane.b32.xlu0 %v15250_v25, %s11161_s21  ;;  %v15296_v25 = vld [vmem:[#allocation102_spill] sm:$0xff] }
 0x90c   : > { %v15297_v52 = vpack.i.bf16 %v15295_v44, %v15296_v25 }
 0x90e   : > { %4285 = vrot.lane.b32.xlu1 %v15253_v32, %s11161_s21 }
 0x90f   : > { %4283 = vrot.lane.b32.xlu0 %v15252_v16, %s11161_s21 }
 0x912   : > { %4289 = vrot.lane.b32.xlu1 %v15255_v48, %s11161_s21 }
 0x913   : > { %4287 = vrot.lane.b32.xlu0 %v15254_v31, %s11161_s21 }
 0x916   : > { %4293 = vrot.lane.b32.xlu1 %v15257_v56, %s11161_s21  ;;  %v10374_v56 = vunpack.i.l.bf16 %v13417_v29 }
 0x917   : > { %4291 = vrot.lane.b32.xlu0 %v15256_v8, %s11161_s21  ;;  %v10375_v8 = vunpack.i.h.bf16 %v13417_v29  ;;  %v10385_v29 = vunpack.i.h.bf16 %v13437_v62 }
 0x919   : > { %v9594_v9 = vpack.c.bf16 %v10375_v8, %v10374_v56 }
 0x91a   : > { %10412 = vrot.lane.b32.xlu1 %v15291_v49, %s11161_s21 }
 0x91b   : > { %10407 = vrot.lane.b32.xlu0 %v15294_v55, %s11161_s21 }
 0x91e   : > { %10417 = vrot.lane.b32.xlu1 %v15297_v52, %s11161_s21 }
 0x921   : > { %v4041_v16 = vpop.xlane.xlu1 %4040 }
 0x922   : > { %10686 = vrcp.f32 %v4041_v16  ;;  %v4039_v32 = vpop.xlane.xlu0 %4038 }
 0x923   : > { %10688 = vrcp.f32 %v4039_v32 }
 0x925   : > { %v10393_v60 = vpop.permute.xlu1 %10392 }
 0x926   : > { %v10395_v5 = vunpack.i.h.bf16 %v10393_v60  ;;  %v10394_v3 = vunpack.i.l.bf16 %v10393_v60  ;;  %v10398_v47 = vpop.permute.xlu0 %10397  ;;  %v15298_v60 = vld [vmem:[#allocation132_spill] sm:$0xff] }
 0x927   : > { %v10400_v24 = vunpack.i.h.bf16 %v10398_v47  ;;  %v10399_v35 = vunpack.i.l.bf16 %v10398_v47 }
 0x929   : > { %v9624_v58 = vpack.c.bf16 %v10400_v24, %v10399_v35 }
 0x92c   : > { %v10687_v31 = vpop.eup %10686 }
 0x92d   : > { %v10689_v48 = vpop.eup %10688  ;;  %v4087_v19 = vmul.f32 %v10687_v31, %v13423_v21  ;;  %v10384_v21 = vunpack.i.l.bf16 %v13437_v62  ;;  %v9618_v62 = vpack.c.bf16 %v10395_v5, %v10394_v3 }
 0x92e   : > { %v4086_v15 = vmul.f32 %v10689_v48, %v13425_v10 }
 0x92f   : > { %v9606_v10 = vpack.c.bf16 %v10385_v29, %v10384_v21 }
 0x930   : > { %8484 = vmatprep.mubr.f32.mxu1 %v4086_v15 }
 0x931   : > { %8485 = vmatmul.mubr.f32.vlgmr.msra.gmra.mrb[144].mxu1 %v4087_v19 }
 0x932   : > { %9593 = vmatpush3.bf16.xpose.msk.msra.mxu1 %vm12120_vm1, %v13281_v13  ;;  %v10390_v13 = vunpack.i.h.bf16 %v10388_v51 }
 0x933   : > { %9596 = vmatprep.subr.msk.bf16.mxu1 %vm12120_vm1, %v9594_v9 }
 0x934   : > { %v9612_v6 = vpack.c.bf16 %v10390_v13, %v10389_v23 }
 0x93a   : > { %9599 = vmatpush3.bf16.xpose.msk.msra.mxu1 %vm12120_vm1, %v9594_v9 }
 0x93b   : > { %9602 = vmatprep.subr.msk.bf16.mxu1 %vm12120_vm1, %v9600_v26 }
 0x942   : > { %9605 = vmatpush3.bf16.xpose.msk.msra.mxu1 %vm12120_vm1, %v9600_v26 }
 0x943   : > { %9608 = vmatprep.subr.msk.bf16.mxu1 %vm12120_vm1, %v9606_v10 }
 0x94a   : > { %9611 = vmatpush3.bf16.xpose.msk.msra.mxu1 %vm12120_vm1, %v9606_v10 }
 0x94b   : > { %9614 = vmatprep.subr.msk.bf16.mxu1 %vm12120_vm1, %v9612_v6 }
 0x952   : > { %9617 = vmatpush3.bf16.xpose.msk.msra.mxu1 %vm12120_vm1, %v9612_v6 }
 0x953   : > { %9620 = vmatprep.subr.msk.bf16.mxu1 %vm12120_vm1, %v9618_v62 }
 0x956   : > { %v4043_v50 = vpop.xlane.xlu1 %4042 }
 0x957   : > { %10690 = vrcp.f32 %v4043_v50  ;;  %v4045_v17 = vpop.xlane.xlu0 %4044 }
 0x958   : > { %10692 = vrcp.f32 %v4045_v17 }
 0x95a   : > { %9623 = vmatpush3.bf16.xpose.msk.msra.mxu1 %vm12120_vm1, %v9618_v62  ;;  %v4049_v2 = vpop.xlane.xlu1 %4048 }
 0x95b   : > { %10694 = vrcp.f32 %v4049_v2  ;;  %9626 = vmatprep.subr.msk.bf16.mxu1 %vm12120_vm1, %v9624_v58  ;;  %v4047_v38 = vpop.xlane.xlu0 %4046 }
 0x95c   : > { %10696 = vrcp.f32 %v4047_v38 }
 0x95e   : > { %v4053_v37 = vpop.xlane.xlu1 %4052 }
 0x95f   : > { %10698 = vrcp.f32 %v4053_v37  ;;  %v4059_v25 = vpop.xlane.xlu0 %4058 }
 0x961   : > { %v10691_v46 = vpop.eup %10690 }
 0x962   : > { %v10693_v49 = vpop.eup %10692  ;;  %9629 = vmatpush3.bf16.xpose.msk.msra.mxu1 %vm12120_vm1, %v9624_v58  ;;  %v4051_v11 = vpop.xlane.xlu1 %4050  ;;  %v4088_v27 = vmul.f32 %v10691_v46, %v13444_v43 }
 0x963   : > { %10700 = vrcp.f32 %v4051_v11  ;;  %v4089_v55 = vmul.f32 %v10693_v49, %v13446_v45  ;;  %v15299_v49 = vld [vmem:[#allocation135_spill] sm:$0xff]  ;;  %v15300_v11 = vld [vmem:[#allocation138_spill] sm:$0xff] }
 0x964   : > { %8487 = vmatprep.mubr.f32.mxu1 %v4088_v27  ;;  %10702 = vrcp.f32 %v4059_v25 }
 0x965   : > { %v10695_v51 = vpop.eup %10694  ;;  %8488 = vmatmul.mubr.f32.gmra.mrb[146].mxu1 %v4089_v55 }
 0x966   : > { %v10697_v44 = vpop.eup %10696  ;;  %v4057_v52 = vpop.xlane.xlu1 %4056  ;;  %v4091_v32 = vmul.f32 %v10695_v51, %v13451_v7  ;;  %v15301_v51 = vld [vmem:[#allocation141_spill] sm:$0xff] }
 0x967   : > { %v4090_v16 = vmul.f32 %v10697_v44, %v13453_v36  ;;  %10704 = vrcp.f32 %v4057_v52 }
 0x969   : > { %8490 = vmatprep.mubr.f32.mxu1 %v4090_v16  ;;  %v10699_v43 = vpop.eup %10698 }
 0x96a   : > { %v4055_v31 = vpop.xlane.xlu1 %4054  ;;  %8491 = vmatmul.mubr.f32.gmra.mrb[148].mxu1 %v4091_v32  ;;  %v4065_v48 = vpop.xlane.xlu0 %4064  ;;  %v4093_v19 = vmul.f32 %v10699_v43, %v13460_v41  ;;  %v15302_v32 = vld [vmem:[#allocation144_spill] sm:$0xff] }
 0x96b   : > { %10706 = vrcp.f32 %v4055_v31 }
 0x96d   : > { %v10701_v8 = vpop.eup %10700 }
 0x96e   : > { %v4061_v45 = vpop.xlane.xlu1 %4060  ;;  %v4063_v56 = vpop.xlane.xlu0 %4062  ;;  %v4092_v15 = vmul.f32 %v10701_v8, %v13467_v40 }
 0x96f   : > { %10708 = vrcp.f32 %v4061_v45  ;;  %v10703_v9 = vpop.eup %10702  ;;  %v15303_v45 = vld [vmem:[#allocation147_spill] sm:$0xff] }
 0x970   : > { %10710 = vrcp.f32 %v4063_v56  ;;  %8493 = vmatprep.mubr.f32.mxu1 %v4092_v15  ;;  %v4096_v23 = vmul.f32 %v10703_v9, %v13462_v53 }
 0x971   : > { %8494 = vmatmul.mubr.f32.gmra.mrb[150].mxu1 %v4093_v19  ;;  %10712 = vrcp.f32 %v4065_v48  ;;  %v10705_v26 = vpop.eup %10704 }
 0x972   : > { %v4069_v7 = vpop.xlane.xlu1 %4068  ;;  %v10403_v36 = vpop.permute.xlu0 %10402  ;;  %v4095_v41 = vmul.f32 %v10705_v26, %v13471_v1 }
 0x973   : > { %v10405_v63 = vunpack.i.h.bf16 %v10403_v36  ;;  %v10404_v30 = vunpack.i.l.bf16 %v10403_v36  ;;  %10714 = vrcp.f32 %v4069_v7  ;;  %v15304_v36 = vld [vmem:[#allocation150_spill] sm:$0xff] }
 0x975   : > { %v10707_v29 = vpop.eup %10706  ;;  %v9630_v21 = vpack.c.bf16 %v10405_v63, %v10404_v30  ;;  %v15305_v63 = vld [vmem:[#allocation153_spill] sm:$0xff] }
 0x976   : > { %v4067_v10 = vpop.xlane.xlu1 %4066  ;;  %v4264_v13 = vpop.permute.xlu0 %4263  ;;  %v4094_v40 = vmul.f32 %v10707_v29, %v13474_v22 }
 0x977   : > { %10716 = vrcp.f32 %v4067_v10  ;;  %9632 = vmatprep.subr.msk.bf16.mxu1 %vm12120_vm1, %v9630_v21 }
 0x978   : > { %8496 = vmatprep.mubr.f32.mxu1 %v4094_v40  ;;  %9635 = vmatpush3.bf16.xpose.msk.msra.mxu1 %vm12120_vm1, %v9630_v21 }
 0x979   : > { %v10709_v6 = vpop.eup %10708  ;;  %8497 = vmatmul.mubr.f32.gmra.mrb[152].mxu1 %v4095_v41  ;;  %9717 = vmatprep.subr.bf16.mxu1 %v15298_v60 }
 0x97a   : > { %v10711_v5 = vpop.eup %10710  ;;  %v4266_v3 = vpop.permute.xlu1 %4265  ;;  %8499 = vmatprep.mubr.f32.mxu1 %v4096_v23  ;;  %v4097_v62 = vmul.f32 %v10709_v6, %v13482_v54 }
 0x97b   : > { %v4268_v22 = vpop.permute.xlu0 %4267  ;;  %v10713_v47 = vpop.eup %10712  ;;  %v4098_v24 = vmul.f32 %v10711_v5, %v13480_v59 }
 0x97c   : > { %v4099_v50 = vmul.f32 %v10713_v47, %v13476_v61 }
 0x97d   : > { %8500 = vmatmul.mubr.f32.gmra.mrb[154].mxu1 %v4097_v62  ;;  %v10715_v53 = vpop.eup %10714 }
 0x97e   : > { %v4270_v1 = vpop.permute.xlu1 %4269  ;;  %8502 = vmatprep.mubr.f32.mxu1 %v4098_v24  ;;  %v4101_v37 = vmul.f32 %v10715_v53, %v13486_v20 }
 0x97f   : > { %v4272_v35 = vpop.permute.xlu0 %4271 }
 0x981   : > { %v10717_v17 = vpop.eup %10716  ;;  %8503 = vmatmul.mubr.f32.gmra.mrb[156].mxu1 %v4099_v50 }
 0x982   : > { %v4274_v58 = vpop.permute.xlu1 %4273  ;;  %v4100_v38 = vmul.f32 %v10717_v17, %v13489_v4 }
 0x983   : > { %v4276_v2 = vpop.permute.xlu0 %4275 }
 0x984   : > { %8505 = vmatprep.mubr.f32.mxu1 %v4100_v38 }
 0x985   : > { %8506 = vmatmul.mubr.f32.gmra.mrb[158].mxu1 %v4101_v37 }
 0x986   : > { %v4278_v54 = vpop.permute.xlu1 %4277  ;;  %8540 = vmatprep.mubr.msk.f32.mxu1 %vm2367_vm0, %v4264_v13 }
 0x987   : > { %v4280_v59 = vpop.permute.xlu0 %4279 }
 0x989   : > { %8541 = vmatmul.mubr.msk.f32.vlgmr.msra.gmra.mrb[160].mxu1 %vm2367_vm0, %v4266_v3 }
 0x98a   : > { %9719 = vmatpush3.bf16.msra.mxu1 %v15298_v60  ;;  %v4282_v61 = vpop.permute.xlu1 %4281  ;;  %8543 = vmatprep.mubr.msk.f32.mxu1 %vm2367_vm0, %v4268_v22 }
 0x98b   : > { %v4284_v46 = vpop.permute.xlu0 %4283  ;;  %9721 = vmatprep.subr.bf16.mxu1 %v15299_v49 }
 0x98d   : > { %8544 = vmatmul.mubr.msk.f32.gmra.mrb[162].mxu1 %vm2367_vm0, %v4270_v1 }
 0x98e   : > { %9723 = vmatpush3.bf16.msra.mxu1 %v15299_v49  ;;  %v4286_v20 = vpop.permute.xlu1 %4285  ;;  %8546 = vmatprep.mubr.msk.f32.mxu1 %vm2367_vm0, %v4272_v35 }
 0x98f   : > { %v4288_v4 = vpop.permute.xlu0 %4287  ;;  %9725 = vmatprep.subr.bf16.mxu1 %v15300_v11 }
 0x991   : > { %8547 = vmatmul.mubr.msk.f32.gmra.mrb[164].mxu1 %vm2367_vm0, %v4274_v58 }
 0x992   : > { %9727 = vmatpush3.bf16.msra.mxu1 %v15300_v11  ;;  %v4290_v27 = vpop.permute.xlu1 %4289  ;;  %8549 = vmatprep.mubr.msk.f32.mxu1 %vm2367_vm0, %v4276_v2 }
 0x993   : > { %v4292_v55 = vpop.permute.xlu0 %4291  ;;  %9729 = vmatprep.subr.bf16.mxu1 %v15301_v51 }
 0x995   : > { %8550 = vmatmul.mubr.msk.f32.gmra.mrb[166].mxu1 %vm2367_vm0, %v4278_v54 }
 0x996   : > { %9731 = vmatpush3.bf16.msra.mxu1 %v15301_v51  ;;  %v4294_v44 = vpop.permute.xlu1 %4293  ;;  %8552 = vmatprep.mubr.msk.f32.mxu1 %vm2367_vm0, %v4280_v59 }
 0x997   : > { %v10408_v25 = vpop.permute.xlu0 %10407  ;;  %9733 = vmatprep.subr.bf16.mxu1 %v15302_v32 }
 0x998   : > { %v10410_v52 = vunpack.i.h.bf16 %v10408_v25  ;;  %v10409_v16 = vunpack.i.l.bf16 %v10408_v25 }
 0x999   : > { %8553 = vmatmul.mubr.msk.f32.gmra.mrb[168].mxu1 %vm2367_vm0, %v4282_v61 }
 0x99a   : > { %v9636_v31 = vpack.c.bf16 %v10410_v52, %v10409_v16  ;;  %9735 = vmatpush3.bf16.msra.mxu1 %v15302_v32  ;;  %v10413_v48 = vpop.permute.xlu1 %10412  ;;  %8555 = vmatprep.mubr.msk.f32.mxu1 %vm2367_vm0, %v4284_v46 }
 0x99b   : > { %v10415_v43 = vunpack.i.h.bf16 %v10413_v48  ;;  %v10414_v8 = vunpack.i.l.bf16 %v10413_v48  ;;  %9737 = vmatprep.subr.bf16.mxu1 %v15303_v45 }
 0x99c   : > { %9637 = vmatprep.subr.bf16.mxu0 %v9636_v31 }
 0x99d   : > { %9639 = vmatpush3.bf16.msra.mxu0 %v9636_v31  ;;  %8556 = vmatmul.mubr.msk.f32.gmra.mrb[170].mxu1 %vm2367_vm0, %v4286_v20  ;;  %v9640_v56 = vpack.c.bf16 %v10415_v43, %v10414_v8  ;;  %v15306_v43 = vld [vmem:[#allocation108_spill] sm:$0xff]  ;;  %v15307_v8 = vld [vmem:[#allocation106_spill] sm:$0xff] }
 0x99e   : > { %9739 = vmatpush3.bf16.msra.mxu1 %v15303_v45  ;;  %v10418_v15 = vpop.permute.xlu1 %10417  ;;  %8558 = vmatprep.mubr.msk.f32.mxu1 %vm2367_vm0, %v4288_v4  ;;  %v15308_v45 = vpack.i.bf16 %v15306_v43, %v15307_v8 }
 0x99f   : > { %v10420_v19 = vunpack.i.h.bf16 %v10418_v15  ;;  %v10419_v7 = vunpack.i.l.bf16 %v10418_v15  ;;  %9741 = vmatprep.subr.bf16.mxu1 %v15304_v36  ;;  %9641 = vmatprep.subr.bf16.mxu0 %v9640_v56 }
 0x9a1   : > { %9643 = vmatpush3.bf16.msra.mxu0 %v9640_v56  ;;  %8559 = vmatmul.mubr.msk.f32.gmra.mrb[172].mxu1 %vm2367_vm0, %v4290_v27  ;;  %v9644_v9 = vpack.c.bf16 %v10420_v19, %v10419_v7 }
 0x9a2   : > { %9743 = vmatpush3.bf16.msra.mxu1 %v15304_v36  ;;  %8561 = vmatprep.mubr.msk.f32.mxu1 %vm2367_vm0, %v4292_v55  ;;  %v15309_v36 = vld [vmem:[#allocation118_spill] sm:$0xff] }
 0x9a3   : > { %9745 = vmatprep.subr.bf16.mxu1 %v15305_v63  ;;  %9645 = vmatprep.subr.bf16.mxu0 %v9644_v9 }
 0x9a5   : > { %9647 = vmatpush3.bf16.msra.mxu0 %v9644_v9  ;;  %8562 = vmatmul.mubr.msk.f32.gmra.mrb[174].mxu1 %vm2367_vm0, %v4294_v44  ;;  %v15310_v9 = vld [vmem:[#allocation116_spill] sm:$0xff] }
 0x9a6   : > { %9747 = vmatpush3.bf16.msra.mxu1 %v15305_v63  ;;  %v15311_v63 = vpack.i.bf16 %v15309_v36, %v15310_v9 }
 0xa04   : > { %v8486_v30 = vpop.f32.mrb[144].mxu1 }
 0xa05   : > { %4248 = vst.msk [vmem:[#allocation2 + $0x20] sm:$0xff] %vm2367_vm0, %v8486_v30  ;;  %v4168_v26 = vpop.f32.mrb[145].mxu1 }
 0xa06   : > { %4247 = vst.msk [vmem:[#allocation2 + $0x8] sm:$0xff] %vm2367_vm0, %v4168_v26  ;;  %v15312_v26 = vld [vmem:[#allocation123_spill] sm:$0xff] }
 0xa38   : > { %v8489_v29 = vpop.f32.mrb[146].mxu1 }
 0xa39   : > { %4250 = vst.msk [vmem:[#allocation2 + $0x50] sm:$0xff] %vm2367_vm0, %v8489_v29  ;;  %v4178_v21 = vpop.f32.mrb[147].mxu1  ;;  %v15313_v29 = vld [vmem:[#allocation121_spill] sm:$0xff] }
 0xa3a   : > { %4249 = vst.msk [vmem:[#allocation2 + $0x38] sm:$0xff] %vm2367_vm0, %v4178_v21  ;;  %v15314_v21 = vpack.i.bf16 %v15312_v26, %v15313_v29 }
 0xa3d   : > { %v8492_v10 = vpop.f32.mrb[148].mxu1 }
 0xa3e   : > { %4252 = vst.msk [vmem:[#allocation2 + $0x80] sm:$0xff] %vm2367_vm0, %v8492_v10  ;;  %v4188_v13 = vpop.f32.mrb[149].mxu1 }
 0xa3f   : > { %4251 = vst.msk [vmem:[#allocation2 + $0x68] sm:$0xff] %vm2367_vm0, %v4188_v13 }
 0xa44   : > { %v8495_v40 = vpop.f32.mrb[150].mxu1 }
 0xa45   : > { %4254 = vst.msk [vmem:[#allocation2 + $0xb0] sm:$0xff] %vm2367_vm0, %v8495_v40  ;;  %v4198_v41 = vpop.f32.mrb[151].mxu1  ;;  %v15315_v40 = vld [vmem:[#allocation158_spill] sm:$0xff] }
 0xa46   : > { %4253 = vst.msk [vmem:[#allocation2 + $0x98] sm:$0xff] %vm2367_vm0, %v4198_v41 }
 0xa4c   : > { %v8498_v23 = vpop.f32.mrb[152].mxu1 }
 0xa4d   : > { %4256 = vst.msk [vmem:[#allocation2 + $0xe0] sm:$0xff] %vm2367_vm0, %v8498_v23  ;;  %v4208_v6 = vpop.f32.mrb[153].mxu1 }
 0xa4e   : > { %4255 = vst.msk [vmem:[#allocation2 + $0xc8] sm:$0xff] %vm2367_vm0, %v4208_v6  ;;  %v15316_v6 = vld [vmem:[#allocation159_spill] sm:$0xff] }
 0xa50   : > { %v8501_v60 = vpop.f32.mrb[154].mxu1 }
 0xa51   : > { %4258 = vst.msk [vmem:[#allocation2 + $0x110] sm:$0xff] %vm2367_vm0, %v8501_v60  ;;  %v4218_v5 = vpop.f32.mrb[155].mxu1 }
 0xa52   : > { %4257 = vst.msk [vmem:[#allocation2 + $0xf8] sm:$0xff] %vm2367_vm0, %v4218_v5 }
 0xa54   : > { %v8504_v3 = vpop.f32.mrb[156].mxu1 }
 0xa55   : > { %4260 = vst.msk [vmem:[#allocation2 + $0x140] sm:$0xff] %vm2367_vm0, %v8504_v3  ;;  %v4228_v22 = vpop.f32.mrb[157].mxu1  ;;  %v15317_v3 = vld [vmem:[#allocation161_spill] sm:$0xff] }
 0xa56   : > { %4259 = vst.msk [vmem:[#allocation2 + $0x128] sm:$0xff] %vm2367_vm0, %v4228_v22 }
 0xa58   : > { %v8507_v62 = vpop.f32.mrb[158].mxu1 }
 0xa59   : > { %4262 = vst.msk [vmem:[#allocation2 + $0x170] sm:$0xff] %vm2367_vm0, %v8507_v62  ;;  %v4238_v47 = vpop.f32.mrb[159].mxu1 }
 0xa5a   : > { %4261 = vst.msk [vmem:[#allocation2 + $0x158] sm:$0xff] %vm2367_vm0, %v4238_v47  ;;  %v15318_v47 = vld [vmem:[#allocation163_spill] sm:$0xff] }
 0xa5c   : > { %v8542_v24 = vpop.f32.mrb[160].mxu1 }
 0xa5d   : > { %v4537_v1 = vmul.f32 0.05103104, %v8542_v24  ;;  %v4457_v35 = vpop.f32.mrb[161].mxu1 }
 0xa5e   : > { %v4536_v50 = vmul.f32 0.05103104, %v4457_v35  ;;  %v15319_v35 = vld [vmem:[#allocation165_spill] sm:$0xff] }
 0xa5f   : > { %v13642_v53 = vadd.f32 %v4537_v1, %v15194_v57 }
 0xa60   : > { %v13645_v17 = vadd.f32 %v4536_v50, %v15195_v18  ;;  %v8545_v58 = vpop.f32.mrb[162].mxu1 }
 0xa61   : > { %4570 = vmax.xlane.f32.xlu1 %v13642_v53  ;;  %v4467_v2 = vpop.f32.mrb[163].mxu1  ;;  %v4539_v30 = vmul.f32 0.05103104, %v8545_v58 }
 0xa62   : > { %4568 = vmax.xlane.f32.xlu0 %v13645_v17  ;;  %v4538_v13 = vmul.f32 0.05103104, %v4467_v2  ;;  %v15320_v2 = vld [vmem:[#allocation167_spill] sm:$0xff] }
 0xa63   : > { %v4555_v10 = vadd.f32 %v4539_v30, %v15211_v34 }
 0xa64   : > { %v8548_v38 = vpop.f32.mrb[164].mxu1  ;;  %v4554_v41 = vadd.f32 %v4538_v13, %v15315_v40 }
 0xa65   : > { %v4541_v37 = vmul.f32 0.05103104, %v8548_v38  ;;  %v4477_v54 = vpop.f32.mrb[165].mxu1 }
 0xa66   : > { %v4540_v23 = vmul.f32 0.05103104, %v4477_v54  ;;  %v15321_v54 = vld [vmem:[#allocation169_spill] sm:$0xff] }
 0xa67   : > { %v13650_v59 = vadd.f32 %v4541_v37, %v15196_v39 }
 0xa68   : > { %v8551_v61 = vpop.f32.mrb[166].mxu1  ;;  %v13688_v60 = vadd.f32 %v4540_v23, %v15316_v6 }
 0xa69   : > { %v4543_v46 = vmul.f32 0.05103104, %v8551_v61  ;;  %4578 = vmax.xlane.f32.xlu1 %v13650_v59  ;;  %v4487_v49 = vpop.f32.mrb[167].mxu1 }
 0xa6a   : > { %v4542_v5 = vmul.f32 0.05103104, %v4487_v49 }
 0xa6b   : > { %v13654_v20 = vadd.f32 %v4543_v46, %v15197_v12 }
 0xa6c   : > { %v8554_v4 = vpop.f32.mrb[168].mxu1  ;;  %v13692_v22 = vadd.f32 %v4542_v5, %v15317_v3 }
 0xa6d   : > { %v4545_v11 = vmul.f32 0.05103104, %v8554_v4  ;;  %4582 = vmax.xlane.f32.xlu1 %v13654_v20  ;;  %v4497_v27 = vpop.f32.mrb[169].mxu1 }
 0xa6e   : > { %v4544_v62 = vmul.f32 0.05103104, %v4497_v27 }
 0xa6f   : > { %v13658_v55 = vadd.f32 %v4545_v11, %v15198_v0 }
 0xa70   : > { %v8557_v51 = vpop.f32.mrb[170].mxu1  ;;  %v13696_v24 = vadd.f32 %v4544_v62, %v15318_v47 }
 0xa71   : > { %v4547_v44 = vmul.f32 0.05103104, %v8557_v51  ;;  %4586 = vmax.xlane.f32.xlu1 %v13658_v55  ;;  %v4507_v25 = vpop.f32.mrb[171].mxu1 }
 0xa72   : > { %v4546_v1 = vmul.f32 0.05103104, %v4507_v25 }
 0xa73   : > { %v13662_v52 = vadd.f32 %v4547_v44, %v15199_v14 }
 0xa74   : > { %v8560_v16 = vpop.f32.mrb[172].mxu1  ;;  %v13700_v50 = vadd.f32 %v4546_v1, %v15319_v35 }
 0xa75   : > { %v4549_v32 = vmul.f32 0.05103104, %v8560_v16  ;;  %4590 = vmax.xlane.f32.xlu1 %v13662_v52  ;;  %v4517_v31 = vpop.f32.mrb[173].mxu1 }
 0xa76   : > { %v4548_v58 = vmul.f32 0.05103104, %v4517_v31 }
 0xa77   : > { %v13666_v48 = vadd.f32 %v4549_v32, %v15200_v28 }
 0xa78   : > { %10422 = vrot.lane.b32.xlu0 %v15308_v45, %s11161_s21  ;;  %v8563_v56 = vpop.f32.mrb[174].mxu1  ;;  %v13704_v38 = vadd.f32 %v4548_v58, %v15320_v2 }
 0xa79   : > { %v4551_v15 = vmul.f32 0.05103104, %v8563_v56  ;;  %4594 = vmax.xlane.f32.xlu1 %v13666_v48  ;;  %v4527_v19 = vpop.f32.mrb[175].mxu1  ;;  %v15325_v56 = vld [vmem:[#allocation113_spill] sm:$0xff] }
 0xa7a   : > { %v4550_v37 = vmul.f32 0.05103104, %v4527_v19 }
 0xa7b   : > { %v13674_v7 = vadd.f32 %v4551_v15, %v15204_v42  ;;  %v15326_v15 = vld [vmem:[#allocation111_spill] sm:$0xff] }
 0xa7c   : > { %v13708_v61 = vadd.f32 %v4550_v37, %v15321_v54  ;;  %v15327_v19 = vpack.i.bf16 %v15325_v56, %v15326_v15 }
 0xa7d   : > { %4598 = vmax.xlane.f32.xlu1 %v13674_v7 }
 0xa8e   : > { %10432 = vrot.lane.b32.xlu1 %v15311_v63, %s11161_s21 }
 0xa92   : > { %10437 = vrot.lane.b32.xlu1 %v15314_v21, %s11161_s21 }
 0xa97   : > { %4574 = vmax.xlane.f32.xlu0 %v4555_v10 }
 0xa9b   : > { %4572 = vmax.xlane.f32.xlu0 %v4554_v41 }
 0xa9f   : > { %4576 = vmax.xlane.f32.xlu0 %v13688_v60 }
 0xaa3   : > { %4580 = vmax.xlane.f32.xlu0 %v13692_v22 }
 0xaa7   : > { %4584 = vmax.xlane.f32.xlu0 %v13696_v24 }
 0xaab   : > { %4588 = vmax.xlane.f32.xlu0 %v13700_v50 }
 0xaaf   : > { %4592 = vmax.xlane.f32.xlu0 %v13704_v38 }
 0xab3   : > { %4596 = vmax.xlane.f32.xlu0 %v13708_v61 }
 0xaee   : > { %v4571_v46 = vpop.xlane.xlu1 %4570 }
 0xaef   : > { %v4601_v49 = vsub.f32 %v13642_v53, %v4571_v46  ;;  %v4569_v4 = vpop.xlane.xlu0 %4568  ;;  %v15322_v53 = vld [vmem:[#allocation128_spill] sm:$0xff] }
 0xaf0   : > { %v4600_v11 = vsub.f32 %v13645_v17, %v4569_v4  ;;  %v15323_v17 = vld [vmem:[#allocation126_spill] sm:$0xff] }
 0xaf1   : > { %v4618_v27 = vmul.f32 1.442695, %v4601_v49  ;;  %v15324_v8 = vpack.i.bf16 %v15322_v53, %v15323_v17 }
 0xaf2   : > { %v4616_v51 = vmul.f32 1.442695, %v4600_v11 }
 0xaf3   : > { %10718 = vpow2.f32 %v4618_v27  ;;  %v10423_v44 = vpop.permute.xlu0 %10422 }
 0xaf4   : > { %10720 = vpow2.f32 %v4616_v51  ;;  %v10425_v25 = vunpack.i.h.bf16 %v10423_v44  ;;  %v10424_v16 = vunpack.i.l.bf16 %v10423_v44 }
 0xaf6   : > { %v9648_v32 = vpack.c.bf16 %v10425_v25, %v10424_v16  ;;  %v4579_v45 = vpop.xlane.xlu1 %4578 }
 0xaf7   : > { %v4605_v13 = vsub.f32 %v13650_v59, %v4579_v45 }
 0xaf8   : > { %9649 = vmatprep.subr.bf16.mxu0 %v9648_v32 }
 0xaf9   : > { %9651 = vmatpush3.bf16.msra.mxu0 %v9648_v32  ;;  %v4626_v46 = vmul.f32 1.442695, %v4605_v13 }
 0xafa   : > { %v4583_v36 = vpop.xlane.xlu1 %4582 }
 0xafb   : > { %v4607_v63 = vsub.f32 %v13654_v20, %v4583_v36 }
 0xafd   : > { %v13713_v31 = vpop.eup %10718  ;;  %v4630_v23 = vmul.f32 1.442695, %v4607_v63 }
 0xafe   : > { %v13715_v43 = vpop.eup %10720  ;;  %4650 = vadd.xlane.f32.xlu0 %v13713_v31  ;;  %v4587_v9 = vpop.xlane.xlu1 %4586 }
 0xaff   : > { %4648 = vadd.xlane.f32.xlu1 %v13715_v43  ;;  %v4609_v62 = vsub.f32 %v13658_v55, %v4587_v9 }
 0xb01   : > { %v4634_v20 = vmul.f32 1.442695, %v4609_v62  ;;  %v15328_v62 = vld [vmem:[#allocation54_spill] sm:$0xff] }
 0xb02   : > { %v4591_v26 = vpop.xlane.xlu1 %4590 }
 0xb03   : > { %v4611_v49 = vsub.f32 %v13662_v52, %v4591_v26 }
 0xb05   : > { %v4638_v11 = vmul.f32 1.442695, %v4611_v49 }
 0xb06   : > { %v4595_v58 = vpop.xlane.xlu1 %4594 }
 0xb07   : > { %v4613_v59 = vsub.f32 %v13666_v48, %v4595_v58 }
 0xb09   : > { %v4642_v25 = vmul.f32 1.442695, %v4613_v59 }
 0xb0a   : > { %v4599_v55 = vpop.xlane.xlu1 %4598 }
 0xb0b   : > { %v4615_v52 = vsub.f32 %v13674_v7, %v4599_v55 }
 0xb0d   : > { %v4646_v17 = vmul.f32 1.442695, %v4615_v52 }
 0xb10   : > { %10442 = vrot.lane.b32.xlu1 %v15324_v8, %s11161_s21 }
 0xb14   : > { %10427 = vrot.lane.b32.xlu0 %v15327_v19, %s11161_s21 }
 0xb24   : > { %v4575_v30 = vpop.xlane.xlu0 %4574 }
 0xb25   : > { %v4603_v29 = vsub.f32 %v4555_v10, %v4575_v30 }
 0xb27   : > { %v4622_v21 = vmul.f32 1.442695, %v4603_v29 }
 0xb28   : > { %v4573_v5 = vpop.xlane.xlu0 %4572 }
 0xb29   : > { %10722 = vpow2.f32 %v4622_v21  ;;  %v4602_v1 = vsub.f32 %v4554_v41, %v4573_v5 }
 0xb2a   : > { %10724 = vpow2.f32 %v4630_v23 }
 0xb2b   : > { %v4620_v37 = vmul.f32 1.442695, %v4602_v1  ;;  %v15329_v1 = vld [vmem:[#allocation50_spill] sm:$0xff] }
 0xb2c   : > { %v4577_v4 = vpop.xlane.xlu0 %4576  ;;  %v15330_v58 = vpack.i.bf16 %v15328_v62, %v15329_v1  ;;  %v15339_v1 = vld [vmem:[#allocation63_spill] sm:$0xff] }
 0xb2d   : > { %10726 = vpow2.f32 %v4620_v37  ;;  %v4604_v10 = vsub.f32 %v13688_v60, %v4577_v4  ;;  %v15331_v37 = vld [vmem:[#allocation46_spill] sm:$0xff] }
 0xb2e   : > { %10728 = vpow2.f32 %v4626_v46  ;;  %v15332_v46 = vld [vmem:[#allocation42_spill] sm:$0xff] }
 0xb2f   : > { %10730 = vpow2.f32 %v4634_v20  ;;  %v4624_v51 = vmul.f32 1.442695, %v4604_v10  ;;  %v15333_v49 = vpack.i.bf16 %v15331_v37, %v15332_v46  ;;  %v15334_v4 = vld [vmem:[#allocation62_spill] sm:$0xff]  ;;  %v15341_v37 = vld [vmem:[#allocation77_spill] sm:$0xff] }
 0xb30   : > { %v4581_v27 = vpop.xlane.xlu0 %4580  ;;  %10732 = vpow2.f32 %v4638_v11  ;;  %v15335_v20 = vld [vmem:[#allocation58_spill] sm:$0xff]  ;;  %v10433_v11 = vpop.permute.xlu1 %10432 }
 0xb31   : > { %v4606_v41 = vsub.f32 %v13692_v22, %v4581_v27  ;;  %10734 = vpow2.f32 %v4624_v51  ;;  %v15336_v10 = vpack.i.bf16 %v15334_v4, %v15335_v20  ;;  %v15342_v20 = vld [vmem:[#allocation83_spill] sm:$0xff] }
 0xb32   : > { %10736 = vpow2.f32 %v4642_v25  ;;  %v10434_v25 = vunpack.i.l.bf16 %v10433_v11 }
 0xb33   : > { %v13734_v44 = vpop.eup %10722  ;;  %v4628_v60 = vmul.f32 1.442695, %v4606_v41  ;;  %v10435_v41 = vunpack.i.h.bf16 %v10433_v11 }
 0xb34   : > { %v4585_v16 = vpop.xlane.xlu0 %4584  ;;  %4654 = vadd.xlane.f32.xlu1 %v13734_v44  ;;  %v13739_v48 = vpop.eup %10724 }
 0xb35   : > { %v4608_v32 = vsub.f32 %v13696_v24, %v4585_v16  ;;  %10738 = vpow2.f32 %v4628_v60  ;;  %v10438_v59 = vpop.permute.xlu1 %10437 }
 0xb36   : > { %10740 = vpow2.f32 %v4646_v17  ;;  %v10439_v17 = vunpack.i.l.bf16 %v10438_v59 }
 0xb37   : > { %v13741_v53 = vpop.eup %10726  ;;  %v4632_v7 = vmul.f32 1.442695, %v4608_v32  ;;  %v10440_v32 = vunpack.i.h.bf16 %v10438_v59 }
 0xb38   : > { %v4589_v22 = vpop.xlane.xlu0 %4588  ;;  %4662 = vadd.xlane.f32.xlu1 %v13739_v48  ;;  %4652 = vadd.xlane.f32.xlu0 %v13741_v53  ;;  %v13746_v45 = vpop.eup %10728 }
 0xb39   : > { %v4610_v8 = vsub.f32 %v13700_v50, %v4589_v22  ;;  %v13748_v56 = vpop.eup %10730  ;;  %10742 = vpow2.f32 %v4632_v7  ;;  %v9656_v22 = vpack.c.bf16 %v10435_v41, %v10434_v25  ;;  %v15343_v25 = vld [vmem:[#allocation89_spill] sm:$0xff] }
 0xb3a   : > { %v13753_v36 = vpop.eup %10732 }
 0xb3b   : > { %v4636_v15 = vmul.f32 1.442695, %v4610_v8  ;;  %v13755_v9 = vpop.eup %10734 }
 0xb3c   : > { %v4593_v24 = vpop.xlane.xlu0 %4592  ;;  %4666 = vadd.xlane.f32.xlu1 %v13748_v56  ;;  %4658 = vadd.xlane.f32.xlu0 %v13746_v45  ;;  %v13760_v26 = vpop.eup %10736 }
 0xb3d   : > { %v4612_v19 = vsub.f32 %v13704_v38, %v4593_v24  ;;  %10744 = vpow2.f32 %v4636_v15 }
 0xb3f   : > { %v4640_v63 = vmul.f32 1.442695, %v4612_v19  ;;  %v13762_v29 = vpop.eup %10738  ;;  %v9660_v19 = vpack.c.bf16 %v10440_v32, %v10439_v17 }
 0xb40   : > { %4670 = vadd.xlane.f32.xlu1 %v13753_v36  ;;  %4656 = vadd.xlane.f32.xlu0 %v13755_v9  ;;  %v4597_v50 = vpop.xlane.xlu0 %4596  ;;  %v13766_v21 = vpop.eup %10740 }
 0xb41   : > { %v4614_v30 = vsub.f32 %v13708_v61, %v4597_v50  ;;  %10746 = vpow2.f32 %v4640_v63 }
 0xb43   : > { %v4644_v38 = vmul.f32 1.442695, %v4614_v30  ;;  %v13768_v13 = vpop.eup %10742 }
 0xb44   : > { %4674 = vadd.xlane.f32.xlu1 %v13760_v26  ;;  %4660 = vadd.xlane.f32.xlu0 %v13762_v29 }
 0xb45   : > { %10748 = vpow2.f32 %v4644_v38  ;;  %v15337_v38 = vld [vmem:[#allocation47_spill] sm:$0xff] }
 0xb47   : > { %v13772_v61 = vpop.eup %10744 }
 0xb48   : > { %4678 = vadd.xlane.f32.xlu1 %v13766_v21  ;;  %4664 = vadd.xlane.f32.xlu0 %v13768_v13 }
 0xb4b   : > { %v13775_v23 = vpop.eup %10746 }
 0xb4c   : > { %4668 = vadd.xlane.f32.xlu0 %v13772_v61 }
 0xb4f   : > { %v13778_v5 = vpop.eup %10748 }
 0xb50   : > { %4672 = vadd.xlane.f32.xlu0 %v13775_v23 }
 0xb54   : > { %4676 = vadd.xlane.f32.xlu0 %v13778_v5 }
 0xb59   : > { %10452 = vrot.lane.b32.xlu1 %v15330_v58, %s11161_s21 }
 0xb6a   : > { %10447 = vrot.lane.b32.xlu0 %v15333_v49, %s11161_s21 }
 0xb6e   : > { %10457 = vrot.lane.b32.xlu0 %v15336_v10, %s11161_s21 }
 0xb8b   : > { %v4651_v27 = vpop.xlane.xlu0 %4650 }
 0xb8c   : > { %v4649_v55 = vpop.xlane.xlu1 %4648 }
 0xb8d   : > { %10750 = vrcp.f32 %v4649_v55 }
 0xb8e   : > { %10752 = vrcp.f32 %v4651_v27 }
 0xb8f   : > { %v10428_v51 = vpop.permute.xlu0 %10427 }
 0xb90   : > { %v10430_v52 = vunpack.i.h.bf16 %v10428_v51  ;;  %v10429_v16 = vunpack.i.l.bf16 %v10428_v51  ;;  %v10443_v7 = vpop.permute.xlu1 %10442 }
 0xb91   : > { %v10445_v24 = vunpack.i.h.bf16 %v10443_v7  ;;  %v10444_v15 = vunpack.i.l.bf16 %v10443_v7  ;;  %v15344_v7 = vld [vmem:[#allocation95_spill] sm:$0xff] }
 0xb92   : > { %v9652_v60 = vpack.c.bf16 %v10430_v52, %v10429_v16 }
 0xb93   : > { %v9664_v63 = vpack.c.bf16 %v10445_v24, %v10444_v15 }
 0xb94   : > { %9653 = vmatprep.subr.bf16.mxu0 %v9652_v60 }
 0xb95   : > { %9655 = vmatpush3.bf16.msra.mxu0 %v9652_v60 }
 0xb96   : > { %9657 = vmatprep.subr.bf16.mxu0 %v9656_v22 }
 0xb97   : > { %v10751_v8 = vpop.eup %10750 }
 0xb98   : > { %v4696_v50 = vmul.f32 %v10751_v8, %v13715_v43  ;;  %v10753_v30 = vpop.eup %10752  ;;  %v15338_v43 = vld [vmem:[#allocation55_spill] sm:$0xff] }
 0xb99   : > { %9659 = vmatpush3.bf16.msra.mxu0 %v9656_v22  ;;  %v4697_v62 = vmul.f32 %v10753_v30, %v13713_v31  ;;  %v15340_v31 = vld [vmem:[#allocation71_spill] sm:$0xff] }
 0xb9a   : > { %9661 = vmatprep.subr.bf16.mxu0 %v9660_v19  ;;  %8596 = vmatprep.mubr.f32.mxu0 %v4696_v50 }
 0xb9d   : > { %9663 = vmatpush3.bf16.msra.mxu0 %v9660_v19 }
 0xb9e   : > { %9665 = vmatprep.subr.bf16.mxu0 %v9664_v63 }
 0xba1   : > { %9667 = vmatpush3.bf16.msra.mxu0 %v9664_v63 }
 0xba2   : > { %9670 = vmatprep.subr.msk.bf16.mxu0 %vm12120_vm1, %v15337_v38 }
 0xba4   : > { %8597 = vmatmul.mubr.f32.vlgmr.msra.gmra.mrb[144].mxu0 %v4697_v62 }
 0xbaa   : > { %9673 = vmatpush3.bf16.xpose.msk.msra.mxu0 %vm12120_vm1, %v15337_v38 }
 0xbab   : > { %9676 = vmatprep.subr.msk.bf16.mxu0 %vm12120_vm1, %v15338_v43 }
 0xbb2   : > { %9679 = vmatpush3.bf16.xpose.msk.msra.mxu0 %vm12120_vm1, %v15338_v43 }
 0xbb3   : > { %9682 = vmatprep.subr.msk.bf16.mxu0 %vm12120_vm1, %v15339_v1 }
 0xbba   : > { %9685 = vmatpush3.bf16.xpose.msk.msra.mxu0 %vm12120_vm1, %v15339_v1 }
 0xbbb   : > { %9688 = vmatprep.subr.msk.bf16.mxu0 %vm12120_vm1, %v15340_v31 }
 0xbc1   : > { %v4655_v58 = vpop.xlane.xlu1 %4654 }
 0xbc2   : > { %9691 = vmatpush3.bf16.xpose.msk.msra.mxu0 %vm12120_vm1, %v15340_v31  ;;  %10754 = vrcp.f32 %v4655_v58 }
 0xbc3   : > { %9694 = vmatprep.subr.msk.bf16.mxu0 %vm12120_vm1, %v15341_v37 }
 0xbc5   : > { %v4653_v46 = vpop.xlane.xlu0 %4652  ;;  %v4663_v49 = vpop.xlane.xlu1 %4662 }
 0xbc6   : > { %10756 = vrcp.f32 %v4653_v46 }
 0xbc9   : > { %v4659_v4 = vpop.xlane.xlu0 %4658  ;;  %v4667_v10 = vpop.xlane.xlu1 %4666 }
 0xbca   : > { %9697 = vmatpush3.bf16.xpose.msk.msra.mxu0 %vm12120_vm1, %v15341_v37  ;;  %10758 = vrcp.f32 %v4659_v4 }
 0xbcb   : > { %9700 = vmatprep.subr.msk.bf16.mxu0 %vm12120_vm1, %v15342_v20 }
 0xbcc   : > { %v10755_v59 = vpop.eup %10754 }
 0xbcd   : > { %v4657_v11 = vpop.xlane.xlu0 %4656  ;;  %v4671_v51 = vpop.xlane.xlu1 %4670  ;;  %v4699_v52 = vmul.f32 %v10755_v59, %v13734_v44  ;;  %v15347_v59 = vld [vmem:[#allocation34_spill] sm:$0xff] }
 0xbce   : > { %10760 = vrcp.f32 %v4657_v11  ;;  %v15345_v11 = vld [vmem:[#allocation32_spill] sm:$0xff] }
 0xbcf   : > { %10762 = vrcp.f32 %v4663_v49 }
 0xbd0   : > { %v10757_v27 = vpop.eup %10756 }
 0xbd1   : > { %v4661_v55 = vpop.xlane.xlu0 %4660  ;;  %v4698_v41 = vmul.f32 %v10757_v27, %v13741_v53  ;;  %v4675_v32 = vpop.xlane.xlu1 %4674  ;;  %v15348_v27 = vld [vmem:[#allocation35_spill] sm:$0xff] }
 0xbd2   : > { %9703 = vmatpush3.bf16.xpose.msk.msra.mxu0 %vm12120_vm1, %v15342_v20  ;;  %10764 = vrcp.f32 %v4661_v55  ;;  %v15352_v55 = vld [vmem:[#allocation39_spill] sm:$0xff] }
 0xbd3   : > { %9706 = vmatprep.subr.msk.bf16.mxu0 %vm12120_vm1, %v15343_v25  ;;  %8599 = vmatprep.mubr.f32.mxu0 %v4698_v41  ;;  %10766 = vrcp.f32 %v4667_v10  ;;  %v15354_v41 = vld [vmem:[#allocation44_spill] sm:$0xff] }
 0xbd4   : > { %8600 = vmatmul.mubr.f32.gmra.mrb[146].mxu0 %v4699_v52  ;;  %v10759_v60 = vpop.eup %10758  ;;  %v15356_v52 = vld [vmem:[#allocation52_spill] sm:$0xff] }
 0xbd5   : > { %v4665_v16 = vpop.xlane.xlu0 %4664  ;;  %v4701_v44 = vmul.f32 %v10759_v60, %v13746_v45  ;;  %v4679_v19 = vpop.xlane.xlu1 %4678  ;;  %v15358_v60 = vld [vmem:[#allocation60_spill] sm:$0xff] }
 0xbd6   : > { %10768 = vrcp.f32 %v4665_v16  ;;  %v15357_v16 = vld [vmem:[#allocation57_spill] sm:$0xff] }
 0xbd7   : > { %10770 = vrcp.f32 %v4671_v51  ;;  %v15353_v51 = vld [vmem:[#allocation41_spill] sm:$0xff] }
 0xbd8   : > { %v10761_v17 = vpop.eup %10760 }
 0xbd9   : > { %v4669_v22 = vpop.xlane.xlu0 %4668  ;;  %v4700_v53 = vmul.f32 %v10761_v17, %v13755_v9  ;;  %v10763_v8 = vpop.eup %10762  ;;  %v15360_v17 = vld [vmem:[#allocation68_spill] sm:$0xff] }
 0xbda   : > { %10772 = vrcp.f32 %v4669_v22  ;;  %9709 = vmatpush3.bf16.xpose.msk.msra.mxu0 %vm12120_vm1, %v15343_v25  ;;  %v4703_v63 = vmul.f32 %v10763_v8, %v13739_v48  ;;  %v15355_v25 = vld [vmem:[#allocation49_spill] sm:$0xff] }
 0xbdb   : > { %9712 = vmatprep.subr.msk.bf16.mxu0 %vm12120_vm1, %v15344_v7  ;;  %8602 = vmatprep.mubr.f32.mxu0 %v4700_v53  ;;  %10774 = vrcp.f32 %v4675_v32  ;;  %v15359_v32 = vld [vmem:[#allocation65_spill] sm:$0xff] }
 0xbdc   : > { %v10765_v24 = vpop.eup %10764  ;;  %8603 = vmatmul.mubr.f32.gmra.mrb[148].mxu0 %v4701_v44 }
 0xbdd   : > { %v4673_v15 = vpop.xlane.xlu0 %4672  ;;  %v4702_v50 = vmul.f32 %v10765_v24, %v13762_v29  ;;  %v10767_v30 = vpop.eup %10766 }
 0xbde   : > { %10776 = vrcp.f32 %v4673_v15  ;;  %v4705_v43 = vmul.f32 %v10767_v30, %v13748_v56 }
 0xbdf   : > { %8605 = vmatprep.mubr.f32.mxu0 %v4702_v50  ;;  %10778 = vrcp.f32 %v4679_v19 }
 0xbe0   : > { %v10769_v9 = vpop.eup %10768  ;;  %8606 = vmatmul.mubr.f32.gmra.mrb[150].mxu0 %v4703_v63 }
 0xbe1   : > { %v4677_v38 = vpop.xlane.xlu0 %4676  ;;  %v4704_v45 = vmul.f32 %v10769_v9, %v13768_v13  ;;  %v10771_v62 = vpop.eup %10770 }
 0xbe2   : > { %10780 = vrcp.f32 %v4677_v38  ;;  %9715 = vmatpush3.bf16.xpose.msk.msra.mxu0 %vm12120_vm1, %v15344_v7  ;;  %v4707_v46 = vmul.f32 %v10771_v62, %v13753_v36 }
 0xbe3   : > { %8608 = vmatprep.mubr.f32.mxu0 %v4704_v45 }
 0xbe4   : > { %v10773_v1 = vpop.eup %10772  ;;  %8609 = vmatmul.mubr.f32.gmra.mrb[152].mxu0 %v4705_v43 }
 0xbe5   : > { %v10448_v48 = vpop.permute.xlu0 %10447  ;;  %v4706_v29 = vmul.f32 %v10773_v1, %v13772_v61  ;;  %v10775_v37 = vpop.eup %10774 }
 0xbe6   : > { %v10450_v31 = vunpack.i.h.bf16 %v10448_v48  ;;  %v10449_v58 = vunpack.i.l.bf16 %v10448_v48  ;;  %v4709_v61 = vmul.f32 %v10775_v37, %v13760_v26  ;;  %v15349_v26 = vld [vmem:[#allocation36_spill] sm:$0xff] }
 0xbe7   : > { %8611 = vmatprep.mubr.f32.mxu0 %v4706_v29 }
 0xbe8   : > { %v10777_v49 = vpop.eup %10776  ;;  %v13853_v4 = vpack.c.bf16 %v10450_v31, %v10449_v58  ;;  %8612 = vmatmul.mubr.f32.gmra.mrb[154].mxu0 %v4707_v46 }
 0xbe9   : > { %v4708_v13 = vmul.f32 %v10777_v49, %v13775_v23  ;;  %v10779_v56 = vpop.eup %10778  ;;  %v15346_v23 = vld [vmem:[#allocation33_spill] sm:$0xff] }
 0xbea   : > { %9750 = vmatprep.subr.msk.bf16.mxu1 %vm12120_vm1, %v13853_v4  ;;  %v4711_v36 = vmul.f32 %v10779_v56, %v13766_v21  ;;  %v15351_v21 = vld [vmem:[#allocation38_spill] sm:$0xff] }
 0xbeb   : > { %8614 = vmatprep.mubr.f32.mxu0 %v4708_v13 }
 0xbec   : > { %v10781_v20 = vpop.eup %10780  ;;  %8615 = vmatmul.mubr.f32.gmra.mrb[156].mxu0 %v4709_v61 }
 0xbed   : > { %v4710_v10 = vmul.f32 %v10781_v20, %v13778_v5  ;;  %v15350_v5 = vld [vmem:[#allocation37_spill] sm:$0xff] }
 0xbef   : > { %8617 = vmatprep.mubr.f32.mxu0 %v4710_v10 }
 0xbf0   : > { %8618 = vmatmul.mubr.f32.gmra.mrb[158].mxu0 %v4711_v36 }
 0xbf1   : > { %8652 = vmatprep.mubr.msk.f32.mxu0 %vm2367_vm0, %v15345_v11 }
 0xbf4   : > { %8653 = vmatmul.mubr.msk.f32.vlgmr.msra.gmra.mrb[160].mxu0 %vm2367_vm0, %v15346_v23 }
 0xbf5   : > { %8655 = vmatprep.mubr.msk.f32.mxu0 %vm2367_vm0, %v15347_v59 }
 0xbf8   : > { %8656 = vmatmul.mubr.msk.f32.gmra.mrb[162].mxu0 %vm2367_vm0, %v15348_v27 }
 0xbf9   : > { %8658 = vmatprep.mubr.msk.f32.mxu0 %vm2367_vm0, %v15349_v26 }
 0xbfc   : > { %8659 = vmatmul.mubr.msk.f32.gmra.mrb[164].mxu0 %vm2367_vm0, %v15350_v5 }
 0xbfd   : > { %8661 = vmatprep.mubr.msk.f32.mxu0 %vm2367_vm0, %v15351_v21 }
 0xc00   : > { %8662 = vmatmul.mubr.msk.f32.gmra.mrb[166].mxu0 %vm2367_vm0, %v15352_v55 }
 0xc01   : > { %8664 = vmatprep.mubr.msk.f32.mxu0 %vm2367_vm0, %v15353_v51 }
 0xc04   : > { %8665 = vmatmul.mubr.msk.f32.gmra.mrb[168].mxu0 %vm2367_vm0, %v15354_v41 }
 0xc05   : > { %8667 = vmatprep.mubr.msk.f32.mxu0 %vm2367_vm0, %v15355_v25 }
 0xc08   : > { %8668 = vmatmul.mubr.msk.f32.gmra.mrb[170].mxu0 %vm2367_vm0, %v15356_v52 }
 0xc09   : > { %8670 = vmatprep.mubr.msk.f32.mxu0 %vm2367_vm0, %v15357_v16 }
 0xc0c   : > { %8671 = vmatmul.mubr.msk.f32.gmra.mrb[172].mxu0 %vm2367_vm0, %v15358_v60 }
 0xc0d   : > { %8673 = vmatprep.mubr.msk.f32.mxu0 %vm2367_vm0, %v15359_v32 }
 0xc10   : > { %8674 = vmatmul.mubr.msk.f32.gmra.mrb[174].mxu0 %vm2367_vm0, %v15360_v17 }
 0xc77   : > { %v13894_v22 = vpop.f32.mrb[144].mxu0 }
 0xc78   : > { %15361 = vst [vmem:[#allocation115_spill] sm:$0xff] %v13894_v22  ;;  %v13896_v53 = vpop.f32.mrb[145].mxu0 }
 0xc79   : > { %15362 = vst [vmem:[#allocation122_spill] sm:$0xff] %v13896_v53  ;;  %v15384_v53 = vld [vmem:[#allocation79_spill] sm:$0xff] }
 0xca7   : > { %v13898_v7 = vpop.f32.mrb[146].mxu0 }
 0xca8   : > { %15363 = vst [vmem:[#allocation120_spill] sm:$0xff] %v13898_v7  ;;  %v13900_v44 = vpop.f32.mrb[147].mxu0 }
 0xca9   : > { %15364 = vst [vmem:[#allocation157_spill] sm:$0xff] %v13900_v44  ;;  %v15383_v44 = vld [vmem:[#allocation82_spill] sm:$0xff] }
 0xcaf   : > { %v13902_v8 = vpop.f32.mrb[148].mxu0 }
 0xcb0   : > { %15365 = vst [vmem:[#allocation127_spill] sm:$0xff] %v13902_v8  ;;  %v13904_v24 = vpop.f32.mrb[149].mxu0 }
 0xcb1   : > { %15366 = vst [vmem:[#allocation125_spill] sm:$0xff] %v13904_v24 }
 0xcb3   : > { %v13906_v15 = vpop.f32.mrb[150].mxu0 }
 0xcb4   : > { %15367 = vst [vmem:[#allocation112_spill] sm:$0xff] %v13906_v15  ;;  %v13908_v19 = vpop.f32.mrb[151].mxu0 }
 0xcb5   : > { %15368 = vst [vmem:[#allocation110_spill] sm:$0xff] %v13908_v19  ;;  %v15381_v19 = vld [vmem:[#allocation73_spill] sm:$0xff] }
 0xcb7   : > { %v13910_v50 = vpop.f32.mrb[152].mxu0 }
 0xcb8   : > { %15369 = vst [vmem:[#allocation51_spill] sm:$0xff] %v13910_v50  ;;  %v13912_v63 = vpop.f32.mrb[153].mxu0 }
 0xcb9   : > { %15370 = vst [vmem:[#allocation48_spill] sm:$0xff] %v13912_v63 }
 0xcbb   : > { %v13914_v30 = vpop.f32.mrb[154].mxu0 }
 0xcbc   : > { %15371 = vst [vmem:[#allocation43_spill] sm:$0xff] %v13914_v30  ;;  %v13916_v9 = vpop.f32.mrb[155].mxu0  ;;  %v15378_v30 = vld [vmem:[#allocation66_spill] sm:$0xff] }
 0xcbd   : > { %15372 = vst [vmem:[#allocation40_spill] sm:$0xff] %v13916_v9 }
 0xcbf   : > { %v13918_v38 = vpop.f32.mrb[156].mxu0 }
 0xcc0   : > { %15373 = vst [vmem:[#allocation59_spill] sm:$0xff] %v13918_v38  ;;  %v13920_v45 = vpop.f32.mrb[157].mxu0 }
 0xcc1   : > { %15374 = vst [vmem:[#allocation56_spill] sm:$0xff] %v13920_v45  ;;  %v15377_v45 = vld [vmem:[#allocation70_spill] sm:$0xff] }
 0xcc3   : > { %v13922_v62 = vpop.f32.mrb[158].mxu0 }
 0xcc4   : > { %15375 = vst [vmem:[#allocation45_spill] sm:$0xff] %v13922_v62  ;;  %v13924_v43 = vpop.f32.mrb[159].mxu0 }
 0xcc5   : > { %15376 = vst [vmem:[#allocation53_spill] sm:$0xff] %v13924_v43 }
 0xcc7   : > { %v8654_v1 = vpop.f32.mrb[160].mxu0 }
 0xcc8   : > { %v5243_v48 = vmul.f32 0.05103104, %v8654_v1  ;;  %v5163_v29 = vpop.f32.mrb[161].mxu0 }
 0xcc9   : > { %v5242_v31 = vmul.f32 0.05103104, %v5163_v29 }
 0xcca   : > { %v13927_v58 = vadd.f32 %v5243_v48, %v15194_v57 }
 0xccb   : > { %v13930_v37 = vadd.f32 %v5242_v31, %v15195_v18  ;;  %v8657_v46 = vpop.f32.mrb[162].mxu0 }
 0xccc   : > { %5276 = vmax.xlane.f32.xlu1 %v13927_v58  ;;  %v5173_v49 = vpop.f32.mrb[163].mxu0 }
 0xccd   : > { %v5244_v13 = vmul.f32 0.05103104, %v5173_v49  ;;  %5274 = vmax.xlane.f32.xlu0 %v13930_v37 }
 0xccf   : > { %v13935_v56 = vadd.f32 %v5244_v13, %v15315_v40  ;;  %v8660_v61 = vpop.f32.mrb[164].mxu0 }
 0xcd0   : > { %v5183_v20 = vpop.f32.mrb[165].mxu0 }
 0xcd1   : > { %v5246_v10 = vmul.f32 0.05103104, %v5183_v20  ;;  %5278 = vmax.xlane.f32.xlu0 %v13935_v56 }
 0xcd3   : > { %v13939_v36 = vadd.f32 %v5246_v10, %v15316_v6  ;;  %v8663_v1 = vpop.f32.mrb[166].mxu0 }
 0xcd4   : > { %v5193_v48 = vpop.f32.mrb[167].mxu0 }
 0xcd5   : > { %v5248_v29 = vmul.f32 0.05103104, %v5193_v48  ;;  %5282 = vmax.xlane.f32.xlu0 %v13939_v36  ;;  %v15379_v48 = vpack.i.bf16 %v15377_v45, %v15378_v30  ;;  %v5245_v45 = vmul.f32 0.05103104, %v8657_v46 }
 0xcd7   : > { %v13943_v31 = vadd.f32 %v5248_v29, %v15317_v3  ;;  %v8666_v49 = vpop.f32.mrb[168].mxu0 }
 0xcd8   : > { %v5203_v62 = vpop.f32.mrb[169].mxu0 }
 0xcd9   : > { %v5250_v13 = vmul.f32 0.05103104, %v5203_v62  ;;  %5286 = vmax.xlane.f32.xlu0 %v13943_v31 }
 0xcdb   : > { %v13947_v20 = vadd.f32 %v5250_v13, %v15318_v47  ;;  %v8669_v43 = vpop.f32.mrb[170].mxu0 }
 0xcdc   : > { %v5213_v38 = vpop.f32.mrb[171].mxu0  ;;  %v5253_v46 = vmul.f32 0.05103104, %v8669_v43  ;;  %v13989_v43 = vpop.permute.xlu1 %10452 }
 0xcdd   : > { %v5252_v10 = vmul.f32 0.05103104, %v5213_v38  ;;  %10462 = vrot.lane.b32.xlu1 %v15379_v48, %s11161_s21  ;;  %5290 = vmax.xlane.f32.xlu0 %v13947_v20  ;;  %v5247_v48 = vmul.f32 0.05103104, %v8660_v61 }
 0xcde   : > { %v13978_v61 = vadd.f32 %v5253_v46, %v15199_v14 }
 0xcdf   : > { %v13955_v29 = vadd.f32 %v5252_v10, %v15319_v35  ;;  %v8672_v9 = vpop.f32.mrb[172].mxu0  ;;  %v5261_v10 = vadd.f32 %v5245_v45, %v15211_v34  ;;  %v13991_v45 = vpop.permute.xlu0 %10457 }
 0xce0   : > { %v5223_v62 = vpop.f32.mrb[173].mxu0 }
 0xce1   : > { %v5254_v50 = vmul.f32 0.05103104, %v5223_v62  ;;  %5294 = vmax.xlane.f32.xlu0 %v13955_v29  ;;  %v15380_v62 = vld [vmem:[#allocation76_spill] sm:$0xff] }
 0xce2   : > { %v15382_v8 = vpack.i.bf16 %v15380_v62, %v15381_v19  ;;  %v5255_v19 = vmul.f32 0.05103104, %v8672_v9 }
 0xce3   : > { %v13959_v13 = vadd.f32 %v5254_v50, %v15320_v2  ;;  %v8675_v63 = vpop.f32.mrb[174].mxu0  ;;  %v5263_v50 = vadd.f32 %v5247_v48, %v15196_v39 }
 0xce4   : > { %v5233_v38 = vpop.f32.mrb[175].mxu0 }
 0xce5   : > { %v5256_v15 = vmul.f32 0.05103104, %v5233_v38  ;;  %5298 = vmax.xlane.f32.xlu0 %v13959_v13  ;;  %v5249_v38 = vmul.f32 0.05103104, %v8663_v1  ;;  %v5257_v1 = vmul.f32 0.05103104, %v8675_v63 }
 0xce7   : > { %v13963_v30 = vadd.f32 %v5256_v15, %v15321_v54  ;;  %v5265_v24 = vadd.f32 %v5249_v38, %v15197_v12  ;;  %v5251_v15 = vmul.f32 0.05103104, %v8666_v49  ;;  %v13986_v49 = vadd.f32 %v5257_v1, %v15204_v42 }
 0xce9   : > { %5302 = vmax.xlane.f32.xlu0 %v13963_v30  ;;  %v13974_v7 = vadd.f32 %v5251_v15, %v15198_v0 }
 0xcff   : > { %10467 = vrot.lane.b32.xlu0 %v15382_v8, %s11161_s21  ;;  %v13982_v8 = vadd.f32 %v5255_v19, %v15200_v28 }
 0xd01   : > { %5280 = vmax.xlane.f32.xlu1 %v5261_v10 }
 0xd05   : > { %5284 = vmax.xlane.f32.xlu1 %v5263_v50 }
 0xd09   : > { %5288 = vmax.xlane.f32.xlu1 %v5265_v24 }
 0xd0d   : > { %5292 = vmax.xlane.f32.xlu1 %v13974_v7 }
 0xd11   : > { %5296 = vmax.xlane.f32.xlu1 %v13978_v61 }
 0xd15   : > { %5300 = vmax.xlane.f32.xlu1 %v13982_v8 }
 0xd19   : > { %5304 = vmax.xlane.f32.xlu1 %v13986_v49 }
 0xd59   : > { %v5277_v48 = vpop.xlane.xlu1 %5276 }
 0xd5a   : > { %v5307_v9 = vsub.f32 %v13927_v58, %v5277_v48  ;;  %v5275_v62 = vpop.xlane.xlu0 %5274  ;;  %v15385_v58 = vpack.i.bf16 %v15383_v44, %v15384_v53 }
 0xd5b   : > { %v5306_v38 = vsub.f32 %v13930_v37, %v5275_v62  ;;  %v15386_v37 = vld [vmem:[#allocation88_spill] sm:$0xff] }
 0xd5c   : > { %v5324_v15 = vmul.f32 1.442695, %v5307_v9  ;;  %v15387_v9 = vld [vmem:[#allocation85_spill] sm:$0xff] }
 0xd5d   : > { %v5322_v46 = vmul.f32 1.442695, %v5306_v38  ;;  %v15388_v62 = vpack.i.bf16 %v15386_v37, %v15387_v9 }
 0xd5e   : > { %10782 = vpow2.f32 %v5324_v15  ;;  %v5279_v1 = vpop.xlane.xlu0 %5278  ;;  %v14009_v15 = vpop.permute.xlu1 %10462 }
 0xd5f   : > { %10784 = vpow2.f32 %v5322_v46  ;;  %v5308_v46 = vsub.f32 %v13935_v56, %v5279_v1 }
 0xd61   : > { %v5326_v54 = vmul.f32 1.442695, %v5308_v46 }
 0xd62   : > { %v5283_v48 = vpop.xlane.xlu0 %5282 }
 0xd63   : > { %v5310_v35 = vsub.f32 %v13939_v36, %v5283_v48  ;;  %10786 = vpow2.f32 %v5326_v54 }
 0xd65   : > { %v5330_v14 = vmul.f32 1.442695, %v5310_v35 }
 0xd66   : > { %v5287_v38 = vpop.xlane.xlu0 %5286 }
 0xd67   : > { %v5312_v47 = vsub.f32 %v13943_v31, %v5287_v38 }
 0xd68   : > { %v13995_v63 = vpop.eup %10782 }
 0xd69   : > { %v13997_v19 = vpop.eup %10784  ;;  %5356 = vadd.xlane.f32.xlu1 %v13995_v63  ;;  %v5334_v36 = vmul.f32 1.442695, %v5312_v47 }
 0xd6a   : > { %5354 = vadd.xlane.f32.xlu0 %v13997_v19  ;;  %v5291_v22 = vpop.xlane.xlu0 %5290 }
 0xd6d   : > { %v14016_v54 = vpop.eup %10786 }
 0xd6e   : > { %v5295_v28 = vpop.xlane.xlu0 %5294 }
 0xd6f   : > { %v5316_v37 = vsub.f32 %v13955_v29, %v5295_v28  ;;  %v5314_v28 = vsub.f32 %v13947_v20, %v5291_v22 }
 0xd71   : > { %v5342_v1 = vmul.f32 1.442695, %v5316_v37 }
 0xd7a   : > { %10472 = vrot.lane.b32.xlu1 %v15385_v58, %s11161_s21 }
 0xd80   : > { %10477 = vrot.lane.b32.xlu0 %v15388_v62, %s11161_s21 }
 0xd8e   : > { %v5281_v2 = vpop.xlane.xlu1 %5280 }
 0xd8f   : > { %v5309_v42 = vsub.f32 %v5261_v10, %v5281_v2 }
 0xd91   : > { %v5328_v53 = vmul.f32 1.442695, %v5309_v42 }
 0xd92   : > { %v5285_v44 = vpop.xlane.xlu1 %5284 }
 0xd93   : > { %10788 = vpow2.f32 %v5328_v53  ;;  %v5311_v58 = vsub.f32 %v5263_v50, %v5285_v44 }
 0xd95   : > { %v5332_v9 = vmul.f32 1.442695, %v5311_v58 }
 0xd96   : > { %v5289_v62 = vpop.xlane.xlu1 %5288 }
 0xd97   : > { %10790 = vpow2.f32 %v5332_v9  ;;  %v5313_v56 = vsub.f32 %v5265_v24, %v5289_v62  ;;  %v5299_v24 = vpop.xlane.xlu0 %5298 }
 0xd98   : > { %10792 = vpow2.f32 %v5330_v14  ;;  %v5318_v50 = vsub.f32 %v13959_v13, %v5299_v24 }
 0xd99   : > { %v5336_v2 = vmul.f32 1.442695, %v5313_v56 }
 0xd9a   : > { %v5293_v10 = vpop.xlane.xlu1 %5292  ;;  %v5346_v44 = vmul.f32 1.442695, %v5318_v50  ;;  %v10454_v50 = vunpack.i.l.bf16 %v13989_v43 }
 0xd9b   : > { %10794 = vpow2.f32 %v5336_v2  ;;  %v5315_v42 = vsub.f32 %v13974_v7, %v5293_v10  ;;  %v5338_v7 = vmul.f32 1.442695, %v5314_v28  ;;  %v15389_v28 = vld [vmem:[#allocation94_spill] sm:$0xff] }
 0xd9c   : > { %10796 = vpow2.f32 %v5342_v1 }
 0xd9d   : > { %v14018_v35 = vpop.eup %10788  ;;  %10798 = vpow2.f32 %v5334_v36  ;;  %v5340_v14 = vmul.f32 1.442695, %v5315_v42 }
 0xd9e   : > { %v5297_v29 = vpop.xlane.xlu1 %5296  ;;  %5358 = vadd.xlane.f32.xlu1 %v14016_v54 }
 0xd9f   : > { %5360 = vadd.xlane.f32.xlu0 %v14018_v35  ;;  %10800 = vpow2.f32 %v5340_v14  ;;  %v5317_v22 = vsub.f32 %v13978_v61, %v5297_v29  ;;  %v5303_v61 = vpop.xlane.xlu0 %5302  ;;  %v15390_v29 = vld [vmem:[#allocation91_spill] sm:$0xff] }
 0xda0   : > { %10802 = vpow2.f32 %v5338_v7  ;;  %v5320_v9 = vsub.f32 %v13963_v30, %v5303_v61  ;;  %v15391_v24 = vpack.i.bf16 %v15389_v28, %v15390_v29  ;;  %v10455_v7 = vunpack.i.h.bf16 %v13989_v43 }
 0xda1   : > { %v14023_v31 = vpop.eup %10790  ;;  %v5344_v58 = vmul.f32 1.442695, %v5317_v22  ;;  %v10465_v43 = vunpack.i.h.bf16 %v14009_v15 }
 0xda2   : > { %v14025_v47 = vpop.eup %10792  ;;  %v5301_v48 = vpop.xlane.xlu1 %5300  ;;  %5364 = vadd.xlane.f32.xlu1 %v14023_v31  ;;  %v5350_v1 = vmul.f32 1.442695, %v5320_v9 }
 0xda3   : > { %v5319_v20 = vsub.f32 %v13982_v8, %v5301_v48  ;;  %5362 = vadd.xlane.f32.xlu0 %v14025_v47 }
 0xda5   : > { %v14032_v38 = vpop.eup %10794  ;;  %v5348_v46 = vmul.f32 1.442695, %v5319_v20  ;;  %v9754_v20 = vpack.c.bf16 %v10455_v7, %v10454_v50 }
 0xda6   : > { %v14034_v53 = vpop.eup %10796  ;;  %5368 = vadd.xlane.f32.xlu1 %v14032_v38  ;;  %v5305_v13 = vpop.xlane.xlu1 %5304 }
 0xda7   : > { %10804 = vpow2.f32 %v5348_v46  ;;  %v5321_v37 = vsub.f32 %v13986_v49, %v5305_v13  ;;  %5374 = vadd.xlane.f32.xlu0 %v14034_v53  ;;  %v14039_v8 = vpop.eup %10798  ;;  %v10460_v46 = vunpack.i.h.bf16 %v13991_v45 }
 0xda8   : > { %10806 = vpow2.f32 %v5346_v44  ;;  %v10459_v44 = vunpack.i.l.bf16 %v13991_v45 }
 0xda9   : > { %10808 = vpow2.f32 %v5344_v58  ;;  %v5352_v62 = vmul.f32 1.442695, %v5321_v37  ;;  %v14043_v56 = vpop.eup %10800 }
 0xdaa   : > { %5366 = vadd.xlane.f32.xlu1 %v14039_v8  ;;  %v14046_v2 = vpop.eup %10802  ;;  %v9760_v13 = vpack.c.bf16 %v10460_v46, %v10459_v44 }
 0xdab   : > { %10810 = vpow2.f32 %v5352_v62 }
 0xdac   : > { %10812 = vpow2.f32 %v5350_v1 }
 0xdae   : > { %5372 = vadd.xlane.f32.xlu1 %v14043_v56 }
 0xdb1   : > { %v14048_v49 = vpop.eup %10804 }
 0xdb2   : > { %5370 = vadd.xlane.f32.xlu1 %v14046_v2  ;;  %5380 = vadd.xlane.f32.xlu0 %v14048_v49  ;;  %v14052_v10 = vpop.eup %10806 }
 0xdb3   : > { %v14054_v30 = vpop.eup %10808 }
 0xdb5   : > { %v14058_v36 = vpop.eup %10810 }
 0xdb6   : > { %5376 = vadd.xlane.f32.xlu1 %v14054_v30  ;;  %5378 = vadd.xlane.f32.xlu0 %v14052_v10  ;;  %v14061_v42 = vpop.eup %10812 }
 0xdba   : > { %5384 = vadd.xlane.f32.xlu1 %v14058_v36 }
 0xdbe   : > { %5382 = vadd.xlane.f32.xlu1 %v14061_v42 }
 0xdcc   : > { %10482 = vrot.lane.b32.xlu0 %v15391_v24, %s11161_s21 }
 0xdcf   : > { %5581 = vrot.lane.b32.xlu1 %v15346_v23, %s11161_s21  ;;  %v15393_v23 = vld [vmem:[#allocation134_spill] sm:$0xff] }
 0xdd0   : > { %5579 = vrot.lane.b32.xlu0 %v15345_v11, %s11161_s21  ;;  %v15392_v11 = vld [vmem:[#allocation133_spill] sm:$0xff] }
 0xdd3   : > { %5585 = vrot.lane.b32.xlu1 %v15348_v27, %s11161_s21  ;;  %v15395_v27 = vld [vmem:[#allocation130_spill] sm:$0xff] }
 0xdd4   : > { %5583 = vrot.lane.b32.xlu0 %v15347_v59, %s11161_s21  ;;  %v15394_v59 = vpack.i.bf16 %v15392_v11, %v15393_v23 }
 0xdd7   : > { %5589 = vrot.lane.b32.xlu1 %v15350_v5, %s11161_s21 }
 0xdd8   : > { %5587 = vrot.lane.b32.xlu0 %v15349_v26, %s11161_s21  ;;  %v15396_v26 = vld [vmem:[#allocation131_spill] sm:$0xff] }
 0xdd9   : > { %v15397_v5 = vpack.i.bf16 %v15395_v27, %v15396_v26 }
 0xddb   : > { %5593 = vrot.lane.b32.xlu1 %v15352_v55, %s11161_s21  ;;  %v15398_v55 = vld [vmem:[#allocation139_spill] sm:$0xff] }
 0xddc   : > { %5591 = vrot.lane.b32.xlu0 %v15351_v21, %s11161_s21  ;;  %v10468_v21 = vpop.permute.xlu0 %10467 }
 0xddd   : > { %v10469_v45 = vunpack.i.l.bf16 %v10468_v21 }
 0xddf   : > { %5597 = vrot.lane.b32.xlu1 %v15354_v41, %s11161_s21 }
 0xde0   : > { %5595 = vrot.lane.b32.xlu0 %v15353_v51, %s11161_s21  ;;  %v15399_v51 = vld [vmem:[#allocation140_spill] sm:$0xff] }
 0xde1   : > { %v15400_v41 = vpack.i.bf16 %v15398_v55, %v15399_v51 }
 0xde3   : > { %5601 = vrot.lane.b32.xlu1 %v15356_v52, %s11161_s21  ;;  %v15402_v52 = vld [vmem:[#allocation137_spill] sm:$0xff] }
 0xde4   : > { %5599 = vrot.lane.b32.xlu0 %v15355_v25, %s11161_s21  ;;  %v15401_v25 = vld [vmem:[#allocation136_spill] sm:$0xff] }
 0xde7   : > { %5605 = vrot.lane.b32.xlu1 %v15358_v60, %s11161_s21 }
 0xde8   : > { %5603 = vrot.lane.b32.xlu0 %v15357_v16, %s11161_s21  ;;  %v15403_v16 = vpack.i.bf16 %v15401_v25, %v15402_v52 }
 0xdeb   : > { %5609 = vrot.lane.b32.xlu1 %v15360_v17, %s11161_s21 }
 0xdec   : > { %5607 = vrot.lane.b32.xlu0 %v15359_v32, %s11161_s21 }
 0xdef   : > { %10492 = vrot.lane.b32.xlu1 %v15394_v59, %s11161_s21 }
 0xdf0   : > { %10487 = vrot.lane.b32.xlu0 %v15397_v5, %s11161_s21 }
 0xdf3   : > { %10502 = vrot.lane.b32.xlu1 %v15400_v41, %s11161_s21 }
 0xdf4   : > { %10497 = vrot.lane.b32.xlu0 %v15403_v16, %s11161_s21 }
 0xdf6   : > { %v5357_v60 = vpop.xlane.xlu1 %5356 }
 0xdf7   : > { %10814 = vrcp.f32 %v5357_v60  ;;  %v5355_v32 = vpop.xlane.xlu0 %5354 }
 0xdf8   : > { %10816 = vrcp.f32 %v5355_v32 }
 0xdfa   : > { %v10473_v37 = vpop.permute.xlu1 %10472 }
 0xdfb   : > { %v10475_v61 = vunpack.i.h.bf16 %v10473_v37  ;;  %v10474_v9 = vunpack.i.l.bf16 %v10473_v37  ;;  %v10478_v62 = vpop.permute.xlu0 %10477 }
 0xdfc   : > { %v10480_v1 = vunpack.i.h.bf16 %v10478_v62  ;;  %v10479_v28 = vunpack.i.l.bf16 %v10478_v62 }
 0xdfe   : > { %v9784_v11 = vpack.c.bf16 %v10480_v1, %v10479_v28 }
 0xe01   : > { %v10815_v17 = vpop.eup %10814 }
 0xe02   : > { %v10817_v14 = vpop.eup %10816  ;;  %v5403_v22 = vmul.f32 %v10815_v17, %v13995_v63  ;;  %v10464_v63 = vunpack.i.l.bf16 %v14009_v15  ;;  %v9778_v15 = vpack.c.bf16 %v10475_v61, %v10474_v9 }
 0xe03   : > { %v5402_v48 = vmul.f32 %v10817_v14, %v13997_v19 }
 0xe04   : > { %v9766_v19 = vpack.c.bf16 %v10465_v43, %v10464_v63 }
 0xe05   : > { %8708 = vmatprep.mubr.f32.mxu1 %v5402_v48 }
 0xe06   : > { %8709 = vmatmul.mubr.f32.vlgmr.msra.gmra.mrb[176].mxu1 %v5403_v22 }
 0xe07   : > { %9753 = vmatpush3.bf16.xpose.msk.msra.mxu1 %vm12120_vm1, %v13853_v4  ;;  %v10470_v4 = vunpack.i.h.bf16 %v10468_v21 }
 0xe08   : > { %9756 = vmatprep.subr.msk.bf16.mxu1 %vm12120_vm1, %v9754_v20 }
 0xe09   : > { %v9772_v58 = vpack.c.bf16 %v10470_v4, %v10469_v45 }
 0xe0f   : > { %9759 = vmatpush3.bf16.xpose.msk.msra.mxu1 %vm12120_vm1, %v9754_v20 }
 0xe10   : > { %9762 = vmatprep.subr.msk.bf16.mxu1 %vm12120_vm1, %v9760_v13 }
 0xe17   : > { %9765 = vmatpush3.bf16.xpose.msk.msra.mxu1 %vm12120_vm1, %v9760_v13 }
 0xe18   : > { %9768 = vmatprep.subr.msk.bf16.mxu1 %vm12120_vm1, %v9766_v19 }
 0xe1f   : > { %9771 = vmatpush3.bf16.xpose.msk.msra.mxu1 %vm12120_vm1, %v9766_v19 }
 0xe20   : > { %9774 = vmatprep.subr.msk.bf16.mxu1 %vm12120_vm1, %v9772_v58 }
 0xe27   : > { %9777 = vmatpush3.bf16.xpose.msk.msra.mxu1 %vm12120_vm1, %v9772_v58 }
 0xe28   : > { %9780 = vmatprep.subr.msk.bf16.mxu1 %vm12120_vm1, %v9778_v15 }
 0xe2b   : > { %v5359_v29 = vpop.xlane.xlu1 %5358 }
 0xe2c   : > { %10818 = vrcp.f32 %v5359_v29  ;;  %v5361_v24 = vpop.xlane.xlu0 %5360 }
 0xe2d   : > { %10820 = vrcp.f32 %v5361_v24 }
 0xe2f   : > { %9783 = vmatpush3.bf16.xpose.msk.msra.mxu1 %vm12120_vm1, %v9778_v15  ;;  %v5365_v23 = vpop.xlane.xlu1 %5364 }
 0xe30   : > { %10822 = vrcp.f32 %v5365_v23  ;;  %9786 = vmatprep.subr.msk.bf16.mxu1 %vm12120_vm1, %v9784_v11  ;;  %v5363_v59 = vpop.xlane.xlu0 %5362 }
 0xe31   : > { %10824 = vrcp.f32 %v5363_v59 }
 0xe33   : > { %v5369_v27 = vpop.xlane.xlu1 %5368 }
 0xe34   : > { %10826 = vrcp.f32 %v5369_v27  ;;  %v5375_v52 = vpop.xlane.xlu0 %5374 }
 0xe36   : > { %v10819_v26 = vpop.eup %10818 }
 0xe37   : > { %v10821_v5 = vpop.eup %10820  ;;  %9789 = vmatpush3.bf16.xpose.msk.msra.mxu1 %vm12120_vm1, %v9784_v11  ;;  %v5367_v21 = vpop.xlane.xlu1 %5366  ;;  %v5404_v55 = vmul.f32 %v10819_v26, %v14016_v54 }
 0xe38   : > { %10828 = vrcp.f32 %v5367_v21  ;;  %v5405_v51 = vmul.f32 %v10821_v5, %v14018_v35 }
 0xe39   : > { %8711 = vmatprep.mubr.f32.mxu1 %v5404_v55  ;;  %10830 = vrcp.f32 %v5375_v52 }
 0xe3a   : > { %v10823_v41 = vpop.eup %10822  ;;  %8712 = vmatmul.mubr.f32.gmra.mrb[178].mxu1 %v5405_v51 }
 0xe3b   : > { %v10825_v25 = vpop.eup %10824  ;;  %v5373_v16 = vpop.xlane.xlu1 %5372  ;;  %v5407_v32 = vmul.f32 %v10823_v41, %v14023_v31 }
 0xe3c   : > { %v5406_v60 = vmul.f32 %v10825_v25, %v14025_v47  ;;  %10832 = vrcp.f32 %v5373_v16 }
 0xe3e   : > { %8714 = vmatprep.mubr.f32.mxu1 %v5406_v60  ;;  %v10827_v54 = vpop.eup %10826 }
 0xe3f   : > { %v5371_v17 = vpop.xlane.xlu1 %5370  ;;  %8715 = vmatmul.mubr.f32.gmra.mrb[180].mxu1 %v5407_v32  ;;  %v5381_v14 = vpop.xlane.xlu0 %5380  ;;  %v5409_v22 = vmul.f32 %v10827_v54, %v14032_v38 }
 0xe40   : > { %10834 = vrcp.f32 %v5371_v17 }
 0xe42   : > { %v10829_v7 = vpop.eup %10828 }
 0xe43   : > { %v5377_v35 = vpop.xlane.xlu1 %5376  ;;  %v5379_v50 = vpop.xlane.xlu0 %5378  ;;  %v5408_v48 = vmul.f32 %v10829_v7, %v14039_v8 }
 0xe44   : > { %10836 = vrcp.f32 %v5377_v35  ;;  %v10831_v20 = vpop.eup %10830 }
 0xe45   : > { %10838 = vrcp.f32 %v5379_v50  ;;  %8717 = vmatprep.mubr.f32.mxu1 %v5408_v48  ;;  %v5412_v45 = vmul.f32 %v10831_v20, %v14034_v53 }
 0xe46   : > { %8718 = vmatmul.mubr.f32.gmra.mrb[182].mxu1 %v5409_v22  ;;  %10840 = vrcp.f32 %v5381_v14  ;;  %v10833_v13 = vpop.eup %10832 }
 0xe47   : > { %v5385_v31 = vpop.xlane.xlu1 %5384  ;;  %v10483_v47 = vpop.permute.xlu0 %10482  ;;  %v5411_v38 = vmul.f32 %v10833_v13, %v14043_v56 }
 0xe48   : > { %v10485_v46 = vunpack.i.h.bf16 %v10483_v47  ;;  %v10484_v44 = vunpack.i.l.bf16 %v10483_v47  ;;  %10842 = vrcp.f32 %v5385_v31 }
 0xe4a   : > { %v10835_v43 = vpop.eup %10834  ;;  %v9790_v63 = vpack.c.bf16 %v10485_v46, %v10484_v44 }
 0xe4b   : > { %v5383_v19 = vpop.xlane.xlu1 %5382  ;;  %v5580_v4 = vpop.permute.xlu0 %5579  ;;  %v5410_v8 = vmul.f32 %v10835_v43, %v14046_v2 }
 0xe4c   : > { %10844 = vrcp.f32 %v5383_v19  ;;  %9792 = vmatprep.subr.msk.bf16.mxu1 %vm12120_vm1, %v9790_v63 }
 0xe4d   : > { %8720 = vmatprep.mubr.f32.mxu1 %v5410_v8  ;;  %9795 = vmatpush3.bf16.xpose.msk.msra.mxu1 %vm12120_vm1, %v9790_v63 }
 0xe4e   : > { %v10837_v58 = vpop.eup %10836  ;;  %8721 = vmatmul.mubr.f32.gmra.mrb[184].mxu1 %v5411_v38 }
 0xe4f   : > { %v10839_v37 = vpop.eup %10838  ;;  %v5582_v61 = vpop.permute.xlu1 %5581  ;;  %8723 = vmatprep.mubr.f32.mxu1 %v5412_v45  ;;  %v5413_v2 = vmul.f32 %v10837_v58, %v14054_v30 }
 0xe50   : > { %v5584_v9 = vpop.permute.xlu0 %5583  ;;  %v10841_v15 = vpop.eup %10840  ;;  %v5414_v62 = vmul.f32 %v10839_v37, %v14052_v10 }
 0xe51   : > { %v5415_v33 = vmul.f32 %v10841_v15, %v14048_v49 }
 0xe52   : > { %8724 = vmatmul.mubr.f32.gmra.mrb[186].mxu1 %v5413_v2  ;;  %v10843_v28 = vpop.eup %10842 }
 0xe53   : > { %v5586_v1 = vpop.permute.xlu1 %5585  ;;  %8726 = vmatprep.mubr.f32.mxu1 %v5414_v62  ;;  %v5417_v23 = vmul.f32 %v10843_v28, %v14058_v36 }
 0xe54   : > { %v5588_v56 = vpop.permute.xlu0 %5587 }
 0xe56   : > { %v10845_v29 = vpop.eup %10844  ;;  %8727 = vmatmul.mubr.f32.gmra.mrb[188].mxu1 %v5415_v33 }
 0xe57   : > { %v5590_v53 = vpop.permute.xlu1 %5589  ;;  %v5416_v11 = vmul.f32 %v10845_v29, %v14061_v42 }
 0xe58   : > { %v5592_v24 = vpop.permute.xlu0 %5591 }
 0xe59   : > { %8729 = vmatprep.mubr.f32.mxu1 %v5416_v11 }
 0xe5a   : > { %8730 = vmatmul.mubr.f32.gmra.mrb[190].mxu1 %v5417_v23 }
 0xe5b   : > { %v5594_v30 = vpop.permute.xlu1 %5593  ;;  %8764 = vmatprep.mubr.msk.f32.mxu1 %vm2367_vm0, %v5580_v4 }
 0xe5c   : > { %v5596_v10 = vpop.permute.xlu0 %5595 }
 0xe5e   : > { %8765 = vmatmul.mubr.msk.f32.vlgmr.msra.gmra.mrb[192].mxu1 %vm2367_vm0, %v5582_v61 }
 0xe5f   : > { %v5598_v59 = vpop.permute.xlu1 %5597  ;;  %8767 = vmatprep.mubr.msk.f32.mxu1 %vm2367_vm0, %v5584_v9 }
 0xe60   : > { %v5600_v27 = vpop.permute.xlu0 %5599 }
 0xe62   : > { %8768 = vmatmul.mubr.msk.f32.gmra.mrb[194].mxu1 %vm2367_vm0, %v5586_v1 }
 0xe63   : > { %v5602_v49 = vpop.permute.xlu1 %5601  ;;  %8770 = vmatprep.mubr.msk.f32.mxu1 %vm2367_vm0, %v5588_v56 }
 0xe64   : > { %v5604_v26 = vpop.permute.xlu0 %5603 }
 0xe66   : > { %8771 = vmatmul.mubr.msk.f32.gmra.mrb[196].mxu1 %vm2367_vm0, %v5590_v53 }
 0xe67   : > { %v5606_v36 = vpop.permute.xlu1 %5605  ;;  %8773 = vmatprep.mubr.msk.f32.mxu1 %vm2367_vm0, %v5592_v24 }
 0xe68   : > { %v5608_v42 = vpop.permute.xlu0 %5607 }
 0xe6a   : > { %8774 = vmatmul.mubr.msk.f32.gmra.mrb[198].mxu1 %vm2367_vm0, %v5594_v30 }
 0xe6b   : > { %v5610_v5 = vpop.permute.xlu1 %5609  ;;  %8776 = vmatprep.mubr.msk.f32.mxu1 %vm2367_vm0, %v5596_v10 }
 0xe6c   : > { %v10488_v21 = vpop.permute.xlu0 %10487 }
 0xe6d   : > { %v10490_v55 = vunpack.i.h.bf16 %v10488_v21  ;;  %v10489_v51 = vunpack.i.l.bf16 %v10488_v21 }
 0xe6e   : > { %8777 = vmatmul.mubr.msk.f32.gmra.mrb[200].mxu1 %vm2367_vm0, %v5598_v59 }
 0xe6f   : > { %v9796_v41 = vpack.c.bf16 %v10490_v55, %v10489_v51  ;;  %v10493_v25 = vpop.permute.xlu1 %10492  ;;  %8779 = vmatprep.mubr.msk.f32.mxu1 %vm2367_vm0, %v5600_v27  ;;  %v15404_v55 = vld [vmem:[#allocation163_spill] sm:$0xff] }
 0xe70   : > { %v10498_v52 = vpop.permute.xlu0 %10497  ;;  %v10495_v16 = vunpack.i.h.bf16 %v10493_v25  ;;  %v10494_v60 = vunpack.i.l.bf16 %v10493_v25 }
 0xe71   : > { %v10500_v32 = vunpack.i.h.bf16 %v10498_v52  ;;  %v10499_v17 = vunpack.i.l.bf16 %v10498_v52  ;;  %9797 = vmatprep.subr.bf16.mxu0 %v9796_v41 }
 0xe72   : > { %9799 = vmatpush3.bf16.msra.mxu0 %v9796_v41  ;;  %v9800_v14 = vpack.c.bf16 %v10495_v16, %v10494_v60  ;;  %8780 = vmatmul.mubr.msk.f32.gmra.mrb[202].mxu1 %vm2367_vm0, %v5602_v49  ;;  %v15405_v16 = vld [vmem:[#allocation145_spill] sm:$0xff] }
 0xe73   : > { %v10503_v54 = vpop.permute.xlu1 %10502  ;;  %8782 = vmatprep.mubr.msk.f32.mxu1 %vm2367_vm0, %v5604_v26  ;;  %v9804_v7 = vpack.c.bf16 %v10500_v32, %v10499_v17  ;;  %v15408_v32 = vld [vmem:[#allocation142_spill] sm:$0xff]  ;;  %v15409_v17 = vld [vmem:[#allocation143_spill] sm:$0xff] }
 0xe74   : > { %v10505_v35 = vunpack.i.h.bf16 %v10503_v54  ;;  %v10504_v50 = vunpack.i.l.bf16 %v10503_v54  ;;  %9801 = vmatprep.subr.bf16.mxu0 %v9800_v14 }
 0xe76   : > { %9803 = vmatpush3.bf16.msra.mxu0 %v9800_v14  ;;  %8783 = vmatmul.mubr.msk.f32.gmra.mrb[204].mxu1 %vm2367_vm0, %v5606_v36  ;;  %v9808_v48 = vpack.c.bf16 %v10505_v35, %v10504_v50  ;;  %v15410_v14 = vpack.i.bf16 %v15408_v32, %v15409_v17  ;;  %v15420_v32 = vld [vmem:[#allocation148_spill] sm:$0xff]  ;;  %v15421_v17 = vld [vmem:[#allocation149_spill] sm:$0xff] }
 0xe77   : > { %9805 = vmatprep.subr.bf16.mxu0 %v9804_v7  ;;  %8785 = vmatprep.mubr.msk.f32.mxu1 %vm2367_vm0, %v5608_v42 }
 0xe7a   : > { %9807 = vmatpush3.bf16.msra.mxu0 %v9804_v7  ;;  %8786 = vmatmul.mubr.msk.f32.gmra.mrb[206].mxu1 %vm2367_vm0, %v5610_v5  ;;  %v15411_v7 = vld [vmem:[#allocation166_spill] sm:$0xff] }
 0xe7b   : > { %9809 = vmatprep.subr.bf16.mxu0 %v9808_v48 }
 0xe7e   : > { %9811 = vmatpush3.bf16.msra.mxu0 %v9808_v48 }
 0xed9   : > { %v8710_v22 = vpop.f32.mrb[176].mxu1 }
 0xeda   : > { %5564 = vst.msk [vmem:[#allocation2 + $0x28] sm:$0xff] %vm2367_vm0, %v8710_v22  ;;  %v5484_v31 = vpop.f32.mrb[177].mxu1  ;;  %v15412_v22 = vld [vmem:[#allocation168_spill] sm:$0xff] }
 0xedb   : > { %5563 = vst.msk [vmem:[#allocation2 + $0x10] sm:$0xff] %vm2367_vm0, %v5484_v31 }
 0xf0d   : > { %v8713_v47 = vpop.f32.mrb[178].mxu1 }
 0xf0e   : > { %5566 = vst.msk [vmem:[#allocation2 + $0x58] sm:$0xff] %vm2367_vm0, %v8713_v47  ;;  %v5494_v20 = vpop.f32.mrb[179].mxu1 }
 0xf0f   : > { %5565 = vst.msk [vmem:[#allocation2 + $0x40] sm:$0xff] %vm2367_vm0, %v5494_v20  ;;  %v15413_v20 = vld [vmem:[#allocation165_spill] sm:$0xff] }
 0xf12   : > { %v8716_v46 = vpop.f32.mrb[180].mxu1 }
 0xf13   : > { %5568 = vst.msk [vmem:[#allocation2 + $0x88] sm:$0xff] %vm2367_vm0, %v8716_v46  ;;  %v5504_v44 = vpop.f32.mrb[181].mxu1 }
 0xf14   : > { %5567 = vst.msk [vmem:[#allocation2 + $0x70] sm:$0xff] %vm2367_vm0, %v5504_v44 }
 0xf19   : > { %v8719_v13 = vpop.f32.mrb[182].mxu1 }
 0xf1a   : > { %5570 = vst.msk [vmem:[#allocation2 + $0xb8] sm:$0xff] %vm2367_vm0, %v8719_v13  ;;  %v5514_v43 = vpop.f32.mrb[183].mxu1  ;;  %v15414_v13 = vld [vmem:[#allocation170_spill] sm:$0xff] }
 0xf1b   : > { %5569 = vst.msk [vmem:[#allocation2 + $0xa0] sm:$0xff] %vm2367_vm0, %v5514_v43 }
 0xf21   : > { %v8722_v63 = vpop.f32.mrb[184].mxu1 }
 0xf22   : > { %5572 = vst.msk [vmem:[#allocation2 + $0xe8] sm:$0xff] %vm2367_vm0, %v8722_v63  ;;  %v5524_v19 = vpop.f32.mrb[185].mxu1  ;;  %v15415_v63 = vld [vmem:[#allocation167_spill] sm:$0xff] }
 0xf23   : > { %5571 = vst.msk [vmem:[#allocation2 + $0xd0] sm:$0xff] %vm2367_vm0, %v5524_v19 }
 0xf25   : > { %v8725_v4 = vpop.f32.mrb[186].mxu1 }
 0xf26   : > { %5574 = vst.msk [vmem:[#allocation2 + $0x118] sm:$0xff] %vm2367_vm0, %v8725_v4  ;;  %v5534_v8 = vpop.f32.mrb[187].mxu1 }
 0xf27   : > { %5573 = vst.msk [vmem:[#allocation2 + $0x100] sm:$0xff] %vm2367_vm0, %v5534_v8  ;;  %v15416_v8 = vld [vmem:[#allocation169_spill] sm:$0xff] }
 0xf29   : > { %v8728_v38 = vpop.f32.mrb[188].mxu1 }
 0xf2a   : > { %5576 = vst.msk [vmem:[#allocation2 + $0x148] sm:$0xff] %vm2367_vm0, %v8728_v38  ;;  %v5544_v45 = vpop.f32.mrb[189].mxu1 }
 0xf2b   : > { %5575 = vst.msk [vmem:[#allocation2 + $0x130] sm:$0xff] %vm2367_vm0, %v5544_v45 }
 0xf2d   : > { %v8731_v58 = vpop.f32.mrb[190].mxu1 }
 0xf2e   : > { %5578 = vst.msk [vmem:[#allocation2 + $0x178] sm:$0xff] %vm2367_vm0, %v8731_v58  ;;  %v5554_v37 = vpop.f32.mrb[191].mxu1 }
 0xf2f   : > { %5577 = vst.msk [vmem:[#allocation2 + $0x160] sm:$0xff] %vm2367_vm0, %v5554_v37  ;;  %vm3668_vm0 = vcmask 1048064  }
 0xf31   : > { %v8766_v61 = vpop.f32.mrb[192].mxu1 }
 0xf32   : > { %v5853_v9 = vmul.f32 0.05103104, %v8766_v61  ;;  %v5773_v2 = vpop.f32.mrb[193].mxu1 }
 0xf33   : > { %v5852_v15 = vmul.f32 0.05103104, %v5773_v2 }
 0xf34   : > { %v14202_v62 = vadd.f32 %v5853_v9, %v15194_v57 }
 0xf35   : > { %v14205_v1 = vadd.f32 %v5852_v15, %v15195_v18  ;;  %v8769_v56 = vpop.f32.mrb[194].mxu1 }
 0xf36   : > { %v5855_v33 = vmul.f32 0.05103104, %v8769_v56  ;;  %5886 = vmax.xlane.f32.xlu1 %v14202_v62  ;;  %v5783_v28 = vpop.f32.mrb[195].mxu1 }
 0xf37   : > { %5884 = vmax.xlane.f32.xlu0 %v14205_v1  ;;  %v5854_v53 = vmul.f32 0.05103104, %v5783_v28 }
 0xf38   : > { %v14210_v29 = vadd.f32 %v5855_v33, %v15211_v34 }
 0xf39   : > { %v8772_v24 = vpop.f32.mrb[196].mxu1  ;;  %v14217_v18 = vadd.f32 %v5854_v53, %v15315_v40 }
 0xf3a   : > { %v5857_v11 = vmul.f32 0.05103104, %v8772_v24  ;;  %v5793_v23 = vpop.f32.mrb[197].mxu1 }
 0xf3b   : > { %5890 = vmax.xlane.f32.xlu0 %v14210_v29  ;;  %v5856_v30 = vmul.f32 0.05103104, %v5793_v23 }
 0xf3c   : > { %v14214_v57 = vadd.f32 %v5857_v11, %v15196_v39 }
 0xf3d   : > { %v8775_v10 = vpop.f32.mrb[198].mxu1  ;;  %v14225_v49 = vadd.f32 %v5856_v30, %v15316_v6 }
 0xf3e   : > { %v5859_v59 = vmul.f32 0.05103104, %v8775_v10  ;;  %5894 = vmax.xlane.f32.xlu1 %v14214_v57  ;;  %v5803_v27 = vpop.f32.mrb[199].mxu1 }
 0xf3f   : > { %5888 = vmax.xlane.f32.xlu0 %v14217_v18  ;;  %v5858_v26 = vmul.f32 0.05103104, %v5803_v27 }
 0xf40   : > { %v14222_v34 = vadd.f32 %v5859_v59, %v15197_v12 }
 0xf41   : > { %v8778_v39 = vpop.f32.mrb[200].mxu1  ;;  %v14233_v5 = vadd.f32 %v5858_v26, %v15317_v3  ;;  %v15406_v3 = vld [vmem:[#allocation146_spill] sm:$0xff] }
 0xf42   : > { %v5861_v36 = vmul.f32 0.05103104, %v8778_v39  ;;  %5898 = vmax.xlane.f32.xlu1 %v14222_v34  ;;  %v5813_v40 = vpop.f32.mrb[201].mxu1  ;;  %v15407_v60 = vpack.i.bf16 %v15405_v16, %v15406_v3  ;;  %v15417_v16 = vld [vmem:[#allocation151_spill] sm:$0xff]  ;;  %v15418_v3 = vld [vmem:[#allocation152_spill] sm:$0xff] }
 0xf43   : > { %5892 = vmax.xlane.f32.xlu0 %v14225_v49  ;;  %v5860_v21 = vmul.f32 0.05103104, %v5813_v40 }
 0xf44   : > { %v14230_v42 = vadd.f32 %v5861_v36, %v15198_v0 }
 0xf45   : > { %v8781_v12 = vpop.f32.mrb[202].mxu1  ;;  %v14238_v51 = vadd.f32 %v5860_v21, %v15404_v55 }
 0xf46   : > { %5902 = vmax.xlane.f32.xlu1 %v14230_v42  ;;  %v5823_v6 = vpop.f32.mrb[203].mxu1  ;;  %v5863_v54 = vmul.f32 0.05103104, %v8781_v12 }
 0xf47   : > { %5896 = vmax.xlane.f32.xlu0 %v14233_v5  ;;  %v5862_v48 = vmul.f32 0.05103104, %v5823_v6 }
 0xf48   : > { %v14250_v35 = vadd.f32 %v5863_v54, %v15411_v7 }
 0xf49   : > { %v8784_v41 = vpop.f32.mrb[204].mxu1  ;;  %v14257_v46 = vadd.f32 %v5862_v48, %v15413_v20 }
 0xf4a   : > { %v5833_v25 = vpop.f32.mrb[205].mxu1  ;;  %v5865_v50 = vmul.f32 0.05103104, %v8784_v41 }
 0xf4b   : > { %5900 = vmax.xlane.f32.xlu0 %v14238_v51  ;;  %v5864_v44 = vmul.f32 0.05103104, %v5833_v25 }
 0xf4c   : > { %v14254_v31 = vadd.f32 %v5865_v50, %v15412_v22 }
 0xf4d   : > { %v8787_v52 = vpop.f32.mrb[206].mxu1  ;;  %v14265_v19 = vadd.f32 %v5864_v44, %v15415_v63 }
 0xf4e   : > { %v5843_v0 = vpop.f32.mrb[207].mxu1  ;;  %v5867_v47 = vmul.f32 0.05103104, %v8787_v52 }
 0xf4f   : > { %v5866_v4 = vmul.f32 0.05103104, %v5843_v0 }
 0xf50   : > { %v14262_v43 = vadd.f32 %v5867_v47, %v15414_v13 }
 0xf51   : > { %v14270_v38 = vadd.f32 %v5866_v4, %v15416_v8 }
 0xf57   : > { %10512 = vrot.lane.b32.xlu1 %v15407_v60, %s11161_s21  ;;  %v15419_v60 = vpack.i.bf16 %v15417_v16, %v15418_v3  ;;  %v6379_v3 = vld [vmem:[#allocation8 + $0x70] sm:$0xff] }
 0xf61   : > { %10507 = vrot.lane.b32.xlu0 %v15410_v14, %s11161_s21  ;;  %v15422_v14 = vpack.i.bf16 %v15420_v32, %v15421_v17  ;;  %v15425_v32 = vld [vmem:[#allocation122_spill] sm:$0xff] }
 0xf7b   : > { %5906 = vmax.xlane.f32.xlu1 %v14250_v35 }
 0xf7f   : > { %5910 = vmax.xlane.f32.xlu1 %v14254_v31 }
 0xf80   : > { %5904 = vmax.xlane.f32.xlu0 %v14257_v46 }
 0xf83   : > { %5914 = vmax.xlane.f32.xlu1 %v14262_v43 }
 0xf84   : > { %5908 = vmax.xlane.f32.xlu0 %v14265_v19 }
 0xf88   : > { %5912 = vmax.xlane.f32.xlu0 %v14270_v38 }
 0xfc3   : > { %v5887_v45 = vpop.xlane.xlu1 %5886 }
 0xfc4   : > { %v5917_v58 = vsub.f32 %v14202_v62, %v5887_v45  ;;  %v5885_v37 = vpop.xlane.xlu0 %5884 }
 0xfc5   : > { %v5916_v61 = vsub.f32 %v14205_v1, %v5885_v37 }
 0xfc6   : > { %v5934_v9 = vmul.f32 1.442695, %v5917_v58 }
 0xfc7   : > { %v5932_v2 = vmul.f32 1.442695, %v5916_v61 }
 0xfc8   : > { %10846 = vpow2.f32 %v5934_v9  ;;  %v5891_v15 = vpop.xlane.xlu0 %5890 }
 0xfc9   : > { %10848 = vpow2.f32 %v5932_v2  ;;  %v5919_v56 = vsub.f32 %v14210_v29, %v5891_v15 }
 0xfcb   : > { %v5938_v33 = vmul.f32 1.442695, %v5919_v56  ;;  %v5895_v28 = vpop.xlane.xlu1 %5894 }
 0xfcc   : > { %v5921_v53 = vsub.f32 %v14214_v57, %v5895_v28  ;;  %v5889_v24 = vpop.xlane.xlu0 %5888 }
 0xfcd   : > { %10850 = vpow2.f32 %v5938_v33  ;;  %v5918_v11 = vsub.f32 %v14217_v18, %v5889_v24 }
 0xfce   : > { %v5942_v23 = vmul.f32 1.442695, %v5921_v53 }
 0xfcf   : > { %v5936_v62 = vmul.f32 1.442695, %v5918_v11  ;;  %v5899_v30 = vpop.xlane.xlu1 %5898 }
 0xfd0   : > { %10852 = vpow2.f32 %v5942_v23  ;;  %v5893_v1 = vpop.xlane.xlu0 %5892  ;;  %v5923_v54 = vsub.f32 %v14222_v34, %v5899_v30  ;;  %v6418_v30 = vld [vmem:[#allocation8 + $0x1a8] sm:$0xff] }
 0xfd1   : > { %10854 = vpow2.f32 %v5936_v62  ;;  %v5920_v10 = vsub.f32 %v14225_v49, %v5893_v1  ;;  %v6415_v62 = vld [vmem:[#allocation8 + $0x190] sm:$0xff] }
 0xfd2   : > { %v14279_v59 = vpop.eup %10846  ;;  %v5946_v50 = vmul.f32 1.442695, %v5923_v54  ;;  %v14345_v1 = vpack.c.bf16 %v6418_v30, %v6415_v62  ;;  %v6436_v54 = vld [vmem:[#allocation8 + $0x238] sm:$0xff]  ;;  %v6403_v30 = vld [vmem:[#allocation8 + $0x130] sm:$0xff] }
 0xfd3   : > { %v14281_v27 = vpop.eup %10848  ;;  %v5940_v29 = vmul.f32 1.442695, %v5920_v10  ;;  %5966 = vadd.xlane.f32.xlu0 %v14279_v59  ;;  %v5903_v57 = vpop.xlane.xlu1 %5902  ;;  %v6367_v10 = vld [vmem:[#allocation8 + $0x10] sm:$0xff] }
 0xfd4   : > { %v5897_v26 = vpop.xlane.xlu0 %5896  ;;  %5964 = vadd.xlane.f32.xlu1 %v14281_v27  ;;  %v5925_v47 = vsub.f32 %v14230_v42, %v5903_v57  ;;  %9988 = vmatprep.subr.bf16.mxu1 %v14345_v1 }
 0xfd5   : > { %10856 = vpow2.f32 %v5940_v29  ;;  %v5922_v7 = vsub.f32 %v14233_v5, %v5897_v26  ;;  %v6370_v29 = vld [vmem:[#allocation8 + $0x28] sm:$0xff]  ;;  %v6421_v26 = vld [vmem:[#allocation8 + $0x1c0] sm:$0xff] }
 0xfd6   : > { %10858 = vpow2.f32 %v5946_v50  ;;  %v5950_v63 = vmul.f32 1.442695, %v5925_v47  ;;  %v14347_v57 = vpack.c.bf16 %v6370_v29, %v6367_v10  ;;  %v15427_v47 = vld [vmem:[#allocation157_spill] sm:$0xff]  ;;  %v15433_v29 = vld [vmem:[#allocation127_spill] sm:$0xff] }
 0xfd7   : > { %v14285_v18 = vpop.eup %10850  ;;  %v10513_v49 = vpop.permute.xlu1 %10512  ;;  %v5944_v22 = vmul.f32 1.442695, %v5922_v7  ;;  %v15426_v7 = vld [vmem:[#allocation98_spill] sm:$0xff]  ;;  %v6406_v10 = vld [vmem:[#allocation8 + $0x148] sm:$0xff] }
 0xfd8   : > { %v5901_v39 = vpop.xlane.xlu0 %5900  ;;  %5970 = vadd.xlane.f32.xlu0 %v14285_v18  ;;  %v10515_v12 = vunpack.i.h.bf16 %v10513_v49  ;;  %v10514_v6 = vunpack.i.l.bf16 %v10513_v49  ;;  %9996 = vmatpush3.bf16.msra.mxu1 %v14347_v57  ;;  %v15423_v49 = vld [vmem:[#allocation101_spill] sm:$0xff] }
 0xfd9   : > { %v5924_v48 = vsub.f32 %v14238_v51, %v5901_v39  ;;  %10860 = vpow2.f32 %v5944_v22  ;;  %v6424_v39 = vld [vmem:[#allocation8 + $0x1d8] sm:$0xff] }
 0xfda   : > { %v14288_v36 = vpop.eup %10852  ;;  %v9816_v0 = vpack.c.bf16 %v10515_v12, %v10514_v6  ;;  %v6373_v12 = vld [vmem:[#allocation8 + $0x40] sm:$0xff]  ;;  %v6376_v6 = vld [vmem:[#allocation8 + $0x58] sm:$0xff] }
 0xfdb   : > { %v14290_v40 = vpop.eup %10854  ;;  %v5948_v20 = vmul.f32 1.442695, %v5924_v48  ;;  %v6385_v48 = vld [vmem:[#allocation8 + $0xa0] sm:$0xff]  ;;  %v6388_v22 = vld [vmem:[#allocation8 + $0xb8] sm:$0xff] }
 0xfdc   : > { %v10508_v21 = vpop.permute.xlu0 %10507  ;;  %5968 = vadd.xlane.f32.xlu1 %v14290_v40  ;;  %5974 = vadd.xlane.f32.xlu0 %v14288_v36 }
 0xfdd   : > { %v10510_v55 = vunpack.i.h.bf16 %v10508_v21  ;;  %v10509_v41 = vunpack.i.l.bf16 %v10508_v21  ;;  %10862 = vpow2.f32 %v5948_v20  ;;  %v14353_v21 = vpack.c.bf16 %v6424_v39, %v6421_v26  ;;  %v6457_v39 = vld [vmem:[#allocation8 + $0x2e0] sm:$0xff] }
 0xfde   : > { %10864 = vpow2.f32 %v5950_v63  ;;  %v14375_v20 = vpack.c.bf16 %v6388_v22, %v6385_v48  ;;  %v15428_v63 = vld [vmem:[#allocation109_spill] sm:$0xff]  ;;  %v14405_v26 = vpack.c.bf16 %v6406_v10, %v6403_v30  ;;  %v15441_v48 = vld [vmem:[#allocation51_spill] sm:$0xff] }
 0xfdf   : > { %v14294_v25 = vpop.eup %10856  ;;  %v9812_v52 = vpack.c.bf16 %v10510_v55, %v10509_v41  ;;  %v14355_v55 = vpack.c.bf16 %v6376_v6, %v6373_v12  ;;  %9989 = vmatprep.subr.bf16.mxu1 %v14353_v21  ;;  %v6427_v41 = vld [vmem:[#allocation8 + $0x1f0] sm:$0xff]  ;;  %v15442_v22 = vld [vmem:[#allocation155_spill] sm:$0xff] }
 0xfe0   : > { %5972 = vadd.xlane.f32.xlu1 %v14294_v25  ;;  %v14312_v51 = vpop.eup %10858  ;;  %v15434_v12 = vld [vmem:[#allocation114_spill] sm:$0xff] }
 0xfe1   : > { %9813 = vmatprep.subr.bf16.mxu0 %v9812_v52  ;;  %9997 = vmatpush3.bf16.msra.mxu1 %v14355_v55 }
 0xfe2   : > { %9815 = vmatpush3.bf16.msra.mxu0 %v9812_v52  ;;  %v6430_v52 = vld [vmem:[#allocation8 + $0x208] sm:$0xff] }
 0xfe3   : > { %9817 = vmatprep.subr.bf16.mxu0 %v9816_v0  ;;  %v14317_v2 = vpop.eup %10860  ;;  %v14361_v16 = vpack.c.bf16 %v6430_v52, %v6427_v41  ;;  %v6409_v41 = vld [vmem:[#allocation8 + $0x160] sm:$0xff]  ;;  %v6412_v52 = vld [vmem:[#allocation8 + $0x178] sm:$0xff] }
 0xfe5   : > { %9990 = vmatprep.subr.bf16.mxu1 %v14361_v16 }
 0xfe6   : > { %9819 = vmatpush3.bf16.msra.mxu0 %v9816_v0  ;;  %v15424_v0 = vld [vmem:[#allocation115_spill] sm:$0xff] }
 0xff1   : > { %10522 = vrot.lane.b32.xlu1 %v15419_v60, %s11161_s21  ;;  %v6382_v60 = vld [vmem:[#allocation8 + $0x88] sm:$0xff] }
 0xff2   : > { %10517 = vrot.lane.b32.xlu0 %v15422_v14, %s11161_s21  ;;  %v14365_v17 = vpack.c.bf16 %v6382_v60, %v6379_v3  ;;  %v6433_v14 = vld [vmem:[#allocation8 + $0x220] sm:$0xff]  ;;  %v14415_v3 = vpack.c.bf16 %v6412_v52, %v6409_v41  ;;  %v15436_v60 = vld [vmem:[#allocation129_spill] sm:$0xff] }
 0xff3   : > { %v14371_v50 = vpack.c.bf16 %v6436_v54, %v6433_v14  ;;  %v15438_v14 = vld [vmem:[#allocation124_spill] sm:$0xff] }
 0xff4   : > { %9998 = vmatpush3.bf16.msra.mxu1 %v14365_v17  ;;  %v15439_v54 = vld [vmem:[#allocation48_spill] sm:$0xff] }
 0xff5   : > { %9991 = vmatprep.subr.bf16.mxu1 %v14371_v50  ;;  %v6366_v41 = vld [vmem:[#allocation8 + $0x8] sm:$0xff]  ;;  %v6369_v52 = vld [vmem:[#allocation8 + $0x20] sm:$0xff] }
 0xff8   : > { %9999 = vmatpush3.bf16.msra.mxu1 %v14375_v20 }
0x1008   : > { %v5907_v44 = vpop.xlane.xlu1 %5906 }
0x1009   : > { %v5927_v13 = vsub.f32 %v14250_v35, %v5907_v44  ;;  %v6439_v44 = vld [vmem:[#allocation8 + $0x250] sm:$0xff] }
0x100b   : > { %v5954_v8 = vmul.f32 1.442695, %v5927_v13  ;;  %v6442_v13 = vld [vmem:[#allocation8 + $0x268] sm:$0xff] }
0x100c   : > { %v5911_v4 = vpop.xlane.xlu1 %5910 }
0x100d   : > { %v5929_v34 = vsub.f32 %v14254_v31, %v5911_v4  ;;  %v5905_v45 = vpop.xlane.xlu0 %5904  ;;  %10866 = vpow2.f32 %v5954_v8  ;;  %v14319_v31 = vpop.eup %10862  ;;  %v14381_v4 = vpack.c.bf16 %v6442_v13, %v6439_v44  ;;  %v6391_v8 = vld [vmem:[#allocation8 + $0xd0] sm:$0xff] }
0x100e   : > { %v5926_v5 = vsub.f32 %v14257_v46, %v5905_v45  ;;  %v14324_v33 = vpop.eup %10864  ;;  %v15429_v45 = vld [vmem:[#allocation120_spill] sm:$0xff] }
0x100f   : > { %v5958_v42 = vmul.f32 1.442695, %v5929_v34  ;;  %v6394_v34 = vld [vmem:[#allocation8 + $0xe8] sm:$0xff]  ;;  %9992 = vmatprep.subr.bf16.mxu1 %v14381_v4 }
0x1010   : > { %v5952_v58 = vmul.f32 1.442695, %v5926_v5  ;;  %v5915_v37 = vpop.xlane.xlu1 %5914  ;;  %v14385_v5 = vpack.c.bf16 %v6394_v34, %v6391_v8  ;;  %v15445_v8 = vld [vmem:[#allocation43_spill] sm:$0xff] }
0x1011   : > { %v5931_v61 = vsub.f32 %v14262_v43, %v5915_v37  ;;  %v5909_v9 = vpop.xlane.xlu0 %5908  ;;  %5978 = vadd.xlane.f32.xlu0 %v14312_v51  ;;  %v6448_v37 = vld [vmem:[#allocation8 + $0x298] sm:$0xff] }
0x1012   : > { %10868 = vpow2.f32 %v5952_v58  ;;  %v5928_v35 = vsub.f32 %v14265_v19, %v5909_v9  ;;  %10000 = vmatpush3.bf16.msra.mxu1 %v14385_v5  ;;  %v6445_v58 = vld [vmem:[#allocation8 + $0x280] sm:$0xff] }
0x1013   : > { %10870 = vpow2.f32 %v5958_v42  ;;  %v5962_v46 = vmul.f32 1.442695, %v5931_v61  ;;  %v15430_v42 = vld [vmem:[#allocation104_spill] sm:$0xff]  ;;  %v14391_v61 = vpack.c.bf16 %v6448_v37, %v6445_v58 }
0x1014   : > { %v5956_v15 = vmul.f32 1.442695, %v5928_v35  ;;  %v6397_v9 = vld [vmem:[#allocation8 + $0x100] sm:$0xff]  ;;  %v6400_v35 = vld [vmem:[#allocation8 + $0x118] sm:$0xff] }
0x1015   : > { %5976 = vadd.xlane.f32.xlu1 %v14317_v2  ;;  %5980 = vadd.xlane.f32.xlu0 %v14319_v31  ;;  %v5913_v56 = vpop.xlane.xlu0 %5912  ;;  %v15447_v58 = vld [vmem:[#allocation56_spill] sm:$0xff] }
0x1016   : > { %10872 = vpow2.f32 %v5956_v15  ;;  %v5930_v43 = vsub.f32 %v14270_v38, %v5913_v56  ;;  %v15431_v15 = vld [vmem:[#allocation125_spill] sm:$0xff]  ;;  %9993 = vmatprep.subr.bf16.mxu1 %v14391_v61 }
0x1017   : > { %10874 = vpow2.f32 %v5962_v46  ;;  %v14327_v19 = vpop.eup %10866  ;;  %v14395_v46 = vpack.c.bf16 %v6400_v35, %v6397_v9  ;;  %v6451_v56 = vld [vmem:[#allocation8 + $0x2b0] sm:$0xff]  ;;  %v15448_v9 = vld [vmem:[#allocation107_spill] sm:$0xff] }
0x1018   : > { %v5960_v28 = vmul.f32 1.442695, %v5930_v43  ;;  %v6454_v43 = vld [vmem:[#allocation8 + $0x2c8] sm:$0xff]  ;;  %v15449_v35 = vld [vmem:[#allocation59_spill] sm:$0xff] }
0x1019   : > { %5982 = vadd.xlane.f32.xlu1 %v14324_v33  ;;  %10001 = vmatpush3.bf16.msra.mxu1 %v14395_v46  ;;  %v14401_v62 = vpack.c.bf16 %v6454_v43, %v6451_v56 }
0x101a   : > { %10876 = vpow2.f32 %v5960_v28  ;;  %v15432_v28 = vld [vmem:[#allocation119_spill] sm:$0xff] }
0x101b   : > { %9994 = vmatprep.subr.bf16.mxu1 %v14401_v62 }
0x101c   : > { %v14329_v53 = vpop.eup %10868 }
0x101d   : > { %5986 = vadd.xlane.f32.xlu1 %v14327_v19  ;;  %5984 = vadd.xlane.f32.xlu0 %v14329_v53  ;;  %v14333_v24 = vpop.eup %10870 }
0x101e   : > { %10002 = vmatpush3.bf16.msra.mxu1 %v14405_v26 }
0x1020   : > { %v14335_v11 = vpop.eup %10872 }
0x1021   : > { %5990 = vadd.xlane.f32.xlu1 %v14333_v24  ;;  %5988 = vadd.xlane.f32.xlu0 %v14335_v11  ;;  %v14339_v38 = vpop.eup %10874 }
0x1024   : > { %v14341_v23 = vpop.eup %10876 }
0x1025   : > { %5994 = vadd.xlane.f32.xlu1 %v14339_v38  ;;  %5992 = vadd.xlane.f32.xlu0 %v14341_v23 }
0x1036   : > { %3620 = vrot.lane.b32.xlu1 %v15423_v49, %s11161_s21  ;;  %v6460_v49 = vld [vmem:[#allocation8 + $0x2f8] sm:$0xff] }
0x1037   : > { %v14411_v6 = vpack.c.bf16 %v6460_v49, %v6457_v39  ;;  %v15451_v39 = vld [vmem:[#allocation53_spill] sm:$0xff] }
0x1039   : > { %9995 = vmatprep.subr.bf16.mxu1 %v14411_v6 }
0x103a   : > { %4939 = vrot.lane.b32.xlu1 %v15424_v0, %s11161_s21  ;;  %v15435_v0 = vld [vmem:[#allocation110_spill] sm:$0xff]  ;;  %10003 = vmatpush3.bf16.msra.mxu1 %v14415_v3 }
0x103b   : > { %4937 = vrot.lane.b32.xlu0 %v15425_v32, %s11161_s21  ;;  %v15437_v32 = vld [vmem:[#allocation112_spill] sm:$0xff] }
0x103e   : > { %3622 = vrot.lane.b32.xlu1 %v15426_v7, %s11161_s21  ;;  %v15440_v7 = vld [vmem:[#allocation156_spill] sm:$0xff] }
0x103f   : > { %4941 = vrot.lane.b32.xlu0 %v15427_v47, %s11161_s21  ;;  %v15443_v47 = vld [vmem:[#allocation40_spill] sm:$0xff] }
0x1042   : > { %3624 = vrot.lane.b32.xlu1 %v15428_v63, %s11161_s21  ;;  %v15444_v63 = vld [vmem:[#allocation162_spill] sm:$0xff] }
0x1043   : > { %4943 = vrot.lane.b32.xlu0 %v15429_v45, %s11161_s21  ;;  %v15446_v45 = vld [vmem:[#allocation160_spill] sm:$0xff] }
0x1046   : > { %3626 = vrot.lane.b32.xlu1 %v15430_v42, %s11161_s21 }
0x1047   : > { %4945 = vrot.lane.b32.xlu0 %v15431_v15, %s11161_s21 }
0x104a   : > { %3628 = vrot.lane.b32.xlu1 %v15432_v28, %s11161_s21 }
0x104b   : > { %4947 = vrot.lane.b32.xlu0 %v15433_v29, %s11161_s21  ;;  %v15450_v29 = vld [vmem:[#allocation164_spill] sm:$0xff] }
0x104e   : > { %3630 = vrot.lane.b32.xlu1 %v15434_v12, %s11161_s21 }
0x104f   : > { %4949 = vrot.lane.b32.xlu0 %v15435_v0, %s11161_s21 }
0x1052   : > { %3632 = vrot.lane.b32.xlu1 %v15436_v60, %s11161_s21 }
0x1053   : > { %4951 = vrot.lane.b32.xlu0 %v15437_v32, %s11161_s21  ;;  %v15452_v32 = vld [vmem:[#allocation117_spill] sm:$0xff] }
0x1056   : > { %3634 = vrot.lane.b32.xlu1 %v15438_v14, %s11161_s21 }
0x1057   : > { %4953 = vrot.lane.b32.xlu0 %v15439_v54, %s11161_s21  ;;  %v9828_v54 = vpack.c.bf16 %v6369_v52, %v6366_v41 }
0x105a   : > { %3636 = vrot.lane.b32.xlu1 %v15440_v7, %s11161_s21  ;;  %v6365_v7 = vld [vmem:[#allocation8] sm:$0xff] }
0x105b   : > { %4955 = vrot.lane.b32.xlu0 %v15441_v48, %s11161_s21  ;;  %v6368_v48 = vld [vmem:[#allocation8 + $0x18] sm:$0xff] }
0x105e   : > { %3638 = vrot.lane.b32.xlu1 %v15442_v22, %s11161_s21 }
0x105f   : > { %4957 = vrot.lane.b32.xlu0 %v15443_v47, %s11161_s21  ;;  %v6372_v47 = vld [vmem:[#allocation8 + $0x38] sm:$0xff] }
0x1060   : > { %v5967_v44 = vpop.xlane.xlu0 %5966 }
0x1061   : > { %v5965_v13 = vpop.xlane.xlu1 %5964 }
0x1062   : > { %10878 = vrcp.f32 %v5965_v13  ;;  %3640 = vrot.lane.b32.xlu1 %v15444_v63, %s11161_s21  ;;  %v15454_v63 = vld [vmem:[#allocation105_spill] sm:$0xff] }
0x1063   : > { %4959 = vrot.lane.b32.xlu0 %v15445_v8, %s11161_s21  ;;  %10880 = vrcp.f32 %v5967_v44  ;;  %v6375_v44 = vld [vmem:[#allocation8 + $0x50] sm:$0xff]  ;;  %v9830_v8 = vpack.c.bf16 %v6368_v48, %v6365_v7  ;;  %v6396_v7 = vld [vmem:[#allocation8 + $0xf8] sm:$0xff] }
0x1064   : > { %v6399_v48 = vld [vmem:[#allocation8 + $0x110] sm:$0xff] }
0x1065   : > { %v5971_v34 = vpop.xlane.xlu0 %5970 }
0x1066   : > { %3642 = vrot.lane.b32.xlu1 %v15446_v45, %s11161_s21  ;;  %v9832_v45 = vpack.c.bf16 %v6375_v44, %v6372_v47  ;;  %v9848_v47 = vpack.c.bf16 %v6399_v48, %v6396_v7  ;;  %v6398_v44 = vld [vmem:[#allocation8 + $0x108] sm:$0xff] }
0x1067   : > { %4961 = vrot.lane.b32.xlu0 %v15447_v58, %s11161_s21  ;;  %v6371_v58 = vld [vmem:[#allocation8 + $0x30] sm:$0xff] }
0x1069   : > { %v5969_v37 = vpop.xlane.xlu1 %5968  ;;  %v5975_v42 = vpop.xlane.xlu0 %5974 }
0x106a   : > { %3644 = vrot.lane.b32.xlu1 %v15448_v9, %s11161_s21  ;;  %10882 = vrcp.f32 %v5969_v37  ;;  %v6374_v37 = vld [vmem:[#allocation8 + $0x48] sm:$0xff] }
0x106b   : > { %4963 = vrot.lane.b32.xlu0 %v15449_v35, %s11161_s21  ;;  %10884 = vrcp.f32 %v5971_v34  ;;  %v6378_v35 = vld [vmem:[#allocation8 + $0x68] sm:$0xff] }
0x106c   : > { %v10879_v15 = vpop.eup %10878 }
0x106d   : > { %v5973_v56 = vpop.xlane.xlu1 %5972  ;;  %v10518_v43 = vpop.permute.xlu0 %10517  ;;  %v6012_v28 = vmul.f32 %v10879_v15, %v14281_v27  ;;  %v15453_v27 = vld [vmem:[#allocation45_spill] sm:$0xff]  ;;  %v6381_v15 = vld [vmem:[#allocation8 + $0x80] sm:$0xff] }
0x106e   : > { %v10520_v30 = vunpack.i.h.bf16 %v10518_v43  ;;  %v10519_v10 = vunpack.i.l.bf16 %v10518_v43  ;;  %3646 = vrot.lane.b32.xlu1 %v15450_v29, %s11161_s21  ;;  %10886 = vrcp.f32 %v5973_v56  ;;  %v10881_v22 = vpop.eup %10880  ;;  %v9834_v43 = vpack.c.bf16 %v6374_v37, %v6371_v58  ;;  %v6404_v58 = vld [vmem:[#allocation8 + $0x138] sm:$0xff] }
0x106f   : > { %8820 = vmatprep.mubr.f32.mxu0 %v6012_v28  ;;  %4965 = vrot.lane.b32.xlu0 %v15451_v39, %s11161_s21  ;;  %10888 = vrcp.f32 %v5975_v42  ;;  %v6013_v34 = vmul.f32 %v10881_v22, %v14279_v59  ;;  %v6380_v59 = vld [vmem:[#allocation8 + $0x78] sm:$0xff] }
0x1070   : > { %v9820_v49 = vpack.c.bf16 %v10520_v30, %v10519_v10  ;;  %v9836_v30 = vpack.c.bf16 %v6381_v15, %v6378_v35  ;;  %v6377_v10 = vld [vmem:[#allocation8 + $0x60] sm:$0xff]  ;;  %v6408_v37 = vld [vmem:[#allocation8 + $0x158] sm:$0xff]  ;;  %v6407_v15 = vld [vmem:[#allocation8 + $0x150] sm:$0xff] }
0x1071   : > { %v10523_v12 = vpop.permute.xlu1 %10522 }
0x1072   : > { %v10525_v0 = vunpack.i.h.bf16 %v10523_v12  ;;  %v10524_v60 = vunpack.i.l.bf16 %v10523_v12  ;;  %3648 = vrot.lane.b32.xlu1 %v15452_v32, %s11161_s21  ;;  %9821 = vmatprep.subr.bf16.mxu0 %v9820_v49  ;;  %v6387_v12 = vld [vmem:[#allocation8 + $0xb0] sm:$0xff]  ;;  %v6393_v32 = vld [vmem:[#allocation8 + $0xe0] sm:$0xff] }
0x1073   : > { %4967 = vrot.lane.b32.xlu0 %v15453_v27, %s11161_s21  ;;  %9823 = vmatpush3.bf16.msra.mxu0 %v9820_v49  ;;  %v6384_v49 = vld [vmem:[#allocation8 + $0x98] sm:$0xff] }
0x1074   : > { %v9824_v14 = vpack.c.bf16 %v10525_v0, %v10524_v60  ;;  %v10883_v13 = vpop.eup %10882  ;;  %v9840_v52 = vpack.c.bf16 %v6387_v12, %v6384_v49  ;;  %v6383_v0 = vld [vmem:[#allocation8 + $0x90] sm:$0xff]  ;;  %v6386_v60 = vld [vmem:[#allocation8 + $0xa8] sm:$0xff] }
0x1075   : > { %v10885_v42 = vpop.eup %10884  ;;  %v6014_v9 = vmul.f32 %v10883_v13, %v14290_v40  ;;  %v9838_v40 = vpack.c.bf16 %v6380_v59, %v6377_v10  ;;  %v9842_v27 = vpack.c.bf16 %v6386_v60, %v6383_v0  ;;  %v6402_v13 = vld [vmem:[#allocation8 + $0x128] sm:$0xff]  ;;  %v6413_v59 = vld [vmem:[#allocation8 + $0x180] sm:$0xff]  ;;  %v6423_v49 = vld [vmem:[#allocation8 + $0x1d0] sm:$0xff] }
0x1076   : > { %3650 = vrot.lane.b32.xlu1 %v15454_v63, %s11161_s21  ;;  %9825 = vmatprep.subr.bf16.mxu0 %v9824_v14  ;;  %v6015_v28 = vmul.f32 %v10885_v42, %v14285_v18  ;;  %v6390_v18 = vld [vmem:[#allocation8 + $0xc8] sm:$0xff]  ;;  %v6405_v63 = vld [vmem:[#allocation8 + $0x140] sm:$0xff]  ;;  %v6411_v42 = vld [vmem:[#allocation8 + $0x170] sm:$0xff] }
0x1077   : > { %9827 = vmatpush3.bf16.msra.mxu0 %v9824_v14  ;;  %v9844_v14 = vpack.c.bf16 %v6393_v32, %v6390_v18  ;;  %v9856_v35 = vpack.c.bf16 %v6411_v42, %v6408_v37  ;;  %v6426_v0 = vld [vmem:[#allocation8 + $0x1e8] sm:$0xff]  ;;  %v6429_v60 = vld [vmem:[#allocation8 + $0x200] sm:$0xff]  ;;  %v6440_v37 = vld [vmem:[#allocation8 + $0x258] sm:$0xff] }
0x1078   : > { %9829 = vmatprep.subr.bf16.mxu0 %v9828_v54  ;;  %v10887_v56 = vpop.eup %10886  ;;  %v6392_v54 = vld [vmem:[#allocation8 + $0xd8] sm:$0xff]  ;;  %v9868_v32 = vpack.c.bf16 %v6429_v60, %v6426_v0  ;;  %v6459_v60 = vld [vmem:[#allocation8 + $0x2f0] sm:$0xff] }
0x1079   : > { %v10889_v29 = vpop.eup %10888  ;;  %v6016_v39 = vmul.f32 %v10887_v56, %v14294_v25  ;;  %v6389_v25 = vld [vmem:[#allocation8 + $0xc0] sm:$0xff]  ;;  %v6410_v56 = vld [vmem:[#allocation8 + $0x168] sm:$0xff]  ;;  %v6444_v42 = vld [vmem:[#allocation8 + $0x278] sm:$0xff] }
0x107a   : > { %8821 = vmatmul.mubr.f32.vlgmr.msra.gmra.mrb[176].mxu0 %v6013_v34  ;;  %v6017_v41 = vmul.f32 %v10889_v29, %v14288_v36  ;;  %v9846_v22 = vpack.c.bf16 %v6392_v54, %v6389_v25  ;;  %v6395_v36 = vld [vmem:[#allocation8 + $0xf0] sm:$0xff]  ;;  %v9852_v34 = vpack.c.bf16 %v6405_v63, %v6402_v13  ;;  %v6416_v29 = vld [vmem:[#allocation8 + $0x198] sm:$0xff]  ;;  %v6441_v13 = vld [vmem:[#allocation8 + $0x260] sm:$0xff] }
0x107b   : > { %8823 = vmatprep.mubr.f32.mxu0 %v6014_v9  ;;  %9831 = vmatpush1.bf16.msra.mxu0 %v9830_v8  ;;  %v9850_v8 = vpack.c.bf16 %v6398_v44, %v6395_v36  ;;  %v9862_v12 = vpack.c.bf16 %v6416_v29, %v6413_v59  ;;  %v6432_v25 = vld [vmem:[#allocation8 + $0x218] sm:$0xff]  ;;  %v6435_v54 = vld [vmem:[#allocation8 + $0x230] sm:$0xff]  ;;  %v6434_v36 = vld [vmem:[#allocation8 + $0x228] sm:$0xff] }
0x107c   : > { %9833 = vmatprep.subr.bf16.mxu0 %v9832_v45  ;;  %v6401_v45 = vld [vmem:[#allocation8 + $0x120] sm:$0xff]  ;;  %v6438_v44 = vld [vmem:[#allocation8 + $0x248] sm:$0xff]  ;;  %v6456_v0 = vld [vmem:[#allocation8 + $0x2d8] sm:$0xff] }
0x107d   : > { %v9854_v9 = vpack.c.bf16 %v6404_v58, %v6401_v45  ;;  %v9876_v45 = vpack.c.bf16 %v6441_v13, %v6438_v44  ;;  %v6437_v58 = vld [vmem:[#allocation8 + $0x240] sm:$0xff] }
0x107e   : > { %8824 = vmatmul.mubr.f32.gmra.mrb[178].mxu0 %v6015_v28  ;;  %v6417_v28 = vld [vmem:[#allocation8 + $0x1a0] sm:$0xff] }
0x107f   : > { %8826 = vmatprep.mubr.f32.mxu0 %v6016_v39  ;;  %9835 = vmatpush1.bf16.msra.mxu0 %v9834_v43  ;;  %v6414_v43 = vld [vmem:[#allocation8 + $0x188] sm:$0xff]  ;;  %v6420_v39 = vld [vmem:[#allocation8 + $0x1b8] sm:$0xff] }
0x1080   : > { %9837 = vmatprep.subr.bf16.mxu0 %v9836_v30  ;;  %v9858_v30 = vpack.c.bf16 %v6410_v56, %v6407_v15  ;;  %v9860_v10 = vpack.c.bf16 %v6417_v28, %v6414_v43  ;;  %v9878_v15 = vpack.c.bf16 %v6440_v37, %v6437_v58  ;;  %v6443_v43 = vld [vmem:[#allocation8 + $0x270] sm:$0xff]  ;;  %v6446_v28 = vld [vmem:[#allocation8 + $0x288] sm:$0xff] }
0x1082   : > { %8827 = vmatmul.mubr.f32.gmra.mrb[180].mxu0 %v6017_v41  ;;  %v6419_v41 = vld [vmem:[#allocation8 + $0x1b0] sm:$0xff] }
0x1083   : > { %9839 = vmatpush1.bf16.msra.mxu0 %v9838_v40  ;;  %v9864_v40 = vpack.c.bf16 %v6423_v49, %v6420_v39  ;;  %v9882_v39 = vpack.c.bf16 %v6446_v28, %v6443_v43 }
0x1084   : > { %9841 = vmatprep.subr.bf16.mxu0 %v9840_v52  ;;  %v6422_v52 = vld [vmem:[#allocation8 + $0x1c8] sm:$0xff] }
0x1085   : > { %v9866_v18 = vpack.c.bf16 %v6422_v52, %v6419_v41  ;;  %v6452_v41 = vld [vmem:[#allocation8 + $0x2b8] sm:$0xff] }
0x1087   : > { %9843 = vmatpush1.bf16.msra.mxu0 %v9842_v27  ;;  %v6425_v27 = vld [vmem:[#allocation8 + $0x1e0] sm:$0xff] }
0x1088   : > { %9845 = vmatprep.subr.bf16.mxu0 %v9844_v14  ;;  %v6428_v14 = vld [vmem:[#allocation8 + $0x1f8] sm:$0xff] }
0x1089   : > { %v9870_v48 = vpack.c.bf16 %v6428_v14, %v6425_v27 }
0x108b   : > { %9847 = vmatpush1.bf16.msra.mxu0 %v9846_v22  ;;  %v9872_v22 = vpack.c.bf16 %v6435_v54, %v6432_v25 }
0x108c   : > { %9849 = vmatprep.subr.bf16.mxu0 %v9848_v47  ;;  %v6431_v47 = vld [vmem:[#allocation8 + $0x210] sm:$0xff] }
0x108f   : > { %9851 = vmatpush1.bf16.msra.mxu0 %v9850_v8 }
0x1090   : > { %9853 = vmatprep.subr.bf16.mxu0 %v9852_v34  ;;  %v9874_v34 = vpack.c.bf16 %v6434_v36, %v6431_v47  ;;  %v6458_v47 = vld [vmem:[#allocation8 + $0x2e8] sm:$0xff] }
0x1093   : > { %9855 = vmatpush1.bf16.msra.mxu0 %v9854_v9  ;;  %v6447_v9 = vld [vmem:[#allocation8 + $0x290] sm:$0xff] }
0x1094   : > { %9857 = vmatprep.subr.bf16.mxu0 %v9856_v35  ;;  %v9880_v56 = vpack.c.bf16 %v6447_v9, %v6444_v42 }
0x1097   : > { %9859 = vmatpush1.bf16.msra.mxu0 %v9858_v30  ;;  %v6450_v30 = vld [vmem:[#allocation8 + $0x2a8] sm:$0xff] }
0x1098   : > { %9861 = vmatprep.subr.bf16.mxu0 %v9860_v10  ;;  %v6453_v10 = vld [vmem:[#allocation8 + $0x2c0] sm:$0xff] }
0x109b   : > { %9863 = vmatpush1.bf16.msra.mxu0 %v9862_v12  ;;  %v9884_v12 = vpack.c.bf16 %v6453_v10, %v6450_v30 }
0x109c   : > { %9865 = vmatprep.subr.bf16.mxu0 %v9864_v40  ;;  %v6449_v40 = vld [vmem:[#allocation8 + $0x2a0] sm:$0xff] }
0x109d   : > { %v9886_v54 = vpack.c.bf16 %v6452_v41, %v6449_v40 }
0x109e   : > { %v5979_v7 = vpop.xlane.xlu0 %5978 }
0x109f   : > { %9867 = vmatpush1.bf16.msra.mxu0 %v9866_v18  ;;  %10890 = vrcp.f32 %v5979_v7 }
0x10a0   : > { %9869 = vmatprep.subr.bf16.mxu0 %v9868_v32 }
0x10a2   : > { %v5977_v63 = vpop.xlane.xlu1 %5976  ;;  %v5981_v8 = vpop.xlane.xlu0 %5980 }
0x10a3   : > { %10892 = vrcp.f32 %v5977_v63  ;;  %9871 = vmatpush1.bf16.msra.mxu0 %v9870_v48  ;;  %v9888_v48 = vpack.c.bf16 %v6459_v60, %v6456_v0 }
0x10a4   : > { %10894 = vrcp.f32 %v5981_v8  ;;  %9873 = vmatprep.subr.bf16.mxu0 %v9872_v22  ;;  %v6455_v22 = vld [vmem:[#allocation8 + $0x2d0] sm:$0xff] }
0x10a6   : > { %v5983_v35 = vpop.xlane.xlu1 %5982 }
0x10a7   : > { %10896 = vrcp.f32 %v5983_v35  ;;  %9875 = vmatpush1.bf16.msra.mxu0 %v9874_v34 }
0x10a8   : > { %9877 = vmatprep.subr.bf16.mxu0 %v9876_v45 }
0x10a9   : > { %v10891_v49 = vpop.eup %10890 }
0x10aa   : > { %v5987_v59 = vpop.xlane.xlu1 %5986  ;;  %v5985_v29 = vpop.xlane.xlu0 %5984  ;;  %v6019_v25 = vmul.f32 %v10891_v49, %v14312_v51  ;;  %v9890_v51 = vpack.c.bf16 %v6458_v47, %v6455_v22 }
0x10ab   : > { %10898 = vrcp.f32 %v5987_v59  ;;  %9879 = vmatpush1.bf16.msra.mxu0 %v9878_v15 }
0x10ac   : > { %10900 = vrcp.f32 %v5985_v29  ;;  %9881 = vmatprep.subr.bf16.mxu0 %v9880_v56 }
0x10ad   : > { %v10893_v52 = vpop.eup %10892 }
0x10ae   : > { %v10895_v18 = vpop.eup %10894  ;;  %v5991_v32 = vpop.xlane.xlu1 %5990  ;;  %v6018_v14 = vmul.f32 %v10893_v52, %v14317_v2 }
0x10af   : > { %v5989_v27 = vpop.xlane.xlu0 %5988  ;;  %10902 = vrcp.f32 %v5991_v32  ;;  %9883 = vmatpush1.bf16.msra.mxu0 %v9882_v39  ;;  %v6020_v7 = vmul.f32 %v10895_v18, %v14319_v31 }
0x10b0   : > { %10904 = vrcp.f32 %v5989_v27  ;;  %8829 = vmatprep.mubr.f32.mxu0 %v6018_v14  ;;  %9885 = vmatprep.subr.bf16.mxu0 %v9884_v12 }
0x10b1   : > { %v10897_v36 = vpop.eup %10896  ;;  %8830 = vmatmul.mubr.f32.gmra.mrb[182].mxu0 %v6019_v25 }
0x10b2   : > { %v5995_v44 = vpop.xlane.xlu1 %5994  ;;  %8832 = vmatprep.mubr.f32.mxu0 %v6020_v7  ;;  %v6021_v2 = vmul.f32 %v10897_v36, %v14324_v33 }
0x10b3   : > { %v5993_v13 = vpop.xlane.xlu0 %5992  ;;  %10906 = vrcp.f32 %v5995_v44  ;;  %9887 = vmatpush1.bf16.msra.mxu0 %v9886_v54 }
0x10b4   : > { %10908 = vrcp.f32 %v5993_v13  ;;  %9889 = vmatprep.subr.bf16.mxu0 %v9888_v48 }
0x10b5   : > { %v10899_v63 = vpop.eup %10898  ;;  %8833 = vmatmul.mubr.f32.gmra.mrb[184].mxu0 %v6021_v2 }
0x10b6   : > { %v10901_v31 = vpop.eup %10900  ;;  %v3621_v8 = vpop.permute.xlu1 %3620  ;;  %v6023_v45 = vmul.f32 %v10899_v63, %v14327_v19 }
0x10b7   : > { %v4938_v34 = vpop.permute.xlu0 %4937  ;;  %3669 = vst.msk [vmem:[#allocation2] sm:$0xff] %vm3668_vm0, %v3621_v8  ;;  %v6022_v58 = vmul.f32 %v10901_v31, %v14329_v53  ;;  %9891 = vmatpush1.bf16.msra.mxu0 %v9890_v51 }
0x10b8   : > { %4985 = vst.msk [vmem:[#allocation2 + $0x8] sm:$0xff] %vm3668_vm0, %v4938_v34 }
0x10b9   : > { %v10903_v33 = vpop.eup %10902  ;;  %8835 = vmatprep.mubr.f32.mxu0 %v6022_v58 }
0x10ba   : > { %v10905_v37 = vpop.eup %10904  ;;  %8836 = vmatmul.mubr.f32.gmra.mrb[186].mxu0 %v6023_v45  ;;  %v4940_v42 = vpop.permute.xlu1 %4939  ;;  %v6025_v35 = vmul.f32 %v10903_v33, %v14333_v24 }
0x10bb   : > { %v4942_v9 = vpop.permute.xlu0 %4941  ;;  %4986 = vst.msk [vmem:[#allocation2 + $0x20] sm:$0xff] %vm3668_vm0, %v4940_v42  ;;  %v6024_v19 = vmul.f32 %v10905_v37, %v14335_v11 }
0x10bc   : > { %4987 = vst.msk [vmem:[#allocation2 + $0x38] sm:$0xff] %vm3668_vm0, %v4942_v9 }
0x10bd   : > { %v10907_v15 = vpop.eup %10906  ;;  %8838 = vmatprep.mubr.f32.mxu0 %v6024_v19 }
0x10be   : > { %v10909_v56 = vpop.eup %10908  ;;  %8839 = vmatmul.mubr.f32.gmra.mrb[188].mxu0 %v6025_v35  ;;  %v3623_v53 = vpop.permute.xlu1 %3622  ;;  %v6027_v28 = vmul.f32 %v10907_v15, %v14339_v38  ;;  %v14484_v11 = vld [vmem:[#allocation2] sm:$0xff] }
0x10bf   : > { %v4944_v43 = vpop.permute.xlu0 %4943  ;;  %3670 = vst.msk [vmem:[#allocation2 + $0x18] sm:$0xff] %vm3668_vm0, %v3623_v53  ;;  %v6026_v24 = vmul.f32 %v10909_v56, %v14341_v23  ;;  %v14479_v59 = vld [vmem:[#allocation2 + $0x8] sm:$0xff] }
0x10c0   : > { %4988 = vst.msk [vmem:[#allocation2 + $0x50] sm:$0xff] %vm3668_vm0, %v4944_v43 }
0x10c1   : > { %8841 = vmatprep.mubr.f32.mxu0 %v6026_v24 }
0x10c2   : > { %8842 = vmatmul.mubr.f32.gmra.mrb[190].mxu0 %v6027_v28  ;;  %v3625_v30 = vpop.permute.xlu1 %3624  ;;  %v14487_v39 = vld [vmem:[#allocation2 + $0x20] sm:$0xff] }
0x10c3   : > { %v4946_v10 = vpop.permute.xlu0 %4945  ;;  %3671 = vst.msk [vmem:[#allocation2 + $0x30] sm:$0xff] %vm3668_vm0, %v3625_v30  ;;  %6590 = vmatprep.mubr.f32.mxu0 %v14479_v59  ;;  %v14495_v40 = vld [vmem:[#allocation2 + $0x38] sm:$0xff] }
0x10c4   : > { %4989 = vst.msk [vmem:[#allocation2 + $0x68] sm:$0xff] %vm3668_vm0, %v4946_v10 }
0x10c6   : > { %6591 = vmatmul.mubr.f32.vlgmr.msra.gmra.mrb[192].mxu0 %v14484_v11  ;;  %v3627_v38 = vpop.permute.xlu1 %3626  ;;  %v14492_v23 = vld [vmem:[#allocation2 + $0x18] sm:$0xff] }
0x10c7   : > { %v4948_v29 = vpop.permute.xlu0 %4947  ;;  %3672 = vst.msk [vmem:[#allocation2 + $0x48] sm:$0xff] %vm3668_vm0, %v3627_v38  ;;  %6596 = vmatprep.mubr.f32.mxu0 %v14487_v39  ;;  %v14503_v18 = vld [vmem:[#allocation2 + $0x50] sm:$0xff] }
0x10c8   : > { %4990 = vst.msk [vmem:[#allocation2 + $0x80] sm:$0xff] %vm3668_vm0, %v4948_v29 }
0x10ca   : > { %6597 = vmatmul.mubr.f32.gmra.mrb[194].mxu0 %v14492_v23  ;;  %v3629_v49 = vpop.permute.xlu1 %3628  ;;  %v14500_v52 = vld [vmem:[#allocation2 + $0x30] sm:$0xff] }
0x10cb   : > { %v4950_v12 = vpop.permute.xlu0 %4949  ;;  %v6330_v41 = vld [vmem:[#allocation2 + $0x68] sm:$0xff]  ;;  %3673 = vst.msk [vmem:[#allocation2 + $0x60] sm:$0xff] %vm3668_vm0, %v3629_v49  ;;  %6602 = vmatprep.mubr.f32.mxu0 %v14495_v40 }
0x10cc   : > { %4991 = vst.msk [vmem:[#allocation2 + $0x98] sm:$0xff] %vm3668_vm0, %v4950_v12  ;;  %6932 = vmatprep.mubr.f32.mxu1 %v6330_v41 }
0x10ce   : > { %6603 = vmatmul.mubr.f32.gmra.mrb[196].mxu0 %v14500_v52  ;;  %v3631_v0 = vpop.permute.xlu1 %3630  ;;  %v14508_v32 = vld [vmem:[#allocation2 + $0x48] sm:$0xff] }
0x10cf   : > { %v4952_v60 = vpop.permute.xlu0 %4951  ;;  %3674 = vst.msk [vmem:[#allocation2 + $0x78] sm:$0xff] %vm3668_vm0, %v3631_v0  ;;  %6608 = vmatprep.mubr.f32.mxu0 %v14503_v18  ;;  %v6333_v54 = vld [vmem:[#allocation2 + $0x80] sm:$0xff] }
0x10d0   : > { %4992 = vst.msk [vmem:[#allocation2 + $0xb0] sm:$0xff] %vm3668_vm0, %v4952_v60 }
0x10d2   : > { %6609 = vmatmul.mubr.f32.gmra.mrb[198].mxu0 %v14508_v32  ;;  %v3633_v27 = vpop.permute.xlu1 %3632  ;;  %v6329_v25 = vld [vmem:[#allocation2 + $0x60] sm:$0xff] }
0x10d3   : > { %v4954_v14 = vpop.permute.xlu0 %4953  ;;  %3675 = vst.msk [vmem:[#allocation2 + $0x90] sm:$0xff] %vm3668_vm0, %v3633_v27  ;;  %6614 = vmatprep.mubr.f32.mxu0 %v6330_v41  ;;  %6933 = vmatmul.mubr.f32.vlgmr.msra.gmra.mrb[208].mxu1 %v6329_v25  ;;  %v6336_v47 = vld [vmem:[#allocation2 + $0x98] sm:$0xff] }
0x10d4   : > { %4993 = vst.msk [vmem:[#allocation2 + $0xc8] sm:$0xff] %vm3668_vm0, %v4954_v14  ;;  %6937 = vmatprep.mubr.f32.mxu1 %v6333_v54  ;;  %v15455_v14 = vmov 0.0  }
0x10d6   : > { %6615 = vmatmul.mubr.f32.gmra.mrb[200].mxu0 %v6329_v25  ;;  %v3635_v7 = vpop.permute.xlu1 %3634  ;;  %v6332_v22 = vld [vmem:[#allocation2 + $0x78] sm:$0xff]  ;;  %v6462_v25 = vld [vmem:[#allocation8 + $0x308] sm:$0xff] }
0x10d7   : > { %v4956_v48 = vpop.permute.xlu0 %4955  ;;  %3676 = vst.msk [vmem:[#allocation2 + $0xa8] sm:$0xff] %vm3668_vm0, %v3635_v7  ;;  %6620 = vmatprep.mubr.f32.mxu0 %v6333_v54  ;;  %6938 = vmatmul.mubr.f32.gmra.mrb[210].mxu1 %v6332_v22  ;;  %v6339_v2 = vld [vmem:[#allocation2 + $0xb0] sm:$0xff]  ;;  %v6465_v54 = vld [vmem:[#allocation8 + $0x320] sm:$0xff] }
0x10d8   : > { %4994 = vst.msk [vmem:[#allocation2 + $0xe0] sm:$0xff] %vm3668_vm0, %v4956_v48  ;;  %6942 = vmatprep.mubr.f32.mxu1 %v6336_v47  ;;  %v6461_v7 = vld [vmem:[#allocation8 + $0x300] sm:$0xff]  ;;  %v9892_v48 = vpack.c.bf16 %v6465_v54, %v6462_v25  ;;  %v6488_v54 = vld [vmem:[#allocation8 + $0x3d8] sm:$0xff] }
0x10d9   : > { %v6485_v25 = vld [vmem:[#allocation8 + $0x3c0] sm:$0xff] }
0x10da   : > { %6621 = vmatmul.mubr.f32.gmra.mrb[202].mxu0 %v6332_v22  ;;  %v3637_v36 = vpop.permute.xlu1 %3636  ;;  %v6335_v13 = vld [vmem:[#allocation2 + $0x90] sm:$0xff]  ;;  %v6464_v22 = vld [vmem:[#allocation8 + $0x318] sm:$0xff]  ;;  %9893 = vmatprep.subr.bf16.mxu0 %v9892_v48  ;;  %v9910_v48 = vpack.c.bf16 %v6488_v54, %v6485_v25 }
0x10db   : > { %v4958_v44 = vpop.permute.xlu0 %4957  ;;  %3677 = vst.msk [vmem:[#allocation2 + $0xc0] sm:$0xff] %vm3668_vm0, %v3637_v36  ;;  %6626 = vmatprep.mubr.f32.mxu0 %v6336_v47  ;;  %6943 = vmatmul.mubr.f32.gmra.mrb[212].mxu1 %v6335_v13  ;;  %v6342_v8 = vld [vmem:[#allocation2 + $0xc8] sm:$0xff]  ;;  %v6463_v47 = vld [vmem:[#allocation8 + $0x310] sm:$0xff] }
0x10dc   : > { %4995 = vst.msk [vmem:[#allocation2 + $0xf8] sm:$0xff] %vm3668_vm0, %v4958_v44  ;;  %6947 = vmatprep.mubr.f32.mxu1 %v6339_v2  ;;  %v6466_v36 = vld [vmem:[#allocation8 + $0x328] sm:$0xff]  ;;  %v9894_v44 = vpack.c.bf16 %v6464_v22, %v6461_v7  ;;  %v6487_v7 = vld [vmem:[#allocation8 + $0x3d0] sm:$0xff] }
0x10dd   : > { %v6490_v22 = vld [vmem:[#allocation8 + $0x3e8] sm:$0xff] }
0x10de   : > { %6627 = vmatmul.mubr.f32.gmra.mrb[204].mxu0 %v6335_v13  ;;  %v3639_v51 = vpop.permute.xlu1 %3638  ;;  %v6338_v31 = vld [vmem:[#allocation2 + $0xa8] sm:$0xff]  ;;  %v9956_v13 = vpack.c.bf16 %v6466_v36, %v6463_v47  ;;  %v9972_v47 = vpack.c.bf16 %v6490_v22, %v6487_v7  ;;  %v6492_v36 = vld [vmem:[#allocation8 + $0x3f8] sm:$0xff] }
0x10df   : > { %v4960_v63 = vpop.permute.xlu0 %4959  ;;  %3678 = vst.msk [vmem:[#allocation2 + $0xd8] sm:$0xff] %vm3668_vm0, %v3639_v51  ;;  %6632 = vmatprep.mubr.f32.mxu0 %v6339_v2  ;;  %6948 = vmatmul.mubr.f32.gmra.mrb[214].mxu1 %v6338_v31  ;;  %v6345_v33 = vld [vmem:[#allocation2 + $0xe0] sm:$0xff]  ;;  %v6468_v2 = vld [vmem:[#allocation8 + $0x338] sm:$0xff]  ;;  %v6471_v51 = vld [vmem:[#allocation8 + $0x350] sm:$0xff] }
0x10e0   : > { %4996 = vst.msk [vmem:[#allocation2 + $0x110] sm:$0xff] %vm3668_vm0, %v4960_v63  ;;  %6952 = vmatprep.mubr.f32.mxu1 %v6342_v8  ;;  %9895 = vmatpush1.bf16.msra.mxu0 %v9894_v44  ;;  %v9896_v63 = vpack.c.bf16 %v6471_v51, %v6468_v2  ;;  %v6495_v44 = vld [vmem:[#allocation8 + $0x410] sm:$0xff]  ;;  %v6494_v51 = vld [vmem:[#allocation8 + $0x408] sm:$0xff] }
0x10e1   : > { %9957 = vmatprep.subr.bf16.mxu1 %v9956_v13  ;;  %v6491_v2 = vld [vmem:[#allocation8 + $0x3f0] sm:$0xff] }
0x10e2   : > { %6633 = vmatmul.mubr.f32.gmra.mrb[206].mxu0 %v6338_v31  ;;  %v3641_v34 = vpop.permute.xlu1 %3640  ;;  %v6341_v58 = vld [vmem:[#allocation2 + $0xc0] sm:$0xff]  ;;  %9959 = vmatpush3.bf16.msra.mxu1 %v9956_v13  ;;  %v6467_v31 = vld [vmem:[#allocation8 + $0x330] sm:$0xff]  ;;  %v9912_v13 = vpack.c.bf16 %v6495_v44, %v6492_v36 }
0x10e3   : > { %v4962_v45 = vpop.permute.xlu0 %4961  ;;  %3679 = vst.msk [vmem:[#allocation2 + $0xf0] sm:$0xff] %vm3668_vm0, %v3641_v34  ;;  %6638 = vmatprep.mubr.f32.mxu0 %v6342_v8  ;;  %6953 = vmatmul.mubr.f32.gmra.mrb[216].mxu1 %v6341_v58  ;;  %v6348_v35 = vld [vmem:[#allocation2 + $0xf8] sm:$0xff]  ;;  %v6470_v8 = vld [vmem:[#allocation8 + $0x348] sm:$0xff]  ;;  %v6469_v34 = vld [vmem:[#allocation8 + $0x340] sm:$0xff] }
0x10e4   : > { %4997 = vst.msk [vmem:[#allocation2 + $0x128] sm:$0xff] %vm3668_vm0, %v4962_v45  ;;  %6957 = vmatprep.mubr.f32.mxu1 %v6345_v33  ;;  %v9898_v45 = vpack.c.bf16 %v6470_v8, %v6467_v31  ;;  %9897 = vmatprep.subr.bf16.mxu0 %v9896_v63  ;;  %v6493_v63 = vld [vmem:[#allocation8 + $0x400] sm:$0xff]  ;;  %v9914_v31 = vpack.c.bf16 %v6494_v51, %v6491_v2  ;;  %v6496_v8 = vld [vmem:[#allocation8 + $0x418] sm:$0xff] }
0x10e6   : > { %6639 = vmatmul.mubr.f32.gmra.mrb[208].mxu0 %v6341_v58  ;;  %v3643_v37 = vpop.permute.xlu1 %3642  ;;  %v6344_v9 = vld [vmem:[#allocation2 + $0xd8] sm:$0xff] }
0x10e7   : > { %v4964_v42 = vpop.permute.xlu0 %4963  ;;  %3680 = vst.msk [vmem:[#allocation2 + $0x108] sm:$0xff] %vm3668_vm0, %v3643_v37  ;;  %6644 = vmatprep.mubr.f32.mxu0 %v6345_v33  ;;  %6958 = vmatmul.mubr.f32.gmra.mrb[218].mxu1 %v6344_v9  ;;  %v6351_v53 = vld [vmem:[#allocation2 + $0x110] sm:$0xff]  ;;  %v6472_v58 = vld [vmem:[#allocation8 + $0x358] sm:$0xff]  ;;  %v6474_v37 = vld [vmem:[#allocation8 + $0x368] sm:$0xff] }
0x10e8   : > { %4998 = vst.msk [vmem:[#allocation2 + $0x140] sm:$0xff] %vm3668_vm0, %v4964_v42  ;;  %6962 = vmatprep.mubr.f32.mxu1 %v6348_v35  ;;  %v9960_v33 = vpack.c.bf16 %v6472_v58, %v6469_v34  ;;  %9899 = vmatpush1.bf16.msra.mxu0 %v9898_v45  ;;  %v6477_v42 = vld [vmem:[#allocation8 + $0x380] sm:$0xff]  ;;  %v9976_v34 = vpack.c.bf16 %v6496_v8, %v6493_v63  ;;  %v6498_v45 = vld [vmem:[#allocation8 + $0x428] sm:$0xff] }
0x10e9   : > { %v6501_v58 = vld [vmem:[#allocation8 + $0x440] sm:$0xff] }
0x10ea   : > { %6645 = vmatmul.mubr.f32.gmra.mrb[210].mxu0 %v6344_v9  ;;  %v3645_v19 = vpop.permute.xlu1 %3644  ;;  %v6347_v56 = vld [vmem:[#allocation2 + $0xf0] sm:$0xff]  ;;  %9961 = vmatprep.subr.bf16.mxu1 %v9960_v33  ;;  %v9900_v9 = vpack.c.bf16 %v6477_v42, %v6474_v37  ;;  %v6497_v37 = vld [vmem:[#allocation8 + $0x420] sm:$0xff]  ;;  %v6500_v42 = vld [vmem:[#allocation8 + $0x438] sm:$0xff] }
0x10eb   : > { %v4966_v15 = vpop.permute.xlu0 %4965  ;;  %3681 = vst.msk [vmem:[#allocation2 + $0x120] sm:$0xff] %vm3668_vm0, %v3645_v19  ;;  %6650 = vmatprep.mubr.f32.mxu0 %v6348_v35  ;;  %6963 = vmatmul.mubr.f32.gmra.mrb[220].mxu1 %v6347_v56  ;;  %v6354_v30 = vld [vmem:[#allocation2 + $0x128] sm:$0xff]  ;;  %v6473_v35 = vld [vmem:[#allocation8 + $0x360] sm:$0xff]  ;;  %v6476_v19 = vld [vmem:[#allocation8 + $0x378] sm:$0xff] }
0x10ec   : > { %4999 = vst.msk [vmem:[#allocation2 + $0x158] sm:$0xff] %vm3668_vm0, %v4966_v15  ;;  %6967 = vmatprep.mubr.f32.mxu1 %v6351_v53  ;;  %v6475_v15 = vld [vmem:[#allocation8 + $0x370] sm:$0xff]  ;;  %9963 = vmatpush3.bf16.msra.mxu1 %v9960_v33  ;;  %v9916_v33 = vpack.c.bf16 %v6501_v58, %v6498_v45 }
0x10ed   : > { %9901 = vmatprep.subr.bf16.mxu0 %v9900_v9  ;;  %v6499_v9 = vld [vmem:[#allocation8 + $0x430] sm:$0xff] }
0x10ee   : > { %6651 = vmatmul.mubr.f32.gmra.mrb[212].mxu0 %v6347_v56  ;;  %v3647_v43 = vpop.permute.xlu1 %3646  ;;  %v6350_v24 = vld [vmem:[#allocation2 + $0x108] sm:$0xff]  ;;  %v9902_v56 = vpack.c.bf16 %v6476_v19, %v6473_v35  ;;  %v9918_v35 = vpack.c.bf16 %v6500_v42, %v6497_v37 }
0x10ef   : > { %v4968_v28 = vpop.permute.xlu0 %4967  ;;  %3682 = vst.msk [vmem:[#allocation2 + $0x138] sm:$0xff] %vm3668_vm0, %v3647_v43  ;;  %6656 = vmatprep.mubr.f32.mxu0 %v6351_v53  ;;  %6968 = vmatmul.mubr.f32.gmra.mrb[222].mxu1 %v6350_v24  ;;  %v6357_v29 = vld [vmem:[#allocation2 + $0x140] sm:$0xff]  ;;  %v6478_v53 = vld [vmem:[#allocation8 + $0x388] sm:$0xff] }
0x10f0   : > { %5000 = vst.msk [vmem:[#allocation2 + $0x170] sm:$0xff] %vm3668_vm0, %v4968_v28  ;;  %6972 = vmatprep.mubr.f32.mxu1 %v6354_v30  ;;  %v9964_v43 = vpack.c.bf16 %v6478_v53, %v6475_v15  ;;  %9903 = vmatpush1.bf16.msra.mxu0 %v9902_v56  ;;  %v6480_v28 = vld [vmem:[#allocation8 + $0x398] sm:$0xff]  ;;  %v6502_v19 = vld [vmem:[#allocation8 + $0x448] sm:$0xff]  ;;  %v6507_v53 = vld [vmem:[#allocation8 + $0x470] sm:$0xff] }
0x10f1   : > { %v9980_v15 = vpack.c.bf16 %v6502_v19, %v6499_v9  ;;  %v6504_v56 = vld [vmem:[#allocation8 + $0x458] sm:$0xff] }
0x10f2   : > { %6657 = vmatmul.mubr.f32.gmra.mrb[214].mxu0 %v6350_v24  ;;  %v3649_v10 = vpop.permute.xlu1 %3648  ;;  %v6353_v38 = vld [vmem:[#allocation2 + $0x120] sm:$0xff]  ;;  %v6483_v24 = vld [vmem:[#allocation8 + $0x3b0] sm:$0xff]  ;;  %9965 = vmatprep.subr.bf16.mxu1 %v9964_v43 }
0x10f3   : > { %3683 = vst.msk [vmem:[#allocation2 + $0x150] sm:$0xff] %vm3668_vm0, %v3649_v10  ;;  %6662 = vmatprep.mubr.f32.mxu0 %v6354_v30  ;;  %6973 = vmatmul.mubr.f32.gmra.mrb[224].mxu1 %v6353_v38  ;;  %v6360_v41 = vld [vmem:[#allocation2 + $0x158] sm:$0xff]  ;;  %v9904_v30 = vpack.c.bf16 %v6483_v24, %v6480_v28  ;;  %v6479_v10 = vld [vmem:[#allocation8 + $0x390] sm:$0xff]  ;;  %v6506_v24 = vld [vmem:[#allocation8 + $0x468] sm:$0xff] }
0x10f4   : > { %6977 = vmatprep.mubr.f32.mxu1 %v6357_v29  ;;  %9967 = vmatpush3.bf16.msra.mxu1 %v9964_v43  ;;  %v9920_v43 = vpack.c.bf16 %v6507_v53, %v6504_v56  ;;  %v6503_v28 = vld [vmem:[#allocation8 + $0x450] sm:$0xff] }
0x10f5   : > { %9905 = vmatprep.subr.bf16.mxu0 %v9904_v30  ;;  %v6505_v30 = vld [vmem:[#allocation8 + $0x460] sm:$0xff] }
0x10f6   : > { %6663 = vmatmul.mubr.f32.gmra.mrb[216].mxu0 %v6353_v38  ;;  %v3651_v49 = vpop.permute.xlu1 %3650  ;;  %v6356_v12 = vld [vmem:[#allocation2 + $0x138] sm:$0xff]  ;;  %v6482_v38 = vld [vmem:[#allocation8 + $0x3a8] sm:$0xff] }
0x10f7   : > { %3684 = vst.msk [vmem:[#allocation2 + $0x168] sm:$0xff] %vm3668_vm0, %v3651_v49  ;;  %6668 = vmatprep.mubr.f32.mxu0 %v6357_v29  ;;  %6978 = vmatmul.mubr.f32.gmra.mrb[226].mxu1 %v6356_v12  ;;  %v6363_v60 = vld [vmem:[#allocation2 + $0x170] sm:$0xff]  ;;  %v6481_v29 = vld [vmem:[#allocation8 + $0x3a0] sm:$0xff]  ;;  %v9906_v49 = vpack.c.bf16 %v6482_v38, %v6479_v10  ;;  %v9922_v10 = vpack.c.bf16 %v6506_v24, %v6503_v28  ;;  %v6508_v38 = vld [vmem:[#allocation8 + $0x478] sm:$0xff] }
0x10f8   : > { %6982 = vmatprep.mubr.f32.mxu1 %v6360_v41 }
0x10f9   : > { %9907 = vmatpush1.bf16.msra.mxu0 %v9906_v49 }
0x10fa   : > { %6669 = vmatmul.mubr.f32.gmra.mrb[218].mxu0 %v6356_v12  ;;  %v6359_v0 = vld [vmem:[#allocation2 + $0x150] sm:$0xff]  ;;  %v6484_v12 = vld [vmem:[#allocation8 + $0x3b8] sm:$0xff] }
0x10fb   : > { %6674 = vmatprep.mubr.f32.mxu0 %v6360_v41  ;;  %6983 = vmatmul.mubr.f32.gmra.mrb[228].mxu1 %v6359_v0  ;;  %v9968_v41 = vpack.c.bf16 %v6484_v12, %v6481_v29  ;;  %v9984_v29 = vpack.c.bf16 %v6508_v38, %v6505_v30 }
0x10fc   : > { %6987 = vmatprep.mubr.f32.mxu1 %v6363_v60 }
0x10fd   : > { %9969 = vmatprep.subr.bf16.mxu1 %v9968_v41 }
0x10fe   : > { %6675 = vmatmul.mubr.f32.gmra.mrb[220].mxu0 %v6359_v0  ;;  %v6362_v27 = vld [vmem:[#allocation2 + $0x168] sm:$0xff]  ;;  %9971 = vmatpush3.bf16.msra.mxu1 %v9968_v41 }
0x10ff   : > { %6680 = vmatprep.mubr.f32.mxu0 %v6363_v60  ;;  %6988 = vmatmul.mubr.f32.gmra.mrb[230].mxu1 %v6362_v27  ;;  %v6486_v0 = vld [vmem:[#allocation8 + $0x3c8] sm:$0xff]  ;;  %v6489_v60 = vld [vmem:[#allocation8 + $0x3e0] sm:$0xff] }
0x1100   : > { %9973 = vmatprep.subr.bf16.mxu1 %v9972_v47 }
0x1102   : > { %6681 = vmatmul.mubr.f32.gmra.mrb[222].mxu0 %v6362_v27  ;;  %v9908_v27 = vpack.c.bf16 %v6489_v60, %v6486_v0  ;;  %9975 = vmatpush3.bf16.msra.mxu1 %v9972_v47 }
0x1103   : > { %6751 = vmatprep.mubr.f32.mxu0 %v15455_v14  ;;  %9977 = vmatprep.subr.bf16.mxu1 %v9976_v34 }
0x1104   : > { %9909 = vmatprep.subr.bf16.mxu0 %v9908_v27 }
0x1105   : > { %9911 = vmatpush1.bf16.msra.mxu0 %v9910_v48 }
0x1106   : > { %9913 = vmatprep.subr.bf16.mxu0 %v9912_v13  ;;  %9979 = vmatpush3.bf16.msra.mxu1 %v9976_v34 }
0x1107   : > { %9981 = vmatprep.subr.bf16.mxu1 %v9980_v15 }
0x1109   : > { %9915 = vmatpush1.bf16.msra.mxu0 %v9914_v31 }
0x110a   : > { %9917 = vmatprep.subr.bf16.mxu0 %v9916_v33  ;;  %9983 = vmatpush3.bf16.msra.mxu1 %v9980_v15 }
0x110b   : > { %9985 = vmatprep.subr.bf16.mxu1 %v9984_v29 }
0x110d   : > { %9919 = vmatpush1.bf16.msra.mxu0 %v9918_v35 }
0x110e   : > { %9921 = vmatprep.subr.bf16.mxu0 %v9920_v43  ;;  %9987 = vmatpush3.bf16.msra.mxu1 %v9984_v29 }
0x1111   : > { %9923 = vmatpush1.bf16.msra.mxu0 %v9922_v10 }
0x1112   : > { %9925 = vmatprep.subr.bf16.mxu0 %v14345_v1 }
0x114d   : > { %v8822_v49 = vpop.f32.mrb[176].mxu0 }
0x114e   : > { %6255 = vrot.lane.b32.xlu1 %v8822_v49, %s11161_s21  ;;  %v6158_v12 = vpop.f32.mrb[177].mxu0 }
0x114f   : > { %6253 = vrot.lane.b32.xlu0 %v6158_v12, %s11161_s21 }
0x1151   : > { %v8825_v41 = vpop.f32.mrb[178].mxu0 }
0x1152   : > { %6259 = vrot.lane.b32.xlu1 %v8825_v41, %s11161_s21  ;;  %v6168_v0 = vpop.f32.mrb[179].mxu0 }
0x1153   : > { %6257 = vrot.lane.b32.xlu0 %v6168_v0, %s11161_s21 }
0x1155   : > { %v8828_v60 = vpop.f32.mrb[180].mxu0 }
0x1156   : > { %6263 = vrot.lane.b32.xlu1 %v8828_v60, %s11161_s21  ;;  %v6178_v27 = vpop.f32.mrb[181].mxu0 }
0x1157   : > { %6261 = vrot.lane.b32.xlu0 %v6178_v27, %s11161_s21 }
0x1184   : > { %v8831_v1 = vpop.f32.mrb[182].mxu0 }
0x1185   : > { %6267 = vrot.lane.b32.xlu1 %v8831_v1, %s11161_s21  ;;  %v6188_v25 = vpop.f32.mrb[183].mxu0 }
0x1186   : > { %6265 = vrot.lane.b32.xlu0 %v6188_v25, %s11161_s21 }
0x1188   : > { %v8834_v54 = vpop.f32.mrb[184].mxu0 }
0x1189   : > { %6271 = vrot.lane.b32.xlu1 %v8834_v54, %s11161_s21  ;;  %v6198_v7 = vpop.f32.mrb[185].mxu0 }
0x118a   : > { %6269 = vrot.lane.b32.xlu0 %v6198_v7, %s11161_s21 }
0x118d   : > { %v8837_v48 = vpop.f32.mrb[186].mxu0 }
0x118e   : > { %6275 = vrot.lane.b32.xlu1 %v8837_v48, %s11161_s21  ;;  %v6208_v22 = vpop.f32.mrb[187].mxu0 }
0x118f   : > { %6273 = vrot.lane.b32.xlu0 %v6208_v22, %s11161_s21 }
0x1191   : > { %v8840_v47 = vpop.f32.mrb[188].mxu0 }
0x1192   : > { %6279 = vrot.lane.b32.xlu1 %v8840_v47, %s11161_s21  ;;  %v6218_v36 = vpop.f32.mrb[189].mxu0 }
0x1193   : > { %6277 = vrot.lane.b32.xlu0 %v6218_v36, %s11161_s21 }
0x1195   : > { %v8843_v44 = vpop.f32.mrb[190].mxu0 }
0x1196   : > { %6283 = vrot.lane.b32.xlu1 %v8843_v44, %s11161_s21  ;;  %v6228_v13 = vpop.f32.mrb[191].mxu0 }
0x1197   : > { %6281 = vrot.lane.b32.xlu0 %v6228_v13, %s11161_s21 }
0x11a6   : > { %v8048_v2 = vpop.f32.mrb[208].mxu1 }
0x11a7   : > { %v8049_v51 = vpop.f32.mrb[209].mxu1 }
0x11a8   : > { %v14547_v63 = vadd.f32 %v8049_v51, %v8048_v2 }
0x11aa   : > { %v8051_v31 = vpop.f32.mrb[210].mxu1 }
0x11ab   : > { %v8052_v8 = vpop.f32.mrb[211].mxu1 }
0x11ac   : > { %v14549_v34 = vadd.f32 %v8052_v8, %v8051_v31 }
0x11ae   : > { %v8054_v45 = vpop.f32.mrb[212].mxu1 }
0x11af   : > { %v8055_v58 = vpop.f32.mrb[213].mxu1 }
0x11b0   : > { %v14551_v33 = vadd.f32 %v8055_v58, %v8054_v45 }
0x11b2   : > { %v8057_v37 = vpop.f32.mrb[214].mxu1 }
0x11b3   : > { %v8058_v42 = vpop.f32.mrb[215].mxu1 }
0x11b4   : > { %v14553_v9 = vadd.f32 %v8058_v42, %v8057_v37 }
0x11b6   : > { %v8060_v35 = vpop.f32.mrb[216].mxu1 }
0x11b7   : > { %v8061_v19 = vpop.f32.mrb[217].mxu1 }
0x11b8   : > { %v14555_v15 = vadd.f32 %v8061_v19, %v8060_v35 }
0x11ba   : > { %v8063_v56 = vpop.f32.mrb[218].mxu1 }
0x11bb   : > { %v8064_v53 = vpop.f32.mrb[219].mxu1 }
0x11bc   : > { %v14557_v43 = vadd.f32 %v8064_v53, %v8063_v56 }
0x11be   : > { %v8066_v28 = vpop.f32.mrb[220].mxu1 }
0x11bf   : > { %v8067_v24 = vpop.f32.mrb[221].mxu1 }
0x11c0   : > { %v14559_v30 = vadd.f32 %v8067_v24, %v8066_v28  ;;  %v6256_v10 = vpop.permute.xlu1 %6255  ;;  %v15456_v24 = vld [vmem:[#allocation154_spill] sm:$0xff] }
0x11c1   : > { %6302 = vst.msk [vmem:[#allocation2 + $0x28] sm:$0xff] %vm3668_vm0, %v6256_v10  ;;  %v6254_v38 = vpop.permute.xlu0 %6253  ;;  %v6517_v10 = vsub.s32 1, %v15456_v24 }
0x11c2   : > { %6301 = vst.msk [vmem:[#allocation2 + $0x10] sm:$0xff] %vm3668_vm0, %v6254_v38  ;;  %v8069_v29 = vpop.f32.mrb[222].mxu1 }
0x11c3   : > { %v8070_v49 = vpop.f32.mrb[223].mxu1 }
0x11c4   : > { %v14563_v12 = vadd.f32 %v8070_v49, %v8069_v29  ;;  %v6260_v41 = vpop.permute.xlu1 %6259 }
0x11c5   : > { %6304 = vst.msk [vmem:[#allocation2 + $0x58] sm:$0xff] %vm3668_vm0, %v6260_v41  ;;  %v6258_v0 = vpop.permute.xlu0 %6257 }
0x11c6   : > { %6303 = vst.msk [vmem:[#allocation2 + $0x40] sm:$0xff] %vm3668_vm0, %v6258_v0  ;;  %v8072_v60 = vpop.f32.mrb[224].mxu1 }
0x11c7   : > { %v8073_v27 = vpop.f32.mrb[225].mxu1 }
0x11c8   : > { %v14567_v1 = vadd.f32 %v8073_v27, %v8072_v60  ;;  %v6264_v25 = vpop.permute.xlu1 %6263  ;;  %v6322_v22 = vld [vmem:[#allocation2 + $0x28] sm:$0xff] }
0x11c9   : > { %6306 = vst.msk [vmem:[#allocation2 + $0x88] sm:$0xff] %vm3668_vm0, %v6264_v25  ;;  %v6262_v54 = vpop.permute.xlu0 %6261  ;;  %v6319_v7 = vld [vmem:[#allocation2 + $0x10] sm:$0xff] }
0x11ca   : > { %6305 = vst.msk [vmem:[#allocation2 + $0x70] sm:$0xff] %vm3668_vm0, %v6262_v54  ;;  %6752 = vmatmul.mubr.f32.vlgmr.msra.gmra.mrb[192].mxu0 %v6319_v7  ;;  %v8075_v48 = vpop.f32.mrb[226].mxu1  ;;  %8876 = vmatprep.mubr.f32.mxu1 %v6319_v7 }
0x11cb   : > { %v8076_v47 = vpop.f32.mrb[227].mxu1  ;;  %8877 = vmatmul.mubr.f32.vlgmr.msra.gmra.mrb[232].mxu1 %v6322_v22  ;;  %6757 = vmatprep.mubr.f32.mxu0 %v15455_v14 }
0x11cc   : > { %v14572_v36 = vadd.f32 %v8076_v47, %v8075_v48  ;;  %9927 = vmatpush3.bf16.msra.mxu0 %v14347_v57  ;;  %v6328_v2 = vld [vmem:[#allocation2 + $0x58] sm:$0xff] }
0x11cd   : > { %v6325_v44 = vld [vmem:[#allocation2 + $0x40] sm:$0xff]  ;;  %9929 = vmatprep.subr.bf16.mxu0 %v14353_v21 }
0x11ce   : > { %6758 = vmatmul.mubr.f32.gmra.mrb[194].mxu0 %v6322_v22  ;;  %v8078_v13 = vpop.f32.mrb[228].mxu1  ;;  %8879 = vmatprep.mubr.f32.mxu1 %v6325_v44 }
0x11cf   : > { %v8079_v51 = vpop.f32.mrb[229].mxu1  ;;  %8880 = vmatmul.mubr.f32.gmra.mrb[234].mxu1 %v6328_v2  ;;  %6763 = vmatprep.mubr.f32.mxu0 %v15455_v14 }
0x11d0   : > { %v14577_v31 = vadd.f32 %v8079_v51, %v8078_v13  ;;  %9931 = vmatpush3.bf16.msra.mxu0 %v14355_v55  ;;  %v6334_v45 = vld [vmem:[#allocation2 + $0x88] sm:$0xff] }
0x11d1   : > { %v6331_v8 = vld [vmem:[#allocation2 + $0x70] sm:$0xff]  ;;  %9933 = vmatprep.subr.bf16.mxu0 %v14361_v16 }
0x11d2   : > { %6764 = vmatmul.mubr.f32.gmra.mrb[196].mxu0 %v6325_v44  ;;  %v8081_v57 = vpop.f32.mrb[230].mxu1  ;;  %8882 = vmatprep.mubr.f32.mxu1 %v6331_v8 }
0x11d3   : > { %v8082_v21 = vpop.f32.mrb[231].mxu1  ;;  %8883 = vmatmul.mubr.f32.gmra.mrb[236].mxu1 %v6334_v45  ;;  %6769 = vmatprep.mubr.f32.mxu0 %v15455_v14 }
0x11d4   : > { %v14582_v58 = vadd.f32 %v8082_v21, %v8081_v57  ;;  %9935 = vmatpush3.bf16.msra.mxu0 %v14365_v17 }
0x11d5   : > { %9937 = vmatprep.subr.bf16.mxu0 %v14371_v50 }
0x11d6   : > { %6770 = vmatmul.mubr.f32.gmra.mrb[198].mxu0 %v6328_v2 }
0x11d7   : > { %6775 = vmatprep.mubr.f32.mxu0 %v15455_v14 }
0x11d8   : > { %9939 = vmatpush3.bf16.msra.mxu0 %v14375_v20 }
0x11d9   : > { %9941 = vmatprep.subr.bf16.mxu0 %v14381_v4 }
0x11da   : > { %6776 = vmatmul.mubr.f32.gmra.mrb[200].mxu0 %v6331_v8 }
0x11db   : > { %6781 = vmatprep.mubr.f32.mxu0 %v15455_v14 }
0x11dc   : > { %9943 = vmatpush3.bf16.msra.mxu0 %v14385_v5 }
0x11dd   : > { %9945 = vmatprep.subr.bf16.mxu0 %v14391_v61 }
0x11de   : > { %6782 = vmatmul.mubr.f32.gmra.mrb[202].mxu0 %v6334_v45 }
0x11df   : > { %6787 = vmatprep.mubr.f32.mxu0 %v15455_v14 }
0x11e0   : > { %9947 = vmatpush3.bf16.msra.mxu0 %v14395_v46 }
0x11e1   : > { %9949 = vmatprep.subr.bf16.mxu0 %v14401_v62 }
0x11e4   : > { %9951 = vmatpush3.bf16.msra.mxu0 %v14405_v26 }
0x11e5   : > { %9953 = vmatprep.subr.bf16.mxu0 %v14411_v6 }
0x11e8   : > { %9955 = vmatpush3.bf16.msra.mxu0 %v14415_v3 }
0x11f7   : > { %v6268_v55 = vpop.permute.xlu1 %6267 }
0x11f8   : > { %6308 = vst.msk [vmem:[#allocation2 + $0xb8] sm:$0xff] %vm3668_vm0, %v6268_v55  ;;  %v6266_v16 = vpop.permute.xlu0 %6265 }
0x11f9   : > { %6307 = vst.msk [vmem:[#allocation2 + $0xa0] sm:$0xff] %vm3668_vm0, %v6266_v16 }
0x11fb   : > { %v6272_v17 = vpop.permute.xlu1 %6271 }
0x11fc   : > { %6310 = vst.msk [vmem:[#allocation2 + $0xe8] sm:$0xff] %vm3668_vm0, %v6272_v17  ;;  %v6270_v50 = vpop.permute.xlu0 %6269 }
0x11fd   : > { %6309 = vst.msk [vmem:[#allocation2 + $0xd0] sm:$0xff] %vm3668_vm0, %v6270_v50 }
0x11ff   : > { %v6340_v61 = vld [vmem:[#allocation2 + $0xb8] sm:$0xff] }
0x1200   : > { %v6276_v20 = vpop.permute.xlu1 %6275  ;;  %v6337_v4 = vld [vmem:[#allocation2 + $0xa0] sm:$0xff] }
0x1201   : > { %6312 = vst.msk [vmem:[#allocation2 + $0x118] sm:$0xff] %vm3668_vm0, %v6276_v20  ;;  %v6274_v5 = vpop.permute.xlu0 %6273  ;;  %6788 = vmatmul.mubr.f32.gmra.mrb[204].mxu0 %v6337_v4  ;;  %8885 = vmatprep.mubr.f32.mxu1 %v6337_v4 }
0x1202   : > { %6311 = vst.msk [vmem:[#allocation2 + $0x100] sm:$0xff] %vm3668_vm0, %v6274_v5  ;;  %8886 = vmatmul.mubr.f32.gmra.mrb[238].mxu1 %v6340_v61  ;;  %6793 = vmatprep.mubr.f32.mxu0 %v15455_v14 }
0x1203   : > { %v6346_v6 = vld [vmem:[#allocation2 + $0xe8] sm:$0xff] }
0x1204   : > { %v6280_v46 = vpop.permute.xlu1 %6279  ;;  %v6343_v62 = vld [vmem:[#allocation2 + $0xd0] sm:$0xff] }
0x1205   : > { %6314 = vst.msk [vmem:[#allocation2 + $0x148] sm:$0xff] %vm3668_vm0, %v6280_v46  ;;  %v6278_v26 = vpop.permute.xlu0 %6277  ;;  %6794 = vmatmul.mubr.f32.gmra.mrb[206].mxu0 %v6340_v61  ;;  %8888 = vmatprep.mubr.f32.mxu1 %v6343_v62 }
0x1206   : > { %6313 = vst.msk [vmem:[#allocation2 + $0x130] sm:$0xff] %vm3668_vm0, %v6278_v26  ;;  %8889 = vmatmul.mubr.f32.gmra.mrb[240].mxu1 %v6346_v6  ;;  %6799 = vmatprep.mubr.f32.mxu0 %v15455_v14 }
0x1208   : > { %v6284_v3 = vpop.permute.xlu1 %6283  ;;  %v6352_v35 = vld [vmem:[#allocation2 + $0x118] sm:$0xff] }
0x1209   : > { %6316 = vst.msk [vmem:[#allocation2 + $0x178] sm:$0xff] %vm3668_vm0, %v6284_v3  ;;  %v6282_v37 = vpop.permute.xlu0 %6281  ;;  %6800 = vmatmul.mubr.f32.gmra.mrb[208].mxu0 %v6343_v62  ;;  %v6349_v42 = vld [vmem:[#allocation2 + $0x100] sm:$0xff] }
0x120a   : > { %6315 = vst.msk [vmem:[#allocation2 + $0x160] sm:$0xff] %vm3668_vm0, %v6282_v37  ;;  %8891 = vmatprep.mubr.f32.mxu1 %v6349_v42  ;;  %6805 = vmatprep.mubr.f32.mxu0 %v15455_v14 }
0x120b   : > { %8892 = vmatmul.mubr.f32.gmra.mrb[242].mxu1 %v6352_v35 }
0x120c   : > { %v6358_v56 = vld [vmem:[#allocation2 + $0x148] sm:$0xff] }
0x120d   : > { %6806 = vmatmul.mubr.f32.gmra.mrb[210].mxu0 %v6346_v6  ;;  %v6355_v19 = vld [vmem:[#allocation2 + $0x130] sm:$0xff] }
0x120e   : > { %8894 = vmatprep.mubr.f32.mxu1 %v6355_v19  ;;  %6811 = vmatprep.mubr.f32.mxu0 %v15455_v14 }
0x120f   : > { %8895 = vmatmul.mubr.f32.gmra.mrb[244].mxu1 %v6358_v56 }
0x1210   : > { %v6364_v28 = vld [vmem:[#allocation2 + $0x178] sm:$0xff] }
0x1211   : > { %6812 = vmatmul.mubr.f32.gmra.mrb[212].mxu0 %v6349_v42  ;;  %v6361_v53 = vld [vmem:[#allocation2 + $0x160] sm:$0xff] }
0x1212   : > { %8897 = vmatprep.mubr.f32.mxu1 %v6361_v53  ;;  %6817 = vmatprep.mubr.f32.mxu0 %v15455_v14 }
0x1213   : > { %8898 = vmatmul.mubr.f32.gmra.mrb[246].mxu1 %v6364_v28 }
0x1215   : > { %6818 = vmatmul.mubr.f32.gmra.mrb[214].mxu0 %v6352_v35 }
0x1216   : > { %6823 = vmatprep.mubr.f32.mxu0 %v15455_v14 }
0x1219   : > { %6824 = vmatmul.mubr.f32.gmra.mrb[216].mxu0 %v6355_v19 }
0x121a   : > { %6829 = vmatprep.mubr.f32.mxu0 %v15455_v14 }
0x121d   : > { %6830 = vmatmul.mubr.f32.gmra.mrb[218].mxu0 %v6358_v56 }
0x121e   : > { %6835 = vmatprep.mubr.f32.mxu0 %v15455_v14 }
0x1221   : > { %6836 = vmatmul.mubr.f32.gmra.mrb[220].mxu0 %v6361_v53 }
0x1222   : > { %6841 = vmatprep.mubr.f32.mxu0 %v15455_v14  ;;  %v6513_v14 = vsub.s32 0, %v15456_v24 }
0x1225   : > { %6842 = vmatmul.mubr.f32.gmra.mrb[222].mxu0 %v6364_v28 }
0x1226   : > { %6912 = vmatprep.mubr.f32.mxu0 %v14479_v59  ;;  %v6509_v59 = vld [vmem:[#allocation9] sm:$0x7] }
0x1227   : > { %v14627_v38 = vrot.slane %v6509_v59, %v6513_v14 }
0x1229   : > { %6913 = vmatmul.mubr.f32.vlgmr.msra.gmra.mrb[224].mxu0 %v14484_v11  ;;  %v14629_v11 = vrot.slane %v6509_v59, %v6517_v10 }
0x122a   : > { %6917 = vmatprep.mubr.f32.mxu0 %v14487_v39 }
0x122d   : > { %6918 = vmatmul.mubr.f32.gmra.mrb[226].mxu0 %v14492_v23 }
0x122e   : > { %6922 = vmatprep.mubr.f32.mxu0 %v14495_v40 }
0x1231   : > { %6923 = vmatmul.mubr.f32.gmra.mrb[228].mxu0 %v14500_v52  ;;  %v6521_v52 = vsub.s32 2, %v15456_v24 }
0x1232   : > { %6927 = vmatprep.mubr.f32.mxu0 %v14503_v18 }
0x1233   : > { %v14647_v27 = vrot.slane %v6509_v59, %v6521_v52 }
0x1235   : > { %6928 = vmatmul.mubr.f32.gmra.mrb[230].mxu0 %v14508_v32  ;;  %v6940_v48 = vadd.f32 %v14549_v34, %v14647_v27  ;;  %v6935_v13 = vadd.f32 %v14547_v63, %v14647_v27  ;;  %v6950_v62 = vadd.f32 %v14553_v9, %v14647_v27  ;;  %v6945_v37 = vadd.f32 %v14551_v33, %v14647_v27 }
0x1236   : > { %v6960_v53 = vadd.f32 %v14557_v43, %v14647_v27  ;;  %v6955_v14 = vadd.f32 %v14555_v15, %v14647_v27  ;;  %v6970_v15 = vadd.f32 %v14563_v12, %v14647_v27  ;;  %v6980_v12 = vadd.f32 %v14572_v36, %v14647_v27 }
0x129d   : > { %v6753_v39 = vpop.f32.mrb[192].mxu0 }
0x129e   : > { %v10036_v23 = vadd.f32 %v6753_v39, %v14627_v38  ;;  %v6755_v40 = vpop.f32.mrb[193].mxu0  ;;  %v14632_v29 = vpop.f32.mrb[232].mxu1 }
0x129f   : > { %v10037_v18 = vadd.f32 %v6755_v40, %v14629_v11  ;;  %v14636_v32 = vpop.f32.mrb[233].mxu1 }
0x12a0   : > { %7138 = vst [vmem:[%s14640_s23] sm:$0xff] %v10036_v23 }
0x12a1   : > { %7139 = vst [vmem:[%s14640_s23 + $0x8] sm:$0xff] %v10037_v18  ;;  %v6759_v49 = vpop.f32.mrb[194].mxu0 }
0x12a2   : > { %v10038_v41 = vadd.f32 %v6759_v49, %v14627_v38  ;;  %v6761_v0 = vpop.f32.mrb[195].mxu0  ;;  %v14645_v60 = vpop.f32.mrb[234].mxu1 }
0x12a3   : > { %v10039_v25 = vadd.f32 %v6761_v0, %v14629_v11  ;;  %v14650_v54 = vpop.f32.mrb[235].mxu1 }
0x12a4   : > { %7141 = vst [vmem:[%s14640_s23 + $0x18] sm:$0xff] %v10038_v41  ;;  %v6965_v41 = vadd.f32 %v14559_v30, %v14647_v27 }
0x12a5   : > { %7142 = vst [vmem:[%s14640_s23 + $0x20] sm:$0xff] %v10039_v25  ;;  %v6765_v7 = vpop.f32.mrb[196].mxu0 }
0x12a6   : > { %v10040_v22 = vadd.f32 %v6765_v7, %v14627_v38  ;;  %v6767_v47 = vpop.f32.mrb[197].mxu0  ;;  %v8884_v44 = vpop.f32.mrb[236].mxu1 }
0x12a7   : > { %v10041_v2 = vadd.f32 %v6767_v47, %v14629_v11  ;;  %v7085_v51 = vadd.f32 %v8884_v44, %v6940_v48  ;;  %v7079_v8 = vpop.f32.mrb[237].mxu1 }
0x12a8   : > { %7144 = vst [vmem:[%s14640_s23 + $0x30] sm:$0xff] %v10040_v22  ;;  %v7080_v57 = vadd.f32 %v7079_v8, %v6935_v13  ;;  %v6975_v13 = vadd.f32 %v14567_v1, %v14647_v27 }
0x12a9   : > { %7145 = vst [vmem:[%s14640_s23 + $0x38] sm:$0xff] %v10041_v2  ;;  %7155 = vst [vmem:[%s14640_s23 + $0x88] sm:$0xff] %v7085_v51  ;;  %v6771_v34 = vpop.f32.mrb[198].mxu0 }
0x12aa   : > { %7152 = vst [vmem:[%s14640_s23 + $0x70] sm:$0xff] %v7080_v57  ;;  %v10042_v45 = vadd.f32 %v6771_v34, %v14627_v38  ;;  %v6773_v21 = vpop.f32.mrb[199].mxu0 }
0x12ab   : > { %v10043_v55 = vadd.f32 %v6773_v21, %v14629_v11 }
0x12ac   : > { %7147 = vst [vmem:[%s14640_s23 + $0x48] sm:$0xff] %v10042_v45  ;;  %v6990_v45 = vadd.f32 %v14582_v58, %v14647_v27 }
0x12ad   : > { %7148 = vst [vmem:[%s14640_s23 + $0x50] sm:$0xff] %v10043_v55  ;;  %v6777_v63 = vpop.f32.mrb[200].mxu0  ;;  %v6985_v55 = vadd.f32 %v14577_v31, %v14647_v27 }
0x12ae   : > { %v10044_v16 = vadd.f32 %v6777_v63, %v14627_v38  ;;  %v6779_v17 = vpop.f32.mrb[201].mxu0 }
0x12af   : > { %v10045_v50 = vadd.f32 %v6779_v17, %v14629_v11 }
0x12b0   : > { %7150 = vst [vmem:[%s14640_s23 + $0x60] sm:$0xff] %v10044_v16 }
0x12b1   : > { %7151 = vst [vmem:[%s14640_s23 + $0x68] sm:$0xff] %v10045_v50  ;;  %v6783_v20 = vpop.f32.mrb[202].mxu0 }
0x12b2   : > { %v10046_v4 = vadd.f32 %v6783_v20, %v14627_v38  ;;  %v6785_v5 = vpop.f32.mrb[203].mxu0 }
0x12b3   : > { %v10047_v61 = vadd.f32 %v6785_v5, %v14629_v11 }
0x12b4   : > { %7153 = vst [vmem:[%s14640_s23 + $0x78] sm:$0xff] %v10046_v4 }
0x12b5   : > { %7154 = vst [vmem:[%s14640_s23 + $0x80] sm:$0xff] %v10047_v61 }
0x12d4   : > { %v6789_v46 = vpop.f32.mrb[204].mxu0 }
0x12d5   : > { %v10048_v26 = vadd.f32 %v6789_v46, %v14627_v38  ;;  %v6791_v6 = vpop.f32.mrb[205].mxu0  ;;  %v8887_v3 = vpop.f32.mrb[238].mxu1 }
0x12d6   : > { %v10049_v42 = vadd.f32 %v6791_v6, %v14629_v11  ;;  %v7095_v35 = vadd.f32 %v8887_v3, %v6950_v62  ;;  %v7089_v19 = vpop.f32.mrb[239].mxu1 }
0x12d7   : > { %7156 = vst [vmem:[%s14640_s23 + $0x90] sm:$0xff] %v10048_v26  ;;  %v7090_v56 = vadd.f32 %v7089_v19, %v6945_v37 }
0x12d8   : > { %7157 = vst [vmem:[%s14640_s23 + $0x98] sm:$0xff] %v10049_v42  ;;  %7161 = vst [vmem:[%s14640_s23 + $0xb8] sm:$0xff] %v7095_v35  ;;  %v6795_v9 = vpop.f32.mrb[206].mxu0 }
0x12d9   : > { %7158 = vst [vmem:[%s14640_s23 + $0xa0] sm:$0xff] %v7090_v56  ;;  %v10050_v28 = vadd.f32 %v6795_v9, %v14627_v38  ;;  %v6797_v33 = vpop.f32.mrb[207].mxu0  ;;  %v8890_v24 = vpop.f32.mrb[240].mxu1 }
0x12da   : > { %v10051_v10 = vadd.f32 %v6797_v33, %v14629_v11  ;;  %v7105_v59 = vadd.f32 %v8890_v24, %v6960_v53  ;;  %v7099_v39 = vpop.f32.mrb[241].mxu1 }
0x12db   : > { %7159 = vst [vmem:[%s14640_s23 + $0xa8] sm:$0xff] %v10050_v28  ;;  %v7100_v23 = vadd.f32 %v7099_v39, %v6955_v14 }
0x12dc   : > { %7160 = vst [vmem:[%s14640_s23 + $0xb0] sm:$0xff] %v10051_v10  ;;  %7167 = vst [vmem:[%s14640_s23 + $0xe8] sm:$0xff] %v7105_v59  ;;  %v6801_v43 = vpop.f32.mrb[208].mxu0 }
0x12dd   : > { %7164 = vst [vmem:[%s14640_s23 + $0xd0] sm:$0xff] %v7100_v23  ;;  %v10052_v40 = vadd.f32 %v6801_v43, %v14627_v38  ;;  %v6803_v52 = vpop.f32.mrb[209].mxu0 }
0x12de   : > { %v10053_v18 = vadd.f32 %v6803_v52, %v14629_v11  ;;  %v8893_v49 = vpop.f32.mrb[242].mxu1 }
0x12df   : > { %7162 = vst [vmem:[%s14640_s23 + $0xc0] sm:$0xff] %v10052_v40  ;;  %v7115_v0 = vadd.f32 %v8893_v49, %v6970_v15  ;;  %v7109_v25 = vpop.f32.mrb[243].mxu1 }
0x12e0   : > { %7163 = vst [vmem:[%s14640_s23 + $0xc8] sm:$0xff] %v10053_v18  ;;  %v7110_v7 = vadd.f32 %v7109_v25, %v6965_v41  ;;  %v6807_v48 = vpop.f32.mrb[210].mxu0 }
0x12e1   : > { %7173 = vst [vmem:[%s14640_s23 + $0x118] sm:$0xff] %v7115_v0  ;;  %v10054_v22 = vadd.f32 %v6807_v48, %v14627_v38  ;;  %v6809_v47 = vpop.f32.mrb[211].mxu0 }
0x12e2   : > { %7170 = vst [vmem:[%s14640_s23 + $0x100] sm:$0xff] %v7110_v7  ;;  %v10055_v44 = vadd.f32 %v6809_v47, %v14629_v11  ;;  %v8896_v30 = vpop.f32.mrb[244].mxu1 }
0x12e3   : > { %7165 = vst [vmem:[%s14640_s23 + $0xd8] sm:$0xff] %v10054_v22  ;;  %v7125_v2 = vadd.f32 %v8896_v30, %v6980_v12  ;;  %v7119_v51 = vpop.f32.mrb[245].mxu1 }
0x12e4   : > { %7166 = vst [vmem:[%s14640_s23 + $0xe0] sm:$0xff] %v10055_v44  ;;  %v7120_v8 = vadd.f32 %v7119_v51, %v6975_v13  ;;  %v6813_v57 = vpop.f32.mrb[212].mxu0 }
0x12e5   : > { %7179 = vst [vmem:[%s14640_s23 + $0x148] sm:$0xff] %v7125_v2  ;;  %v10056_v34 = vadd.f32 %v6813_v57, %v14627_v38  ;;  %v6815_v36 = vpop.f32.mrb[213].mxu0 }
0x12e6   : > { %7176 = vst [vmem:[%s14640_s23 + $0x130] sm:$0xff] %v7120_v8  ;;  %v10057_v1 = vadd.f32 %v6815_v36, %v14629_v11  ;;  %v8899_v21 = vpop.f32.mrb[246].mxu1 }
0x12e7   : > { %7168 = vst [vmem:[%s14640_s23 + $0xf0] sm:$0xff] %v10056_v34  ;;  %v7135_v63 = vadd.f32 %v8899_v21, %v6990_v45  ;;  %v7129_v16 = vpop.f32.mrb[247].mxu1 }
0x12e8   : > { %7169 = vst [vmem:[%s14640_s23 + $0xf8] sm:$0xff] %v10057_v1  ;;  %v7130_v17 = vadd.f32 %v7129_v16, %v6985_v55  ;;  %v6819_v50 = vpop.f32.mrb[214].mxu0 }
0x12e9   : > { %7185 = vst [vmem:[%s14640_s23 + $0x178] sm:$0xff] %v7135_v63  ;;  %v10058_v58 = vadd.f32 %v6819_v50, %v14627_v38  ;;  %v6821_v20 = vpop.f32.mrb[215].mxu0 }
0x12ea   : > { %7182 = vst [vmem:[%s14640_s23 + $0x160] sm:$0xff] %v7130_v17  ;;  %v10059_v4 = vadd.f32 %v6821_v20, %v14629_v11 }
0x12eb   : > { %7171 = vst [vmem:[%s14640_s23 + $0x108] sm:$0xff] %v10058_v58 }
0x12ec   : > { %7172 = vst [vmem:[%s14640_s23 + $0x110] sm:$0xff] %v10059_v4  ;;  %v6825_v31 = vpop.f32.mrb[216].mxu0 }
0x12ed   : > { %v10060_v5 = vadd.f32 %v6825_v31, %v14627_v38  ;;  %v6827_v61 = vpop.f32.mrb[217].mxu0 }
0x12ee   : > { %v10061_v46 = vadd.f32 %v6827_v61, %v14629_v11 }
0x12ef   : > { %7174 = vst [vmem:[%s14640_s23 + $0x120] sm:$0xff] %v10060_v5 }
0x12f0   : > { %7175 = vst [vmem:[%s14640_s23 + $0x128] sm:$0xff] %v10061_v46  ;;  %v6831_v62 = vpop.f32.mrb[218].mxu0 }
0x12f1   : > { %v10062_v26 = vadd.f32 %v6831_v62, %v14627_v38  ;;  %v6833_v6 = vpop.f32.mrb[219].mxu0 }
0x12f2   : > { %v10063_v3 = vadd.f32 %v6833_v6, %v14629_v11 }
0x12f3   : > { %7177 = vst [vmem:[%s14640_s23 + $0x138] sm:$0xff] %v10062_v26 }
0x12f4   : > { %7178 = vst [vmem:[%s14640_s23 + $0x140] sm:$0xff] %v10063_v3  ;;  %v6837_v37 = vpop.f32.mrb[220].mxu0 }
0x12f5   : > { %v10064_v42 = vadd.f32 %v6837_v37, %v14627_v38  ;;  %v6839_v35 = vpop.f32.mrb[221].mxu0 }
0x12f6   : > { %v10065_v19 = vadd.f32 %v6839_v35, %v14629_v11 }
0x12f7   : > { %7180 = vst [vmem:[%s14640_s23 + $0x150] sm:$0xff] %v10064_v42 }
0x12f8   : > { %7181 = vst [vmem:[%s14640_s23 + $0x158] sm:$0xff] %v10065_v19  ;;  %v6843_v56 = vpop.f32.mrb[222].mxu0 }
0x12f9   : > { %v10066_v9 = vadd.f32 %v6843_v56, %v14627_v38  ;;  %v6845_v53 = vpop.f32.mrb[223].mxu0 }
0x12fa   : > { %v10067_v28 = vadd.f32 %v6845_v53, %v14629_v11 }
0x12fb   : > { %7183 = vst [vmem:[%s14640_s23 + $0x168] sm:$0xff] %v10066_v9 }
0x12fc   : > { %7184 = vst [vmem:[%s14640_s23 + $0x170] sm:$0xff] %v10067_v28  ;;  %v8036_v33 = vpop.f32.mrb[224].mxu0 }
0x12fd   : > { %v8037_v24 = vpop.f32.mrb[225].mxu0 }
0x12fe   : > { %v8038_v14 = vadd.f32 %v8037_v24, %v8036_v33 }
0x1300   : > { %v6915_v10 = vadd.f32 %v8038_v14, %v14647_v27  ;;  %v8039_v59 = vpop.f32.mrb[226].mxu0 }
0x1301   : > { %v8040_v39 = vpop.f32.mrb[227].mxu0 }
0x1302   : > { %v7060_v23 = vadd.f32 %v14636_v32, %v6915_v10  ;;  %v8041_v43 = vadd.f32 %v8040_v39, %v8039_v59 }
0x1304   : > { %7140 = vst [vmem:[%s14640_s23 + $0x10] sm:$0xff] %v7060_v23  ;;  %v6920_v38 = vadd.f32 %v8041_v43, %v14647_v27  ;;  %v8042_v11 = vpop.f32.mrb[228].mxu0 }
0x1305   : > { %v8043_v40 = vpop.f32.mrb[229].mxu0 }
0x1306   : > { %v7065_v52 = vadd.f32 %v14632_v29, %v6920_v38  ;;  %v8044_v15 = vadd.f32 %v8043_v40, %v8042_v11 }
0x1308   : > { %7143 = vst [vmem:[%s14640_s23 + $0x28] sm:$0xff] %v7065_v52  ;;  %v6925_v18 = vadd.f32 %v8044_v15, %v14647_v27  ;;  %v8045_v49 = vpop.f32.mrb[230].mxu0 }
0x1309   : > { %v8046_v41 = vpop.f32.mrb[231].mxu0 }
0x130a   : > { %v7070_v32 = vadd.f32 %v14650_v54, %v6925_v18  ;;  %v8047_v0 = vadd.f32 %v8046_v41, %v8045_v49 }
0x130c   : > { %7146 = vst [vmem:[%s14640_s23 + $0x40] sm:$0xff] %v7070_v32  ;;  %v6930_v25 = vadd.f32 %v8047_v0, %v14647_v27 }
0x130e   : > { %v7075_v29 = vadd.f32 %v14645_v60, %v6930_v25 }
0x1310   : > { %7149 = vst [vmem:[%s14640_s23 + $0x58] sm:$0xff] %v7075_v29 }
0x1311   : > { %11089 = shalt.err (!%p11086_p4)
}
0x1312   : > { %s11090_s28 = scalar_lea.hbm %s14761_s11, 6144  ;;  %s11094_s29 = scalar_lea.hbm %s14813_s4, 12288 }
0x1313   : > { %p11091_p9 = scmp.ne.s32.totalorder %s14761_s11, %s11090_s28  ;;  %p11095_p8 = scmp.lt.u32.totalorder %s14761_s11, %s14813_s4 }
0x1314   : > { %p11096_p13 = scmp.lt.u32.totalorder %s11094_s29, %s11090_s28  ;;  %p11098_p10 = scmp.lt.u32.totalorder %s11090_s28, %s14761_s11 }
0x1315   : > { %p11092_p0 = pnand %p11091_p9, %p11336_p5 }
0x1316   : > { %p11097_p6 = por %p11096_p13, %p11095_p8 }
0x1317   : > { %p11093_p7 = pneg %p11092_p0 }
0x1318   : > { %p11099_p3 = por %p11098_p10, %p11097_p6 }
0x131a   : > { %p11100_p11 = pnand %p11099_p3, %p11093_p7 }
0x131c   : > { %11103 = shalt.err (!%p11100_p11)
}
0x131d   : > { %s11164_s23 = smov 384   ;;  %s11165_s9 = smov 24  }
0x131e   : > { %10214 = dma.vmem_to_hbm [thread:$0]  (%p11336_p5), %s14763_s10, 6144, %s14761_s11, %s7187_s19, %s11164_s23, %s11164_s23, %s11165_s9  }
0x131f PF: > { %s7215_s7 = sand.u32 1, %s11138_s15   ;;  %p15457_p12 = scmp.ne.s32.totalorder %s15008_s22, 0 }
0x1320   : > { %p15458_p2 = scmp.ge.s32.totalorder %s11150_s18, 2  ;;  %s7216_s25 = scalar_lea.sflag [#allocation5], %s7215_s7 }
0x1322   : > { %p10231_p1 = pnand %p15458_p2, %p15457_p12 }
0x1324   : > { %11133 = dma.done.wait (!%p10231_p1), %s7216_s25, 6144  }
0x1325   : > { %11135 = vsyncadd (!%p10231_p1), %s7216_s25, 4294961152  ;;  %p19_p4 = scmp.ge.s32.totalorder %s11304_s20, 4   ;;  %s15459_s15 = smov %s11142_s16 }
0x1326   : > { %s15460_s16 = smov %s11146_s17  ;;  %s15461_s17 = smov %s11332_s26 }
0x1327   : > { %s15462_s18 = smov %s11304_s20  ;;  %21 = sbr.rel (!%p19_p4) target bundleno = 7 (0x7), region = 93 }
0x132e   :  { %7221 = vsyncpa [#allocation4], 1 }
0x132f   :  { %7223 = vsyncpa [#allocation4 + $0x1], 1 }
0x1330   :  { %7224 = vsyncpa [#allocation7], 1 }
0x1331   :  { %7225 = vsyncpa [#allocation10], 1 }
0x1332   :  { %7226 = vsyncpa [#allocation5], 1 }
0x1333   :  { %7228 = vsyncpa [#allocation5 + $0x1], 1 }

</bundles_post_ra>
